<compile_context>
chip_gen: v7x
topology: tpu7x:2x2x1
jax: 0.10.0
libtpu: 0.0.40
codegen_flags: <defaults>
</compile_context>

<pallas_src>
import math
from functools import partial

import jax
import jax.numpy as jnp
from jax.experimental import pallas as pl
from jax.experimental.pallas import tpu as pltpu


def _round_up(v, m):
    return (v + m - 1) // m * m


# ---------------------------------------------------------------------------
# Fused kernel: 2 heads x (4 conv3x3+ReLU + 1 conv3x3) for one batch element.
# ---------------------------------------------------------------------------
def _fused_head_kernel(x_ref, mask_ref,
                       w0_ref, b0_ref,
                       cw_ref, cb_ref, cwf_ref, cbf_ref,
                       rw_ref, rb_ref, rwf_ref, rbf_ref,
                       cls_ref, reg_ref,
                       buf_a, buf_b, buf_r,
                       *, W, Cin, base, hwp_pad):
    Wp = W + 2
    src0 = base - Wp - 1                 # flat offset of padded pixel (0, 0)
    mask = mask_ref[...]                 # (1, hwp_pad) f32: 1.0 on valid cols

    # Keep the halo strips OUTSIDE the per-step store window zeroed.  The
    # interior [base, base+hwp_pad) is fully rewritten every step (with
    # masked zeros in the pad columns), so only these two lane-aligned strips
    # need zeroing; doing it per step keeps the kernel correct even when the
    # batch grid axis is split across TensorCores.
    flat = buf_a.shape[1]
    tail = flat - (base + hwp_pad)
    for buf in (buf_a, buf_b, buf_r):
        buf[:, :base] = jnp.zeros((Cin, base), buf.dtype)
        buf[:, base + hwp_pad:] = jnp.zeros((Cin, tail), buf.dtype)

    def im2col(src):
        # 9 contiguous lane slices of the flat padded buffer -> (9*Cin, hwp_pad).
        cols = [src[:, src0 + kh * Wp + kw: src0 + kh * Wp + kw + hwp_pad]
                for kh in range(3) for kw in range(3)]
        return jnp.concatenate(cols, axis=0)

    def store_act(dst, acc):
        # 128-aligned, lane-dense store of a (Cin, hwp_pad) activation.
        dst[:, base:base + hwp_pad] = acc.astype(dst.dtype)

    x = x_ref[0]                         # (Cin, flat) bf16, pre-padded layout

    # ---- layer 0 of BOTH towers: one matmul on the shared im2col (M=2*Cin) --
    cols0 = im2col(x)
    acc0 = jnp.dot(w0_ref[...], cols0, preferred_element_type=jnp.float32)
    acc0 = jnp.maximum(acc0 + b0_ref[...], 0.0) * mask
    store_act(buf_a, acc0[:Cin])         # classification tower layer-0 act
    store_act(buf_r, acc0[Cin:])         # regression tower layer-0 act

    def tower_rest(src, other, w_ref, b_ref):
        # layers 1..3 of one tower; ping-pong between `src` and `other`.
        dsts = (other, src, other)
        cur = src
        for i in range(3):
            acc = jnp.dot(w_ref[i], im2col(cur),
                          preferred_element_type=jnp.float32)
            acc = jnp.maximum(acc + b_ref[i], 0.0) * mask
            store_act(dsts[i], acc)
            cur = dsts[i]
        return cur

    # ---- classification tower + final conv ----
    feat = tower_rest(buf_a, buf_b, cw_ref, cb_ref)           # ends in buf_b
    cls_ref[0] = (jnp.dot(cwf_ref[...], im2col(feat),
                          preferred_element_type=jnp.float32)
                  + cbf_ref[...]).astype(cls_ref.dtype)

    # ---- regression tower + final conv (buf_a is free again) ----
    feat = tower_rest(buf_r, buf_a, rw_ref, rb_ref)           # ends in buf_a
    reg_ref[0] = (jnp.dot(rwf_ref[...], im2col(feat),
                          preferred_element_type=jnp.float32)
                  + rbf_ref[...]).astype(reg_ref.dtype)


# ---------------------------------------------------------------------------
# Wrapper: one pallas_call per FPN level (both heads, full towers).
# ---------------------------------------------------------------------------
def fused_head_level(x_nchw, packed, num_classes):
    """Both RetinaNet heads on one FPN level.

    x_nchw: (N, Cin, H, W) float32.
    Returns (cls_logits (N, H*W*A, num_classes), bbox_reg (N, H*W*A, 4)).
    """
    N, Cin, H, W = x_nchw.shape
    Wp = W + 2
    HWp = H * Wp
    hwp_pad = _round_up(HWp, 128)            # lane-dense matmul N dim
    base = _round_up(Wp + 1, 128)            # 128-aligned interior origin
    src0 = base - Wp - 1                     # flat offset of padded pixel (0,0)
    flat = _round_up(base + Wp + 1 + hwp_pad, 128)

    (w0, b0, cw, cb, cwf, cbf, rw, rb, rwf, rbf) = packed
    Ccls = cwf.shape[0]
    Creg = rwf.shape[0]

    # Pre-pad the feature map into the flattened padded layout (cheap XLA pad;
    # removes the per-row scatter loop and one full-size VMEM scratch buffer).
    xp = jnp.pad(x_nchw, ((0, 0), (0, 0), (1, 1), (1, 1)))
    xp = xp.reshape(N, Cin, (H + 2) * Wp)
    xp = jnp.pad(xp, ((0, 0), (0, 0), (src0, flat - src0 - (H + 2) * Wp)))
    xp = xp.astype(jnp.bfloat16)

    col = jnp.arange(hwp_pad, dtype=jnp.int32)
    mask = ((col < HWp) & (col % Wp < W)).astype(jnp.float32).reshape(1, hwp_pad)

    kernel = partial(_fused_head_kernel, W=W, Cin=Cin, base=base,
                     hwp_pad=hwp_pad)

    flops = 2 * N * hwp_pad * 9 * Cin * (8 * Cin + Ccls + Creg)
    bytes_accessed = (xp.size * 2
                      + (w0.size + cw.size + cwf.size + rw.size + rwf.size) * 2
                      + (b0.size + cb.size + cbf.size + rb.size + rbf.size) * 4
                      + N * (Ccls + Creg) * hwp_pad * 2)

    cls_raw, reg_raw = pl.pallas_call(
        kernel,
        out_shape=(jax.ShapeDtypeStruct((N, Ccls, hwp_pad), jnp.bfloat16),
                   jax.ShapeDtypeStruct((N, Creg, hwp_pad), jnp.bfloat16)),
        grid=(N,),
        in_specs=[
            pl.BlockSpec((1, Cin, flat), lambda n: (n, 0, 0)),       # features
            pl.BlockSpec((1, hwp_pad), lambda n: (0, 0)),            # col mask
            pl.BlockSpec((2 * Cin, 9 * Cin), lambda n: (0, 0)),      # stacked L0 W
            pl.BlockSpec((2 * Cin, 1), lambda n: (0, 0)),            # stacked L0 b
            pl.BlockSpec((3, Cin, 9 * Cin), lambda n: (0, 0, 0)),    # cls L1-3 W
            pl.BlockSpec((3, Cin, 1), lambda n: (0, 0, 0)),          # cls L1-3 b
            pl.BlockSpec((Ccls, 9 * Cin), lambda n: (0, 0)),         # cls final W
            pl.BlockSpec((Ccls, 1), lambda n: (0, 0)),               # cls final b
            pl.BlockSpec((3, Cin, 9 * Cin), lambda n: (0, 0, 0)),    # reg L1-3 W
            pl.BlockSpec((3, Cin, 1), lambda n: (0, 0, 0)),          # reg L1-3 b
            pl.BlockSpec((Creg, 9 * Cin), lambda n: (0, 0)),         # reg final W
            pl.BlockSpec((Creg, 1), lambda n: (0, 0)),               # reg final b
        ],
        out_specs=(pl.BlockSpec((1, Ccls, hwp_pad), lambda n: (n, 0, 0)),
                   pl.BlockSpec((1, Creg, hwp_pad), lambda n: (n, 0, 0))),
        scratch_shapes=[pltpu.VMEM((Cin, flat), jnp.bfloat16),       # ping
                        pltpu.VMEM((Cin, flat), jnp.bfloat16),       # pong
                        pltpu.VMEM((Cin, flat), jnp.bfloat16)],      # reg L0 act
        compiler_params=pltpu.CompilerParams(
            dimension_semantics=("parallel",),
            vmem_limit_bytes=32 * 1024 * 1024),
        cost_estimate=pl.CostEstimate(flops=int(flops), transcendentals=0,
                                      bytes_accessed=int(bytes_accessed)),
    )(xp, mask, w0, b0, cw, cb, cwf, cbf, rw, rb, rwf, rbf)

    def _postprocess(y_raw, last_dim):
        # (N, A*K, hwp_pad) bf16 -> strip pad/halo columns -> NCHW
        #   -> view(N, A, K, H, W) -> permute(N, H, W, A, K) -> (N, H*W*A, K),
        # matching the PyTorch view/permute/reshape; cast back to f32.
        c = y_raw.shape[1]
        a = c // last_dim
        y = y_raw[:, :, :HWp].reshape(N, c, H, Wp)[:, :, :, :W]
        y = y.reshape(N, a, last_dim, H, W)
        y = jnp.transpose(y, (0, 3, 4, 1, 2))
        return y.reshape(N, H * W * a, last_dim).astype(jnp.float32)

    return _postprocess(cls_raw, num_classes), _postprocess(reg_raw, 4)


# ---------------------------------------------------------------------------
# Parameter construction / packing (matching the PyTorch __init__)
# ---------------------------------------------------------------------------
def make_head_params(key, in_channels, out_channels, final_bias_value):
    tower_w, tower_b = [], []
    for _ in range(4):
        key, k = jax.random.split(key)
        tower_w.append(jax.random.normal(
            k, (in_channels, in_channels, 3, 3), jnp.float32) * 0.01)
        tower_b.append(jnp.zeros((in_channels,), jnp.float32))
    key, k = jax.random.split(key)
    final_w = jax.random.normal(
        k, (out_channels, in_channels, 3, 3), jnp.float32) * 0.01
    final_b = jnp.full((out_channels,), final_bias_value, jnp.float32)
    return dict(tower_w=tower_w, tower_b=tower_b,
                final_w=final_w, final_b=final_b)


def _pack_conv_weight(w):
    """(Cout, Cin, 3, 3) -> (Cout, 9*Cin) bf16 im2col layout (kh, kw, cin)."""
    cout, cin = w.shape[0], w.shape[1]
    return jnp.transpose(w, (0, 2, 3, 1)).reshape(cout, 9 * cin).astype(jnp.bfloat16)


def pack_head_params(cls_p, reg_p):
    cw = [_pack_conv_weight(w) for w in cls_p["tower_w"]]
    rw = [_pack_conv_weight(w) for w in reg_p["tower_w"]]
    cb = [b.reshape(-1, 1) for b in cls_p["tower_b"]]
    rb = [b.reshape(-1, 1) for b in reg_p["tower_b"]]
    return (
        jnp.concatenate([cw[0], rw[0]], axis=0),   # (2*Cin, 9*Cin) stacked L0 W
        jnp.concatenate([cb[0], rb[0]], axis=0),   # (2*Cin, 1)     stacked L0 b
        jnp.stack(cw[1:], axis=0),                 # (3, Cin, 9*Cin) cls L1-3 W
        jnp.stack(cb[1:], axis=0),                 # (3, Cin, 1)     cls L1-3 b
        _pack_conv_weight(cls_p["final_w"]),       # (Ccls, 9*Cin)
        cls_p["final_b"].reshape(-1, 1),           # (Ccls, 1)
        jnp.stack(rw[1:], axis=0),                 # (3, Cin, 9*Cin) reg L1-3 W
        jnp.stack(rb[1:], axis=0),                 # (3, Cin, 1)     reg L1-3 b
        _pack_conv_weight(reg_p["final_w"]),       # (Creg, 9*Cin)
        reg_p["final_b"].reshape(-1, 1),           # (Creg, 1)
    )


class RetinaNetHeadPallas:
    def __init__(self, in_channels, num_anchors, num_classes, key):
        self.num_anchors = num_anchors
        self.num_classes = num_classes
        prior_probability = 0.01
        cls_bias = -math.log((1.0 - prior_probability) / prior_probability)
        kc, kr = jax.random.split(key)
        self.cls_raw = make_head_params(
            kc, in_channels, num_anchors * num_classes, cls_bias)
        self.reg_raw = make_head_params(
            kr, in_channels, num_anchors * 4, 0.0)
        self.packed = pack_head_params(self.cls_raw, self.reg_raw)

    def __call__(self, features_nchw):
        all_cls, all_reg = [], []
        for f in features_nchw:
            cls, reg = fused_head_level(f, self.packed, self.num_classes)
            all_cls.append(cls)
            all_reg.append(reg)
        return {
            "cls_logits": jnp.concatenate(all_cls, axis=1),
            "bbox_regression": jnp.concatenate(all_reg, axis=1),
        }


# ---------------------------------------------------------------------------
# Pure-JAX f32 reference (mirrors the PyTorch forward) for validation.
# ---------------------------------------------------------------------------
def _ref_single_head(x, params, last_dim):
    dn = ("NCHW", "OIHW", "NCHW")
    y = x
    for w, b in zip(params["tower_w"], params["tower_b"]):
        y = jax.lax.conv_general_dilated(y, w, (1, 1), "SAME",
                                         dimension_numbers=dn)
        y = jax.nn.relu(y + b.reshape(1, -1, 1, 1))
    y = jax.lax.conv_general_dilated(y, params["final_w"], (1, 1), "SAME",
                                     dimension_numbers=dn)
    y = y + params["final_b"].reshape(1, -1, 1, 1)
    n, c, h, w = y.shape
    a = c // last_dim
    y = y.reshape(n, a, last_dim, h, w).transpose(0, 3, 4, 1, 2)
    return y.reshape(n, h * w * a, last_dim)


def _ref_head(features, cls_p, reg_p, num_classes):
    cls = jnp.concatenate(
        [_ref_single_head(f, cls_p, num_classes) for f in features], axis=1)
    reg = jnp.concatenate(
        [_ref_single_head(f, reg_p, 4) for f in features], axis=1)
    return {"cls_logits": cls, "bbox_regression": reg}


if __name__ == "__main__":
    key = jax.random.PRNGKey(0)
    k_params, k_x1, k_x2 = jax.random.split(key, 3)

    batch = 2
    in_channels = 32
    num_anchors = 4
    num_classes = 8

    # Two FPN-style feature levels (NCHW, as the PyTorch module expects).
    x1 = jax.random.normal(k_x1, (batch, in_channels, 16, 16), jnp.float32)
    x2 = jax.random.normal(k_x2, (batch, in_channels, 8, 8), jnp.float32)

    head = RetinaNetHeadPallas(in_channels, num_anchors, num_classes, k_params)
    out = head([x1, x2])
    out = jax.tree_util.tree_map(jax.block_until_ready, out)

    expected_anchors = (16 * 16 + 8 * 8) * num_anchors
    assert out["cls_logits"].shape == (batch, expected_anchors, num_classes)
    assert out["bbox_regression"].shape == (batch, expected_anchors, 4)
    assert bool(jnp.all(jnp.isfinite(out["cls_logits"])))
    assert bool(jnp.all(jnp.isfinite(out["bbox_regression"])))

    # bf16 matmuls / bf16 output writeback vs. an f32 reference -> tolerance,
    # not exact equality.
    ref = _ref_head([x1, x2], head.cls_raw, head.reg_raw, num_classes)
    assert bool(jnp.allclose(out["cls_logits"], ref["cls_logits"],
                             atol=5e-2, rtol=5e-2))
    assert bool(jnp.allclose(out["bbox_regression"], ref["bbox_regression"],
                             atol=5e-2, rtol=5e-2))

    print("KERNEL_OK")
</pallas_src>

<mosaic_0001>
module attributes {stable_mosaic.version = 11 : i64} {
  func.func @_fused_head_kernel(%arg0: i32, %arg1: memref<1x32x640xbf16, #tpu.memory_space<vmem>>, %arg2: memref<1x384xf32, #tpu.memory_space<vmem>>, %arg3: memref<64x288xbf16, #tpu.memory_space<vmem>>, %arg4: memref<64x1xf32, #tpu.memory_space<vmem>>, %arg5: memref<3x32x288xbf16, #tpu.memory_space<vmem>>, %arg6: memref<3x32x1xf32, #tpu.memory_space<vmem>>, %arg7: memref<32x288xbf16, #tpu.memory_space<vmem>>, %arg8: memref<32x1xf32, #tpu.memory_space<vmem>>, %arg9: memref<3x32x288xbf16, #tpu.memory_space<vmem>>, %arg10: memref<3x32x1xf32, #tpu.memory_space<vmem>>, %arg11: memref<16x288xbf16, #tpu.memory_space<vmem>>, %arg12: memref<16x1xf32, #tpu.memory_space<vmem>>, %arg13: memref<1x32x384xbf16, #tpu.memory_space<vmem>>, %arg14: memref<1x16x384xbf16, #tpu.memory_space<vmem>>, %arg15: memref<32x640xbf16, #tpu.memory_space<vmem>>, %arg16: memref<32x640xbf16, #tpu.memory_space<vmem>>, %arg17: memref<32x640xbf16, #tpu.memory_space<vmem>>) attributes {dimension_semantics = [#tpu.dimension_semantics<parallel>], iteration_bounds = array<i64: 2>, scalar_prefetch = 0 : i64, scratch_operands = 3 : i64, tpu.core_type = #tpu.core_type<tc>, window_params = [{transform_indices = @transform_0, window_bounds = array<i64: 1, 32, 640>}, {pipeline_mode = #tpu.pipeline_mode<synchronous>, transform_indices = @transform_1, window_bounds = array<i64: 1, 384>}, {pipeline_mode = #tpu.pipeline_mode<synchronous>, transform_indices = @transform_2, window_bounds = array<i64: 64, 288>}, {pipeline_mode = #tpu.pipeline_mode<synchronous>, transform_indices = @transform_3, window_bounds = array<i64: 64, 1>}, {pipeline_mode = #tpu.pipeline_mode<synchronous>, transform_indices = @transform_4, window_bounds = array<i64: 3, 32, 288>}, {pipeline_mode = #tpu.pipeline_mode<synchronous>, transform_indices = @transform_5, window_bounds = array<i64: 3, 32, 1>}, {pipeline_mode = #tpu.pipeline_mode<synchronous>, transform_indices = @transform_6, window_bounds = array<i64: 32, 288>}, {pipeline_mode = #tpu.pipeline_mode<synchronous>, transform_indices = @transform_7, window_bounds = array<i64: 32, 1>}, {pipeline_mode = #tpu.pipeline_mode<synchronous>, transform_indices = @transform_8, window_bounds = array<i64: 3, 32, 288>}, {pipeline_mode = #tpu.pipeline_mode<synchronous>, transform_indices = @transform_9, window_bounds = array<i64: 3, 32, 1>}, {pipeline_mode = #tpu.pipeline_mode<synchronous>, transform_indices = @transform_10, window_bounds = array<i64: 16, 288>}, {pipeline_mode = #tpu.pipeline_mode<synchronous>, transform_indices = @transform_11, window_bounds = array<i64: 16, 1>}, {transform_indices = @transform_12, window_bounds = array<i64: 1, 32, 384>}, {transform_indices = @transform_13, window_bounds = array<i64: 1, 16, 384>}]} {
    %c0 = arith.constant 0 : index
    %c0_0 = arith.constant 0 : index
    %0 = vector.load %arg2[%c0, %c0_0] : memref<1x384xf32, #tpu.memory_space<vmem>>, vector<1x384xf32>
    %cst = arith.constant 0.000000e+00 : bf16
    %1 = vector.broadcast %cst : bf16 to vector<32x128xbf16>
    %c0_1 = arith.constant 0 : index
    %c0_2 = arith.constant 0 : index
    %2 = vector.load %arg15[%c0_1, %c0_2] : memref<32x640xbf16, #tpu.memory_space<vmem>>, vector<32x128xbf16>
    tpu.vector_store %arg15[%c0_1, %c0_2], %1 {strides = array<i32>} : memref<32x640xbf16, #tpu.memory_space<vmem>>, vector<32x128xbf16>,
    %cst_3 = arith.constant 0.000000e+00 : bf16
    %3 = vector.broadcast %cst_3 : bf16 to vector<32x128xbf16>
    %c0_4 = arith.constant 0 : index
    %c512 = arith.constant 512 : index
    %4 = vector.load %arg15[%c0_4, %c512] : memref<32x640xbf16, #tpu.memory_space<vmem>>, vector<32x128xbf16>
    tpu.vector_store %arg15[%c0_4, %c512], %3 {strides = array<i32>} : memref<32x640xbf16, #tpu.memory_space<vmem>>, vector<32x128xbf16>,
    %cst_5 = arith.constant 0.000000e+00 : bf16
    %5 = vector.broadcast %cst_5 : bf16 to vector<32x128xbf16>
    %c0_6 = arith.constant 0 : index
    %c0_7 = arith.constant 0 : index
    %6 = vector.load %arg16[%c0_6, %c0_7] : memref<32x640xbf16, #tpu.memory_space<vmem>>, vector<32x128xbf16>
    tpu.vector_store %arg16[%c0_6, %c0_7], %5 {strides = array<i32>} : memref<32x640xbf16, #tpu.memory_space<vmem>>, vector<32x128xbf16>,
    %cst_8 = arith.constant 0.000000e+00 : bf16
    %7 = vector.broadcast %cst_8 : bf16 to vector<32x128xbf16>
    %c0_9 = arith.constant 0 : index
    %c512_10 = arith.constant 512 : index
    %8 = vector.load %arg16[%c0_9, %c512_10] : memref<32x640xbf16, #tpu.memory_space<vmem>>, vector<32x128xbf16>
    tpu.vector_store %arg16[%c0_9, %c512_10], %7 {strides = array<i32>} : memref<32x640xbf16, #tpu.memory_space<vmem>>, vector<32x128xbf16>,
    %cst_11 = arith.constant 0.000000e+00 : bf16
    %9 = vector.broadcast %cst_11 : bf16 to vector<32x128xbf16>
    %c0_12 = arith.constant 0 : index
    %c0_13 = arith.constant 0 : index
    %10 = vector.load %arg17[%c0_12, %c0_13] : memref<32x640xbf16, #tpu.memory_space<vmem>>, vector<32x128xbf16>
    tpu.vector_store %arg17[%c0_12, %c0_13], %9 {strides = array<i32>} : memref<32x640xbf16, #tpu.memory_space<vmem>>, vector<32x128xbf16>,
    %cst_14 = arith.constant 0.000000e+00 : bf16
    %11 = vector.broadcast %cst_14 : bf16 to vector<32x128xbf16>
    %c0_15 = arith.constant 0 : index
    %c512_16 = arith.constant 512 : index
    %12 = vector.load %arg17[%c0_15, %c512_16] : memref<32x640xbf16, #tpu.memory_space<vmem>>, vector<32x128xbf16>
    tpu.vector_store %arg17[%c0_15, %c512_16], %11 {strides = array<i32>} : memref<32x640xbf16, #tpu.memory_space<vmem>>, vector<32x128xbf16>,
    %c0_17 = arith.constant 0 : index
    %c0_18 = arith.constant 0 : index
    %c0_19 = arith.constant 0 : index
    %13 = vector.load %arg1[%c0_17, %c0_18, %c0_19] : memref<1x32x640xbf16, #tpu.memory_space<vmem>>, vector<1x32x640xbf16>
    %14 = vector.shape_cast %13 : vector<1x32x640xbf16> to vector<32x640xbf16>
    %15 = vector.extract_strided_slice %14 {offsets = [0, 109], sizes = [32, 384], strides = [1, 1]} : vector<32x640xbf16> to vector<32x384xbf16>
    %16 = vector.extract_strided_slice %14 {offsets = [0, 110], sizes = [32, 384], strides = [1, 1]} : vector<32x640xbf16> to vector<32x384xbf16>
    %17 = vector.extract_strided_slice %14 {offsets = [0, 111], sizes = [32, 384], strides = [1, 1]} : vector<32x640xbf16> to vector<32x384xbf16>
    %18 = vector.extract_strided_slice %14 {offsets = [0, 127], sizes = [32, 384], strides = [1, 1]} : vector<32x640xbf16> to vector<32x384xbf16>
    %19 = vector.extract_strided_slice %14 {offsets = [0, 128], sizes = [32, 384], strides = [1, 1]} : vector<32x640xbf16> to vector<32x384xbf16>
    %20 = vector.extract_strided_slice %14 {offsets = [0, 129], sizes = [32, 384], strides = [1, 1]} : vector<32x640xbf16> to vector<32x384xbf16>
    %21 = vector.extract_strided_slice %14 {offsets = [0, 145], sizes = [32, 384], strides = [1, 1]} : vector<32x640xbf16> to vector<32x384xbf16>
    %22 = vector.extract_strided_slice %14 {offsets = [0, 146], sizes = [32, 384], strides = [1, 1]} : vector<32x640xbf16> to vector<32x384xbf16>
    %23 = vector.extract_strided_slice %14 {offsets = [0, 147], sizes = [32, 384], strides = [1, 1]} : vector<32x640xbf16> to vector<32x384xbf16>
    %24 = tpu.concatenate %15, %16, %17, %18, %19, %20, %21, %22, %23 in 0 : vector<32x384xbf16>, vector<32x384xbf16>, vector<32x384xbf16>, vector<32x384xbf16>, vector<32x384xbf16>, vector<32x384xbf16>, vector<32x384xbf16>, vector<32x384xbf16>, vector<32x384xbf16> -> vector<288x384xbf16>
    %c0_20 = arith.constant 0 : index
    %c0_21 = arith.constant 0 : index
    %25 = vector.load %arg3[%c0_20, %c0_21] : memref<64x288xbf16, #tpu.memory_space<vmem>>, vector<64x288xbf16>
    %cst_22 = arith.constant dense<0.000000e+00> : vector<64x384xf32>
    %26 = tpu.matmul %25, %24, %cst_22 {dimension_numbers = #tpu.dot_dimension_numbers<[1], [0], [0], [1], [0, 0, 1, 1], [], []>} : vector<64x288xbf16>, vector<288x384xbf16>, vector<64x384xf32> -> vector<64x384xf32>
    %c0_23 = arith.constant 0 : index
    %c0_24 = arith.constant 0 : index
    %27 = vector.load %arg4[%c0_23, %c0_24] : memref<64x1xf32, #tpu.memory_space<vmem>>, vector<64x1xf32>
    %28 = vector.broadcast %27 : vector<64x1xf32> to vector<64x384xf32>
    %29 = arith.addf %26, %28 : vector<64x384xf32>
    %cst_25 = arith.constant 0.000000e+00 : f32
    %30 = vector.broadcast %cst_25 : f32 to vector<64x384xf32>
    %31 = arith.maximumf %29, %30 : vector<64x384xf32>
    %32 = vector.broadcast %0 : vector<1x384xf32> to vector<64x384xf32>
    %33 = arith.mulf %31, %32 : vector<64x384xf32>
    %34 = vector.extract_strided_slice %33 {offsets = [0, 0], sizes = [32, 384], strides = [1, 1]} : vector<64x384xf32> to vector<32x384xf32>
    %35 = arith.truncf %34 : vector<32x384xf32> to vector<32x384xbf16>
    %c0_26 = arith.constant 0 : index
    %c128 = arith.constant 128 : index
    %36 = vector.load %arg15[%c0_26, %c128] : memref<32x640xbf16, #tpu.memory_space<vmem>>, vector<32x384xbf16>
    tpu.vector_store %arg15[%c0_26, %c128], %35 {strides = array<i32>} : memref<32x640xbf16, #tpu.memory_space<vmem>>, vector<32x384xbf16>,
    %37 = vector.extract_strided_slice %33 {offsets = [32, 0], sizes = [32, 384], strides = [1, 1]} : vector<64x384xf32> to vector<32x384xf32>
    %38 = arith.truncf %37 : vector<32x384xf32> to vector<32x384xbf16>
    %c0_27 = arith.constant 0 : index
    %c128_28 = arith.constant 128 : index
    %39 = vector.load %arg17[%c0_27, %c128_28] : memref<32x640xbf16, #tpu.memory_space<vmem>>, vector<32x384xbf16>
    tpu.vector_store %arg17[%c0_27, %c128_28], %38 {strides = array<i32>} : memref<32x640xbf16, #tpu.memory_space<vmem>>, vector<32x384xbf16>,
    %c0_29 = arith.constant 0 : index
    %c0_30 = arith.constant 0 : index
    %c0_31 = arith.constant 0 : index
    %40 = vector.load %arg5[%c0_29, %c0_30, %c0_31] : memref<3x32x288xbf16, #tpu.memory_space<vmem>>, vector<1x32x288xbf16>
    %41 = vector.shape_cast %40 : vector<1x32x288xbf16> to vector<32x288xbf16>
    %c0_32 = arith.constant 0 : index
    %c109 = arith.constant 109 : index
    %42 = vector.load %arg15[%c0_32, %c109] : memref<32x640xbf16, #tpu.memory_space<vmem>>, vector<32x384xbf16>
    %c0_33 = arith.constant 0 : index
    %c110 = arith.constant 110 : index
    %43 = vector.load %arg15[%c0_33, %c110] : memref<32x640xbf16, #tpu.memory_space<vmem>>, vector<32x384xbf16>
    %c0_34 = arith.constant 0 : index
    %c111 = arith.constant 111 : index
    %44 = vector.load %arg15[%c0_34, %c111] : memref<32x640xbf16, #tpu.memory_space<vmem>>, vector<32x384xbf16>
    %c0_35 = arith.constant 0 : index
    %c127 = arith.constant 127 : index
    %45 = vector.load %arg15[%c0_35, %c127] : memref<32x640xbf16, #tpu.memory_space<vmem>>, vector<32x384xbf16>
    %c0_36 = arith.constant 0 : index
    %c128_37 = arith.constant 128 : index
    %46 = vector.load %arg15[%c0_36, %c128_37] : memref<32x640xbf16, #tpu.memory_space<vmem>>, vector<32x384xbf16>
    %c0_38 = arith.constant 0 : index
    %c129 = arith.constant 129 : index
    %47 = vector.load %arg15[%c0_38, %c129] : memref<32x640xbf16, #tpu.memory_space<vmem>>, vector<32x384xbf16>
    %c0_39 = arith.constant 0 : index
    %c145 = arith.constant 145 : index
    %48 = vector.load %arg15[%c0_39, %c145] : memref<32x640xbf16, #tpu.memory_space<vmem>>, vector<32x384xbf16>
    %c0_40 = arith.constant 0 : index
    %c146 = arith.constant 146 : index
    %49 = vector.load %arg15[%c0_40, %c146] : memref<32x640xbf16, #tpu.memory_space<vmem>>, vector<32x384xbf16>
    %c0_41 = arith.constant 0 : index
    %c147 = arith.constant 147 : index
    %50 = vector.load %arg15[%c0_41, %c147] : memref<32x640xbf16, #tpu.memory_space<vmem>>, vector<32x384xbf16>
    %51 = tpu.concatenate %42, %43, %44, %45, %46, %47, %48, %49, %50 in 0 : vector<32x384xbf16>, vector<32x384xbf16>, vector<32x384xbf16>, vector<32x384xbf16>, vector<32x384xbf16>, vector<32x384xbf16>, vector<32x384xbf16>, vector<32x384xbf16>, vector<32x384xbf16> -> vector<288x384xbf16>
    %cst_42 = arith.constant dense<0.000000e+00> : vector<32x384xf32>
    %52 = tpu.matmul %41, %51, %cst_42 {dimension_numbers = #tpu.dot_dimension_numbers<[1], [0], [0], [1], [0, 0, 1, 1], [], []>} : vector<32x288xbf16>, vector<288x384xbf16>, vector<32x384xf32> -> vector<32x384xf32>
    %c0_43 = arith.constant 0 : index
    %c0_44 = arith.constant 0 : index
    %c0_45 = arith.constant 0 : index
    %53 = vector.load %arg6[%c0_43, %c0_44, %c0_45] : memref<3x32x1xf32, #tpu.memory_space<vmem>>, vector<1x32x1xf32>
    %54 = vector.shape_cast %53 : vector<1x32x1xf32> to vector<32x1xf32>
    %55 = vector.broadcast %54 : vector<32x1xf32> to vector<32x384xf32>
    %56 = arith.addf %52, %55 : vector<32x384xf32>
    %cst_46 = arith.constant 0.000000e+00 : f32
    %57 = vector.broadcast %cst_46 : f32 to vector<32x384xf32>
    %58 = arith.maximumf %56, %57 : vector<32x384xf32>
    %59 = vector.broadcast %0 : vector<1x384xf32> to vector<32x384xf32>
    %60 = arith.mulf %58, %59 : vector<32x384xf32>
    %61 = arith.truncf %60 : vector<32x384xf32> to vector<32x384xbf16>
    %c0_47 = arith.constant 0 : index
    %c128_48 = arith.constant 128 : index
    %62 = vector.load %arg16[%c0_47, %c128_48] : memref<32x640xbf16, #tpu.memory_space<vmem>>, vector<32x384xbf16>
    tpu.vector_store %arg16[%c0_47, %c128_48], %61 {strides = array<i32>} : memref<32x640xbf16, #tpu.memory_space<vmem>>, vector<32x384xbf16>,
    %c1 = arith.constant 1 : index
    %c0_49 = arith.constant 0 : index
    %c0_50 = arith.constant 0 : index
    %63 = vector.load %arg5[%c1, %c0_49, %c0_50] : memref<3x32x288xbf16, #tpu.memory_space<vmem>>, vector<1x32x288xbf16>
    %64 = vector.shape_cast %63 : vector<1x32x288xbf16> to vector<32x288xbf16>
    %c0_51 = arith.constant 0 : index
    %c109_52 = arith.constant 109 : index
    %65 = vector.load %arg16[%c0_51, %c109_52] : memref<32x640xbf16, #tpu.memory_space<vmem>>, vector<32x384xbf16>
    %c0_53 = arith.constant 0 : index
    %c110_54 = arith.constant 110 : index
    %66 = vector.load %arg16[%c0_53, %c110_54] : memref<32x640xbf16, #tpu.memory_space<vmem>>, vector<32x384xbf16>
    %c0_55 = arith.constant 0 : index
    %c111_56 = arith.constant 111 : index
    %67 = vector.load %arg16[%c0_55, %c111_56] : memref<32x640xbf16, #tpu.memory_space<vmem>>, vector<32x384xbf16>
    %c0_57 = arith.constant 0 : index
    %c127_58 = arith.constant 127 : index
    %68 = vector.load %arg16[%c0_57, %c127_58] : memref<32x640xbf16, #tpu.memory_space<vmem>>, vector<32x384xbf16>
    %c0_59 = arith.constant 0 : index
    %c128_60 = arith.constant 128 : index
    %69 = vector.load %arg16[%c0_59, %c128_60] : memref<32x640xbf16, #tpu.memory_space<vmem>>, vector<32x384xbf16>
    %c0_61 = arith.constant 0 : index
    %c129_62 = arith.constant 129 : index
    %70 = vector.load %arg16[%c0_61, %c129_62] : memref<32x640xbf16, #tpu.memory_space<vmem>>, vector<32x384xbf16>
    %c0_63 = arith.constant 0 : index
    %c145_64 = arith.constant 145 : index
    %71 = vector.load %arg16[%c0_63, %c145_64] : memref<32x640xbf16, #tpu.memory_space<vmem>>, vector<32x384xbf16>
    %c0_65 = arith.constant 0 : index
    %c146_66 = arith.constant 146 : index
    %72 = vector.load %arg16[%c0_65, %c146_66] : memref<32x640xbf16, #tpu.memory_space<vmem>>, vector<32x384xbf16>
    %c0_67 = arith.constant 0 : index
    %c147_68 = arith.constant 147 : index
    %73 = vector.load %arg16[%c0_67, %c147_68] : memref<32x640xbf16, #tpu.memory_space<vmem>>, vector<32x384xbf16>
    %74 = tpu.concatenate %65, %66, %67, %68, %69, %70, %71, %72, %73 in 0 : vector<32x384xbf16>, vector<32x384xbf16>, vector<32x384xbf16>, vector<32x384xbf16>, vector<32x384xbf16>, vector<32x384xbf16>, vector<32x384xbf16>, vector<32x384xbf16>, vector<32x384xbf16> -> vector<288x384xbf16>
    %cst_69 = arith.constant dense<0.000000e+00> : vector<32x384xf32>
    %75 = tpu.matmul %64, %74, %cst_69 {dimension_numbers = #tpu.dot_dimension_numbers<[1], [0], [0], [1], [0, 0, 1, 1], [], []>} : vector<32x288xbf16>, vector<288x384xbf16>, vector<32x384xf32> -> vector<32x384xf32>
    %c1_70 = arith.constant 1 : index
    %c0_71 = arith.constant 0 : index
    %c0_72 = arith.constant 0 : index
    %76 = vector.load %arg6[%c1_70, %c0_71, %c0_72] : memref<3x32x1xf32, #tpu.memory_space<vmem>>, vector<1x32x1xf32>
    %77 = vector.shape_cast %76 : vector<1x32x1xf32> to vector<32x1xf32>
    %78 = vector.broadcast %77 : vector<32x1xf32> to vector<32x384xf32>
    %79 = arith.addf %75, %78 : vector<32x384xf32>
    %cst_73 = arith.constant 0.000000e+00 : f32
    %80 = vector.broadcast %cst_73 : f32 to vector<32x384xf32>
    %81 = arith.maximumf %79, %80 : vector<32x384xf32>
    %82 = vector.broadcast %0 : vector<1x384xf32> to vector<32x384xf32>
    %83 = arith.mulf %81, %82 : vector<32x384xf32>
    %84 = arith.truncf %83 : vector<32x384xf32> to vector<32x384xbf16>
    %c0_74 = arith.constant 0 : index
    %c128_75 = arith.constant 128 : index
    %85 = vector.load %arg15[%c0_74, %c128_75] : memref<32x640xbf16, #tpu.memory_space<vmem>>, vector<32x384xbf16>
    tpu.vector_store %arg15[%c0_74, %c128_75], %84 {strides = array<i32>} : memref<32x640xbf16, #tpu.memory_space<vmem>>, vector<32x384xbf16>,
    %c2 = arith.constant 2 : index
    %c0_76 = arith.constant 0 : index
    %c0_77 = arith.constant 0 : index
    %86 = vector.load %arg5[%c2, %c0_76, %c0_77] : memref<3x32x288xbf16, #tpu.memory_space<vmem>>, vector<1x32x288xbf16>
    %87 = vector.shape_cast %86 : vector<1x32x288xbf16> to vector<32x288xbf16>
    %c0_78 = arith.constant 0 : index
    %c109_79 = arith.constant 109 : index
    %88 = vector.load %arg15[%c0_78, %c109_79] : memref<32x640xbf16, #tpu.memory_space<vmem>>, vector<32x384xbf16>
    %c0_80 = arith.constant 0 : index
    %c110_81 = arith.constant 110 : index
    %89 = vector.load %arg15[%c0_80, %c110_81] : memref<32x640xbf16, #tpu.memory_space<vmem>>, vector<32x384xbf16>
    %c0_82 = arith.constant 0 : index
    %c111_83 = arith.constant 111 : index
    %90 = vector.load %arg15[%c0_82, %c111_83] : memref<32x640xbf16, #tpu.memory_space<vmem>>, vector<32x384xbf16>
    %c0_84 = arith.constant 0 : index
    %c127_85 = arith.constant 127 : index
    %91 = vector.load %arg15[%c0_84, %c127_85] : memref<32x640xbf16, #tpu.memory_space<vmem>>, vector<32x384xbf16>
    %c0_86 = arith.constant 0 : index
    %c128_87 = arith.constant 128 : index
    %92 = vector.load %arg15[%c0_86, %c128_87] : memref<32x640xbf16, #tpu.memory_space<vmem>>, vector<32x384xbf16>
    %c0_88 = arith.constant 0 : index
    %c129_89 = arith.constant 129 : index
    %93 = vector.load %arg15[%c0_88, %c129_89] : memref<32x640xbf16, #tpu.memory_space<vmem>>, vector<32x384xbf16>
    %c0_90 = arith.constant 0 : index
    %c145_91 = arith.constant 145 : index
    %94 = vector.load %arg15[%c0_90, %c145_91] : memref<32x640xbf16, #tpu.memory_space<vmem>>, vector<32x384xbf16>
    %c0_92 = arith.constant 0 : index
    %c146_93 = arith.constant 146 : index
    %95 = vector.load %arg15[%c0_92, %c146_93] : memref<32x640xbf16, #tpu.memory_space<vmem>>, vector<32x384xbf16>
    %c0_94 = arith.constant 0 : index
    %c147_95 = arith.constant 147 : index
    %96 = vector.load %arg15[%c0_94, %c147_95] : memref<32x640xbf16, #tpu.memory_space<vmem>>, vector<32x384xbf16>
    %97 = tpu.concatenate %88, %89, %90, %91, %92, %93, %94, %95, %96 in 0 : vector<32x384xbf16>, vector<32x384xbf16>, vector<32x384xbf16>, vector<32x384xbf16>, vector<32x384xbf16>, vector<32x384xbf16>, vector<32x384xbf16>, vector<32x384xbf16>, vector<32x384xbf16> -> vector<288x384xbf16>
    %cst_96 = arith.constant dense<0.000000e+00> : vector<32x384xf32>
    %98 = tpu.matmul %87, %97, %cst_96 {dimension_numbers = #tpu.dot_dimension_numbers<[1], [0], [0], [1], [0, 0, 1, 1], [], []>} : vector<32x288xbf16>, vector<288x384xbf16>, vector<32x384xf32> -> vector<32x384xf32>
    %c2_97 = arith.constant 2 : index
    %c0_98 = arith.constant 0 : index
    %c0_99 = arith.constant 0 : index
    %99 = vector.load %arg6[%c2_97, %c0_98, %c0_99] : memref<3x32x1xf32, #tpu.memory_space<vmem>>, vector<1x32x1xf32>
    %100 = vector.shape_cast %99 : vector<1x32x1xf32> to vector<32x1xf32>
    %101 = vector.broadcast %100 : vector<32x1xf32> to vector<32x384xf32>
    %102 = arith.addf %98, %101 : vector<32x384xf32>
    %cst_100 = arith.constant 0.000000e+00 : f32
    %103 = vector.broadcast %cst_100 : f32 to vector<32x384xf32>
    %104 = arith.maximumf %102, %103 : vector<32x384xf32>
    %105 = vector.broadcast %0 : vector<1x384xf32> to vector<32x384xf32>
    %106 = arith.mulf %104, %105 : vector<32x384xf32>
    %107 = arith.truncf %106 : vector<32x384xf32> to vector<32x384xbf16>
    %c0_101 = arith.constant 0 : index
    %c128_102 = arith.constant 128 : index
    %108 = vector.load %arg16[%c0_101, %c128_102] : memref<32x640xbf16, #tpu.memory_space<vmem>>, vector<32x384xbf16>
    tpu.vector_store %arg16[%c0_101, %c128_102], %107 {strides = array<i32>} : memref<32x640xbf16, #tpu.memory_space<vmem>>, vector<32x384xbf16>,
    %c0_103 = arith.constant 0 : index
    %c0_104 = arith.constant 0 : index
    %109 = vector.load %arg7[%c0_103, %c0_104] : memref<32x288xbf16, #tpu.memory_space<vmem>>, vector<32x288xbf16>
    %c0_105 = arith.constant 0 : index
    %c109_106 = arith.constant 109 : index
    %110 = vector.load %arg16[%c0_105, %c109_106] : memref<32x640xbf16, #tpu.memory_space<vmem>>, vector<32x384xbf16>
    %c0_107 = arith.constant 0 : index
    %c110_108 = arith.constant 110 : index
    %111 = vector.load %arg16[%c0_107, %c110_108] : memref<32x640xbf16, #tpu.memory_space<vmem>>, vector<32x384xbf16>
    %c0_109 = arith.constant 0 : index
    %c111_110 = arith.constant 111 : index
    %112 = vector.load %arg16[%c0_109, %c111_110] : memref<32x640xbf16, #tpu.memory_space<vmem>>, vector<32x384xbf16>
    %c0_111 = arith.constant 0 : index
    %c127_112 = arith.constant 127 : index
    %113 = vector.load %arg16[%c0_111, %c127_112] : memref<32x640xbf16, #tpu.memory_space<vmem>>, vector<32x384xbf16>
    %c0_113 = arith.constant 0 : index
    %c128_114 = arith.constant 128 : index
    %114 = vector.load %arg16[%c0_113, %c128_114] : memref<32x640xbf16, #tpu.memory_space<vmem>>, vector<32x384xbf16>
    %c0_115 = arith.constant 0 : index
    %c129_116 = arith.constant 129 : index
    %115 = vector.load %arg16[%c0_115, %c129_116] : memref<32x640xbf16, #tpu.memory_space<vmem>>, vector<32x384xbf16>
    %c0_117 = arith.constant 0 : index
    %c145_118 = arith.constant 145 : index
    %116 = vector.load %arg16[%c0_117, %c145_118] : memref<32x640xbf16, #tpu.memory_space<vmem>>, vector<32x384xbf16>
    %c0_119 = arith.constant 0 : index
    %c146_120 = arith.constant 146 : index
    %117 = vector.load %arg16[%c0_119, %c146_120] : memref<32x640xbf16, #tpu.memory_space<vmem>>, vector<32x384xbf16>
    %c0_121 = arith.constant 0 : index
    %c147_122 = arith.constant 147 : index
    %118 = vector.load %arg16[%c0_121, %c147_122] : memref<32x640xbf16, #tpu.memory_space<vmem>>, vector<32x384xbf16>
    %119 = tpu.concatenate %110, %111, %112, %113, %114, %115, %116, %117, %118 in 0 : vector<32x384xbf16>, vector<32x384xbf16>, vector<32x384xbf16>, vector<32x384xbf16>, vector<32x384xbf16>, vector<32x384xbf16>, vector<32x384xbf16>, vector<32x384xbf16>, vector<32x384xbf16> -> vector<288x384xbf16>
    %cst_123 = arith.constant dense<0.000000e+00> : vector<32x384xf32>
    %120 = tpu.matmul %109, %119, %cst_123 {dimension_numbers = #tpu.dot_dimension_numbers<[1], [0], [0], [1], [0, 0, 1, 1], [], []>} : vector<32x288xbf16>, vector<288x384xbf16>, vector<32x384xf32> -> vector<32x384xf32>
    %c0_124 = arith.constant 0 : index
    %c0_125 = arith.constant 0 : index
    %121 = vector.load %arg8[%c0_124, %c0_125] : memref<32x1xf32, #tpu.memory_space<vmem>>, vector<32x1xf32>
    %122 = vector.broadcast %121 : vector<32x1xf32> to vector<32x384xf32>
    %123 = arith.addf %120, %122 : vector<32x384xf32>
    %124 = arith.truncf %123 : vector<32x384xf32> to vector<32x384xbf16>
    %c0_126 = arith.constant 0 : index
    %c0_127 = arith.constant 0 : index
    %c0_128 = arith.constant 0 : index
    %125 = vector.load %arg13[%c0_126, %c0_127, %c0_128] : memref<1x32x384xbf16, #tpu.memory_space<vmem>>, vector<1x32x384xbf16>
    %126 = vector.shape_cast %125 : vector<1x32x384xbf16> to vector<32x384xbf16>
    %127 = vector.shape_cast %124 : vector<32x384xbf16> to vector<1x32x384xbf16>
    tpu.vector_store %arg13[%c0_126, %c0_127, %c0_128], %127 {strides = array<i32>} : memref<1x32x384xbf16, #tpu.memory_space<vmem>>, vector<1x32x384xbf16>,
    %c0_129 = arith.constant 0 : index
    %c0_130 = arith.constant 0 : index
    %c0_131 = arith.constant 0 : index
    %128 = vector.load %arg9[%c0_129, %c0_130, %c0_131] : memref<3x32x288xbf16, #tpu.memory_space<vmem>>, vector<1x32x288xbf16>
    %129 = vector.shape_cast %128 : vector<1x32x288xbf16> to vector<32x288xbf16>
    %c0_132 = arith.constant 0 : index
    %c109_133 = arith.constant 109 : index
    %130 = vector.load %arg17[%c0_132, %c109_133] : memref<32x640xbf16, #tpu.memory_space<vmem>>, vector<32x384xbf16>
    %c0_134 = arith.constant 0 : index
    %c110_135 = arith.constant 110 : index
    %131 = vector.load %arg17[%c0_134, %c110_135] : memref<32x640xbf16, #tpu.memory_space<vmem>>, vector<32x384xbf16>
    %c0_136 = arith.constant 0 : index
    %c111_137 = arith.constant 111 : index
    %132 = vector.load %arg17[%c0_136, %c111_137] : memref<32x640xbf16, #tpu.memory_space<vmem>>, vector<32x384xbf16>
    %c0_138 = arith.constant 0 : index
    %c127_139 = arith.constant 127 : index
    %133 = vector.load %arg17[%c0_138, %c127_139] : memref<32x640xbf16, #tpu.memory_space<vmem>>, vector<32x384xbf16>
    %c0_140 = arith.constant 0 : index
    %c128_141 = arith.constant 128 : index
    %134 = vector.load %arg17[%c0_140, %c128_141] : memref<32x640xbf16, #tpu.memory_space<vmem>>, vector<32x384xbf16>
    %c0_142 = arith.constant 0 : index
    %c129_143 = arith.constant 129 : index
    %135 = vector.load %arg17[%c0_142, %c129_143] : memref<32x640xbf16, #tpu.memory_space<vmem>>, vector<32x384xbf16>
    %c0_144 = arith.constant 0 : index
    %c145_145 = arith.constant 145 : index
    %136 = vector.load %arg17[%c0_144, %c145_145] : memref<32x640xbf16, #tpu.memory_space<vmem>>, vector<32x384xbf16>
    %c0_146 = arith.constant 0 : index
    %c146_147 = arith.constant 146 : index
    %137 = vector.load %arg17[%c0_146, %c146_147] : memref<32x640xbf16, #tpu.memory_space<vmem>>, vector<32x384xbf16>
    %c0_148 = arith.constant 0 : index
    %c147_149 = arith.constant 147 : index
    %138 = vector.load %arg17[%c0_148, %c147_149] : memref<32x640xbf16, #tpu.memory_space<vmem>>, vector<32x384xbf16>
    %139 = tpu.concatenate %130, %131, %132, %133, %134, %135, %136, %137, %138 in 0 : vector<32x384xbf16>, vector<32x384xbf16>, vector<32x384xbf16>, vector<32x384xbf16>, vector<32x384xbf16>, vector<32x384xbf16>, vector<32x384xbf16>, vector<32x384xbf16>, vector<32x384xbf16> -> vector<288x384xbf16>
    %cst_150 = arith.constant dense<0.000000e+00> : vector<32x384xf32>
    %140 = tpu.matmul %129, %139, %cst_150 {dimension_numbers = #tpu.dot_dimension_numbers<[1], [0], [0], [1], [0, 0, 1, 1], [], []>} : vector<32x288xbf16>, vector<288x384xbf16>, vector<32x384xf32> -> vector<32x384xf32>
    %c0_151 = arith.constant 0 : index
    %c0_152 = arith.constant 0 : index
    %c0_153 = arith.constant 0 : index
    %141 = vector.load %arg10[%c0_151, %c0_152, %c0_153] : memref<3x32x1xf32, #tpu.memory_space<vmem>>, vector<1x32x1xf32>
    %142 = vector.shape_cast %141 : vector<1x32x1xf32> to vector<32x1xf32>
    %143 = vector.broadcast %142 : vector<32x1xf32> to vector<32x384xf32>
    %144 = arith.addf %140, %143 : vector<32x384xf32>
    %cst_154 = arith.constant 0.000000e+00 : f32
    %145 = vector.broadcast %cst_154 : f32 to vector<32x384xf32>
    %146 = arith.maximumf %144, %145 : vector<32x384xf32>
    %147 = vector.broadcast %0 : vector<1x384xf32> to vector<32x384xf32>
    %148 = arith.mulf %146, %147 : vector<32x384xf32>
    %149 = arith.truncf %148 : vector<32x384xf32> to vector<32x384xbf16>
    %c0_155 = arith.constant 0 : index
    %c128_156 = arith.constant 128 : index
    %150 = vector.load %arg15[%c0_155, %c128_156] : memref<32x640xbf16, #tpu.memory_space<vmem>>, vector<32x384xbf16>
    tpu.vector_store %arg15[%c0_155, %c128_156], %149 {strides = array<i32>} : memref<32x640xbf16, #tpu.memory_space<vmem>>, vector<32x384xbf16>,
    %c1_157 = arith.constant 1 : index
    %c0_158 = arith.constant 0 : index
    %c0_159 = arith.constant 0 : index
    %151 = vector.load %arg9[%c1_157, %c0_158, %c0_159] : memref<3x32x288xbf16, #tpu.memory_space<vmem>>, vector<1x32x288xbf16>
    %152 = vector.shape_cast %151 : vector<1x32x288xbf16> to vector<32x288xbf16>
    %c0_160 = arith.constant 0 : index
    %c109_161 = arith.constant 109 : index
    %153 = vector.load %arg15[%c0_160, %c109_161] : memref<32x640xbf16, #tpu.memory_space<vmem>>, vector<32x384xbf16>
    %c0_162 = arith.constant 0 : index
    %c110_163 = arith.constant 110 : index
    %154 = vector.load %arg15[%c0_162, %c110_163] : memref<32x640xbf16, #tpu.memory_space<vmem>>, vector<32x384xbf16>
    %c0_164 = arith.constant 0 : index
    %c111_165 = arith.constant 111 : index
    %155 = vector.load %arg15[%c0_164, %c111_165] : memref<32x640xbf16, #tpu.memory_space<vmem>>, vector<32x384xbf16>
    %c0_166 = arith.constant 0 : index
    %c127_167 = arith.constant 127 : index
    %156 = vector.load %arg15[%c0_166, %c127_167] : memref<32x640xbf16, #tpu.memory_space<vmem>>, vector<32x384xbf16>
    %c0_168 = arith.constant 0 : index
    %c128_169 = arith.constant 128 : index
    %157 = vector.load %arg15[%c0_168, %c128_169] : memref<32x640xbf16, #tpu.memory_space<vmem>>, vector<32x384xbf16>
    %c0_170 = arith.constant 0 : index
    %c129_171 = arith.constant 129 : index
    %158 = vector.load %arg15[%c0_170, %c129_171] : memref<32x640xbf16, #tpu.memory_space<vmem>>, vector<32x384xbf16>
    %c0_172 = arith.constant 0 : index
    %c145_173 = arith.constant 145 : index
    %159 = vector.load %arg15[%c0_172, %c145_173] : memref<32x640xbf16, #tpu.memory_space<vmem>>, vector<32x384xbf16>
    %c0_174 = arith.constant 0 : index
    %c146_175 = arith.constant 146 : index
    %160 = vector.load %arg15[%c0_174, %c146_175] : memref<32x640xbf16, #tpu.memory_space<vmem>>, vector<32x384xbf16>
    %c0_176 = arith.constant 0 : index
    %c147_177 = arith.constant 147 : index
    %161 = vector.load %arg15[%c0_176, %c147_177] : memref<32x640xbf16, #tpu.memory_space<vmem>>, vector<32x384xbf16>
    %162 = tpu.concatenate %153, %154, %155, %156, %157, %158, %159, %160, %161 in 0 : vector<32x384xbf16>, vector<32x384xbf16>, vector<32x384xbf16>, vector<32x384xbf16>, vector<32x384xbf16>, vector<32x384xbf16>, vector<32x384xbf16>, vector<32x384xbf16>, vector<32x384xbf16> -> vector<288x384xbf16>
    %cst_178 = arith.constant dense<0.000000e+00> : vector<32x384xf32>
    %163 = tpu.matmul %152, %162, %cst_178 {dimension_numbers = #tpu.dot_dimension_numbers<[1], [0], [0], [1], [0, 0, 1, 1], [], []>} : vector<32x288xbf16>, vector<288x384xbf16>, vector<32x384xf32> -> vector<32x384xf32>
    %c1_179 = arith.constant 1 : index
    %c0_180 = arith.constant 0 : index
    %c0_181 = arith.constant 0 : index
    %164 = vector.load %arg10[%c1_179, %c0_180, %c0_181] : memref<3x32x1xf32, #tpu.memory_space<vmem>>, vector<1x32x1xf32>
    %165 = vector.shape_cast %164 : vector<1x32x1xf32> to vector<32x1xf32>
    %166 = vector.broadcast %165 : vector<32x1xf32> to vector<32x384xf32>
    %167 = arith.addf %163, %166 : vector<32x384xf32>
    %cst_182 = arith.constant 0.000000e+00 : f32
    %168 = vector.broadcast %cst_182 : f32 to vector<32x384xf32>
    %169 = arith.maximumf %167, %168 : vector<32x384xf32>
    %170 = vector.broadcast %0 : vector<1x384xf32> to vector<32x384xf32>
    %171 = arith.mulf %169, %170 : vector<32x384xf32>
    %172 = arith.truncf %171 : vector<32x384xf32> to vector<32x384xbf16>
    %c0_183 = arith.constant 0 : index
    %c128_184 = arith.constant 128 : index
    %173 = vector.load %arg17[%c0_183, %c128_184] : memref<32x640xbf16, #tpu.memory_space<vmem>>, vector<32x384xbf16>
    tpu.vector_store %arg17[%c0_183, %c128_184], %172 {strides = array<i32>} : memref<32x640xbf16, #tpu.memory_space<vmem>>, vector<32x384xbf16>,
    %c2_185 = arith.constant 2 : index
    %c0_186 = arith.constant 0 : index
    %c0_187 = arith.constant 0 : index
    %174 = vector.load %arg9[%c2_185, %c0_186, %c0_187] : memref<3x32x288xbf16, #tpu.memory_space<vmem>>, vector<1x32x288xbf16>
    %175 = vector.shape_cast %174 : vector<1x32x288xbf16> to vector<32x288xbf16>
    %c0_188 = arith.constant 0 : index
    %c109_189 = arith.constant 109 : index
    %176 = vector.load %arg17[%c0_188, %c109_189] : memref<32x640xbf16, #tpu.memory_space<vmem>>, vector<32x384xbf16>
    %c0_190 = arith.constant 0 : index
    %c110_191 = arith.constant 110 : index
    %177 = vector.load %arg17[%c0_190, %c110_191] : memref<32x640xbf16, #tpu.memory_space<vmem>>, vector<32x384xbf16>
    %c0_192 = arith.constant 0 : index
    %c111_193 = arith.constant 111 : index
    %178 = vector.load %arg17[%c0_192, %c111_193] : memref<32x640xbf16, #tpu.memory_space<vmem>>, vector<32x384xbf16>
    %c0_194 = arith.constant 0 : index
    %c127_195 = arith.constant 127 : index
    %179 = vector.load %arg17[%c0_194, %c127_195] : memref<32x640xbf16, #tpu.memory_space<vmem>>, vector<32x384xbf16>
    %c0_196 = arith.constant 0 : index
    %c128_197 = arith.constant 128 : index
    %180 = vector.load %arg17[%c0_196, %c128_197] : memref<32x640xbf16, #tpu.memory_space<vmem>>, vector<32x384xbf16>
    %c0_198 = arith.constant 0 : index
    %c129_199 = arith.constant 129 : index
    %181 = vector.load %arg17[%c0_198, %c129_199] : memref<32x640xbf16, #tpu.memory_space<vmem>>, vector<32x384xbf16>
    %c0_200 = arith.constant 0 : index
    %c145_201 = arith.constant 145 : index
    %182 = vector.load %arg17[%c0_200, %c145_201] : memref<32x640xbf16, #tpu.memory_space<vmem>>, vector<32x384xbf16>
    %c0_202 = arith.constant 0 : index
    %c146_203 = arith.constant 146 : index
    %183 = vector.load %arg17[%c0_202, %c146_203] : memref<32x640xbf16, #tpu.memory_space<vmem>>, vector<32x384xbf16>
    %c0_204 = arith.constant 0 : index
    %c147_205 = arith.constant 147 : index
    %184 = vector.load %arg17[%c0_204, %c147_205] : memref<32x640xbf16, #tpu.memory_space<vmem>>, vector<32x384xbf16>
    %185 = tpu.concatenate %176, %177, %178, %179, %180, %181, %182, %183, %184 in 0 : vector<32x384xbf16>, vector<32x384xbf16>, vector<32x384xbf16>, vector<32x384xbf16>, vector<32x384xbf16>, vector<32x384xbf16>, vector<32x384xbf16>, vector<32x384xbf16>, vector<32x384xbf16> -> vector<288x384xbf16>
    %cst_206 = arith.constant dense<0.000000e+00> : vector<32x384xf32>
    %186 = tpu.matmul %175, %185, %cst_206 {dimension_numbers = #tpu.dot_dimension_numbers<[1], [0], [0], [1], [0, 0, 1, 1], [], []>} : vector<32x288xbf16>, vector<288x384xbf16>, vector<32x384xf32> -> vector<32x384xf32>
    %c2_207 = arith.constant 2 : index
    %c0_208 = arith.constant 0 : index
    %c0_209 = arith.constant 0 : index
    %187 = vector.load %arg10[%c2_207, %c0_208, %c0_209] : memref<3x32x1xf32, #tpu.memory_space<vmem>>, vector<1x32x1xf32>
    %188 = vector.shape_cast %187 : vector<1x32x1xf32> to vector<32x1xf32>
    %189 = vector.broadcast %188 : vector<32x1xf32> to vector<32x384xf32>
    %190 = arith.addf %186, %189 : vector<32x384xf32>
    %cst_210 = arith.constant 0.000000e+00 : f32
    %191 = vector.broadcast %cst_210 : f32 to vector<32x384xf32>
    %192 = arith.maximumf %190, %191 : vector<32x384xf32>
    %193 = vector.broadcast %0 : vector<1x384xf32> to vector<32x384xf32>
    %194 = arith.mulf %192, %193 : vector<32x384xf32>
    %195 = arith.truncf %194 : vector<32x384xf32> to vector<32x384xbf16>
    %c0_211 = arith.constant 0 : index
    %c128_212 = arith.constant 128 : index
    %196 = vector.load %arg15[%c0_211, %c128_212] : memref<32x640xbf16, #tpu.memory_space<vmem>>, vector<32x384xbf16>
    tpu.vector_store %arg15[%c0_211, %c128_212], %195 {strides = array<i32>} : memref<32x640xbf16, #tpu.memory_space<vmem>>, vector<32x384xbf16>,
    %c0_213 = arith.constant 0 : index
    %c0_214 = arith.constant 0 : index
    %197 = vector.load %arg11[%c0_213, %c0_214] : memref<16x288xbf16, #tpu.memory_space<vmem>>, vector<16x288xbf16>
    %c0_215 = arith.constant 0 : index
    %c109_216 = arith.constant 109 : index
    %198 = vector.load %arg15[%c0_215, %c109_216] : memref<32x640xbf16, #tpu.memory_space<vmem>>, vector<32x384xbf16>
    %c0_217 = arith.constant 0 : index
    %c110_218 = arith.constant 110 : index
    %199 = vector.load %arg15[%c0_217, %c110_218] : memref<32x640xbf16, #tpu.memory_space<vmem>>, vector<32x384xbf16>
    %c0_219 = arith.constant 0 : index
    %c111_220 = arith.constant 111 : index
    %200 = vector.load %arg15[%c0_219, %c111_220] : memref<32x640xbf16, #tpu.memory_space<vmem>>, vector<32x384xbf16>
    %c0_221 = arith.constant 0 : index
    %c127_222 = arith.constant 127 : index
    %201 = vector.load %arg15[%c0_221, %c127_222] : memref<32x640xbf16, #tpu.memory_space<vmem>>, vector<32x384xbf16>
    %c0_223 = arith.constant 0 : index
    %c128_224 = arith.constant 128 : index
    %202 = vector.load %arg15[%c0_223, %c128_224] : memref<32x640xbf16, #tpu.memory_space<vmem>>, vector<32x384xbf16>
    %c0_225 = arith.constant 0 : index
    %c129_226 = arith.constant 129 : index
    %203 = vector.load %arg15[%c0_225, %c129_226] : memref<32x640xbf16, #tpu.memory_space<vmem>>, vector<32x384xbf16>
    %c0_227 = arith.constant 0 : index
    %c145_228 = arith.constant 145 : index
    %204 = vector.load %arg15[%c0_227, %c145_228] : memref<32x640xbf16, #tpu.memory_space<vmem>>, vector<32x384xbf16>
    %c0_229 = arith.constant 0 : index
    %c146_230 = arith.constant 146 : index
    %205 = vector.load %arg15[%c0_229, %c146_230] : memref<32x640xbf16, #tpu.memory_space<vmem>>, vector<32x384xbf16>
    %c0_231 = arith.constant 0 : index
    %c147_232 = arith.constant 147 : index
    %206 = vector.load %arg15[%c0_231, %c147_232] : memref<32x640xbf16, #tpu.memory_space<vmem>>, vector<32x384xbf16>
    %207 = tpu.concatenate %198, %199, %200, %201, %202, %203, %204, %205, %206 in 0 : vector<32x384xbf16>, vector<32x384xbf16>, vector<32x384xbf16>, vector<32x384xbf16>, vector<32x384xbf16>, vector<32x384xbf16>, vector<32x384xbf16>, vector<32x384xbf16>, vector<32x384xbf16> -> vector<288x384xbf16>
    %cst_233 = arith.constant dense<0.000000e+00> : vector<16x384xf32>
    %208 = tpu.matmul %197, %207, %cst_233 {dimension_numbers = #tpu.dot_dimension_numbers<[1], [0], [0], [1], [0, 0, 1, 1], [], []>} : vector<16x288xbf16>, vector<288x384xbf16>, vector<16x384xf32> -> vector<16x384xf32>
    %c0_234 = arith.constant 0 : index
    %c0_235 = arith.constant 0 : index
    %209 = vector.load %arg12[%c0_234, %c0_235] : memref<16x1xf32, #tpu.memory_space<vmem>>, vector<16x1xf32>
    %210 = vector.broadcast %209 : vector<16x1xf32> to vector<16x384xf32>
    %211 = arith.addf %208, %210 : vector<16x384xf32>
    %212 = arith.truncf %211 : vector<16x384xf32> to vector<16x384xbf16>
    %c0_236 = arith.constant 0 : index
    %c0_237 = arith.constant 0 : index
    %c0_238 = arith.constant 0 : index
    %213 = vector.load %arg14[%c0_236, %c0_237, %c0_238] : memref<1x16x384xbf16, #tpu.memory_space<vmem>>, vector<1x16x384xbf16>
    %214 = vector.shape_cast %213 : vector<1x16x384xbf16> to vector<16x384xbf16>
    %215 = vector.shape_cast %212 : vector<16x384xbf16> to vector<1x16x384xbf16>
    tpu.vector_store %arg14[%c0_236, %c0_237, %c0_238], %215 {strides = array<i32>} : memref<1x16x384xbf16, #tpu.memory_space<vmem>>, vector<1x16x384xbf16>,
    return
  }
  func.func @transform_0(%arg0: i32) -> (i32, i32, i32) {
    %c0_i32 = arith.constant 0 : i32
    %c0_i32_0 = arith.constant 0 : i32
    %c0_i32_1 = arith.constant 0 : i32
    return %arg0, %c0_i32, %c0_i32_0 : i32, i32, i32
  }
  func.func @transform_1(%arg0: i32) -> (i32, i32) {
    %c0_i32 = arith.constant 0 : i32
    %c0_i32_0 = arith.constant 0 : i32
    %c0_i32_1 = arith.constant 0 : i32
    return %c0_i32, %c0_i32_0 : i32, i32
  }
  func.func @transform_2(%arg0: i32) -> (i32, i32) {
    %c0_i32 = arith.constant 0 : i32
    %c0_i32_0 = arith.constant 0 : i32
    %c0_i32_1 = arith.constant 0 : i32
    return %c0_i32, %c0_i32_0 : i32, i32
  }
  func.func @transform_3(%arg0: i32) -> (i32, i32) {
    %c0_i32 = arith.constant 0 : i32
    %c0_i32_0 = arith.constant 0 : i32
    %c0_i32_1 = arith.constant 0 : i32
    return %c0_i32, %c0_i32_0 : i32, i32
  }
  func.func @transform_4(%arg0: i32) -> (i32, i32, i32) {
    %c0_i32 = arith.constant 0 : i32
    %c0_i32_0 = arith.constant 0 : i32
    %c0_i32_1 = arith.constant 0 : i32
    %c0_i32_2 = arith.constant 0 : i32
    return %c0_i32, %c0_i32_0, %c0_i32_1 : i32, i32, i32
  }
  func.func @transform_5(%arg0: i32) -> (i32, i32, i32) {
    %c0_i32 = arith.constant 0 : i32
    %c0_i32_0 = arith.constant 0 : i32
    %c0_i32_1 = arith.constant 0 : i32
    %c0_i32_2 = arith.constant 0 : i32
    return %c0_i32, %c0_i32_0, %c0_i32_1 : i32, i32, i32
  }
  func.func @transform_6(%arg0: i32) -> (i32, i32) {
    %c0_i32 = arith.constant 0 : i32
    %c0_i32_0 = arith.constant 0 : i32
    %c0_i32_1 = arith.constant 0 : i32
    return %c0_i32, %c0_i32_0 : i32, i32
  }
  func.func @transform_7(%arg0: i32) -> (i32, i32) {
    %c0_i32 = arith.constant 0 : i32
    %c0_i32_0 = arith.constant 0 : i32
    %c0_i32_1 = arith.constant 0 : i32
    return %c0_i32, %c0_i32_0 : i32, i32
  }
  func.func @transform_8(%arg0: i32) -> (i32, i32, i32) {
    %c0_i32 = arith.constant 0 : i32
    %c0_i32_0 = arith.constant 0 : i32
    %c0_i32_1 = arith.constant 0 : i32
    %c0_i32_2 = arith.constant 0 : i32
    return %c0_i32, %c0_i32_0, %c0_i32_1 : i32, i32, i32
  }
  func.func @transform_9(%arg0: i32) -> (i32, i32, i32) {
    %c0_i32 = arith.constant 0 : i32
    %c0_i32_0 = arith.constant 0 : i32
    %c0_i32_1 = arith.constant 0 : i32
    %c0_i32_2 = arith.constant 0 : i32
    return %c0_i32, %c0_i32_0, %c0_i32_1 : i32, i32, i32
  }
  func.func @transform_10(%arg0: i32) -> (i32, i32) {
    %c0_i32 = arith.constant 0 : i32
    %c0_i32_0 = arith.constant 0 : i32
    %c0_i32_1 = arith.constant 0 : i32
    return %c0_i32, %c0_i32_0 : i32, i32
  }
  func.func @transform_11(%arg0: i32) -> (i32, i32) {
    %c0_i32 = arith.constant 0 : i32
    %c0_i32_0 = arith.constant 0 : i32
    %c0_i32_1 = arith.constant 0 : i32
    return %c0_i32, %c0_i32_0 : i32, i32
  }
  func.func @transform_12(%arg0: i32) -> (i32, i32, i32) {
    %c0_i32 = arith.constant 0 : i32
    %c0_i32_0 = arith.constant 0 : i32
    %c0_i32_1 = arith.constant 0 : i32
    return %arg0, %c0_i32, %c0_i32_0 : i32, i32, i32
  }
  func.func @transform_13(%arg0: i32) -> (i32, i32, i32) {
    %c0_i32 = arith.constant 0 : i32
    %c0_i32_0 = arith.constant 0 : i32
    %c0_i32_1 = arith.constant 0 : i32
    return %arg0, %c0_i32, %c0_i32_0 : i32, i32, i32
  }
}

</mosaic_0001>

<bundles_post_ra>
// kernel: tpu_custom_call.1
= control target key start
LH: loop header
LB: loop body
LE: loop exit
PB: predicated region body
PF: predicated region fallthrough
CT: control target
= control target key end

     0   :  { %s14342_s0 = inlined_call_operand.vmem [shape: bf16[2,32,640], index: 0, kind: input, shape index: {}]   ;;  %s14343_s1 = inlined_call_operand.hbm [shape: f32[1,384], index: 1, kind: input, shape index: {}]   ;;  %s14344_s2 = inlined_call_operand.vmem [shape: bf16[64,288], index: 2, kind: input, shape index: {}]   ;;  %s14345_s3 = inlined_call_operand.vmem [shape: f32[64,1], index: 3, kind: input, shape index: {}]   ;;  %s14346_s4 = inlined_call_operand.hbm [shape: bf16[3,32,288], index: 4, kind: input, shape index: {}]   ;;  %s14347_s5 = inlined_call_operand.vmem [shape: f32[3,32,1], index: 5, kind: input, shape index: {}]   ;;  %s14348_s6 = inlined_call_operand.vmem [shape: bf16[32,288], index: 6, kind: input, shape index: {}]   ;;  %s14349_s7 = inlined_call_operand.vmem [shape: f32[32,1], index: 7, kind: input, shape index: {}]   ;;  %s14350_s8 = inlined_call_operand.hbm [shape: bf16[3,32,288], index: 8, kind: input, shape index: {}]   ;;  %s14351_s9 = inlined_call_operand.vmem [shape: f32[3,32,1], index: 9, kind: input, shape index: {}]   ;;  %s14352_s10 = inlined_call_operand.vmem [shape: bf16[16,288], index: 10, kind: input, shape index: {}]   ;;  %s14353_s11 = inlined_call_operand.vmem [shape: f32[16,1], index: 11, kind: input, shape index: {}]   ;;  %s14354_s12 = inlined_call_operand.hbm [shape: bf16[2,32,384], index: 12, kind: output, shape index: {0}]   ;;  %s14355_s13 = inlined_call_operand.hbm [shape: bf16[2,16,384], index: 13, kind: output, shape index: {1}]  }
   0x1   :  { %14425 = sst [smem:[#allocation72_spill]] %s14354_s12 }
   0x2   :  { %14426 = sst [smem:[#allocation73_spill]] %s14355_s13 }
   0x3   :  { %19 = vsyncpa [#allocation6], 0 }
   0x4   :  { %20 = vsyncpa [#allocation9], 0 }
   0x5   :  { %21 = vsyncpa [#allocation7], 0 }
   0x6   :  { %23 = vsyncpa [#allocation7 + $0x1], 0 }
   0x7   :  { %24 = vsyncpa [#allocation13], 0 }
   0x8   :  { %26 = vsyncpa [#allocation13 + $0x1], 0  ;;  %s9156_s25 = smov 0   ;;  %s9158_s26 = smov 0  }
   0x9   :  { %s9160_s27 = smov 0   ;;  %s9162_s28 = smov 0  }
   0xa LB: > { %14427 = sst [smem:[#allocation18_spill]] %s9051_s25  ;;  %s9177_s29 = sadd.s32 4294967295, %s9063_s28   ;;  %s9063_s28 = sphi %s9162_s28, %s14621_s28   ;;  %s9059_s27 = sphi %s9160_s27, %s14623_s27   ;;  %s9055_s26 = sphi %s9158_s26, %s14625_s26   ;;  %s9051_s25 = sphi %s9156_s25, %s14624_s25  }
   0xb   : > { %14428 = sst [smem:[#allocation19_spill]] %s9059_s27  ;;  %s7686_s30 = sadd.s32 4294967294, %s9063_s28  }
   0xc   : > { %14429 = sst [smem:[#allocation20_spill]] %s9063_s28  ;;  %s9181_s14 = sadd.s32 1, %s9063_s28  }
   0xd   : > { %14430 = sst [smem:[#allocation21_spill]] %s9181_s14  ;;  %s296_s15 = sadd.s32 1, %s9059_s27 }
   0xe   : > { %s293_s16 = ssub.s32 %s9063_s28, %s9181_s14  ;;  %p306_p0 = scmp.ne.s32.totalorder %s9059_s27, %s9055_s26 }
   0xf   : > { %p294_p1 = scmp.eq.s32.totalorder %s293_s16, 0  ;;  %p307_p2 = scmp.eq.s32.totalorder %s9177_s29, 1 }
  0x10   : > { %p312_p3 = scmp.ne.s32.totalorder %s9055_s26, %s9051_s25  ;;  %p313_p4 = scmp.eq.s32.totalorder %s7686_s30, 1 }
  0x11   : > { %s9192_s17 = scalar_select %p294_p1, %s9059_s27, %s296_s15  }
  0x12   : > { %p9194_p5 = por %p307_p2, %p306_p0  ;;  %p9198_p6 = por %p313_p4, %p312_p3 }
  0x13   : > { %14431 = sst [smem:[#allocation22_spill]] %s9192_s17  ;;  %p7687_p7 = scmp.ge.s32.totalorder %s9063_s28, 1 }
  0x14   : > { %s14432_s18 = scalar_select %p9194_p5, 1, 0 }
  0x15   : > { %s14434_s19 = scalar_select %p9198_p6, 1, 0 }
  0x16   : > { %14433 = sst [smem:[#allocation23_spill]] %s14432_s18  ;;  %p346_p8 = scmp.lt.s32.totalorder %s9063_s28, 3 }
  0x17   : > { %14435 = sst [smem:[#allocation24_spill]] %s14434_s19  ;;  %p14361_p9 = scmp.eq.s32.totalorder %s9177_s29, 0 }
  0x18   : > { %p9205_p10 = pnand %p7687_p7, %p346_p8  ;;  %s9065_s21 = smov [#allocation8]  }
  0x19   : > { %s375_s22 = sshll.u32 %s9065_s21, 4  ;;  %s9066_s24 = smov [#allocation5]   ;;  %s9211_s22 = int_to_ptr.vmem [resolvable:$true] %s375_s22 }
  0x1a   : > { %s14436_s20 = scalar_select %p9205_p10, 1, 0 }
  0x1b   : > { %p8390_p11 = pneg %p9205_p10  ;;  %s359_s30 = sshll.u32 %s9066_s24, 4  ;;  %s9219_s30 = int_to_ptr.vmem [resolvable:$true] %s359_s30 }
  0x1c   : > { %s9067_s15 = smov [#allocation10]   ;;  %s8877_s21 = scalar_lea.hbm %s14346_s4, 2304 }
  0x1d   : > { %p9215_p12 = pnand %p14361_p9, %p8390_p11  ;;  %s9221_s16 = sshll.u32 %s9067_s15, 4  ;;  %s398_s16 = int_to_ptr.vmem [resolvable:$true] %s9221_s16 }
  0x1e   : > { %p8878_p13 = scmp.ne.s32.totalorder %s14346_s4, %s8877_s21  ;;  %p8884_p3 = scmp.lt.u32.totalorder %s8877_s21, %s14346_s4 }
  0x1f   : > { %p9231_p0 = pneg %p9215_p12 }
  0x21   : > { %p8880_p1 = pnand %p9231_p0, %p8878_p13 }
  0x23   : > { %p8881_p2 = pneg %p8880_p1 }
  0x25   : > { %p8886_p4 = pnand %p8884_p3, %p8881_p2 }
  0x27   : > { %8889 = shalt.err (!%p8886_p4)
}
  0x28   : > { %s8890_s27 = scalar_lea.vmem %s9211_s22, 2304  ;;  %p8898_p9 = scmp.lt.s32.totalorder %s9211_s22, %s9211_s22 }
  0x29   : > { %p8891_p7 = scmp.ne.s32.totalorder %s9211_s22, %s8890_s27  ;;  %p8899_p6 = scmp.lt.s32.totalorder %s8890_s27, %s8890_s27 }
  0x2b   : > { %p8893_p8 = pnand %p8891_p7, %p9231_p0  ;;  %p8900_p13 = por %p8899_p6, %p8898_p9 }
  0x2d   : > { %p8894_p11 = pneg %p8893_p8 }
  0x2f   : > { %p8901_p1 = pnand %p8900_p13, %p8894_p11 }
  0x31   : > { %8904 = shalt.err (!%p8901_p1)
}
  0x32   : > { %s9068_s14 = smov 192   ;;  %s9069_s17 = smov 12  }
  0x33   : > { %8396 = dma.hbm_to_vmem [thread:$0]  (!%p9215_p12), %s14346_s4, 2304, %s9211_s22, [#allocation9], %s9068_s14, %s9068_s14, %s9069_s17  }
  0x34   : > { %s8905_s27 = scalar_lea.hbm %s14343_s1, 48 }
  0x35   : > { %p8906_p6 = scmp.ne.s32.totalorder %s14343_s1, %s8905_s27  ;;  %p8912_p3 = scmp.lt.u32.totalorder %s8905_s27, %s14343_s1 }
  0x37   : > { %p8908_p9 = pnand %p8906_p6, %p9231_p0 }
  0x39   : > { %p8909_p2 = pneg %p8908_p9 }
  0x3b   : > { %p8914_p4 = pnand %p8912_p3, %p8909_p2 }
  0x3d   : > { %8917 = shalt.err (!%p8914_p4)
}
  0x3e   : > { %s8918_s22 = scalar_lea.vmem %s9219_s30, 48  ;;  %s8925_s13 = scalar_lea.vmem %s9219_s30, 64 }
  0x3f   : > { %p8919_p7 = scmp.ne.s32.totalorder %s9219_s30, %s8918_s22  ;;  %p8926_p13 = scmp.lt.s32.totalorder %s9219_s30, %s9219_s30 }
  0x40   : > { %p8927_p1 = scmp.lt.s32.totalorder %s8925_s13, %s8918_s22 }
  0x41   : > { %p8921_p8 = pnand %p8919_p7, %p9231_p0 }
  0x42   : > { %p8928_p6 = por %p8927_p1, %p8926_p13 }
  0x43   : > { %p8922_p11 = pneg %p8921_p8 }
  0x45   : > { %p8929_p9 = pnand %p8928_p6, %p8922_p11 }
  0x47   : > { %8932 = shalt.err (!%p8929_p9)
}
  0x48   : > { %8393 = dma.hbm_to_vmem [thread:$0]  (!%p9215_p12), %s14343_s1, 48, %s9219_s30, [#allocation6]  }
  0x49   : > { %s8933_s21 = scalar_lea.hbm %s14350_s8, 2304 }
  0x4a   : > { %p8934_p2 = scmp.ne.s32.totalorder %s14350_s8, %s8933_s21  ;;  %p8940_p7 = scmp.lt.u32.totalorder %s8933_s21, %s14350_s8 }
  0x4c   : > { %p8936_p3 = pnand %p8934_p2, %p9231_p0 }
  0x4e   : > { %p8937_p4 = pneg %p8936_p3 }
  0x50   : > { %p8942_p8 = pnand %p8940_p7, %p8937_p4 }
  0x52   : > { %8945 = shalt.err (!%p8942_p8)
}
  0x53   : > { %s8946_s13 = scalar_lea.vmem %s398_s16, 2304  ;;  %p8954_p6 = scmp.lt.s32.totalorder %s398_s16, %s398_s16 }
  0x54   : > { %p8947_p11 = scmp.ne.s32.totalorder %s398_s16, %s8946_s13  ;;  %p8955_p9 = scmp.lt.s32.totalorder %s8946_s13, %s8946_s13 }
  0x56   : > { %p8949_p13 = pnand %p8947_p11, %p9231_p0  ;;  %p8956_p5 = por %p8955_p9, %p8954_p6 }
  0x58   : > { %p8950_p1 = pneg %p8949_p13 }
  0x5a   : > { %p8957_p10 = pnand %p8956_p5, %p8950_p1 }
  0x5c   : > { %8960 = shalt.err (!%p8957_p10)
}
  0x5d   : > { %8399 = dma.hbm_to_vmem [thread:$0]  (!%p9215_p12), %s14350_s8, 2304, %s398_s16, [#allocation9], %s9068_s14, %s9068_s14, %s9069_s17  }
  0x5e   : > { %p14439_p2 = scmp.ne.s32.totalorder %s14436_s20, 0 }
  0x60   : > { %430 = sbr.rel (%p14439_p2) target bundleno = 5302 (0x14b6), region = 68 }
  0x67   : > { %p14440_p0 = scmp.eq.s32.totalorder %s9177_s29, 0 }
  0x69   : > { %9034 = dma.done.wait (%p14440_p0), [#allocation6], 48   ;;  %p14441_p3 = pmov %p14440_p0 }
  0x6a   : > { %p14442_p5 = pmov %p14440_p0 }
  0x6b   : > { %9036 = vsyncadd (%p14441_p3), [#allocation6], 4294967248 }
  0x6c   : > { %9038 = dma.done.wait (%p14442_p5), [#allocation9], 4608   ;;  %p14443_p10 = pmov %p14440_p0 }
  0x6d   : > { %p487_p4 = scmp.lt.s32.totalorder %s9177_s29, 1  ;;  %s9070_s17 = smov 90   ;;  %vm731_vm0 = vcmask 736256   ;;  %vm631_vm1 = vcmask 891904   ;;  %v14369_v28 = vmov 0   ;;  %vm566_vm2 = vcmask 1039360  }
  0x6e   : > { %9040 = vsyncadd (%p14443_p10), [#allocation9], 4294962688  ;;  %s9071_s28 = smov 109   ;;  %s9072_s18 = smov 127   ;;  %1233 = vmatprep.mubr.bf16.mxu1 %v14369_v28  ;;  %8466 = vset.pattern.permute.xlu1 %v14369_v28  ;;  %vm662_vm3 = vcmask 883712   ;;  %vm589_vm4 = vcmask 1031168  }
  0x6f   : > { %s488_s25 = scalar_select %p487_p4, %s9177_s29, 1  ;;  %8465 = vset.pattern.permute.xlu0 %v14369_v28  ;;  %vm685_vm5 = vcmask 752640   ;;  %vm612_vm6 = vcmask 900096   ;;  %vm708_vm7 = vcmask 744448   ;;  %vm1006_vm8 = vcmask 154624  }
  0x70   : > { %s9073_s19 = smov 108   ;;  %s9074_s21 = smov 126   ;;  %vm1115_vm9 = vcmask 261120   ;;  %vm9081_vm10 = vmmov 0  }
  0x71   : > { %s8371_s23 = smul.u32 80, %s488_s25  ;;  %s9075_s24 = smov 92  }
  0x72   : > { %s9076_s15 = smov 110   ;;  %s9077_s27 = smov 91  }
  0x73   : > { %s9316_s14 = scalar_lea.vmem %s14342_s0, %s8371_s23  ;;  %s9078_s22 = smov 19  }
  0x74   : > { %v9319_v0 = vld [vmem:[%s9316_s14 + $0xc] ss:$20 sps:$4 sm:$0xff]   ;;  %v9322_v1 = vld [vmem:[%s9316_s14 + $0x4] ss:$20 sps:$4 sm:$0xff]   ;;  %v9332_v3 = vld [vmem:[%s9316_s14 + $0x8] ss:$20 sps:$4 sm:$0xff]  }
  0x75   : > { %719 = vrot.lane.b32.xlu1 %v9319_v0, %s9070_s17  ;;  %v9327_v2 = vld [vmem:[%s9316_s14 + $0x2c] ss:$20 sps:$4 sm:$0xff]   ;;  %715 = vrot.lane.b32.xlu0 %v9322_v1, %s9070_s17  ;;  %v9337_v4 = vld [vmem:[%s9316_s14 + $0x34] ss:$20 sps:$4 sm:$0xff]   ;;  %s9082_s13 = smov [#allocation11]  }
  0x76   : > { %v9342_v5 = vld [vmem:[%s9316_s14 + $0x30] ss:$20 sps:$4 sm:$0xff]   ;;  %v9353_v6 = vld [vmem:[%s9316_s14] ss:$20 sps:$4 sm:$0xff]   ;;  %v9368_v7 = vld [vmem:[%s9316_s14 + $0x28] ss:$20 sps:$4 sm:$0xff]  }
  0x77   : > { %v9383_v8 = vld [vmem:[%s9316_s14 + $0x10] ss:$20 sps:$4 sm:$0xff]   ;;  %v9396_v9 = vld [vmem:[%s9316_s14 + $0x38] ss:$20 sps:$4 sm:$0xff]   ;;  %s8965_s30 = sshll.u32 %s9082_s13, 4  ;;  %s8966_s30 = int_to_ptr.vmem [resolvable:$false] %s8965_s30 }
  0x78   : > { %s8967_s12 = scalar_lea.vmem %s8966_s30, 1536 }
  0x79   : > { %723 = vrot.lane.b32.xlu1 %v9327_v2, %s9070_s17  ;;  %717 = vrot.lane.b32.xlu0 %v9332_v3, %s9070_s17 }
  0x7d   : > { %727 = vrot.lane.b32.xlu1 %v9337_v4, %s9070_s17  ;;  %725 = vrot.lane.b32.xlu0 %v9342_v5, %s9070_s17 }
  0x81   : > { %623 = vrot.lane.b32.xlu1 %v9319_v0, %s9071_s28  ;;  %621 = vrot.lane.b32.xlu0 %v9332_v3, %s9071_s28 }
  0x85   : > { %554 = vrot.lane.b32.xlu1 %v9332_v3, %s9072_s18  ;;  %552 = vrot.lane.b32.xlu0 %v9322_v1, %s9072_s18 }
  0x89   : > { %550 = vrot.lane.b32.xlu1 %v9353_v6, %s9072_s18  ;;  %556 = vrot.lane.b32.xlu0 %v9319_v0, %s9072_s18 }
  0x8d   : > { %629 = vrot.lane.b32.xlu1 %v9337_v4, %s9071_s28  ;;  %627 = vrot.lane.b32.xlu0 %v9342_v5, %s9071_s28 }
  0x91   : > { %562 = vrot.lane.b32.xlu1 %v9342_v5, %s9072_s18  ;;  %560 = vrot.lane.b32.xlu0 %v9327_v2, %s9072_s18 }
  0x95   : > { %558 = vrot.lane.b32.xlu1 %v9368_v7, %s9072_s18  ;;  %564 = vrot.lane.b32.xlu0 %v9337_v4, %s9072_s18 }
  0x99   : > { %650 = vrot.lane.b32.xlu1 %v9319_v0, %s9073_s19  ;;  %648 = vrot.lane.b32.xlu0 %v9332_v3, %s9073_s19 }
  0x9d   : > { %575 = vrot.lane.b32.xlu1 %v9322_v1, %s9074_s21  ;;  %652 = vrot.lane.b32.xlu0 %v9383_v8, %s9073_s19 }
  0xa1   : > { %579 = vrot.lane.b32.xlu1 %v9319_v0, %s9074_s21  ;;  %577 = vrot.lane.b32.xlu0 %v9332_v3, %s9074_s21 }
  0xa5   : > { %656 = vrot.lane.b32.xlu1 %v9342_v5, %s9073_s19  ;;  %573 = vrot.lane.b32.xlu0 %v9353_v6, %s9074_s21 }
  0xa9   : > { %660 = vrot.lane.b32.xlu1 %v9396_v9, %s9073_s19  ;;  %658 = vrot.lane.b32.xlu0 %v9337_v4, %s9073_s19 }
  0xad   : > { %585 = vrot.lane.b32.xlu1 %v9342_v5, %s9074_s21  ;;  %583 = vrot.lane.b32.xlu0 %v9327_v2, %s9074_s21 }
  0xb1   : > { %581 = vrot.lane.b32.xlu1 %v9368_v7, %s9074_s21  ;;  %587 = vrot.lane.b32.xlu0 %v9337_v4, %s9074_s21 }
  0xb5   : > { %673 = vrot.lane.b32.xlu1 %v9319_v0, %s9075_s24  ;;  %671 = vrot.lane.b32.xlu0 %v9332_v3, %s9075_s24 }
  0xb9   : > { %598 = vrot.lane.b32.xlu1 %v9322_v1, %s9076_s15  ;;  %675 = vrot.lane.b32.xlu0 %v9383_v8, %s9075_s24 }
  0xbd   : > { %602 = vrot.lane.b32.xlu1 %v9319_v0, %s9076_s15  ;;  %600 = vrot.lane.b32.xlu0 %v9332_v3, %s9076_s15 }
  0xc1   : > { %679 = vrot.lane.b32.xlu1 %v9342_v5, %s9075_s24  ;;  %596 = vrot.lane.b32.xlu0 %v9353_v6, %s9076_s15 }
  0xc5   : > { %683 = vrot.lane.b32.xlu1 %v9396_v9, %s9075_s24  ;;  %681 = vrot.lane.b32.xlu0 %v9337_v4, %s9075_s24 }
  0xc9   : > { %608 = vrot.lane.b32.xlu1 %v9342_v5, %s9076_s15  ;;  %606 = vrot.lane.b32.xlu0 %v9327_v2, %s9076_s15 }
  0xcd   : > { %604 = vrot.lane.b32.xlu1 %v9368_v7, %s9076_s15  ;;  %610 = vrot.lane.b32.xlu0 %v9337_v4, %s9076_s15 }
  0xd1   : > { %696 = vrot.lane.b32.xlu1 %v9319_v0, %s9077_s27  ;;  %694 = vrot.lane.b32.xlu0 %v9332_v3, %s9077_s27 }
  0xd5   : > { %619 = vrot.lane.b32.xlu1 %v9322_v1, %s9071_s28  ;;  %698 = vrot.lane.b32.xlu0 %v9383_v8, %s9077_s27 }
  0xd9   : > { %704 = vrot.lane.b32.xlu1 %v9337_v4, %s9077_s27  ;;  %702 = vrot.lane.b32.xlu0 %v9342_v5, %s9077_s27 }
  0xdd   : > { %625 = vrot.lane.b32.xlu1 %v9327_v2, %s9071_s28  ;;  %706 = vrot.lane.b32.xlu0 %v9396_v9, %s9077_s27 }
  0xe1   : > { %654 = vrot.lane.b32.xlu1 %v9327_v2, %s9073_s19  ;;  %646 = vrot.lane.b32.xlu0 %v9322_v1, %s9073_s19 }
  0xe5   : > { %677 = vrot.lane.b32.xlu1 %v9327_v2, %s9075_s24  ;;  %669 = vrot.lane.b32.xlu0 %v9322_v1, %s9075_s24 }
  0xe7   : > { %v9464_v10 = vpop.permute.xlu1 %719  ;;  %v716_v11 = vpop.permute.xlu0 %715 }
  0xe9   : > { %866 = vrot.lane.b32.xlu1 %v9332_v3, %s9078_s22  ;;  %692 = vrot.lane.b32.xlu0 %v9322_v1, %s9077_s27 }
  0xeb   : > { %v724_v12 = vpop.permute.xlu1 %723  ;;  %v718_v13 = vpop.permute.xlu0 %717 }
  0xec   : > { %v732_v16 = vsel %vm731_vm0, %v716_v11, %v718_v13  ;;  %v733_v17 = vsel %vm731_vm0, %v718_v13, %v9464_v10 }
  0xed   : > { %990 = vrot.lane.b32.xlu1 %v716_v11, %s9078_s22  ;;  %864 = vrot.lane.b32.xlu0 %v9322_v1, %s9078_s22 }
  0xef   : > { %v9473_v14 = vpop.permute.xlu1 %727  ;;  %v726_v15 = vpop.permute.xlu0 %725 }
  0xf0   : > { %v736_v22 = vsel %vm731_vm0, %v726_v15, %v9473_v14  ;;  %v735_v23 = vsel %vm731_vm0, %v724_v12, %v726_v15 }
  0xf1   : > { %992 = vrot.lane.b32.xlu1 %v732_v16, %s9078_s22  ;;  %994 = vrot.lane.b32.xlu0 %v733_v17, %s9078_s22 }
  0xf3   : > { %v624_v18 = vpop.permute.xlu1 %623  ;;  %v9480_v19 = vpop.permute.xlu0 %621 }
  0xf4   : > { %v633_v31 = vsel %vm631_vm1, %v9480_v19, %v624_v18 }
  0xf5   : > { %862 = vrot.lane.b32.xlu1 %v9353_v6, %s9078_s22  ;;  %700 = vrot.lane.b32.xlu0 %v9327_v2, %s9077_s27 }
  0xf7   : > { %v555_v20 = vpop.permute.xlu1 %554  ;;  %v553_v21 = vpop.permute.xlu0 %552 }
  0xf8   : > { %v568_v36 = vsel %vm566_vm2, %v553_v21, %v555_v20 }
  0xf9   : > { %1002 = vrot.lane.b32.xlu1 %v736_v22, %s9078_s22  ;;  %1000 = vrot.lane.b32.xlu0 %v735_v23, %s9078_s22 }
  0xfb   : > { %v551_v24 = vpop.permute.xlu1 %550  ;;  %v557_v25 = vpop.permute.xlu0 %556 }
  0xfc   : > { %v567_v39 = vsel %vm566_vm2, %v551_v24, %v553_v21  ;;  %v569_v40 = vsel %vm566_vm2, %v555_v20, %v557_v25 }
  0xfd   : > { %998 = vrot.lane.b32.xlu1 %v724_v12, %s9078_s22  ;;  %721 = vrot.lane.b32.xlu0 %v9383_v8, %s9070_s17 }
  0xff   : > { %v630_v26 = vpop.permute.xlu1 %629  ;;  %v9494_v27 = vpop.permute.xlu0 %627 }
 0x100   : > { %v635_v43 = vsel %vm631_vm1, %v9494_v27, %v630_v26 }
 0x101   : > { %874 = vrot.lane.b32.xlu1 %v9342_v5, %s9078_s22  ;;  %872 = vrot.lane.b32.xlu0 %v9327_v2, %s9078_s22 }
 0x103   : > { %v563_v29 = vpop.permute.xlu1 %562  ;;  %v561_v30 = vpop.permute.xlu0 %560 }
 0x104   : > { %v571_v46 = vsel %vm566_vm2, %v561_v30, %v563_v29 }
 0x105   : > { %930 = vrot.lane.b32.xlu1 %v633_v31, %s9078_s22  ;;  %870 = vrot.lane.b32.xlu0 %v9368_v7, %s9078_s22 }
 0x107   : > { %v559_v32 = vpop.permute.xlu1 %558  ;;  %v565_v33 = vpop.permute.xlu0 %564 }
 0x108   : > { %v570_v49 = vsel %vm566_vm2, %v559_v32, %v561_v30  ;;  %v572_v50 = vsel %vm566_vm2, %v563_v29, %v565_v33 }
 0x109   : > { %729 = vrot.lane.b32.xlu1 %v9396_v9, %s9070_s17  ;;  %932 = vrot.lane.b32.xlu0 %v624_v18, %s9078_s22 }
 0x10b   : > { %v651_v34 = vpop.permute.xlu1 %650  ;;  %v9511_v35 = vpop.permute.xlu0 %648 }
 0x10c   : > { %v664_v54 = vsel %vm662_vm3, %v9511_v35, %v651_v34 }
 0x10d   : > { %880 = vrot.lane.b32.xlu1 %v568_v36, %s9078_s22  ;;  %868 = vrot.lane.b32.xlu0 %v9319_v0, %s9078_s22 }
 0x10f   : > { %v576_v37 = vpop.permute.xlu1 %575  ;;  %v653_v38 = vpop.permute.xlu0 %652 }
 0x110   : > { %v665_v53 = vsel %vm662_vm3, %v651_v34, %v653_v38 }
 0x111   : > { %878 = vrot.lane.b32.xlu1 %v567_v39, %s9078_s22  ;;  %882 = vrot.lane.b32.xlu0 %v569_v40, %s9078_s22 }
 0x113   : > { %v9521_v41 = vpop.permute.xlu1 %579  ;;  %v578_v42 = vpop.permute.xlu0 %577 }
 0x114   : > { %v591_v57 = vsel %vm589_vm4, %v576_v37, %v578_v42  ;;  %v592_v61 = vsel %vm589_vm4, %v578_v42, %v9521_v41 }
 0x115   : > { %940 = vrot.lane.b32.xlu1 %v630_v26, %s9078_s22  ;;  %938 = vrot.lane.b32.xlu0 %v635_v43, %s9078_s22 }
 0x117   : > { %v9527_v44 = vpop.permute.xlu1 %656  ;;  %v574_v45 = vpop.permute.xlu0 %573 }
 0x118   : > { %v590_v60 = vsel %vm589_vm4, %v574_v45, %v576_v37 }
 0x119   : > { %888 = vrot.lane.b32.xlu1 %v571_v46, %s9078_s22  ;;  %876 = vrot.lane.b32.xlu0 %v9337_v4, %s9078_s22  ;;  %v9607_v46 = vld [vmem:[%s14344_s2 + $0x4] ss:$12 sps:$4 sm:$0xff]  }
 0x11a   : > { %1160 = vmatprep.mubr.bf16.mxu0 %v9607_v46 }
 0x11b   : > { %v661_v47 = vpop.permute.xlu1 %660  ;;  %v659_v48 = vpop.permute.xlu0 %658 }
 0x11c   : > { %v668_v0 = vsel %vm662_vm3, %v659_v48, %v661_v47  ;;  %v667_v1 = vsel %vm662_vm3, %v9527_v44, %v659_v48 }
 0x11d   : > { %886 = vrot.lane.b32.xlu1 %v570_v49, %s9078_s22  ;;  %890 = vrot.lane.b32.xlu0 %v572_v50, %s9078_s22 }
 0x11f   : > { %v586_v51 = vpop.permute.xlu1 %585  ;;  %v584_v52 = vpop.permute.xlu0 %583 }
 0x120   : > { %v594_v4 = vsel %vm589_vm4, %v584_v52, %v586_v51 }
 0x121   : > { %948 = vrot.lane.b32.xlu1 %v665_v53, %s9078_s22  ;;  %946 = vrot.lane.b32.xlu0 %v664_v54, %s9078_s22 }
 0x123   : > { %v582_v55 = vpop.permute.xlu1 %581  ;;  %v588_v56 = vpop.permute.xlu0 %587 }
 0x124   : > { %v593_v7 = vsel %vm589_vm4, %v582_v55, %v584_v52  ;;  %v595_v8 = vsel %vm589_vm4, %v586_v51, %v588_v56 }
 0x125   : > { %896 = vrot.lane.b32.xlu1 %v591_v57, %s9078_s22  ;;  %884 = vrot.lane.b32.xlu0 %v557_v25, %s9078_s22 }
 0x127   : > { %v674_v58 = vpop.permute.xlu1 %673  ;;  %v9545_v59 = vpop.permute.xlu0 %671 }
 0x128   : > { %v687_v13 = vsel %vm685_vm5, %v9545_v59, %v674_v58 }
 0x129   : > { %894 = vrot.lane.b32.xlu1 %v590_v60, %s9078_s22  ;;  %898 = vrot.lane.b32.xlu0 %v592_v61, %s9078_s22 }
 0x12b   : > { %v599_v62 = vpop.permute.xlu1 %598  ;;  %v676_v63 = vpop.permute.xlu0 %675 }
 0x12c   : > { %v688_v11 = vsel %vm685_vm5, %v674_v58, %v676_v63 }
 0x12d   : > { %956 = vrot.lane.b32.xlu1 %v668_v0, %s9078_s22  ;;  %954 = vrot.lane.b32.xlu0 %v667_v1, %s9078_s22 }
 0x12f   : > { %v603_v2 = vpop.permute.xlu1 %602  ;;  %v601_v3 = vpop.permute.xlu0 %600 }
 0x130   : > { %v614_v17 = vsel %vm612_vm6, %v599_v62, %v601_v3  ;;  %v615_v22 = vsel %vm612_vm6, %v601_v3, %v603_v2 }
 0x131   : > { %904 = vrot.lane.b32.xlu1 %v594_v4, %s9078_s22  ;;  %892 = vrot.lane.b32.xlu0 %v565_v33, %s9078_s22 }
 0x133   : > { %v9560_v5 = vpop.permute.xlu1 %679  ;;  %v597_v6 = vpop.permute.xlu0 %596 }
 0x134   : > { %v613_v20 = vsel %vm612_vm6, %v597_v6, %v599_v62  ;;  %v9651_v6 = vld [vmem:[%s14344_s2 + $0x8] ss:$12 sps:$4 sm:$0xff]  }
 0x135   : > { %902 = vrot.lane.b32.xlu1 %v593_v7, %s9078_s22  ;;  %906 = vrot.lane.b32.xlu0 %v595_v8, %s9078_s22 }
 0x137   : > { %v684_v9 = vpop.permute.xlu1 %683  ;;  %v682_v12 = vpop.permute.xlu0 %681 }
 0x138   : > { %v691_v24 = vsel %vm685_vm5, %v682_v12, %v684_v9  ;;  %v690_v26 = vsel %vm685_vm5, %v9560_v5, %v682_v12 }
 0x139   : > { %964 = vrot.lane.b32.xlu1 %v688_v11, %s9078_s22  ;;  %962 = vrot.lane.b32.xlu0 %v687_v13, %s9078_s22  ;;  %v9670_v13 = vld [vmem:[%s14344_s2 + $0x20] ss:$12 sps:$4 sm:$0xff]  }
 0x13b   : > { %v609_v15 = vpop.permute.xlu1 %608  ;;  %v607_v16 = vpop.permute.xlu0 %606 }
 0x13c   : > { %v617_v31 = vsel %vm612_vm6, %v607_v16, %v609_v15 }
 0x13d   : > { %912 = vrot.lane.b32.xlu1 %v614_v17, %s9078_s22  ;;  %900 = vrot.lane.b32.xlu0 %v9521_v41, %s9078_s22 }
 0x13f   : > { %v605_v18 = vpop.permute.xlu1 %604  ;;  %v611_v21 = vpop.permute.xlu0 %610 }
 0x140   : > { %v616_v33 = vsel %vm612_vm6, %v605_v18, %v607_v16  ;;  %v618_v36 = vsel %vm612_vm6, %v609_v15, %v611_v21 }
 0x141   : > { %910 = vrot.lane.b32.xlu1 %v613_v20, %s9078_s22  ;;  %914 = vrot.lane.b32.xlu0 %v615_v22, %s9078_s22 }
 0x143   : > { %v697_v23 = vpop.permute.xlu1 %696  ;;  %v9580_v25 = vpop.permute.xlu0 %694 }
 0x144   : > { %v710_v40 = vsel %vm708_vm7, %v9580_v25, %v697_v23 }
 0x145   : > { %972 = vrot.lane.b32.xlu1 %v691_v24, %s9078_s22  ;;  %970 = vrot.lane.b32.xlu0 %v690_v26, %s9078_s22  ;;  %v754_v24 = vld [vmem:[%s14345_s3] sm:$0xff] }
 0x147   : > { %v620_v29 = vpop.permute.xlu1 %619  ;;  %v699_v30 = vpop.permute.xlu0 %698 }
 0x148   : > { %v711_v38 = vsel %vm708_vm7, %v697_v23, %v699_v30  ;;  %v632_v43 = vsel %vm631_vm1, %v620_v29, %v9480_v19 }
 0x149   : > { %920 = vrot.lane.b32.xlu1 %v617_v31, %s9078_s22  ;;  %908 = vrot.lane.b32.xlu0 %v588_v56, %s9078_s22  ;;  %v757_v31 = vld [vmem:[%s14345_s3 + $0x18] sm:$0xff] }
 0x14b   : > { %v705_v32 = vpop.permute.xlu1 %704  ;;  %v9590_v34 = vpop.permute.xlu0 %702 }
 0x14c   : > { %v713_v48 = vsel %vm708_vm7, %v9590_v34, %v705_v32 }
 0x14d   : > { %918 = vrot.lane.b32.xlu1 %v616_v33, %s9078_s22  ;;  %922 = vrot.lane.b32.xlu0 %v618_v36, %s9078_s22 }
 0x14f   : > { %v626_v37 = vpop.permute.xlu1 %625  ;;  %v707_v39 = vpop.permute.xlu0 %706 }
 0x150   : > { %v714_v50 = vsel %vm708_vm7, %v705_v32, %v707_v39  ;;  %v634_v53 = vsel %vm631_vm1, %v626_v37, %v9494_v27 }
 0x151   : > { %980 = vrot.lane.b32.xlu1 %v711_v38, %s9078_s22  ;;  %978 = vrot.lane.b32.xlu0 %v710_v40, %s9078_s22  ;;  %v9717_v38 = vld [vmem:[%s14344_s2 + $0x50] ss:$12 sps:$4 sm:$0xff]  }
 0x153   : > { %v655_v41 = vpop.permute.xlu1 %654  ;;  %v647_v42 = vpop.permute.xlu0 %646 }
 0x154   : > { %v663_v58 = vsel %vm662_vm3, %v647_v42, %v9511_v35  ;;  %v666_v63 = vsel %vm662_vm3, %v655_v41, %v9527_v44 }
 0x155   : > { %928 = vrot.lane.b32.xlu1 %v632_v43, %s9078_s22  ;;  %916 = vrot.lane.b32.xlu0 %v603_v2, %s9078_s22 }
 0x157   : > { %v678_v45 = vpop.permute.xlu1 %677  ;;  %v670_v47 = vpop.permute.xlu0 %669 }
 0x158   : > { %v686_v1 = vsel %vm685_vm5, %v670_v47, %v9545_v59  ;;  %v689_v59 = vsel %vm685_vm5, %v678_v45, %v9560_v5 }
 0x159   : > { %986 = vrot.lane.b32.xlu1 %v713_v48, %s9078_s22  ;;  %926 = vrot.lane.b32.xlu0 %v620_v29, %s9078_s22  ;;  %v756_v29 = vld [vmem:[%s14345_s3 + $0x10] sm:$0xff] }
 0x15b   : > { %v9614_v19 = vpop.permute.xlu1 %866  ;;  %v693_v49 = vpop.permute.xlu0 %692 }
 0x15c   : > { %v709_v9 = vsel %vm708_vm7, %v693_v49, %v9580_v25  ;;  %v9697_v25 = vld [vmem:[%s14344_s2 + $0x38] ss:$12 sps:$4 sm:$0xff]  }
 0x15d   : > { %924 = vrot.lane.b32.xlu1 %v611_v21, %s9078_s22  ;;  %988 = vrot.lane.b32.xlu0 %v714_v50, %s9078_s22 }
 0x15f   : > { %v991_v51 = vpop.permute.xlu1 %990  ;;  %v865_v52 = vpop.permute.xlu0 %864 }
 0x160   : > { %v1008_v54 = vsel %vm1006_vm8, %v865_v52, %v9614_v19 }
 0x161   : > { %934 = vrot.lane.b32.xlu1 %v626_v37, %s9078_s22  ;;  %936 = vrot.lane.b32.xlu0 %v634_v53, %s9078_s22 }
 0x162   : > { %1128 = vmatprep.subr.bf16.mxu0 %v1008_v54 }
 0x163   : > { %v993_v55 = vpop.permute.xlu1 %992  ;;  %v9625_v56 = vpop.permute.xlu0 %994 }
 0x164   : > { %v1055_v57 = vsel %vm1006_vm8, %v991_v51, %v993_v55  ;;  %v1056_v27 = vsel %vm1006_vm8, %v993_v55, %v9625_v56 }
 0x165   : > { %942 = vrot.lane.b32.xlu1 %v647_v42, %s9078_s22  ;;  %944 = vrot.lane.b32.xlu0 %v663_v58, %s9078_s22 }
 0x166   : > { %1201 = vmatprep.subr.bf16.mxu1 %v1056_v27 }
 0x167   : > { %1202 = vmatpush1.bf16.msra.mxu1 %v1055_v57  ;;  %v863_v60 = vpop.permute.xlu1 %862  ;;  %v701_v61 = vpop.permute.xlu0 %700 }
 0x168   : > { %v1007_v62 = vsel %vm1006_vm8, %v863_v60, %v865_v52  ;;  %v712_v15 = vsel %vm708_vm7, %v701_v61, %v9590_v34 }
 0x169   : > { %950 = vrot.lane.b32.xlu1 %v655_v41, %s9078_s22  ;;  %1129 = vmatpush1.bf16.msra.mxu0 %v1007_v62 }
 0x16a   : > { %952 = vrot.lane.b32.xlu0 %v666_v63, %s9078_s22 }
 0x16b   : > { %v9639_v35 = vpop.permute.xlu1 %1002  ;;  %v1001_v0 = vpop.permute.xlu0 %1000 }
 0x16c   : > { %v1059_v2 = vsel %vm1006_vm8, %v1001_v0, %v9639_v35 }
 0x16d   : > { %958 = vrot.lane.b32.xlu1 %v670_v47, %s9078_s22  ;;  %1203 = vmatprep.subr.bf16.mxu1 %v1059_v2 }
 0x16e   : > { %960 = vrot.lane.b32.xlu0 %v686_v1, %s9078_s22 }
 0x16f   : > { %v999_v44 = vpop.permute.xlu1 %998  ;;  %v722_v3 = vpop.permute.xlu0 %721 }
 0x170   : > { %v1058_v4 = vsel %vm1006_vm8, %v999_v44, %v1001_v0  ;;  %v734_v21 = vsel %vm731_vm0, %v9464_v10, %v722_v3 }
 0x171   : > { %966 = vrot.lane.b32.xlu1 %v678_v45, %s9078_s22  ;;  %1204 = vmatpush1.bf16.msra.mxu1 %v1058_v4 }
 0x172   : > { %968 = vrot.lane.b32.xlu0 %v689_v59, %s9078_s22 }
 0x173   : > { %v875_v7 = vpop.permute.xlu1 %874  ;;  %v873_v8 = vpop.permute.xlu0 %872 }
 0x174   : > { %7719 = vmatmul.mubr.msk.bf16.vlgmr.msra.gmra.mrb[0].mxu1 %vm1115_vm9, %v9651_v6  ;;  %v1011_v11 = vsel %vm1006_vm8, %v873_v8, %v875_v7 }
 0x175   : > { %974 = vrot.lane.b32.xlu1 %v693_v49, %s9078_s22  ;;  %1243 = vmatprep.mubr.bf16.mxu1 %v14369_v28 }
 0x176   : > { %976 = vrot.lane.b32.xlu0 %v709_v9, %s9078_s22  ;;  %1130 = vmatprep.subr.bf16.mxu0 %v1011_v11 }
 0x177   : > { %v9665_v5 = vpop.permute.xlu1 %930  ;;  %v871_v12 = vpop.permute.xlu0 %870 }
 0x178   : > { %v1010_v16 = vsel %vm1006_vm8, %v871_v12, %v873_v8 }
 0x179   : > { %982 = vrot.lane.b32.xlu1 %v701_v61, %s9078_s22  ;;  %1131 = vmatpush1.bf16.msra.mxu0 %v1010_v16 }
 0x17a   : > { %984 = vrot.lane.b32.xlu0 %v712_v15, %s9078_s22 }
 0x17b   : > { %v730_v17 = vpop.permute.xlu1 %729  ;;  %v933_v18 = vpop.permute.xlu0 %932 }
 0x17c   : > { %v737_v20 = vsel %vm731_vm0, %v9473_v14, %v730_v17  ;;  %7720 = vmatmul.mubr.msk.bf16.gmra.mrb[4].mxu1 %vm1115_vm9, %v9670_v13  ;;  %v1033_v22 = vsel %vm1006_vm8, %v9665_v5, %v933_v18  ;;  %v755_v14 = vld [vmem:[%s14345_s3 + $0x8] sm:$0xff] }
 0x17d   : > { %1004 = vrot.lane.b32.xlu1 %v737_v20, %s9078_s22  ;;  %1253 = vmatprep.mubr.bf16.mxu1 %v14369_v28 }
 0x17e   : > { %996 = vrot.lane.b32.xlu0 %v734_v21, %s9078_s22  ;;  %7846 = vmatprep.subr.bf16.mxu1 %v1033_v22 }
 0x17f   : > { %v881_v23 = vpop.permute.xlu1 %880  ;;  %v869_v10 = vpop.permute.xlu0 %868 }
 0x180   : > { %v1009_v26 = vsel %vm1006_vm8, %v9614_v19, %v869_v10 }
 0x181   : > { %769 = vperm.xlu1 %8466, %v755_v14   ;;  %7847 = vmatpush3.bf16.msra.mxu1 %v1009_v26 }
 0x182   : > { %764 = vperm.xlu0 %8465, %v754_v24  }
 0x183   : > { %v879_v30 = vpop.permute.xlu1 %878  ;;  %v883_v32 = vpop.permute.xlu0 %882 }
 0x184   : > { %v1013_v33 = vsel %vm1006_vm8, %v879_v30, %v881_v23  ;;  %7721 = vmatmul.mubr.msk.bf16.gmra.mrb[8].mxu1 %vm1115_vm9, %v9697_v25  ;;  %v1014_v34 = vsel %vm1006_vm8, %v881_v23, %v883_v32 }
 0x185   : > { %1263 = vmatprep.mubr.bf16.mxu1 %v14369_v28  ;;  %774 = vperm.xlu1 %8466, %v756_v29  }
 0x186   : > { %1132 = vmatprep.subr.bf16.mxu0 %v1014_v34  ;;  %779 = vperm.xlu0 %8465, %v757_v31  }
 0x187   : > { %1133 = vmatpush1.bf16.msra.mxu0 %v1013_v33  ;;  %v941_v36 = vpop.permute.xlu1 %940  ;;  %v9712_v37 = vpop.permute.xlu0 %938 }
 0x188   : > { %v1036_v39 = vsel %vm1006_vm8, %v9712_v37, %v941_v36 }
 0x189   : > { %7848 = vmatprep.subr.bf16.mxu1 %v1036_v39  ;;  %8473 = vrot.lane.b32.xlu1 %v14369_v28, %s9074_s21 }
 0x18a   : > { %8468 = vrot.lane.b32.xlu0 %v14369_v28, %s9072_s18 }
 0x18b   : > { %v889_v40 = vpop.permute.xlu1 %888  ;;  %v877_v41 = vpop.permute.xlu0 %876 }
 0x18c   : > { %7722 = vmatmul.mubr.msk.bf16.gmra.mrb[12].mxu1 %vm1115_vm9, %v9717_v38  ;;  %v1012_v42 = vsel %vm1006_vm8, %v875_v7, %v877_v41 }
 0x18d   : > { %1306 = vmatprep.mubr.bf16.mxu1 %v9607_v46  ;;  %7849 = vmatpush3.bf16.msra.mxu1 %v1012_v42 }
 0x18e   : > { %8483 = vrot.lane.b32.xlu1 %v14369_v28, %s9073_s19  ;;  %8478 = vrot.lane.b32.xlu0 %v14369_v28, %s9076_s15 }
 0x18f   : > { %v887_v43 = vpop.permute.xlu1 %886  ;;  %v891_v45 = vpop.permute.xlu0 %890 }
 0x190   : > { %v1016_v47 = vsel %vm1006_vm8, %v887_v43, %v889_v40  ;;  %v1017_v48 = vsel %vm1006_vm8, %v889_v40, %v891_v45 }
 0x191   : > { %1134 = vmatprep.subr.bf16.mxu0 %v1017_v48 }
 0x192   : > { %1135 = vmatpush1.bf16.msra.mxu0 %v1016_v47  ;;  %8493 = vrot.lane.b32.xlu1 %v14369_v28, %s9077_s27 }
 0x193   : > { %v949_v19 = vpop.permute.xlu1 %948  ;;  %v9727_v49 = vpop.permute.xlu0 %946  ;;  %8488 = vrot.lane.b32.xlu0 %v14369_v28, %s9075_s24 }
 0x194   : > { %v1039_v50 = vsel %vm1006_vm8, %v9727_v49, %v949_v19  ;;  %v9771_v19 = vld [vmem:[%s14344_s2 + $0x1c] ss:$12 sps:$4 sm:$0xff]  }
 0x195   : > { %7850 = vmatprep.subr.bf16.mxu1 %v1039_v50 }
 0x196   : > { %8498 = vrot.lane.b32.xlu1 %v14369_v28, %s9078_s22 }
 0x197   : > { %v897_v51 = vpop.permute.xlu1 %896  ;;  %v885_v52 = vpop.permute.xlu0 %884 }
 0x198   : > { %v1015_v46 = vsel %vm1006_vm8, %v883_v32, %v885_v52 }
 0x199   : > { %7851 = vmatpush3.bf16.msra.mxu1 %v1015_v46 }
 0x19a   : > { %8503 = vrot.lane.b32.xlu1 %v14369_v28, %s9070_s17 }
 0x19b   : > { %v895_v53 = vpop.permute.xlu1 %894  ;;  %v899_v54 = vpop.permute.xlu0 %898 }
 0x19c   : > { %v1019_v55 = vsel %vm1006_vm8, %v895_v53, %v897_v51  ;;  %v1020_v57 = vsel %vm1006_vm8, %v897_v51, %v899_v54 }
 0x19d   : > { %1136 = vmatprep.subr.bf16.mxu0 %v1020_v57  ;;  %v8810_v57 = vld [vmem:[%s14344_s2 + $0x18] ss:$12 sps:$4 sm:$0xff]  }
 0x19e   : > { %1137 = vmatpush1.bf16.msra.mxu0 %v1019_v55 }
 0x19f   : > { %v957_v58 = vpop.permute.xlu1 %956  ;;  %v9734_v27 = vpop.permute.xlu0 %954 }
 0x1a0   : > { %v1042_v60 = vsel %vm1006_vm8, %v9734_v27, %v957_v58  ;;  %v8811_v58 = vld [vmem:[%s14344_s2 + $0x34] ss:$12 sps:$4 sm:$0xff]  }
 0x1a1   : > { %7852 = vmatprep.subr.bf16.mxu1 %v1042_v60 }
 0x1a3   : > { %v905_v61 = vpop.permute.xlu1 %904  ;;  %v893_v62 = vpop.permute.xlu0 %892 }
 0x1a4   : > { %v1018_v63 = vsel %vm1006_vm8, %v891_v45, %v893_v62 }
 0x1a5   : > { %7853 = vmatpush3.bf16.msra.mxu1 %v1018_v63 }
 0x1a7   : > { %v903_v0 = vpop.permute.xlu1 %902  ;;  %v907_v1 = vpop.permute.xlu0 %906 }
 0x1a8   : > { %v1022_v2 = vsel %vm1006_vm8, %v903_v0, %v905_v61  ;;  %v1023_v44 = vsel %vm1006_vm8, %v905_v61, %v907_v1 }
 0x1a9   : > { %1138 = vmatprep.subr.bf16.mxu0 %v1023_v44  ;;  %v8814_v44 = vld [vmem:[%s14344_s2 + $0x4c] ss:$12 sps:$4 sm:$0xff]  }
 0x1aa   : > { %1139 = vmatpush1.bf16.msra.mxu0 %v1022_v2  ;;  %v8813_v2 = vld [vmem:[%s14344_s2 + $0x30] ss:$12 sps:$4 sm:$0xff]  }
 0x1ab   : > { %v965_v3 = vpop.permute.xlu1 %964  ;;  %v9741_v4 = vpop.permute.xlu0 %962 }
 0x1ac   : > { %v1045_v59 = vsel %vm1006_vm8, %v9741_v4, %v965_v3 }
 0x1ad   : > { %7854 = vmatprep.subr.bf16.mxu1 %v1045_v59 }
 0x1af   : > { %v913_v7 = vpop.permute.xlu1 %912  ;;  %v901_v8 = vpop.permute.xlu0 %900 }
 0x1b0   : > { %v1021_v9 = vsel %vm1006_vm8, %v899_v54, %v901_v8 }
 0x1b1   : > { %7855 = vmatpush3.bf16.msra.mxu1 %v1021_v9 }
 0x1b3   : > { %v911_v11 = vpop.permute.xlu1 %910  ;;  %v915_v12 = vpop.permute.xlu0 %914 }
 0x1b4   : > { %v1025_v15 = vsel %vm1006_vm8, %v911_v11, %v913_v7  ;;  %v1026_v16 = vsel %vm1006_vm8, %v913_v7, %v915_v12 }
 0x1b5   : > { %1140 = vmatprep.subr.bf16.mxu0 %v1026_v16 }
 0x1b6   : > { %1141 = vmatpush1.bf16.msra.mxu0 %v1025_v15 }
 0x1b7   : > { %v973_v17 = vpop.permute.xlu1 %972  ;;  %v9748_v18 = vpop.permute.xlu0 %970 }
 0x1b8   : > { %v1048_v20 = vsel %vm1006_vm8, %v9748_v18, %v973_v17 }
 0x1b9   : > { %7856 = vmatprep.subr.bf16.mxu1 %v1048_v20 }
 0x1bb   : > { %v921_v21 = vpop.permute.xlu1 %920  ;;  %v909_v22 = vpop.permute.xlu0 %908 }
 0x1bc   : > { %v1024_v14 = vsel %vm1006_vm8, %v907_v1, %v909_v22 }
 0x1bd   : > { %7857 = vmatpush3.bf16.msra.mxu1 %v1024_v14 }
 0x1bf   : > { %v919_v23 = vpop.permute.xlu1 %918  ;;  %v923_v24 = vpop.permute.xlu0 %922 }
 0x1c0   : > { %v1028_v10 = vsel %vm1006_vm8, %v919_v23, %v921_v21  ;;  %v1029_v26 = vsel %vm1006_vm8, %v921_v21, %v923_v24 }
 0x1c1   : > { %1142 = vmatprep.subr.bf16.mxu0 %v1029_v26 }
 0x1c2   : > { %1143 = vmatpush1.bf16.msra.mxu0 %v1028_v10  ;;  %v493_v10 = vld [vmem:[#allocation5] sm:$0x7] }
 0x1c3   : > { %v981_v29 = vpop.permute.xlu1 %980  ;;  %v9755_v30 = vpop.permute.xlu0 %978 }
 0x1c4   : > { %v1051_v31 = vsel %vm1006_vm8, %v9755_v30, %v981_v29 }
 0x1c5   : > { %7858 = vmatprep.subr.bf16.mxu1 %v1051_v31 }
 0x1c7   : > { %v929_v32 = vpop.permute.xlu1 %928  ;;  %v917_v33 = vpop.permute.xlu0 %916 }
 0x1c8   : > { %v1032_v34 = vsel %vm1006_vm8, %v929_v32, %v9665_v5  ;;  %v1027_v36 = vsel %vm1006_vm8, %v915_v12, %v917_v33  ;;  %v8805_v5 = vld [vmem:[%s14344_s2] ss:$12 sps:$4 sm:$0xff]   ;;  %v8816_v12 = vld [vmem:[%s14344_s2 + $0x48] ss:$12 sps:$4 sm:$0xff]  }
 0x1c9   : > { %1144 = vmatprep.subr.bf16.mxu0 %v1032_v34  ;;  %7859 = vmatpush3.bf16.msra.mxu1 %v1027_v36 }
 0x1cb   : > { %v987_v39 = vpop.permute.xlu1 %986  ;;  %v927_v40 = vpop.permute.xlu0 %926 }
 0x1cc   : > { %v1031_v41 = vsel %vm1006_vm8, %v927_v40, %v929_v32 }
 0x1cd   : > { %1145 = vmatpush1.bf16.msra.mxu0 %v1031_v41 }
 0x1cf   : > { %v925_v42 = vpop.permute.xlu1 %924  ;;  %v989_v43 = vpop.permute.xlu0 %988 }
 0x1d0   : > { %v1030_v45 = vsel %vm1006_vm8, %v923_v24, %v925_v42  ;;  %v1054_v47 = vsel %vm1006_vm8, %v987_v39, %v989_v43 }
 0x1d1   : > { %7860 = vmatprep.subr.bf16.mxu1 %v1054_v47 }
 0x1d2   : > { %7861 = vmatpush3.bf16.msra.mxu1 %v1030_v45 }
 0x1d3   : > { %v935_v48 = vpop.permute.xlu1 %934  ;;  %v937_v50 = vpop.permute.xlu0 %936 }
 0x1d4   : > { %v1035_v51 = vsel %vm1006_vm8, %v937_v50, %v9712_v37  ;;  %v1034_v52 = vsel %vm1006_vm8, %v935_v48, %v937_v50 }
 0x1d5   : > { %1146 = vmatprep.subr.bf16.mxu0 %v1035_v51  ;;  %1307 = vmatmul.mubr.bf16.vlgmr.msra.gmra.mrb[16].mxu1 %v8805_v5 }
 0x1d6   : > { %1147 = vmatpush1.bf16.msra.mxu0 %v1034_v52  ;;  %1314 = vmatprep.mubr.bf16.mxu1 %v9771_v19 }
 0x1d7   : > { %v943_v46 = vpop.permute.xlu1 %942  ;;  %v945_v53 = vpop.permute.xlu0 %944 }
 0x1d8   : > { %v1038_v54 = vsel %vm1006_vm8, %v945_v53, %v9727_v49  ;;  %v1037_v55 = vsel %vm1006_vm8, %v943_v46, %v945_v53 }
 0x1d9   : > { %1148 = vmatprep.subr.bf16.mxu0 %v1038_v54 }
 0x1da   : > { %1149 = vmatpush1.bf16.msra.mxu0 %v1037_v55 }
 0x1db   : > { %v951_v37 = vpop.permute.xlu1 %950 }
 0x1dc   : > { %v953_v60 = vpop.permute.xlu0 %952 }
 0x1dd   : > { %v1041_v61 = vsel %vm1006_vm8, %v953_v60, %v9734_v27  ;;  %v1040_v62 = vsel %vm1006_vm8, %v951_v37, %v953_v60  ;;  %1315 = vmatmul.mubr.bf16.gmra.mrb[20].mxu1 %v8810_v57 }
 0x1de   : > { %1150 = vmatprep.subr.bf16.mxu0 %v1041_v61  ;;  %1322 = vmatprep.mubr.bf16.mxu1 %v8811_v58 }
 0x1df   : > { %1151 = vmatpush1.bf16.msra.mxu0 %v1040_v62  ;;  %v959_v49 = vpop.permute.xlu1 %958 }
 0x1e0   : > { %v961_v63 = vpop.permute.xlu0 %960 }
 0x1e1   : > { %v1044_v0 = vsel %vm1006_vm8, %v961_v63, %v9741_v4  ;;  %v1043_v1 = vsel %vm1006_vm8, %v959_v49, %v961_v63 }
 0x1e2   : > { %1152 = vmatprep.subr.bf16.mxu0 %v1044_v0 }
 0x1e3   : > { %1153 = vmatpush1.bf16.msra.mxu0 %v1043_v1  ;;  %v967_v27 = vpop.permute.xlu1 %966 }
 0x1e4   : > { %v969_v3 = vpop.permute.xlu0 %968 }
 0x1e5   : > { %v1047_v59 = vsel %vm1006_vm8, %v969_v3, %v9748_v18  ;;  %v1046_v7 = vsel %vm1006_vm8, %v967_v27, %v969_v3  ;;  %1323 = vmatmul.mubr.bf16.gmra.mrb[24].mxu1 %v8813_v2 }
 0x1e6   : > { %1154 = vmatprep.subr.bf16.mxu0 %v1047_v59  ;;  %1330 = vmatprep.mubr.bf16.mxu1 %v8814_v44 }
 0x1e7   : > { %1155 = vmatpush1.bf16.msra.mxu0 %v1046_v7  ;;  %v975_v4 = vpop.permute.xlu1 %974 }
 0x1e8   : > { %v977_v8 = vpop.permute.xlu0 %976 }
 0x1e9   : > { %v1050_v9 = vsel %vm1006_vm8, %v977_v8, %v9755_v30  ;;  %v1049_v11 = vsel %vm1006_vm8, %v975_v4, %v977_v8 }
 0x1ea   : > { %1156 = vmatprep.subr.bf16.mxu0 %v1050_v9 }
 0x1eb   : > { %1157 = vmatpush1.bf16.msra.mxu0 %v1049_v11  ;;  %v983_v15 = vpop.permute.xlu1 %982 }
 0x1ec   : > { %v985_v16 = vpop.permute.xlu0 %984 }
 0x1ed   : > { %v1053_v17 = vsel %vm1006_vm8, %v985_v16, %v987_v39  ;;  %v1052_v18 = vsel %vm1006_vm8, %v983_v15, %v985_v16  ;;  %1331 = vmatmul.mubr.bf16.gmra.mrb[28].mxu1 %v8816_v12 }
 0x1ee   : > { %1158 = vmatprep.subr.bf16.mxu0 %v1053_v17  ;;  %8145 = vmatprep.mubr.msk.bf16.mxu1 %vm1115_vm9, %v9651_v6  ;;  %v1429_v6 = vlaneseq }
 0x1ef   : > { %1159 = vmatpush1.bf16.msra.mxu0 %v1052_v18  ;;  %v1005_v21 = vpop.permute.xlu1 %1004 }
 0x1f0   : > { %v997_v20 = vpop.permute.xlu0 %996  ;;  %v1060_v14 = vsel %vm1006_vm8, %v9639_v35, %v1005_v21 }
 0x1f1   : > { %v1057_v22 = vsel %vm1006_vm8, %v9625_v56, %v997_v20 }
 0x1f2   : > { %1161 = vmatmul.mubr.bf16.vlgmr.msra.gmra.mrb[0].mxu0 %v8805_v5  ;;  %8141 = vmatprep.subr.bf16.mxu1 %v1057_v22 }
 0x1f3   : > { %8142 = vmatpush3.bf16.msra.mxu1 %v1057_v22  ;;  %1170 = vmatprep.mubr.bf16.mxu0 %v9771_v19 }
 0x1f4   : > { %8143 = vmatprep.subr.bf16.mxu1 %v1060_v14 }
 0x1f7   : > { %8144 = vmatpush3.bf16.msra.mxu1 %v1060_v14 }
 0x1fa   : > { %1171 = vmatmul.mubr.bf16.gmra.mrb[4].mxu0 %v8810_v57  ;;  %8146 = vmatmul.mubr.msk.bf16.vlgmr.msra.gmra.mrb[32].mxu1 %vm1115_vm9, %v9670_v13 }
 0x1fb   : > { %1180 = vmatprep.mubr.bf16.mxu0 %v8811_v58  ;;  %8149 = vmatprep.mubr.msk.bf16.mxu1 %vm1115_vm9, %v9697_v25 }
 0x200   : > { %v770_v63 = vpop.permute.xlu1 %769 }
 0x202   : > { %1181 = vmatmul.mubr.bf16.gmra.mrb[8].mxu0 %v8813_v2  ;;  %8150 = vmatmul.mubr.msk.bf16.gmra.mrb[36].mxu1 %vm1115_vm9, %v9717_v38  ;;  %v9838_v38 = vshrl.u32 %v1429_v6, 7  ;;  %v765_v2 = vpop.permute.xlu0 %764 }
 0x203   : > { %1190 = vmatprep.mubr.bf16.mxu0 %v8814_v44 }
 0x204   : > { %v1439_v23 = vsub.s32 2, %v9838_v38  ;;  %v1431_v7 = vsub.s32 0, %v9838_v38  ;;  %v1435_v9 = vsub.s32 1, %v9838_v38  ;;  %v775_v18 = vpop.permute.xlu1 %774 }
 0x206   : > { %v9849_v29 = vrot.slane %v493_v10, %v1439_v23  ;;  %v9883_v22 = vrot.slane %v493_v10, %v1431_v7  ;;  %v780_v14 = vpop.permute.xlu0 %779 }
 0x208   : > { %14444 = vst [vmem:[#allocation25_spill] sm:$0xff] %v9849_v29  ;;  %14450 = vst [vmem:[#allocation31_spill] sm:$0xff] %v9883_v22 }
 0x20a   : > { %1191 = vmatmul.mubr.bf16.gmra.mrb[12].mxu0 %v8816_v12 }
 0x247   : > { %v1235_v56 = vpop.f32.mrb[0].mxu1 }
 0x248   : > { %v1237_v35 = vpop.f32.mrb[1].mxu1 }
 0x249   : > { %v9830_v13 = vpop.f32.mrb[2].mxu1 }
 0x24a   : > { %v9832_v25 = vpop.f32.mrb[3].mxu1 }
 0x24f   : > { %v9845_v24 = vpop.f32.mrb[4].mxu1 }
 0x250   : > { %v9847_v26 = vpop.f32.mrb[5].mxu1 }
 0x251   : > { %v9851_v30 = vpop.f32.mrb[6].mxu1 }
 0x252   : > { %v9853_v31 = vpop.f32.mrb[7].mxu1 }
 0x257   : > { %v9855_v32 = vpop.f32.mrb[8].mxu1 }
 0x258   : > { %v9857_v33 = vpop.f32.mrb[9].mxu1 }
 0x259   : > { %v9859_v34 = vpop.f32.mrb[10].mxu1 }
 0x25a   : > { %14445 = vst [vmem:[#allocation26_spill] sm:$0xff] %v9859_v34  ;;  %v9861_v36 = vpop.f32.mrb[11].mxu1 }
 0x25b   : > { %14446 = vst [vmem:[#allocation27_spill] sm:$0xff] %v9861_v36 }
 0x25f   : > { %v9863_v39 = vpop.f32.mrb[12].mxu1 }
 0x260   : > { %v9865_v40 = vpop.f32.mrb[13].mxu1 }
 0x261   : > { %v9867_v41 = vpop.f32.mrb[14].mxu1 }
 0x262   : > { %14447 = vst [vmem:[#allocation28_spill] sm:$0xff] %v9867_v41  ;;  %v9869_v42 = vpop.f32.mrb[15].mxu1 }
 0x263   : > { %14448 = vst [vmem:[#allocation29_spill] sm:$0xff] %v9869_v42 }
 0x2a8   : > { %v7862_v43 = vpop.f32.mrb[16].mxu1 }
 0x2a9   : > { %v7863_v45 = vpop.f32.mrb[17].mxu1 }
 0x2aa   : > { %v7864_v47 = vadd.f32 %v7863_v45, %v7862_v43  ;;  %v7865_v5 = vpop.f32.mrb[18].mxu1  ;;  %v9886_v43 = vrot.slane %v493_v10, %v1435_v9 }
 0x2ab   : > { %v7866_v48 = vpop.f32.mrb[19].mxu1 }
 0x2ac   : > { %v9871_v19 = vadd.f32 %v7866_v48, %v7865_v5  ;;  %14451 = vst [vmem:[#allocation32_spill] sm:$0xff] %v9886_v43 }
 0x2b0   : > { %v7868_v50 = vpop.f32.mrb[20].mxu1 }
 0x2b1   : > { %v7869_v51 = vpop.f32.mrb[21].mxu1 }
 0x2b2   : > { %v7870_v52 = vadd.f32 %v7869_v51, %v7868_v50  ;;  %v7871_v46 = vpop.f32.mrb[22].mxu1  ;;  %v1309_v51 = vadd.f32 %v7864_v47, %v765_v2 }
 0x2b3   : > { %v7872_v53 = vpop.f32.mrb[23].mxu1 }
 0x2b4   : > { %v7873_v54 = vadd.f32 %v7872_v53, %v7871_v46  ;;  %v1317_v38 = vadd.f32 %v7870_v52, %v775_v18 }
 0x2b8   : > { %v7874_v55 = vpop.f32.mrb[24].mxu1 }
 0x2b9   : > { %v7875_v57 = vpop.f32.mrb[25].mxu1 }
 0x2ba   : > { %v9873_v37 = vadd.f32 %v7875_v57, %v7874_v55  ;;  %v7877_v58 = vpop.f32.mrb[26].mxu1 }
 0x2bb   : > { %v7878_v60 = vpop.f32.mrb[27].mxu1 }
 0x2bc   : > { %v9875_v61 = vadd.f32 %v7878_v60, %v7877_v58 }
 0x2c0   : > { %v7880_v62 = vpop.f32.mrb[28].mxu1 }
 0x2c1   : > { %v7881_v49 = vpop.f32.mrb[29].mxu1 }
 0x2c2   : > { %v9877_v0 = vadd.f32 %v7881_v49, %v7880_v62  ;;  %v7883_v1 = vpop.f32.mrb[30].mxu1 }
 0x2c3   : > { %v7884_v27 = vpop.f32.mrb[31].mxu1 }
 0x2c4   : > { %v9879_v3 = vadd.f32 %v7884_v27, %v7883_v1  ;;  %v1312_v27 = vadd.f32 %v9871_v19, %v770_v63 }
 0x2c5   : > { %v1162_v44 = vpop.f32.mrb[0].mxu0 }
 0x2c6   : > { %14449 = vst [vmem:[#allocation30_spill] sm:$0xff] %v9879_v3  ;;  %v1163_v59 = vadd.f32 %v1162_v44, %v765_v2  ;;  %v1164_v4 = vpop.f32.mrb[1].mxu0 }
 0x2c7   : > { %v1165_v8 = vadd.f32 %v1164_v4, %v765_v2  ;;  %v1166_v11 = vpop.f32.mrb[2].mxu0 }
 0x2c8   : > { %v1236_v12 = vadd.f32 %v1235_v56, %v1163_v59  ;;  %v1167_v15 = vadd.f32 %v1166_v11, %v770_v63  ;;  %v1168_v16 = vpop.f32.mrb[3].mxu0 }
 0x2c9   : > { %v1238_v17 = vadd.f32 %v1237_v35, %v1165_v8  ;;  %v1169_v20 = vadd.f32 %v1168_v16, %v770_v63  ;;  %v1320_v35 = vadd.f32 %v7873_v54, %v780_v14 }
 0x2ca   : > { %v1404_v21 = vmax.f32 %v1236_v12, 0.0  ;;  %v1240_v6 = vadd.f32 %v9830_v13, %v1167_v15 }
 0x2cb   : > { %v1405_v23 = vmax.f32 %v1238_v17, 0.0  ;;  %v1242_v45 = vadd.f32 %v9832_v25, %v1169_v20 }
 0x2cc   : > { %v1407_v5 = vmax.f32 %v1240_v6, 0.0  ;;  %v1444_v46 = vmul.f32 %v9883_v22, %v1404_v21 }
 0x2cd   : > { %v1408_v48 = vmax.f32 %v1242_v45, 0.0  ;;  %v1172_v56 = vpop.f32.mrb[4].mxu0  ;;  %v8147_v50 = vpop.f32.mrb[32].mxu1  ;;  %v1445_v10 = vmul.f32 %v9886_v43, %v1405_v23 }
 0x2ce   : > { %v1447_v53 = vmul.f32 %v9883_v22, %v1407_v5  ;;  %v1173_v55 = vadd.f32 %v1172_v56, %v775_v18  ;;  %v1382_v57 = vadd.f32 %v8147_v50, %v1317_v38  ;;  %v1174_v58 = vpop.f32.mrb[5].mxu0  ;;  %v1373_v13 = vpop.f32.mrb[33].mxu1 }
 0x2cf   : > { %v1448_v60 = vmul.f32 %v9886_v43, %v1408_v48  ;;  %v1175_v25 = vadd.f32 %v1174_v58, %v775_v18  ;;  %v1374_v62 = vadd.f32 %v1373_v13, %v1309_v51  ;;  %v1176_v52 = vpop.f32.mrb[6].mxu0  ;;  %v8148_v49 = vpop.f32.mrb[34].mxu1 }
 0x2d0   : > { %v1468_v1 = vpack.c.bf16 %v1447_v53, %v1444_v46  ;;  %v1246_v47 = vadd.f32 %v9845_v24, %v1173_v55  ;;  %v1177_v54 = vadd.f32 %v1176_v52, %v780_v14  ;;  %v1178_v2 = vpop.f32.mrb[7].mxu0  ;;  %v1376_v44 = vpop.f32.mrb[35].mxu1  ;;  %v1412_v7 = vmax.f32 %v1382_v57, 0.0 }
 0x2d1   : > { %v1469_v59 = vpack.c.bf16 %v1448_v60, %v1445_v10  ;;  %v1248_v4 = vadd.f32 %v9847_v26, %v1175_v25  ;;  %v1385_v8 = vadd.f32 %v8148_v49, %v1320_v35  ;;  %v1179_v12 = vadd.f32 %v1178_v2, %v780_v14  ;;  %v9950_v50 = vpop.permute.xlu1 %8473  ;;  %v9960_v35 = vpop.permute.xlu0 %8468 }
 0x2d2   : > { %v1410_v9 = vmax.f32 %v1246_v47, 0.0  ;;  %v1250_v11 = vadd.f32 %v9851_v30, %v1177_v54  ;;  %1548 = vrot.lane.b32.xlu0 %v1468_v1, %s9074_s21  ;;  %1526 = vrot.lane.b32.xlu1 %v1468_v1, %s9072_s18  ;;  %v1406_v15 = vmax.f32 %v1374_v62, 0.0  ;;  %v1377_v16 = vadd.f32 %v1376_v44, %v1312_v27 }
 0x2d3   : > { %v1415_v24 = vmax.f32 %v1385_v8, 0.0  ;;  %v1411_v17 = vmax.f32 %v1248_v4, 0.0  ;;  %v1252_v19 = vadd.f32 %v9853_v31, %v1179_v12  ;;  %v1452_v63 = vmul.f32 %v9849_v29, %v1412_v7 }
 0x2d4   : > { %v1413_v18 = vmax.f32 %v1250_v11, 0.0  ;;  %v1409_v20 = vmax.f32 %v1377_v16, 0.0  ;;  %v1450_v21 = vmul.f32 %v9883_v22, %v1410_v9  ;;  %v1446_v6 = vmul.f32 %v9849_v29, %v1406_v15 }
 0x2d5   : > { %v1455_v26 = vmul.f32 %v9849_v29, %v1415_v24  ;;  %v1414_v14 = vmax.f32 %v1252_v19, 0.0  ;;  %v1451_v31 = vmul.f32 %v9886_v43, %v1411_v17  ;;  %v9954_v51 = vpop.permute.xlu1 %8483  ;;  %v9966_v53 = vpop.permute.xlu0 %8478  ;;  %v8470_v13 = vunpack.i.l.bf16 %v9960_v35 }
 0x2d6   : > { %v1453_v30 = vmul.f32 %v9883_v22, %v1413_v18  ;;  %1590 = vrot.lane.b32.xlu0 %v1468_v1, %s9071_s28  ;;  %1570 = vrot.lane.b32.xlu1 %v1468_v1, %s9076_s15  ;;  %v1449_v45 = vmul.f32 %v9849_v29, %v1409_v20  ;;  %v8475_v49 = vunpack.i.l.bf16 %v9950_v50  ;;  %v8480_v44 = vunpack.i.l.bf16 %v9966_v53 }
 0x2d7   : > { %v1473_v23 = vpack.c.bf16 %v1455_v26, %v1452_v63  ;;  %v1454_v38 = vmul.f32 %v9886_v43, %v1414_v14 }
 0x2d8   : > { %v1471_v5 = vpack.c.bf16 %v1453_v30, %v1450_v21  ;;  %v1470_v48 = vpack.c.bf16 %v1449_v45, %v1446_v6 }
 0x2d9   : > { %v1472_v56 = vpack.c.bf16 %v1454_v38, %v1451_v31  ;;  %v9962_v46 = vpop.permute.xlu1 %8493  ;;  %v9972_v57 = vpop.permute.xlu0 %8488 }
 0x2da   : > { %1614 = vrot.lane.b32.xlu0 %v1468_v1, %s9073_s19  ;;  %1636 = vrot.lane.b32.xlu1 %v1468_v1, %s9075_s24 }
 0x2dd   : > { %v9968_v55 = vpop.permute.xlu1 %8498 }
 0x2de   : > { %1658 = vrot.lane.b32.xlu0 %v1468_v1, %s9077_s27  ;;  %1758 = vrot.lane.b32.xlu1 %v1468_v1, %s9078_s22  ;;  %v8500_v17 = vunpack.i.l.bf16 %v9968_v55 }
 0x2e1   : > { %v9974_v58 = vpop.permute.xlu1 %8503 }
 0x2e2   : > { %1528 = vrot.lane.b32.xlu0 %v1469_v59, %s9072_s18  ;;  %1680 = vrot.lane.b32.xlu1 %v1468_v1, %s9070_s17 }
 0x2e6   : > { %1572 = vrot.lane.b32.xlu0 %v1469_v59, %s9076_s15  ;;  %1550 = vrot.lane.b32.xlu1 %v1469_v59, %s9074_s21 }
 0x2ea   : > { %1638 = vrot.lane.b32.xlu0 %v1469_v59, %s9075_s24  ;;  %1592 = vrot.lane.b32.xlu1 %v1469_v59, %s9071_s28 }
 0x2ee   : > { %1760 = vrot.lane.b32.xlu0 %v1469_v59, %s9078_s22  ;;  %1616 = vrot.lane.b32.xlu1 %v1469_v59, %s9073_s19 }
 0x2f2   : > { %1682 = vrot.lane.b32.xlu0 %v1469_v59, %s9070_s17  ;;  %1660 = vrot.lane.b32.xlu1 %v1469_v59, %s9077_s27 }
 0x2f6   : > { %1556 = vrot.lane.b32.xlu0 %v1471_v5, %s9074_s21  ;;  %1534 = vrot.lane.b32.xlu1 %v1471_v5, %s9072_s18 }
 0x2fa   : > { %1622 = vrot.lane.b32.xlu0 %v1471_v5, %s9073_s19  ;;  %1578 = vrot.lane.b32.xlu1 %v1471_v5, %s9076_s15 }
 0x2fe   : > { %1666 = vrot.lane.b32.xlu0 %v1471_v5, %s9077_s27  ;;  %1596 = vrot.lane.b32.xlu1 %v1471_v5, %s9071_s28 }
 0x302   : > { %1766 = vrot.lane.b32.xlu0 %v1471_v5, %s9078_s22  ;;  %1644 = vrot.lane.b32.xlu1 %v1471_v5, %s9075_s24 }
 0x306   : > { %1688 = vrot.lane.b32.xlu0 %v1471_v5, %s9070_s17  ;;  %1558 = vrot.lane.b32.xlu1 %v1472_v56, %s9074_s21 }
 0x30a   : > { %1536 = vrot.lane.b32.xlu0 %v1472_v56, %s9072_s18  ;;  %1624 = vrot.lane.b32.xlu1 %v1472_v56, %s9073_s19 }
 0x30e   : > { %1580 = vrot.lane.b32.xlu0 %v1472_v56, %s9076_s15  ;;  %1668 = vrot.lane.b32.xlu1 %v1472_v56, %s9077_s27 }
 0x312   : > { %1598 = vrot.lane.b32.xlu0 %v1472_v56, %s9071_s28  ;;  %1768 = vrot.lane.b32.xlu1 %v1472_v56, %s9078_s22 }
 0x316   : > { %1646 = vrot.lane.b32.xlu0 %v1472_v56, %s9075_s24  ;;  %1690 = vrot.lane.b32.xlu1 %v1472_v56, %s9070_s17 }
 0x31a   : > { %1560 = vrot.lane.b32.xlu0 %v1473_v23, %s9074_s21  ;;  %1538 = vrot.lane.b32.xlu1 %v1473_v23, %s9072_s18 }
 0x31e   : > { %1626 = vrot.lane.b32.xlu0 %v1473_v23, %s9073_s19  ;;  %1582 = vrot.lane.b32.xlu1 %v1473_v23, %s9076_s15 }
 0x322   : > { %1670 = vrot.lane.b32.xlu0 %v1473_v23, %s9077_s27  ;;  %1600 = vrot.lane.b32.xlu1 %v1473_v23, %s9071_s28 }
 0x326   : > { %1692 = vrot.lane.b32.xlu0 %v1473_v23, %s9070_s17  ;;  %1648 = vrot.lane.b32.xlu1 %v1473_v23, %s9075_s24 }
 0x32a   : > { %1770 = vrot.lane.b32.xlu0 %v1473_v23, %s9078_s22  ;;  %1530 = vrot.lane.b32.xlu1 %v1470_v48, %s9072_s18 }
 0x32e   : > { %1552 = vrot.lane.b32.xlu0 %v1470_v48, %s9074_s21  ;;  %1574 = vrot.lane.b32.xlu1 %v1470_v48, %s9076_s15 }
 0x332   : > { %1594 = vrot.lane.b32.xlu0 %v1470_v48, %s9071_s28  ;;  %1640 = vrot.lane.b32.xlu1 %v1470_v48, %s9075_s24 }
 0x336   : > { %1618 = vrot.lane.b32.xlu0 %v1470_v48, %s9073_s19  ;;  %1684 = vrot.lane.b32.xlu1 %v1470_v48, %s9070_s17 }
 0x33a   : > { %1662 = vrot.lane.b32.xlu0 %v1470_v48, %s9077_s27  ;;  %1762 = vrot.lane.b32.xlu1 %v1470_v48, %s9078_s22  ;;  %v8471_v48 = vunpack.i.h.bf16 %v9960_v35 }
 0x344   : > { %v1549_v10 = vpop.permute.xlu0 %1548  ;;  %v1527_v60 = vpop.permute.xlu1 %1526 }
 0x345   : > { %v1540_v25 = vsel %vm566_vm2, %v8470_v13, %v1527_v60  ;;  %v1562_v27 = vsel %vm589_vm4, %v8475_v49, %v1549_v10  ;;  %v8481_v49 = vunpack.i.h.bf16 %v9966_v53 }
 0x346   : > { %1772 = vrot.lane.b32.xlu0 %v1540_v25, %s9078_s22 }
 0x348   : > { %v1591_v62 = vpop.permute.xlu0 %1590  ;;  %v1571_v52 = vpop.permute.xlu1 %1570 }
 0x349   : > { %1820 = vrot.lane.b32.xlu1 %v1591_v62, %s9078_s22  ;;  %v1584_v4 = vsel %vm612_vm6, %v8480_v44, %v1571_v52 }
 0x34c   : > { %v1615_v1 = vpop.permute.xlu0 %1614  ;;  %v9981_v47 = vpop.permute.xlu1 %1636 }
 0x34d   : > { %1836 = vrot.lane.b32.xlu1 %v1615_v1, %s9078_s22 }
 0x350   : > { %v9984_v54 = vpop.permute.xlu0 %1658  ;;  %v1759_v2 = vpop.permute.xlu1 %1758 }
 0x351   : > { %1788 = vrot.lane.b32.xlu1 %v1562_v27, %s9078_s22  ;;  %v1900_v21 = vsel %vm1006_vm8, %v8500_v17, %v1759_v2 }
 0x354   : > { %v9989_v59 = vpop.permute.xlu0 %1528  ;;  %v9991_v7 = vpop.permute.xlu1 %1680 }
 0x355   : > { %1804 = vrot.lane.b32.xlu1 %v1584_v4, %s9078_s22  ;;  %v1541_v8 = vsel %vm566_vm2, %v1527_v60, %v9989_v59  ;;  %v8476_v60 = vunpack.i.h.bf16 %v9950_v50 }
 0x356   : > { %1774 = vrot.lane.b32.xlu0 %v1541_v8, %s9078_s22  ;;  %v8501_v8 = vunpack.i.h.bf16 %v9968_v55 }
 0x358   : > { %v9998_v9 = vpop.permute.xlu0 %1572  ;;  %v10000_v11 = vpop.permute.xlu1 %1550 }
 0x359   : > { %v1563_v12 = vsel %vm589_vm4, %v1549_v10, %v10000_v11  ;;  %v1585_v16 = vsel %vm612_vm6, %v1571_v52, %v9998_v9 }
 0x35a   : > { %1790 = vrot.lane.b32.xlu1 %v1563_v12, %s9078_s22 }
 0x35c   : > { %v10005_v15 = vpop.permute.xlu0 %1638  ;;  %v10007_v24 = vpop.permute.xlu1 %1592 }
 0x35d   : > { %v1602_v26 = vsel %vm631_vm1, %v1591_v62, %v10007_v24 }
 0x35e   : > { %1806 = vrot.lane.b32.xlu1 %v1585_v16, %s9078_s22 }
 0x360   : > { %v10013_v18 = vpop.permute.xlu0 %1760  ;;  %v10015_v19 = vpop.permute.xlu1 %1616 }
 0x361   : > { %v1901_v63 = vsel %vm1006_vm8, %v1759_v2, %v10013_v18  ;;  %v1630_v20 = vsel %vm662_vm3, %v1615_v1, %v10015_v19 }
 0x362   : > { %2014 = vmatprep.subr.bf16.mxu1 %v1901_v63  ;;  %1822 = vrot.lane.b32.xlu1 %v1602_v26, %s9078_s22 }
 0x363   : > { %1838 = vrot.lane.b32.xlu0 %v1630_v20, %s9078_s22  ;;  %2015 = vmatpush1.bf16.msra.mxu1 %v1900_v21 }
 0x364   : > { %v10026_v30 = vpop.permute.xlu0 %1682  ;;  %v10028_v14 = vpop.permute.xlu1 %1660 }
 0x368   : > { %v1557_v6 = vpop.permute.xlu0 %1556  ;;  %v1535_v23 = vpop.permute.xlu1 %1534 }
 0x369   : > { %v1543_v10 = vsel %vm566_vm2, %v8471_v48, %v1535_v23  ;;  %v1565_v52 = vsel %vm589_vm4, %v8476_v60, %v1557_v6 }
 0x36c   : > { %v10030_v45 = vpop.permute.xlu0 %1622  ;;  %v1579_v31 = vpop.permute.xlu1 %1578 }
 0x36d   : > { %v1587_v2 = vsel %vm612_vm6, %v8481_v49, %v1579_v31 }
 0x370   : > { %v10032_v5 = vpop.permute.xlu0 %1666  ;;  %v1597_v38 = vpop.permute.xlu1 %1596 }
 0x371   : > { %1828 = vrot.lane.b32.xlu0 %v1597_v38, %s9078_s22 }
 0x374   : > { %v1767_v56 = vpop.permute.xlu0 %1766  ;;  %v10036_v13 = vpop.permute.xlu1 %1644 }
 0x375   : > { %1780 = vrot.lane.b32.xlu0 %v1543_v10, %s9078_s22  ;;  %v1903_v26 = vsel %vm1006_vm8, %v8501_v8, %v1767_v56 }
 0x378   : > { %v10041_v25 = vpop.permute.xlu0 %1688  ;;  %v1559_v62 = vpop.permute.xlu1 %1558 }
 0x379   : > { %1796 = vrot.lane.b32.xlu0 %v1565_v52, %s9078_s22  ;;  %v1566_v4 = vsel %vm589_vm4, %v1557_v6, %v1559_v62 }
 0x37c   : > { %v1537_v1 = vpop.permute.xlu0 %1536  ;;  %v1625_v35 = vpop.permute.xlu1 %1624 }
 0x37d   : > { %1812 = vrot.lane.b32.xlu0 %v1587_v2, %s9078_s22  ;;  %v1544_v27 = vsel %vm566_vm2, %v1535_v23, %v1537_v1 }
 0x37e   : > { %1782 = vrot.lane.b32.xlu1 %v1544_v27, %s9078_s22 }
 0x380   : > { %v1581_v50 = vpop.permute.xlu0 %1580  ;;  %v10050_v44 = vpop.permute.xlu1 %1668 }
 0x381   : > { %1798 = vrot.lane.b32.xlu0 %v1566_v4, %s9078_s22  ;;  %v1588_v16 = vsel %vm612_vm6, %v1579_v31, %v1581_v50 }
 0x384   : > { %v1599_v53 = vpop.permute.xlu0 %1598  ;;  %v10055_v12 = vpop.permute.xlu1 %1768 }
 0x385   : > { %1814 = vrot.lane.b32.xlu0 %v1588_v16, %s9078_s22  ;;  %v1604_v17 = vsel %vm631_vm1, %v1597_v38, %v1599_v53  ;;  %v1904_v63 = vsel %vm1006_vm8, %v1767_v56, %v10055_v12 }
 0x386   : > { %1830 = vrot.lane.b32.xlu1 %v1604_v17, %s9078_s22  ;;  %2016 = vmatprep.subr.bf16.mxu1 %v1904_v63 }
 0x387   : > { %2017 = vmatpush1.bf16.msra.mxu1 %v1903_v26 }
 0x388   : > { %v1647_v20 = vpop.permute.xlu0 %1646  ;;  %v10064_v55 = vpop.permute.xlu1 %1690 }
 0x389   : > { %v1655_v63 = vsel %vm685_vm5, %v10036_v13, %v1647_v20 }
 0x38c   : > { %v10066_v21 = vpop.permute.xlu0 %1560  ;;  %v1539_v6 = vpop.permute.xlu1 %1538 }
 0x38d   : > { %v1545_v23 = vsel %vm566_vm2, %v1537_v1, %v1539_v6  ;;  %v1567_v52 = vsel %vm589_vm4, %v1559_v62, %v10066_v21  ;;  %v1633_v62 = vsel %vm662_vm3, %v10030_v45, %v1625_v35 }
 0x38e   : > { %1784 = vrot.lane.b32.xlu0 %v1545_v23, %s9078_s22 }
 0x390   : > { %v1627_v31 = vpop.permute.xlu0 %1626  ;;  %v10070_v38 = vpop.permute.xlu1 %1582 }
 0x391   : > { %v1589_v1 = vsel %vm612_vm6, %v1581_v50, %v10070_v38  ;;  %v8486_v50 = vunpack.i.h.bf16 %v9954_v51 }
 0x393   : > { %v1635_v17 = vsel %vm662_vm3, %v1627_v31, %v8486_v50 }
 0x394   : > { %v10072_v48 = vpop.permute.xlu0 %1670  ;;  %v1601_v10 = vpop.permute.xlu1 %1600 }
 0x395   : > { %1834 = vrot.lane.b32.xlu1 %v1601_v10, %s9078_s22  ;;  %v1605_v16 = vsel %vm631_vm1, %v1599_v53, %v1601_v10  ;;  %v1652_v53 = vsel %vm685_vm5, %v9981_v47, %v10005_v15 }
 0x398   : > { %v10075_v56 = vpop.permute.xlu0 %1692  ;;  %v1649_v60 = vpop.permute.xlu1 %1648 }
 0x399   : > { %1800 = vrot.lane.b32.xlu1 %v1567_v52, %s9078_s22 }
 0x39c   : > { %v10080_v49 = vpop.permute.xlu0 %1770  ;;  %v1531_v2 = vpop.permute.xlu1 %1530 }
 0x39d   : > { %1816 = vrot.lane.b32.xlu1 %v1589_v1, %s9078_s22  ;;  %v1542_v4 = vsel %vm566_vm2, %v9989_v59, %v1531_v2  ;;  %v1634_v59 = vsel %vm662_vm3, %v1625_v35, %v1627_v31  ;;  %v1656_v31 = vsel %vm685_vm5, %v1647_v20, %v1649_v60  ;;  %v8485_v1 = vunpack.i.l.bf16 %v9954_v51 }
 0x39e   : > { %v1696_v51 = vsel %vm731_vm0, %v9991_v7, %v10026_v30 }
 0x3a0   : > { %v1553_v27 = vpop.permute.xlu0 %1552 }
 0x3a1   : > { %1776 = vrot.lane.b32.xlu1 %v1542_v4, %s9078_s22  ;;  %v1564_v35 = vsel %vm589_vm4, %v10000_v11, %v1553_v27 }
 0x3a4   : > { %v1595_v8 = vpop.permute.xlu0 %1594 }
 0x3a5   : > { %1826 = vrot.lane.b32.xlu0 %v1595_v8, %s9078_s22  ;;  %1846 = vrot.lane.b32.xlu1 %v1633_v62, %s9078_s22 }
 0x3a8   : > { %v1619_v23 = vpop.permute.xlu0 %1618 }
 0x3a9   : > { %1832 = vrot.lane.b32.xlu0 %v1605_v16, %s9078_s22  ;;  %1778 = vrot.lane.b32.xlu1 %v1531_v2, %s9078_s22  ;;  %v8496_v2 = vunpack.i.h.bf16 %v9962_v46  ;;  %v8819_v16 = vld [vmem:[#allocation8 + $0x4] ss:$12 sps:$4 sm:$0xff]  }
 0x3aa   : > { %2046 = vmatprep.mubr.bf16.mxu1 %v8819_v16  ;;  %2152 = vmatprep.mubr.bf16.mxu0 %v8819_v16 }
 0x3ad   : > { %1848 = vrot.lane.b32.xlu0 %v1634_v59, %s9078_s22  ;;  %1850 = vrot.lane.b32.xlu1 %v1635_v17, %s9078_s22 }
 0x3b1   : > { %1844 = vrot.lane.b32.xlu0 %v10030_v45, %s9078_s22  ;;  %1852 = vrot.lane.b32.xlu1 %v9981_v47, %s9078_s22  ;;  %v8491_v45 = vunpack.i.h.bf16 %v9972_v57  ;;  %v1575_v47 = vpop.permute.xlu1 %1574 }
 0x3b2   : > { %v1586_v11 = vsel %vm612_vm6, %v9998_v9, %v1575_v47  ;;  %v1677_v9 = vsel %vm708_vm7, %v10032_v5, %v10050_v44 }
 0x3b3   : > { %v1657_v26 = vsel %vm685_vm5, %v1649_v60, %v8491_v45  ;;  %v1663_v60 = vpop.permute.xlu0 %1662 }
 0x3b5   : > { %1854 = vrot.lane.b32.xlu0 %v1652_v53, %s9078_s22  ;;  %1862 = vrot.lane.b32.xlu1 %v1655_v63, %s9078_s22  ;;  %v1641_v10 = vpop.permute.xlu1 %1640  ;;  %v1702_v53 = vld [vmem:[%s14347_s5] sm:$0xff] }
 0x3b6   : > { %v1653_v52 = vsel %vm685_vm5, %v10005_v15, %v1641_v10  ;;  %v1674_v15 = vsel %vm708_vm7, %v9984_v54, %v10028_v14 }
 0x3b8   : > { %v1773_v50 = vpop.permute.xlu0 %1772 }
 0x3b9   : > { %1786 = vrot.lane.b32.xlu0 %v1539_v6, %s9078_s22  ;;  %1794 = vrot.lane.b32.xlu1 %v1553_v27, %s9078_s22  ;;  %v1631_v6 = vsel %vm662_vm3, %v10015_v19, %v1619_v23  ;;  %v1603_v19 = vsel %vm631_vm1, %v10007_v24, %v1595_v8  ;;  %v1685_v20 = vpop.permute.xlu1 %1684  ;;  %v8490_v8 = vunpack.i.l.bf16 %v9972_v57  ;;  %v8495_v57 = vunpack.i.l.bf16 %v9962_v46  ;;  %v1704_v46 = vld [vmem:[%s14347_s5 + $0x10] sm:$0xff] }
 0x3bb   : > { %v1654_v62 = vsel %vm685_vm5, %v1641_v10, %v8490_v8  ;;  %v1676_v59 = vsel %vm708_vm7, %v1663_v60, %v8495_v57 }
 0x3bd   : > { %1792 = vrot.lane.b32.xlu0 %v1564_v35, %s9078_s22  ;;  %1866 = vrot.lane.b32.xlu1 %v1657_v26, %s9078_s22  ;;  %v10148_v24 = vpop.permute.xlu1 %1762  ;;  %v1697_v35 = vsel %vm731_vm0, %v10026_v30, %v1685_v20  ;;  %v8505_v26 = vunpack.i.l.bf16 %v9974_v58  ;;  %v1703_v30 = vld [vmem:[%s14347_s5 + $0x8] sm:$0xff] }
 0x3c1   : > { %1864 = vrot.lane.b32.xlu0 %v1656_v31, %s9078_s22  ;;  %1840 = vrot.lane.b32.xlu1 %v1631_v6, %s9078_s22  ;;  %v10155_v27 = vpop.permute.xlu1 %1820 }
 0x3c5   : > { %1868 = vrot.lane.b32.xlu1 %v9984_v54, %s9078_s22  ;;  %1808 = vrot.lane.b32.xlu0 %v1586_v11, %s9078_s22  ;;  %v1632_v54 = vsel %vm662_vm3, %v1619_v23, %v8485_v1  ;;  %v10168_v4 = vpop.permute.xlu1 %1836 }
 0x3c9   : > { %1860 = vrot.lane.b32.xlu0 %v10036_v13, %s9078_s22  ;;  %1856 = vrot.lane.b32.xlu1 %v1653_v52, %s9078_s22  ;;  %v1675_v13 = vsel %vm708_vm7, %v10028_v14, %v1663_v60  ;;  %v1679_v14 = vsel %vm708_vm7, %v10072_v48, %v8496_v2  ;;  %v1705_v52 = vld [vmem:[%s14347_s5 + $0x18] sm:$0xff] }
 0x3cd   : > { %1824 = vrot.lane.b32.xlu0 %v1603_v19, %s9078_s22  ;;  %1878 = vrot.lane.b32.xlu1 %v1677_v9, %s9078_s22  ;;  %v10232_v9 = vpop.f32.mrb[8].mxu0 }
 0x3d1   : > { %1870 = vrot.lane.b32.xlu0 %v1674_v15, %s9078_s22  ;;  %1872 = vrot.lane.b32.xlu1 %v1675_v13, %s9078_s22 }
 0x3d5   : > { %1802 = vrot.lane.b32.xlu0 %v10066_v21, %s9078_s22  ;;  %1810 = vrot.lane.b32.xlu1 %v1575_v47, %s9078_s22  ;;  %v1678_v21 = vsel %vm708_vm7, %v10050_v44, %v10072_v48  ;;  %v10177_v44 = vpop.permute.xlu1 %1788  ;;  %v1699_v48 = vsel %vm731_vm0, %v10041_v25, %v10064_v55  ;;  %v1698_v47 = vsel %vm731_vm0, %v1685_v20, %v8505_v26 }
 0x3d9   : > { %1842 = vrot.lane.b32.xlu0 %v1632_v54, %s9078_s22  ;;  %1882 = vrot.lane.b32.xlu1 %v1679_v14, %s9078_s22  ;;  %v10187_v17 = vpop.permute.xlu1 %1804 }
 0x3dd   : > { %1880 = vrot.lane.b32.xlu0 %v1678_v21, %s9078_s22  ;;  %1886 = vrot.lane.b32.xlu1 %v1696_v51, %s9078_s22 }
 0x3e1   : > { %1858 = vrot.lane.b32.xlu0 %v1654_v62, %s9078_s22  ;;  %1884 = vrot.lane.b32.xlu1 %v9991_v7, %s9078_s22  ;;  %v1775_v7 = vpop.permute.xlu0 %1774 }
 0x3e2   : > { %v1906_v57 = vsel %vm1006_vm8, %v1773_v50, %v1775_v7 }
 0x3e5   : > { %1876 = vrot.lane.b32.xlu0 %v10032_v5, %s9078_s22  ;;  %1894 = vrot.lane.b32.xlu1 %v1699_v48, %s9078_s22  ;;  %v10195_v63 = vpop.permute.xlu0 %1838  ;;  %v10202_v5 = vpop.permute.xlu1 %1790 }
 0x3e9   : > { %1874 = vrot.lane.b32.xlu0 %v1676_v59, %s9078_s22  ;;  %1892 = vrot.lane.b32.xlu1 %v10041_v25, %s9078_s22  ;;  %v1700_v25 = vsel %vm731_vm0, %v10064_v55, %v10075_v56  ;;  %v10207_v45 = vpop.permute.xlu0 %1828  ;;  %v8506_v55 = vunpack.i.h.bf16 %v9974_v58 }
 0x3eb   : > { %v1701_v6 = vsel %vm731_vm0, %v10075_v56, %v8506_v55  ;;  %v10234_v56 = vpop.f32.mrb[9].mxu0 }
 0x3ec   : > { %v10236_v20 = vpop.f32.mrb[10].mxu0 }
 0x3ed   : > { %1818 = vrot.lane.b32.xlu0 %v10070_v38, %s9078_s22  ;;  %1708 = vperm.xlu1 %8466, %v1702_v53   ;;  %v10212_v38 = vpop.permute.xlu1 %1806  ;;  %v1781_v23 = vpop.permute.xlu0 %1780 }
 0x3ee   : > { %v10240_v15 = vpop.f32.mrb[11].mxu0 }
 0x3ef   : > { %v10242_v13 = vpop.f32.mrb[12].mxu0 }
 0x3f0   : > { %v10244_v2 = vpop.f32.mrb[13].mxu0 }
 0x3f1   : > { %1896 = vrot.lane.b32.xlu0 %v1700_v25, %s9078_s22  ;;  %1718 = vperm.xlu1 %8466, %v1704_v46   ;;  %v10219_v31 = vpop.permute.xlu1 %1822  ;;  %v1797_v11 = vpop.permute.xlu0 %1796 }
 0x3f2   : > { %v10246_v54 = vpop.f32.mrb[14].mxu0 }
 0x3f3   : > { %14452 = vst [vmem:[#allocation33_spill] sm:$0xff] %v10246_v54  ;;  %v10250_v21 = vpop.f32.mrb[15].mxu0 }
 0x3f4   : > { %14453 = vst [vmem:[#allocation34_spill] sm:$0xff] %v10250_v21 }
 0x3f5   : > { %1888 = vrot.lane.b32.xlu0 %v1697_v35, %s9078_s22  ;;  %v1783_v10 = vpop.permute.xlu1 %1782  ;;  %v1813_v19 = vpop.permute.xlu0 %1812 }
 0x3f6   : > { %v1909_v25 = vsel %vm1006_vm8, %v1781_v23, %v1783_v10 }
 0x3f9   : > { %1890 = vrot.lane.b32.xlu0 %v1698_v47, %s9078_s22  ;;  %v10230_v58 = vpop.permute.xlu1 %1830  ;;  %v1799_v1 = vpop.permute.xlu0 %1798 }
 0x3fa   : > { %v1915_v41 = vsel %vm1006_vm8, %v1797_v11, %v1799_v1 }
 0x3fd   : > { %1898 = vrot.lane.b32.xlu0 %v1701_v6, %s9078_s22  ;;  %v1815_v51 = vpop.permute.xlu0 %1814 }
 0x3fe   : > { %v1921_v11 = vsel %vm1006_vm8, %v1813_v19, %v1815_v51 }
 0x401   : > { %1713 = vperm.xlu0 %8465, %v1703_v30   ;;  %v10254_v62 = vpop.permute.xlu0 %1784 }
 0x402   : > { %v1910_v59 = vsel %vm1006_vm8, %v1783_v10, %v10254_v62 }
 0x405   : > { %1723 = vperm.xlu0 %8465, %v1705_v52  }
 0x407   : > { %v10238_v60 = vpop.permute.xlu1 %1834 }
 0x40b   : > { %v10248_v14 = vpop.permute.xlu1 %1800 }
 0x40f   : > { %v10252_v8 = vpop.permute.xlu1 %1816 }
 0x413   : > { %v10256_v16 = vpop.permute.xlu1 %1776 }
 0x414   : > { %v1907_v48 = vsel %vm1006_vm8, %v1775_v7, %v10256_v16 }
 0x415   : > { %2018 = vmatprep.subr.bf16.mxu1 %v1907_v48 }
 0x416   : > { %2019 = vmatpush1.bf16.msra.mxu1 %v1906_v57 }
 0x417   : > { %v1827_v53 = vpop.permute.xlu0 %1826  ;;  %2020 = vmatprep.subr.bf16.mxu1 %v1910_v59  ;;  %v10263_v46 = vpop.permute.xlu1 %1846  ;;  %v1912_v59 = vsel %vm1006_vm8, %v10177_v44, %v10202_v5  ;;  %v1918_v44 = vsel %vm1006_vm8, %v10187_v17, %v10212_v38  ;;  %v1902_v17 = vsel %vm1006_vm8, %v10013_v18, %v10148_v24  ;;  %v1905_v18 = vsel %vm1006_vm8, %v10055_v12, %v10080_v49 }
 0x418   : > { %v1927_v24 = vsel %vm1006_vm8, %v10207_v45, %v10230_v58 }
 0x41a   : > { %2021 = vmatpush1.bf16.msra.mxu1 %v1909_v25  ;;  %v1916_v25 = vsel %vm1006_vm8, %v1799_v1, %v10248_v14 }
 0x41b   : > { %v1833_v35 = vpop.permute.xlu0 %1832  ;;  %v10266_v26 = vpop.permute.xlu1 %1778 }
 0x41c   : > { %v1928_v19 = vsel %vm1006_vm8, %v10230_v58, %v1833_v35 }
 0x41f   : > { %v10268_v47 = vpop.permute.xlu0 %1848  ;;  %v10270_v55 = vpop.permute.xlu1 %1850 }
 0x420   : > { %v1934_v12 = vsel %vm1006_vm8, %v10263_v46, %v10268_v47 }
 0x423   : > { %v1845_v6 = vpop.permute.xlu0 %1844  ;;  %v10272_v50 = vpop.permute.xlu1 %1852 }
 0x427   : > { %v10274_v7 = vpop.permute.xlu0 %1854  ;;  %v10276_v30 = vpop.permute.xlu1 %1862 }
 0x42b   : > { %v10278_v52 = vpop.permute.xlu0 %1786  ;;  %v10280_v48 = vpop.permute.xlu1 %1794 }
 0x42f   : > { %v10282_v23 = vpop.permute.xlu0 %1792  ;;  %v10284_v10 = vpop.permute.xlu1 %1866 }
 0x430   : > { %v1913_v57 = vsel %vm1006_vm8, %v10202_v5, %v10282_v23  ;;  %v1922_v5 = vsel %vm1006_vm8, %v1815_v51, %v10252_v8  ;;  %v1929_v51 = vsel %vm1006_vm8, %v1833_v35, %v10238_v60  ;;  %v1930_v60 = vsel %vm1006_vm8, %v10168_v4, %v10195_v63 }
 0x431   : > { %2022 = vmatprep.subr.bf16.mxu1 %v1913_v57  ;;  %v1933_v35 = vsel %vm1006_vm8, %v1845_v6, %v10263_v46 }
 0x432   : > { %2023 = vmatpush1.bf16.msra.mxu1 %v1912_v59 }
 0x433   : > { %v10294_v28 = vpop.permute.xlu0 %1864  ;;  %2024 = vmatprep.subr.bf16.mxu1 %v1916_v25  ;;  %v1841_v42 = vpop.permute.xlu1 %1840 }
 0x436   : > { %2025 = vmatpush1.bf16.msra.mxu1 %v1915_v41 }
 0x437   : > { %v10297_v3 = vpop.permute.xlu0 %1808  ;;  %v10299_v21 = vpop.permute.xlu1 %1868 }
 0x438   : > { %v1919_v57 = vsel %vm1006_vm8, %v10212_v38, %v10297_v3  ;;  %v1924_v38 = vsel %vm1006_vm8, %v10155_v27, %v10219_v31 }
 0x439   : > { %2026 = vmatprep.subr.bf16.mxu1 %v1919_v57 }
 0x43a   : > { %2027 = vmatpush1.bf16.msra.mxu1 %v1918_v44 }
 0x43b   : > { %v1861_v59 = vpop.permute.xlu0 %1860  ;;  %2028 = vmatprep.subr.bf16.mxu1 %v1922_v5  ;;  %v1857_v41 = vpop.permute.xlu1 %1856 }
 0x43c   : > { %v1937_v4 = vsel %vm1006_vm8, %v10274_v7, %v1857_v41 }
 0x43e   : > { %2029 = vmatpush1.bf16.msra.mxu1 %v1921_v11 }
 0x43f   : > { %v1825_v1 = vpop.permute.xlu0 %1824  ;;  %v10310_v25 = vpop.permute.xlu1 %1878 }
 0x440   : > { %v1925_v57 = vsel %vm1006_vm8, %v10219_v31, %v1825_v1  ;;  %v1926_v54 = vsel %vm1006_vm8, %v1825_v1, %v1827_v53  ;;  %v1931_v31 = vsel %vm1006_vm8, %v10195_v63, %v1841_v42  ;;  %v1908_v53 = vsel %vm1006_vm8, %v10256_v16, %v10266_v26 }
 0x441   : > { %2030 = vmatprep.subr.bf16.mxu1 %v1925_v57  ;;  %7892 = vmatprep.subr.bf16.mxu0 %v1926_v54  ;;  %v1935_v63 = vsel %vm1006_vm8, %v10268_v47, %v10270_v55  ;;  %v1936_v16 = vsel %vm1006_vm8, %v10272_v50, %v10274_v7  ;;  %v1940_v26 = vsel %vm1006_vm8, %v10276_v30, %v10294_v28  ;;  %v8820_v57 = vld [vmem:[#allocation8 + $0x1c] ss:$12 sps:$4 sm:$0xff]  }
 0x442   : > { %2031 = vmatpush1.bf16.msra.mxu1 %v1924_v38  ;;  %7893 = vmatpush3.bf16.msra.mxu0 %v1902_v17  ;;  %v1939_v55 = vsel %vm1006_vm8, %v1861_v59, %v10276_v30  ;;  %v1941_v7 = vsel %vm1006_vm8, %v10294_v28, %v10284_v10 }
 0x443   : > { %v1871_v44 = vpop.permute.xlu0 %1870  ;;  %2032 = vmatprep.subr.bf16.mxu1 %v1928_v19  ;;  %7894 = vmatprep.subr.bf16.mxu0 %v1929_v51  ;;  %v1873_v27 = vpop.permute.xlu1 %1872 }
 0x444   : > { %v1943_v50 = vsel %vm1006_vm8, %v1871_v44, %v1873_v27  ;;  %v1942_v59 = vsel %vm1006_vm8, %v10299_v21, %v1871_v44 }
 0x446   : > { %2033 = vmatpush1.bf16.msra.mxu1 %v1927_v24  ;;  %7895 = vmatpush3.bf16.msra.mxu0 %v1905_v18 }
 0x447   : > { %v1803_v54 = vpop.permute.xlu0 %1802  ;;  %2034 = vmatprep.subr.bf16.mxu1 %v1931_v31  ;;  %v1811_v45 = vpop.permute.xlu1 %1810 }
 0x448   : > { %v1917_v30 = vsel %vm1006_vm8, %v10248_v14, %v1803_v54  ;;  %v1920_v28 = vsel %vm1006_vm8, %v10297_v3, %v1811_v45  ;;  %v8817_v14 = vld [vmem:[#allocation8] ss:$12 sps:$4 sm:$0xff]  }
 0x44a   : > { %2035 = vmatpush1.bf16.msra.mxu1 %v1930_v60 }
 0x44b   : > { %v1843_v49 = vpop.permute.xlu0 %1842  ;;  %2036 = vmatprep.subr.bf16.mxu1 %v1934_v12  ;;  %v1883_v46 = vpop.permute.xlu1 %1882  ;;  %v8823_v12 = vld [vmem:[#allocation8 + $0x8] ss:$12 sps:$4 sm:$0xff]  }
 0x44c   : > { %v1932_v58 = vsel %vm1006_vm8, %v1841_v42, %v1843_v49  ;;  %v1911_v42 = vsel %vm1006_vm8, %v10254_v62, %v10278_v52  ;;  %v1914_v62 = vsel %vm1006_vm8, %v10282_v23, %v10280_v48 }
 0x44d   : > { %7896 = vmatprep.subr.bf16.mxu0 %v1932_v58  ;;  %v8824_v58 = vld [vmem:[#allocation8 + $0x20] ss:$12 sps:$4 sm:$0xff]  }
 0x44e   : > { %2037 = vmatpush1.bf16.msra.mxu1 %v1933_v35  ;;  %7897 = vmatpush3.bf16.msra.mxu0 %v1908_v53  ;;  %v10395_v53 = vpop.f32.mrb[36].mxu1 }
 0x44f   : > { %v1881_v5 = vpop.permute.xlu0 %1880  ;;  %2038 = vmatprep.subr.bf16.mxu1 %v1937_v4  ;;  %7898 = vmatprep.subr.bf16.mxu0 %v1935_v63  ;;  %14455 = vst [vmem:[#allocation35_spill] sm:$0xff] %v10395_v53  ;;  %v10399_v35 = vpop.f32.mrb[37].mxu1 }
 0x450   : > { %v1946_v48 = vsel %vm1006_vm8, %v10310_v25, %v1881_v5  ;;  %v1947_v21 = vsel %vm1006_vm8, %v1881_v5, %v1883_v46  ;;  %v10401_v4 = vpop.f32.mrb[38].mxu1 }
 0x451   : > { %14456 = vst [vmem:[#allocation36_spill] sm:$0xff] %v10401_v4  ;;  %v10403_v63 = vpop.f32.mrb[39].mxu1 }
 0x452   : > { %2039 = vmatpush1.bf16.msra.mxu1 %v1936_v16  ;;  %7899 = vmatpush3.bf16.msra.mxu0 %v1911_v42  ;;  %14457 = vst [vmem:[#allocation37_spill] sm:$0xff] %v10403_v63 }
 0x453   : > { %v1859_v6 = vpop.permute.xlu0 %1858  ;;  %2040 = vmatprep.subr.bf16.mxu1 %v1940_v26 }
 0x454   : > { %v1938_v47 = vsel %vm1006_vm8, %v1857_v41, %v1859_v6  ;;  %v1887_v41 = vpop.permute.xlu1 %1886 }
 0x455   : > { %7900 = vmatprep.subr.bf16.mxu0 %v1938_v47 }
 0x456   : > { %2041 = vmatpush1.bf16.msra.mxu1 %v1939_v55  ;;  %7901 = vmatpush3.bf16.msra.mxu0 %v1914_v62 }
 0x457   : > { %v1877_v52 = vpop.permute.xlu0 %1876  ;;  %2042 = vmatprep.subr.bf16.mxu1 %v1943_v50  ;;  %7902 = vmatprep.subr.bf16.mxu0 %v1941_v7 }
 0x458   : > { %v1945_v10 = vsel %vm1006_vm8, %v1877_v52, %v10310_v25  ;;  %v1885_v1 = vpop.permute.xlu1 %1884  ;;  %v8822_v25 = vld [vmem:[#allocation8 + $0x18] ss:$12 sps:$4 sm:$0xff]  }
 0x459   : > { %v1948_v18 = vsel %vm1006_vm8, %v1885_v1, %v1887_v41 }
 0x45a   : > { %2043 = vmatpush1.bf16.msra.mxu1 %v1942_v59  ;;  %7903 = vmatpush3.bf16.msra.mxu0 %v1917_v30 }
 0x45b   : > { %v1875_v23 = vpop.permute.xlu0 %1874  ;;  %2044 = vmatprep.subr.bf16.mxu1 %v1946_v48 }
 0x45c   : > { %v1944_v11 = vsel %vm1006_vm8, %v1873_v27, %v1875_v23  ;;  %v1895_v19 = vpop.permute.xlu1 %1894 }
 0x45d   : > { %7904 = vmatprep.subr.bf16.mxu0 %v1944_v11 }
 0x45e   : > { %2045 = vmatpush1.bf16.msra.mxu1 %v1945_v10  ;;  %7905 = vmatpush3.bf16.msra.mxu0 %v1920_v28 }
 0x45f   : > { %v1819_v17 = vpop.permute.xlu0 %1818  ;;  %7906 = vmatprep.subr.bf16.mxu0 %v1947_v21 }
 0x460   : > { %v1923_v38 = vsel %vm1006_vm8, %v10252_v8, %v1819_v17  ;;  %v1893_v24 = vpop.permute.xlu1 %1892  ;;  %v14454_v8 = vmov 0  }
 0x461   : > { %2047 = vmatmul.mubr.bf16.vlgmr.msra.gmra.mrb[40].mxu1 %v8817_v14  ;;  %v1951_v60 = vsel %vm1006_vm8, %v1893_v24, %v1895_v19  ;;  %8513 = vrot.lane.b32.xlu1 %v14454_v8, %s9074_s21 }
 0x462   : > { %7907 = vmatpush3.bf16.msra.mxu0 %v1923_v38  ;;  %2056 = vmatprep.mubr.bf16.mxu1 %v8820_v57 }
 0x463   : > { %v1897_v3 = vpop.permute.xlu0 %1896  ;;  %8508 = vrot.lane.b32.xlu0 %v14454_v8, %s9072_s18 }
 0x464   : > { %v1952_v27 = vsel %vm1006_vm8, %v1895_v19, %v1897_v3 }
 0x465   : > { %2153 = vmatmul.mubr.bf16.vlgmr.msra.gmra.mrb[16].mxu0 %v8817_v14  ;;  %8523 = vrot.lane.b32.xlu1 %v14454_v8, %s9073_s19 }
 0x466   : > { %2160 = vmatprep.mubr.bf16.mxu0 %v8820_v57 }
 0x467   : > { %v1889_v51 = vpop.permute.xlu0 %1888  ;;  %8518 = vrot.lane.b32.xlu0 %v14454_v8, %s9076_s15 }
 0x468   : > { %v1949_v44 = vsel %vm1006_vm8, %v1887_v41, %v1889_v51 }
 0x469   : > { %2057 = vmatmul.mubr.bf16.gmra.mrb[44].mxu1 %v8822_v25  ;;  %2067 = vmatprep.subr.bf16.mxu1 %v1949_v44 }
 0x46a   : > { %2068 = vmatpush1.bf16.msra.mxu1 %v1948_v18  ;;  %2099 = vmatprep.mubr.bf16.mxu1 %v14454_v8 }
 0x46b   : > { %v1891_v31 = vpop.permute.xlu0 %1890  ;;  %2069 = vmatprep.subr.bf16.mxu1 %v1952_v27  ;;  %8533 = vrot.lane.b32.xlu1 %v14454_v8, %s9077_s27 }
 0x46c   : > { %v1950_v54 = vsel %vm1006_vm8, %v1889_v51, %v1891_v31  ;;  %8528 = vrot.lane.b32.xlu0 %v14454_v8, %s9075_s24  ;;  %v1709_v47 = vpop.permute.xlu1 %1708 }
 0x46d   : > { %2161 = vmatmul.mubr.bf16.gmra.mrb[20].mxu0 %v8822_v25  ;;  %8153 = vmatprep.subr.bf16.mxu0 %v1950_v54 }
 0x46e   : > { %2070 = vmatpush1.bf16.msra.mxu1 %v1951_v60  ;;  %8154 = vmatpush3.bf16.msra.mxu0 %v1950_v54 }
 0x46f   : > { %v1899_v49 = vpop.permute.xlu0 %1898  ;;  %8157 = vmatprep.mubr.msk.bf16.mxu0 %vm1115_vm9, %v8823_v12  ;;  %8538 = vrot.lane.b32.xlu1 %v14454_v8, %s9078_s22 }
 0x470   : > { %v1953_v45 = vsel %vm1006_vm8, %v1897_v3, %v1899_v49  ;;  %v1719_v11 = vpop.permute.xlu1 %1718 }
 0x471   : > { %7733 = vmatmul.mubr.msk.bf16.vlgmr.msra.gmra.mrb[40].mxu1 %vm1115_vm9, %v8823_v12  ;;  %8155 = vmatprep.subr.bf16.mxu0 %v1953_v45 }
 0x472   : > { %8156 = vmatpush3.bf16.msra.mxu0 %v1953_v45  ;;  %2109 = vmatprep.mubr.bf16.mxu1 %v14454_v8 }
 0x473   : > { %8543 = vrot.lane.b32.xlu1 %v14454_v8, %s9070_s17 }
 0x475   : > { %8158 = vmatmul.mubr.msk.bf16.vlgmr.msra.gmra.mrb[24].mxu0 %vm1115_vm9, %v8824_v58 }
 0x479   : > { %7734 = vmatmul.mubr.msk.bf16.gmra.mrb[44].mxu1 %vm1115_vm9, %v8824_v58 }
 0x480   : > { %v1714_v50 = vpop.permute.xlu0 %1713 }
 0x484   : > { %v1724_v17 = vpop.permute.xlu0 %1723 }
 0x538   : > { %v7908_v5 = vpop.f32.mrb[16].mxu0 }
 0x539   : > { %v7909_v42 = vpop.f32.mrb[17].mxu0 }
 0x53a   : > { %v7910_v16 = vadd.f32 %v7909_v42, %v7908_v5  ;;  %v7911_v46 = vpop.f32.mrb[18].mxu0 }
 0x53b   : > { %v7912_v26 = vpop.f32.mrb[19].mxu0 }
 0x53c   : > { %v7913_v6 = vadd.f32 %v7912_v26, %v7911_v46  ;;  %v2155_v25 = vadd.f32 %v7910_v16, %v1709_v47 }
 0x53e   : > { %v2158_v60 = vadd.f32 %v7913_v6, %v1714_v50 }
 0x540   : > { %v7914_v55 = vpop.f32.mrb[20].mxu0 }
 0x541   : > { %v7915_v62 = vpop.f32.mrb[21].mxu0 }
 0x542   : > { %v7916_v7 = vadd.f32 %v7915_v62, %v7914_v55  ;;  %v7917_v52 = vpop.f32.mrb[22].mxu0 }
 0x543   : > { %v7918_v41 = vpop.f32.mrb[23].mxu0 }
 0x544   : > { %v7919_v30 = vadd.f32 %v7918_v41, %v7917_v52  ;;  %v2101_v59 = vpop.f32.mrb[40].mxu1  ;;  %v2163_v57 = vadd.f32 %v7916_v7, %v1719_v11 }
 0x545   : > { %v8249_v48 = vadd.f32 %v2101_v59, %v1709_v47  ;;  %v2103_v23 = vpop.f32.mrb[41].mxu1 }
 0x546   : > { %v8250_v28 = vadd.f32 %v2103_v23, %v1709_v47  ;;  %v2105_v10 = vpop.f32.mrb[42].mxu1  ;;  %v2166_v24 = vadd.f32 %v7919_v30, %v1724_v17 }
 0x547   : > { %v2218_v14 = vmax.f32 %v8249_v48, 0.0  ;;  %v8251_v1 = vadd.f32 %v2105_v10, %v1714_v50  ;;  %v2107_v21 = vpop.f32.mrb[43].mxu1 }
 0x548   : > { %v2219_v38 = vmax.f32 %v8250_v28, 0.0  ;;  %v8252_v3 = vadd.f32 %v2107_v21, %v1714_v50  ;;  %v8159_v19 = vpop.f32.mrb[24].mxu0 }
 0x549   : > { %v2221_v51 = vmax.f32 %v8251_v1, 0.0  ;;  %v2212_v44 = vadd.f32 %v8159_v19, %v2163_v57  ;;  %v2203_v18 = vpop.f32.mrb[25].mxu0  ;;  %v2230_v12 = vmul.f32 %v2218_v14, %v9883_v22 }
 0x54a   : > { %v2222_v27 = vmax.f32 %v8252_v3, 0.0  ;;  %v2204_v31 = vadd.f32 %v2203_v18, %v2155_v25  ;;  %v8160_v54 = vpop.f32.mrb[26].mxu0  ;;  %v2231_v42 = vmul.f32 %v2219_v38, %v9886_v43 }
 0x54b   : > { %v2233_v49 = vmul.f32 %v2221_v51, %v9883_v22  ;;  %v2226_v45 = vmax.f32 %v2212_v44, 0.0  ;;  %v2215_v58 = vadd.f32 %v8160_v54, %v2166_v24  ;;  %v2206_v5 = vpop.f32.mrb[27].mxu0  ;;  %v10483_v54 = vpop.permute.xlu0 %8508 }
 0x54c   : > { %v2234_v46 = vmul.f32 %v2222_v27, %v9886_v43  ;;  %v2220_v16 = vmax.f32 %v2204_v31, 0.0  ;;  %v2207_v26 = vadd.f32 %v2206_v5, %v2158_v60  ;;  %v2111_v47 = vpop.f32.mrb[44].mxu1 }
 0x54d   : > { %v2242_v55 = vpack.c.bf16 %v2233_v49, %v2230_v12  ;;  %v2229_v62 = vmax.f32 %v2215_v58, 0.0  ;;  %v8253_v7 = vadd.f32 %v2111_v47, %v1719_v11  ;;  %v2113_v52 = vpop.f32.mrb[45].mxu1  ;;  %v2238_v59 = vmul.f32 %v2226_v45, %v9849_v29 }
 0x54e   : > { %v2243_v41 = vpack.c.bf16 %v2234_v46, %v2231_v42  ;;  %v2223_v6 = vmax.f32 %v2207_v26, 0.0  ;;  %v8254_v50 = vadd.f32 %v2113_v52, %v1719_v11  ;;  %v2115_v30 = vpop.f32.mrb[46].mxu1  ;;  %v2232_v14 = vmul.f32 %v2220_v16, %v9849_v29 }
 0x54f   : > { %v2241_v48 = vmul.f32 %v2229_v62, %v9849_v29  ;;  %v2224_v23 = vmax.f32 %v8253_v7, 0.0  ;;  %v8255_v28 = vadd.f32 %v2115_v30, %v1724_v17  ;;  %v2117_v10 = vpop.f32.mrb[47].mxu1  ;;  %v10489_v12 = vpop.permute.xlu0 %8518 }
 0x550   : > { %v2235_v1 = vmul.f32 %v2223_v6, %v9849_v29  ;;  %v2225_v21 = vmax.f32 %v8254_v50, 0.0  ;;  %v8256_v57 = vadd.f32 %v2117_v10, %v1724_v17  ;;  %v10475_v17 = vpop.permute.xlu1 %8513  ;;  %v8521_v53 = vunpack.i.h.bf16 %v10489_v12 }
 0x551   : > { %v2247_v38 = vpack.c.bf16 %v2241_v48, %v2238_v59  ;;  %v2227_v3 = vmax.f32 %v8255_v28, 0.0  ;;  %v2236_v11 = vmul.f32 %v2224_v23, %v9883_v22 }
 0x552   : > { %v2244_v19 = vpack.c.bf16 %v2235_v1, %v2232_v14  ;;  %v2228_v25 = vmax.f32 %v8256_v57, 0.0  ;;  %v2237_v44 = vmul.f32 %v2225_v21, %v9886_v43  ;;  %v8510_v57 = vunpack.i.l.bf16 %v10483_v54 }
 0x553   : > { %v2239_v51 = vmul.f32 %v2227_v3, %v9883_v22  ;;  %2323 = vrot.lane.b32.xlu0 %v2247_v38, %s9074_s21  ;;  %2301 = vrot.lane.b32.xlu1 %v2247_v38, %s9072_s18  ;;  %v10495_v45 = vpop.permute.xlu0 %8528 }
 0x554   : > { %v2240_v18 = vmul.f32 %v2228_v25, %v9886_v43  ;;  %v8524_v31 = vpop.permute.xlu1 %8523 }
 0x555   : > { %v2245_v24 = vpack.c.bf16 %v2239_v51, %v2236_v11  ;;  %v8525_v23 = vunpack.i.l.bf16 %v8524_v31 }
 0x556   : > { %v2246_v27 = vpack.c.bf16 %v2240_v18, %v2237_v44  ;;  %v8515_v18 = vunpack.i.l.bf16 %v10475_v17 }
 0x557   : > { %2389 = vrot.lane.b32.xlu0 %v2247_v38, %s9073_s19  ;;  %2345 = vrot.lane.b32.xlu1 %v2247_v38, %s9076_s15 }
 0x558   : > { %v10485_v60 = vpop.permute.xlu1 %8533 }
 0x55b   : > { %2433 = vrot.lane.b32.xlu0 %v2247_v38, %s9077_s27  ;;  %2363 = vrot.lane.b32.xlu1 %v2247_v38, %s9071_s28 }
 0x55c   : > { %v10491_v49 = vpop.permute.xlu1 %8538 }
 0x55f   : > { %2455 = vrot.lane.b32.xlu0 %v2247_v38, %s9070_s17  ;;  %2411 = vrot.lane.b32.xlu1 %v2247_v38, %s9075_s24 }
 0x560   : > { %v10497_v58 = vpop.permute.xlu1 %8543 }
 0x563   : > { %2534 = vrot.lane.b32.xlu0 %v2247_v38, %s9078_s22  ;;  %2293 = vrot.lane.b32.xlu1 %v2244_v19, %s9072_s18 }
 0x567   : > { %2315 = vrot.lane.b32.xlu0 %v2244_v19, %s9074_s21  ;;  %2337 = vrot.lane.b32.xlu1 %v2244_v19, %s9076_s15 }
 0x56b   : > { %2357 = vrot.lane.b32.xlu0 %v2244_v19, %s9071_s28  ;;  %2403 = vrot.lane.b32.xlu1 %v2244_v19, %s9075_s24 }
 0x56f   : > { %2381 = vrot.lane.b32.xlu0 %v2244_v19, %s9073_s19  ;;  %2447 = vrot.lane.b32.xlu1 %v2244_v19, %s9070_s17 }
 0x573   : > { %2425 = vrot.lane.b32.xlu0 %v2244_v19, %s9077_s27  ;;  %2526 = vrot.lane.b32.xlu1 %v2244_v19, %s9078_s22 }
 0x577   : > { %2311 = vrot.lane.b32.xlu0 %v2242_v55, %s9074_s21  ;;  %2289 = vrot.lane.b32.xlu1 %v2242_v55, %s9072_s18 }
 0x57b   : > { %2353 = vrot.lane.b32.xlu0 %v2242_v55, %s9071_s28  ;;  %2333 = vrot.lane.b32.xlu1 %v2242_v55, %s9076_s15 }
 0x57f   : > { %2377 = vrot.lane.b32.xlu0 %v2242_v55, %s9073_s19  ;;  %2399 = vrot.lane.b32.xlu1 %v2242_v55, %s9075_s24 }
 0x583   : > { %2421 = vrot.lane.b32.xlu0 %v2242_v55, %s9077_s27  ;;  %2522 = vrot.lane.b32.xlu1 %v2242_v55, %s9078_s22 }
 0x587   : > { %2291 = vrot.lane.b32.xlu0 %v2243_v41, %s9072_s18  ;;  %2443 = vrot.lane.b32.xlu1 %v2242_v55, %s9070_s17 }
 0x58b   : > { %2335 = vrot.lane.b32.xlu0 %v2243_v41, %s9076_s15  ;;  %2313 = vrot.lane.b32.xlu1 %v2243_v41, %s9074_s21 }
 0x58f   : > { %2401 = vrot.lane.b32.xlu0 %v2243_v41, %s9075_s24  ;;  %2355 = vrot.lane.b32.xlu1 %v2243_v41, %s9071_s28 }
 0x593   : > { %2524 = vrot.lane.b32.xlu0 %v2243_v41, %s9078_s22  ;;  %2379 = vrot.lane.b32.xlu1 %v2243_v41, %s9073_s19 }
 0x597   : > { %2445 = vrot.lane.b32.xlu0 %v2243_v41, %s9070_s17  ;;  %2423 = vrot.lane.b32.xlu1 %v2243_v41, %s9077_s27  ;;  %v8526_v41 = vunpack.i.h.bf16 %v8524_v31 }
 0x59b   : > { %2319 = vrot.lane.b32.xlu0 %v2245_v24, %s9074_s21  ;;  %2297 = vrot.lane.b32.xlu1 %v2245_v24, %s9072_s18 }
 0x59f   : > { %2385 = vrot.lane.b32.xlu0 %v2245_v24, %s9073_s19  ;;  %2341 = vrot.lane.b32.xlu1 %v2245_v24, %s9076_s15 }
 0x5a3   : > { %2429 = vrot.lane.b32.xlu0 %v2245_v24, %s9077_s27  ;;  %2359 = vrot.lane.b32.xlu1 %v2245_v24, %s9071_s28 }
 0x5a7   : > { %2530 = vrot.lane.b32.xlu0 %v2245_v24, %s9078_s22  ;;  %2407 = vrot.lane.b32.xlu1 %v2245_v24, %s9075_s24 }
 0x5ab   : > { %2451 = vrot.lane.b32.xlu0 %v2245_v24, %s9070_s17  ;;  %2321 = vrot.lane.b32.xlu1 %v2246_v27, %s9074_s21 }
 0x5af   : > { %2299 = vrot.lane.b32.xlu0 %v2246_v27, %s9072_s18  ;;  %2387 = vrot.lane.b32.xlu1 %v2246_v27, %s9073_s19 }
 0x5b3   : > { %2343 = vrot.lane.b32.xlu0 %v2246_v27, %s9076_s15  ;;  %2431 = vrot.lane.b32.xlu1 %v2246_v27, %s9077_s27 }
 0x5b7   : > { %2361 = vrot.lane.b32.xlu0 %v2246_v27, %s9071_s28  ;;  %2532 = vrot.lane.b32.xlu1 %v2246_v27, %s9078_s22 }
 0x5bb   : > { %2409 = vrot.lane.b32.xlu0 %v2246_v27, %s9075_s24  ;;  %2453 = vrot.lane.b32.xlu1 %v2246_v27, %s9070_s17 }
 0x5c5   : > { %v10499_v5 = vpop.permute.xlu0 %2323  ;;  %v10501_v42 = vpop.permute.xlu1 %2301 }
 0x5c6   : > { %2550 = vrot.lane.b32.xlu0 %v10501_v42, %s9078_s22 }
 0x5c9   : > { %v10505_v46 = vpop.permute.xlu0 %2389  ;;  %v10507_v16 = vpop.permute.xlu1 %2345 }
 0x5ca   : > { %v2398_v30 = vsel %vm662_vm3, %v10505_v46, %v8526_v41  ;;  %v8520_v41 = vunpack.i.l.bf16 %v10489_v12  ;;  %v8530_v12 = vunpack.i.l.bf16 %v10495_v45 }
 0x5cd   : > { %v10509_v26 = vpop.permute.xlu0 %2433  ;;  %v10511_v47 = vpop.permute.xlu1 %2363 }
 0x5ce   : > { %2598 = vrot.lane.b32.xlu1 %v10511_v47, %s9078_s22 }
 0x5d1   : > { %v10515_v55 = vpop.permute.xlu0 %2455  ;;  %v10517_v62 = vpop.permute.xlu1 %2411 }
 0x5d5   : > { %v10519_v7 = vpop.permute.xlu0 %2534  ;;  %v2294_v52 = vpop.permute.xlu1 %2293 }
 0x5d6   : > { %2542 = vrot.lane.b32.xlu1 %v2294_v52, %s9078_s22 }
 0x5d9   : > { %v10522_v6 = vpop.permute.xlu0 %2315  ;;  %v10524_v50 = vpop.permute.xlu1 %2337 }
 0x5da   : > { %2614 = vrot.lane.b32.xlu1 %v2398_v30, %s9078_s22 }
 0x5dd   : > { %v2358_v59 = vpop.permute.xlu0 %2357  ;;  %v10529_v48 = vpop.permute.xlu1 %2403 }
 0x5de   : > { %2590 = vrot.lane.b32.xlu0 %v2358_v59, %s9078_s22 }
 0x5e1   : > { %v2382_v28 = vpop.permute.xlu0 %2381  ;;  %v10532_v10 = vpop.permute.xlu1 %2447 }
 0x5e2   : > { %v2395_v14 = vsel %vm662_vm3, %v2382_v28, %v8525_v23 }
 0x5e3   : > { %2606 = vrot.lane.b32.xlu0 %v2395_v14, %s9078_s22 }
 0x5e5   : > { %v10536_v1 = vpop.permute.xlu0 %2425  ;;  %v10538_v21 = vpop.permute.xlu1 %2526 }
 0x5e9   : > { %v2312_v38 = vpop.permute.xlu0 %2311  ;;  %v2290_v3 = vpop.permute.xlu1 %2289 }
 0x5ea   : > { %v2303_v19 = vsel %vm566_vm2, %v8510_v57, %v2290_v3  ;;  %v2325_v31 = vsel %vm589_vm4, %v8515_v18, %v2312_v38 }
 0x5eb   : > { %2536 = vrot.lane.b32.xlu0 %v2303_v19, %s9078_s22 }
 0x5ed   : > { %v2354_v25 = vpop.permute.xlu0 %2353  ;;  %v2334_v11 = vpop.permute.xlu1 %2333 }
 0x5ee   : > { %2584 = vrot.lane.b32.xlu1 %v2354_v25, %s9078_s22  ;;  %v2347_v14 = vsel %vm612_vm6, %v8520_v41, %v2334_v11 }
 0x5f1   : > { %v2378_v51 = vpop.permute.xlu0 %2377  ;;  %v10544_v44 = vpop.permute.xlu1 %2399 }
 0x5f2   : > { %2600 = vrot.lane.b32.xlu1 %v2378_v51, %s9078_s22 }
 0x5f5   : > { %v10548_v24 = vpop.permute.xlu0 %2421  ;;  %v2523_v27 = vpop.permute.xlu1 %2522 }
 0x5f6   : > { %2552 = vrot.lane.b32.xlu1 %v2325_v31, %s9078_s22 }
 0x5f9   : > { %v2292_v30 = vpop.permute.xlu0 %2291  ;;  %v10553_v23 = vpop.permute.xlu1 %2443 }
 0x5fa   : > { %2568 = vrot.lane.b32.xlu1 %v2347_v14, %s9078_s22  ;;  %v2304_v57 = vsel %vm566_vm2, %v2290_v3, %v2292_v30  ;;  %v2305_v63 = vsel %vm566_vm2, %v2292_v30, %v2294_v52  ;;  %v8540_v52 = vunpack.i.l.bf16 %v10491_v49 }
 0x5fb   : > { %2538 = vrot.lane.b32.xlu0 %v2304_v57, %s9078_s22 }
 0x5fd   : > { %v2336_v19 = vpop.permute.xlu0 %2335  ;;  %v2314_v4 = vpop.permute.xlu1 %2313 }
 0x5fe   : > { %2540 = vrot.lane.b32.xlu1 %v2305_v63, %s9078_s22  ;;  %v2327_v18 = vsel %vm589_vm4, %v2314_v4, %v10522_v6  ;;  %v2326_v41 = vsel %vm589_vm4, %v2312_v38, %v2314_v4  ;;  %v2349_v3 = vsel %vm612_vm6, %v2336_v19, %v10524_v50  ;;  %v2348_v14 = vsel %vm612_vm6, %v2334_v11, %v2336_v19 }
 0x5ff   : > { %2556 = vrot.lane.b32.xlu0 %v2327_v18, %s9078_s22  ;;  %v2664_v38 = vsel %vm1006_vm8, %v8540_v52, %v2523_v27 }
 0x601   : > { %v2402_v31 = vpop.permute.xlu0 %2401  ;;  %v2356_v36 = vpop.permute.xlu1 %2355 }
 0x602   : > { %2554 = vrot.lane.b32.xlu1 %v2326_v41, %s9078_s22  ;;  %v2366_v4 = vsel %vm631_vm1, %v2356_v36, %v2358_v59 }
 0x603   : > { %2572 = vrot.lane.b32.xlu0 %v2349_v3, %s9078_s22  ;;  %v2365_v3 = vsel %vm631_vm1, %v2354_v25, %v2356_v36  ;;  %v2416_v36 = vsel %vm685_vm5, %v2402_v31, %v10529_v48 }
 0x605   : > { %v10570_v30 = vpop.permute.xlu0 %2524  ;;  %v2380_v63 = vpop.permute.xlu1 %2379 }
 0x606   : > { %2570 = vrot.lane.b32.xlu1 %v2348_v14, %s9078_s22  ;;  %v2665_v57 = vsel %vm1006_vm8, %v2523_v27, %v10570_v30  ;;  %v2393_v11 = vsel %vm662_vm3, %v2378_v51, %v2380_v63  ;;  %v2394_v14 = vsel %vm662_vm3, %v2380_v63, %v2382_v28  ;;  %v2415_v27 = vsel %vm685_vm5, %v10544_v44, %v2402_v31 }
 0x607   : > { %2778 = vmatprep.subr.bf16.mxu0 %v2665_v57  ;;  %2588 = vrot.lane.b32.xlu0 %v2366_v4, %s9078_s22  ;;  %v8511_v4 = vunpack.i.h.bf16 %v10483_v54  ;;  %v8516_v31 = vunpack.i.h.bf16 %v10475_v17  ;;  %v8541_v17 = vunpack.i.h.bf16 %v10491_v49 }
 0x608   : > { %2779 = vmatpush1.bf16.msra.mxu0 %v2664_v38 }
 0x609   : > { %v10579_v18 = vpop.permute.xlu0 %2445  ;;  %v10581_v41 = vpop.permute.xlu1 %2423 }
 0x60a   : > { %2586 = vrot.lane.b32.xlu1 %v2365_v3, %s9078_s22 }
 0x60b   : > { %2602 = vrot.lane.b32.xlu0 %v2393_v11, %s9078_s22 }
 0x60d   : > { %v2320_v19 = vpop.permute.xlu0 %2319  ;;  %v2298_v59 = vpop.permute.xlu1 %2297 }
 0x60e   : > { %2604 = vrot.lane.b32.xlu1 %v2394_v14, %s9078_s22  ;;  %v2306_v11 = vsel %vm566_vm2, %v8511_v4, %v2298_v59 }
 0x60f   : > { %2618 = vrot.lane.b32.xlu0 %v2415_v27, %s9078_s22 }
 0x611   : > { %v2386_v52 = vpop.permute.xlu0 %2385  ;;  %v2342_v57 = vpop.permute.xlu1 %2341 }
 0x612   : > { %2620 = vrot.lane.b32.xlu1 %v2416_v36, %s9078_s22  ;;  %v2328_v36 = vsel %vm589_vm4, %v8516_v31, %v2320_v19  ;;  %v2350_v4 = vsel %vm612_vm6, %v8521_v53, %v2342_v57 }
 0x615   : > { %v10595_v25 = vpop.permute.xlu0 %2429  ;;  %v2360_v51 = vpop.permute.xlu1 %2359 }
 0x616   : > { %2592 = vrot.lane.b32.xlu0 %v2360_v51, %s9078_s22 }
 0x619   : > { %v2531_v28 = vpop.permute.xlu0 %2530  ;;  %v2408_v63 = vpop.permute.xlu1 %2407 }
 0x61a   : > { %2608 = vrot.lane.b32.xlu0 %v2386_v52, %s9078_s22  ;;  %v2667_v49 = vsel %vm1006_vm8, %v8541_v17, %v2531_v28  ;;  %v8535_v17 = vunpack.i.l.bf16 %v10485_v60 }
 0x61d   : > { %v10600_v38 = vpop.permute.xlu0 %2451  ;;  %v2322_v3 = vpop.permute.xlu1 %2321 }
 0x61e   : > { %2544 = vrot.lane.b32.xlu0 %v2306_v11, %s9078_s22  ;;  %v2330_v53 = vsel %vm589_vm4, %v2322_v3, %v10499_v5  ;;  %v2329_v31 = vsel %vm589_vm4, %v2320_v19, %v2322_v3  ;;  %v2438_v3 = vsel %vm708_vm7, %v10581_v41, %v10536_v1 }
 0x621   : > { %v2300_v14 = vpop.permute.xlu0 %2299  ;;  %v2388_v27 = vpop.permute.xlu1 %2387 }
 0x622   : > { %2560 = vrot.lane.b32.xlu0 %v2328_v36, %s9078_s22  ;;  %v2307_v34 = vsel %vm566_vm2, %v2298_v59, %v2300_v14  ;;  %v2308_v59 = vsel %vm566_vm2, %v2300_v14, %v10501_v42 }
 0x623   : > { %2546 = vrot.lane.b32.xlu1 %v2307_v34, %s9078_s22 }
 0x625   : > { %v10610_v54 = vpop.permute.xlu1 %2431  ;;  %v2344_v42 = vpop.permute.xlu0 %2343 }
 0x626   : > { %2576 = vrot.lane.b32.xlu0 %v2350_v4, %s9078_s22  ;;  %v2352_v14 = vsel %vm612_vm6, %v2344_v42, %v10507_v16 }
 0x627   : > { %2616 = vrot.lane.b32.xlu1 %v10544_v44, %s9078_s22  ;;  %v2417_v44 = vsel %vm685_vm5, %v10529_v48, %v8530_v12 }
 0x629   : > { %v10617_v11 = vpop.permute.xlu1 %2532  ;;  %v2362_v36 = vpop.permute.xlu0 %2361 }
 0x62a   : > { %2548 = vrot.lane.b32.xlu0 %v2308_v59, %s9078_s22  ;;  %v2668_v34 = vsel %vm1006_vm8, %v2531_v28, %v10617_v11  ;;  %v8531_v28 = vunpack.i.h.bf16 %v10495_v45  ;;  %v2367_v19 = vsel %vm631_vm1, %v2360_v51, %v2362_v36  ;;  %v2437_v45 = vsel %vm708_vm7, %v10548_v24, %v10581_v41 }
 0x62b   : > { %2780 = vmatprep.subr.bf16.mxu0 %v2668_v34  ;;  %2564 = vrot.lane.b32.xlu1 %v2330_v53, %s9078_s22  ;;  %v2396_v51 = vsel %vm662_vm3, %v2386_v52, %v2388_v27  ;;  %v2397_v41 = vsel %vm662_vm3, %v2388_v27, %v10505_v46  ;;  %v2439_v52 = vsel %vm708_vm7, %v10536_v1, %v8535_v17  ;;  %v8827_v46 = vld [vmem:[#allocation8 + $0x34] ss:$12 sps:$4 sm:$0xff]   ;;  %v8536_v1 = vunpack.i.h.bf16 %v10485_v60 }
 0x62c   : > { %2781 = vmatpush1.bf16.msra.mxu0 %v2667_v49  ;;  %v2420_v48 = vsel %vm685_vm5, %v10517_v62, %v8531_v28  ;;  %2810 = vmatprep.mubr.bf16.mxu0 %v8827_v46  ;;  %v2459_v60 = vsel %vm731_vm0, %v10553_v23, %v10579_v18  ;;  %v8545_v49 = vunpack.i.l.bf16 %v10497_v58  ;;  %v8546_v28 = vunpack.i.h.bf16 %v10497_v58 }
 0x62d   : > { %v2410_v4 = vpop.permute.xlu0 %2409  ;;  %v2454_v59 = vpop.permute.xlu1 %2453  ;;  %2916 = vmatprep.mubr.bf16.mxu1 %v8827_v46  ;;  %v7754_v46 = vld [vmem:[%s14347_s5 + $0x58] sm:$0xff] }
 0x62e   : > { %2622 = vrot.lane.b32.xlu0 %v2417_v44, %s9078_s22  ;;  %v2462_v12 = vsel %vm731_vm0, %v10600_v38, %v2454_v59 }
 0x62f   : > { %2558 = vrot.lane.b32.xlu1 %v10522_v6, %s9078_s22  ;;  %v2351_v6 = vsel %vm612_vm6, %v2342_v57, %v2344_v42  ;;  %v2368_v57 = vsel %vm631_vm1, %v2362_v36, %v10511_v47  ;;  %v2418_v47 = vsel %vm685_vm5, %v2408_v63, %v2410_v4  ;;  %v7737_v42 = vld [vmem:[%s14347_s5 + $0x20] sm:$0xff]  ;;  %v2464_v36 = vsel %vm731_vm0, %v10515_v55, %v8546_v28 }
 0x632   : > { %2562 = vrot.lane.b32.xlu0 %v2329_v31, %s9078_s22 }
 0x633   : > { %2580 = vrot.lane.b32.xlu1 %v2352_v14, %s9078_s22  ;;  %v2463_v14 = vsel %vm731_vm0, %v2454_v59, %v10515_v55  ;;  %v7740_v55 = vld [vmem:[%s14347_s5 + $0x38] sm:$0xff]  ;;  %v7751_v59 = vld [vmem:[%s14347_s5 + $0x40] sm:$0xff] }
 0x636   : > { %2624 = vrot.lane.b32.xlu0 %v2408_v63, %s9078_s22  ;;  %v2440_v63 = vsel %vm708_vm7, %v10595_v25, %v10610_v54 }
 0x637   : > { %2630 = vrot.lane.b32.xlu1 %v2420_v48, %s9078_s22 }
 0x638   : > { %v10700_v34 = vpop.permute.xlu0 %2550 }
 0x63a   : > { %2578 = vrot.lane.b32.xlu0 %v2351_v6, %s9078_s22  ;;  %v7738_v6 = vld [vmem:[%s14347_s5 + $0x28] sm:$0xff] }
 0x63b   : > { %2594 = vrot.lane.b32.xlu1 %v2367_v19, %s9078_s22 }
 0x63e   : > { %2634 = vrot.lane.b32.xlu0 %v2437_v45, %s9078_s22 }
 0x63f   : > { %2636 = vrot.lane.b32.xlu1 %v2438_v3, %s9078_s22 }
 0x642   : > { %2596 = vrot.lane.b32.xlu0 %v2368_v57, %s9078_s22 }
 0x643   : > { %2610 = vrot.lane.b32.xlu1 %v2396_v51, %s9078_s22 }
 0x646   : > { %2566 = vrot.lane.b32.xlu0 %v10499_v5, %s9078_s22  ;;  %v2419_v5 = vsel %vm685_vm5, %v2410_v4, %v10517_v62  ;;  %v2442_v62 = vsel %vm708_vm7, %v10509_v26, %v8536_v1  ;;  %v7753_v1 = vld [vmem:[%s14347_s5 + $0x50] sm:$0xff] }
 0x647   : > { %2632 = vrot.lane.b32.xlu1 %v10548_v24, %s9078_s22  ;;  %v10678_v24 = vpop.permute.xlu1 %2598 }
 0x64a   : > { %2612 = vrot.lane.b32.xlu0 %v2397_v41, %s9078_s22 }
 0x64b   : > { %2626 = vrot.lane.b32.xlu1 %v2418_v47, %s9078_s22  ;;  %v10686_v27 = vpop.permute.xlu1 %2542  ;;  %v2666_v47 = vsel %vm1006_vm8, %v10570_v30, %v10538_v21  ;;  %v7752_v21 = vld [vmem:[%s14347_s5 + $0x48] sm:$0xff] }
 0x64e   : > { %2638 = vrot.lane.b32.xlu0 %v2439_v52, %s9078_s22 }
 0x64f   : > { %2574 = vrot.lane.b32.xlu1 %v10524_v50, %s9078_s22  ;;  %v2441_v50 = vsel %vm708_vm7, %v10610_v54, %v10509_v26  ;;  %v2460_v54 = vsel %vm731_vm0, %v10579_v18, %v10532_v10 }
 0x650   : > { %v2591_v53 = vpop.permute.xlu0 %2590 }
 0x652   : > { %2628 = vrot.lane.b32.xlu0 %v2419_v5, %s9078_s22 }
 0x653   : > { %2642 = vrot.lane.b32.xlu1 %v2440_v63, %s9078_s22 }
 0x655   : > { %v10721_v44 = vpop.permute.xlu0 %2606 }
 0x656   : > { %2640 = vrot.lane.b32.xlu0 %v10595_v25, %s9078_s22  ;;  %v10703_v25 = vpop.permute.xlu1 %2614 }
 0x657   : > { %2646 = vrot.lane.b32.xlu1 %v2442_v62, %s9078_s22 }
 0x65a   : > { %2644 = vrot.lane.b32.xlu0 %v2441_v50, %s9078_s22 }
 0x65b   : > { %2650 = vrot.lane.b32.xlu1 %v2459_v60, %s9078_s22 }
 0x65d   : > { %v2537_v31 = vpop.permute.xlu0 %2536 }
 0x65e   : > { %2582 = vrot.lane.b32.xlu0 %v10507_v16, %s9078_s22 }
 0x65f   : > { %2648 = vrot.lane.b32.xlu1 %v10553_v23, %s9078_s22  ;;  %v2461_v23 = vsel %vm731_vm0, %v10532_v10, %v8545_v49 }
 0x660   : > { %v10709_v26 = vpop.permute.xlu1 %2584 }
 0x662   : > { %2652 = vrot.lane.b32.xlu0 %v2460_v54, %s9078_s22 }
 0x663   : > { %2658 = vrot.lane.b32.xlu1 %v2462_v12, %s9078_s22 }
 0x664   : > { %v10719_v16 = vpop.permute.xlu1 %2600 }
 0x666   : > { %2654 = vrot.lane.b32.xlu0 %v2461_v23, %s9078_s22 }
 0x667   : > { %2656 = vrot.lane.b32.xlu1 %v10600_v38, %s9078_s22  ;;  %v7739_v38 = vld [vmem:[%s14347_s5 + $0x30] sm:$0xff] }
 0x668   : > { %v10728_v18 = vpop.permute.xlu1 %2552 }
 0x66a   : > { %2660 = vrot.lane.b32.xlu0 %v2463_v14, %s9078_s22 }
 0x66b   : > { %2472 = vperm.xlu1 %8466, %v7737_v42  }
 0x66c   : > { %v10737_v10 = vpop.permute.xlu1 %2568 }
 0x66d   : > { %v2539_v48 = vpop.permute.xlu0 %2538 }
 0x66e   : > { %2662 = vrot.lane.b32.xlu0 %v2464_v36, %s9078_s22  ;;  %v2670_v3 = vsel %vm1006_vm8, %v2537_v31, %v2539_v48 }
 0x66f   : > { %2482 = vperm.xlu1 %8466, %v7739_v38  }
 0x670   : > { %v10748_v19 = vpop.permute.xlu1 %2540 }
 0x671   : > { %v10750_v58 = vpop.permute.xlu0 %2556  ;;  %v2671_v45 = vsel %vm1006_vm8, %v2539_v48, %v10748_v19 }
 0x672   : > { %2477 = vperm.xlu0 %8465, %v7738_v6   ;;  %2782 = vmatprep.subr.bf16.mxu0 %v2671_v45 }
 0x673   : > { %8553 = vrot.lane.b32.xlu1 %v14454_v8, %s9074_s21  ;;  %2783 = vmatpush1.bf16.msra.mxu0 %v2670_v3 }
 0x674   : > { %v2555_v51 = vpop.permute.xlu1 %2554 }
 0x675   : > { %v10760_v57 = vpop.permute.xlu0 %2572  ;;  %v2677_v38 = vsel %vm1006_vm8, %v2555_v51, %v10750_v58  ;;  %v2676_v6 = vsel %vm1006_vm8, %v10728_v18, %v2555_v51 }
 0x676   : > { %2487 = vperm.xlu0 %8465, %v7740_v55  }
 0x677   : > { %8563 = vrot.lane.b32.xlu1 %v14454_v8, %s9073_s19 }
 0x678   : > { %v2571_v52 = vpop.permute.xlu1 %2570 }
 0x679   : > { %v10764_v4 = vpop.permute.xlu0 %2588  ;;  %v2682_v18 = vsel %vm1006_vm8, %v10737_v10, %v2571_v52 }
 0x67a   : > { %8548 = vrot.lane.b32.xlu0 %v14454_v8, %s9072_s18  ;;  %v2690_v41 = vsel %vm1006_vm8, %v10764_v4, %v2591_v53 }
 0x67b   : > { %7924 = vmatprep.subr.bf16.mxu1 %v2690_v41  ;;  %8573 = vrot.lane.b32.xlu1 %v14454_v8, %s9077_s27 }
 0x67c   : > { %7925 = vmatpush3.bf16.msra.mxu1 %v2666_v47  ;;  %v2587_v5 = vpop.permute.xlu1 %2586  ;;  %v2683_v47 = vsel %vm1006_vm8, %v2571_v52, %v10760_v57 }
 0x67d   : > { %v10775_v17 = vpop.permute.xlu0 %2602 }
 0x67e   : > { %8558 = vrot.lane.b32.xlu0 %v14454_v8, %s9076_s15 }
 0x67f   : > { %8578 = vrot.lane.b32.xlu1 %v14454_v8, %s9078_s22 }
 0x680   : > { %v2605_v62 = vpop.permute.xlu1 %2604 }
 0x681   : > { %v10788_v30 = vpop.permute.xlu0 %2618 }
 0x682   : > { %8568 = vrot.lane.b32.xlu0 %v14454_v8, %s9075_s24 }
 0x683   : > { %8583 = vrot.lane.b32.xlu1 %v14454_v8, %s9070_s17 }
 0x684   : > { %v10801_v53 = vpop.permute.xlu1 %2620 }
 0x686   : > { %3241 = vperm.xlu0 %8465, %v7752_v21  }
 0x687   : > { %3236 = vperm.xlu1 %8466, %v7751_v59  }
 0x688   : > { %v2593_v63 = vpop.permute.xlu0 %2592 }
 0x68a   : > { %3251 = vperm.xlu0 %8465, %v7754_v46  }
 0x68b   : > { %3246 = vperm.xlu1 %8466, %v7753_v1  }
 0x68c   : > { %v10799_v50 = vpop.permute.xlu0 %2608 }
 0x690   : > { %v2545_v60 = vpop.permute.xlu0 %2544 }
 0x694   : > { %v2561_v54 = vpop.permute.xlu0 %2560 }
 0x695   : > { %v2547_v12 = vpop.permute.xlu1 %2546 }
 0x696   : > { %v2673_v28 = vsel %vm1006_vm8, %v2545_v60, %v2547_v12 }
 0x698   : > { %v2577_v49 = vpop.permute.xlu0 %2576 }
 0x699   : > { %v10803_v23 = vpop.permute.xlu1 %2616 }
 0x69c   : > { %v10805_v42 = vpop.permute.xlu0 %2548 }
 0x69d   : > { %v10807_v31 = vpop.permute.xlu1 %2564  ;;  %v2674_v14 = vsel %vm1006_vm8, %v2547_v12, %v10805_v42 }
 0x69e   : > { %2784 = vmatprep.subr.bf16.mxu0 %v2674_v14 }
 0x69f   : > { %2785 = vmatpush1.bf16.msra.mxu0 %v2673_v28  ;;  %v2688_v28 = vsel %vm1006_vm8, %v10709_v26, %v2587_v5  ;;  %v2695_v26 = vsel %vm1006_vm8, %v10775_v17, %v2605_v62 }
 0x6a0   : > { %v2623_v48 = vpop.permute.xlu0 %2622  ;;  %2786 = vmatprep.subr.bf16.mxu0 %v2677_v38 }
 0x6a1   : > { %v10814_v36 = vpop.permute.xlu1 %2558 }
 0x6a3   : > { %2787 = vmatpush1.bf16.msra.mxu0 %v2676_v6 }
 0x6a4   : > { %v2563_v45 = vpop.permute.xlu0 %2562 }
 0x6a5   : > { %v10818_v3 = vpop.permute.xlu1 %2580  ;;  %v2680_v55 = vsel %vm1006_vm8, %v2563_v45, %v10807_v31  ;;  %v2679_v41 = vsel %vm1006_vm8, %v2561_v54, %v2563_v45  ;;  %v2689_v54 = vsel %vm1006_vm8, %v2587_v5, %v10764_v4  ;;  %v2669_v4 = vsel %vm1006_vm8, %v10617_v11, %v10519_v7 }
 0x6a6   : > { %2788 = vmatprep.subr.bf16.mxu0 %v2680_v55  ;;  %v2696_v5 = vsel %vm1006_vm8, %v2605_v62, %v10721_v44  ;;  %v2672_v7 = vsel %vm1006_vm8, %v10748_v19, %v10686_v27  ;;  %v2701_v27 = vsel %vm1006_vm8, %v10788_v30, %v10801_v53  ;;  %v2702_v19 = vsel %vm1006_vm8, %v10801_v53, %v2623_v48 }
 0x6a7   : > { %2789 = vmatpush1.bf16.msra.mxu0 %v2679_v41 }
 0x6a8   : > { %v10825_v21 = vpop.permute.xlu0 %2624  ;;  %2790 = vmatprep.subr.bf16.mxu0 %v2683_v47 }
 0x6a9   : > { %v2631_v59 = vpop.permute.xlu1 %2630 }
 0x6ab   : > { %2791 = vmatpush1.bf16.msra.mxu0 %v2682_v18 }
 0x6ac   : > { %v2579_v51 = vpop.permute.xlu0 %2578 }
 0x6ad   : > { %v2595_v46 = vpop.permute.xlu1 %2594  ;;  %v2686_v1 = vsel %vm1006_vm8, %v2579_v51, %v10818_v3  ;;  %v2685_v60 = vsel %vm1006_vm8, %v2577_v49, %v2579_v51 }
 0x6ae   : > { %2792 = vmatprep.subr.bf16.mxu0 %v2686_v1  ;;  %v2691_v49 = vsel %vm1006_vm8, %v2593_v63, %v2595_v46  ;;  %v2694_v63 = vsel %vm1006_vm8, %v10719_v16, %v10775_v17  ;;  %v2675_v16 = vsel %vm1006_vm8, %v10805_v42, %v10700_v34  ;;  %v2678_v34 = vsel %vm1006_vm8, %v10750_v58, %v10814_v36 }
 0x6af   : > { %2793 = vmatpush1.bf16.msra.mxu0 %v2685_v60 }
 0x6b0   : > { %v2635_v12 = vpop.permute.xlu0 %2634  ;;  %2794 = vmatprep.subr.bf16.mxu0 %v2689_v54 }
 0x6b1   : > { %v2637_v14 = vpop.permute.xlu1 %2636 }
 0x6b2   : > { %v2707_v58 = vsel %vm1006_vm8, %v2635_v12, %v2637_v14 }
 0x6b3   : > { %2795 = vmatpush1.bf16.msra.mxu0 %v2688_v28  ;;  %v8828_v28 = vld [vmem:[#allocation8 + $0x4c] ss:$12 sps:$4 sm:$0xff]  }
 0x6b4   : > { %v2597_v10 = vpop.permute.xlu0 %2596 }
 0x6b5   : > { %v2611_v52 = vpop.permute.xlu1 %2610  ;;  %v2692_v38 = vsel %vm1006_vm8, %v2595_v46, %v2597_v10  ;;  %v2693_v6 = vsel %vm1006_vm8, %v2597_v10, %v10678_v24 }
 0x6b6   : > { %2796 = vmatprep.subr.bf16.mxu0 %v2692_v38  ;;  %7926 = vmatprep.subr.bf16.mxu1 %v2693_v6  ;;  %v2697_v62 = vsel %vm1006_vm8, %v10799_v50, %v2611_v52  ;;  %v2700_v50 = vsel %vm1006_vm8, %v10803_v23, %v10788_v30 }
 0x6b7   : > { %2797 = vmatpush1.bf16.msra.mxu0 %v2691_v49  ;;  %7927 = vmatpush3.bf16.msra.mxu1 %v2669_v4  ;;  %v8830_v4 = vld [vmem:[#allocation8 + $0x48] ss:$12 sps:$4 sm:$0xff]  }
 0x6b8   : > { %v2567_v45 = vpop.permute.xlu0 %2566  ;;  %2798 = vmatprep.subr.bf16.mxu0 %v2695_v26  ;;  %7928 = vmatprep.subr.bf16.mxu1 %v2696_v5 }
 0x6b9   : > { %v2633_v24 = vpop.permute.xlu1 %2632  ;;  %v2681_v48 = vsel %vm1006_vm8, %v10807_v31, %v2567_v45 }
 0x6bb   : > { %2799 = vmatpush1.bf16.msra.mxu0 %v2694_v63  ;;  %7929 = vmatpush3.bf16.msra.mxu1 %v2672_v7 }
 0x6bc   : > { %v2613_v11 = vpop.permute.xlu0 %2612 }
 0x6bd   : > { %v2627_v55 = vpop.permute.xlu1 %2626  ;;  %v2698_v41 = vsel %vm1006_vm8, %v2611_v52, %v2613_v11  ;;  %v2699_v44 = vsel %vm1006_vm8, %v2613_v11, %v10703_v25 }
 0x6be   : > { %2800 = vmatprep.subr.bf16.mxu0 %v2698_v41  ;;  %7930 = vmatprep.subr.bf16.mxu1 %v2699_v44  ;;  %v2703_v30 = vsel %vm1006_vm8, %v10825_v21, %v2627_v55  ;;  %v8832_v41 = vld [vmem:[#allocation8 + $0x50] ss:$12 sps:$4 sm:$0xff]  }
 0x6bf   : > { %2801 = vmatpush1.bf16.msra.mxu0 %v2697_v62  ;;  %7931 = vmatpush3.bf16.msra.mxu1 %v2675_v16 }
 0x6c0   : > { %v2639_v17 = vpop.permute.xlu0 %2638  ;;  %2802 = vmatprep.subr.bf16.mxu0 %v2701_v27  ;;  %7932 = vmatprep.subr.bf16.mxu1 %v2702_v19 }
 0x6c1   : > { %v2575_v25 = vpop.permute.xlu1 %2574  ;;  %v2708_v23 = vsel %vm1006_vm8, %v2637_v14, %v2639_v17  ;;  %v8825_v14 = vld [vmem:[#allocation8 + $0x30] ss:$12 sps:$4 sm:$0xff]  }
 0x6c2   : > { %v2684_v31 = vsel %vm1006_vm8, %v10760_v57, %v2575_v25 }
 0x6c3   : > { %2803 = vmatpush1.bf16.msra.mxu0 %v2700_v50  ;;  %7933 = vmatpush3.bf16.msra.mxu1 %v2678_v34 }
 0x6c4   : > { %v2629_v42 = vpop.permute.xlu0 %2628 }
 0x6c5   : > { %v2643_v47 = vpop.permute.xlu1 %2642  ;;  %v2704_v18 = vsel %vm1006_vm8, %v2627_v55, %v2629_v42  ;;  %v2705_v53 = vsel %vm1006_vm8, %v2629_v42, %v2631_v59  ;;  %v2706_v59 = vsel %vm1006_vm8, %v2633_v24, %v2635_v12  ;;  %v8831_v24 = vld [vmem:[#allocation8 + $0x38] ss:$12 sps:$4 sm:$0xff]  }
 0x6c6   : > { %2804 = vmatprep.subr.bf16.mxu0 %v2704_v18  ;;  %7934 = vmatprep.subr.bf16.mxu1 %v2705_v53 }
 0x6c7   : > { %2805 = vmatpush1.bf16.msra.mxu0 %v2703_v30  ;;  %7935 = vmatpush3.bf16.msra.mxu1 %v2681_v48 }
 0x6c8   : > { %v2641_v36 = vpop.permute.xlu0 %2640  ;;  %2806 = vmatprep.subr.bf16.mxu0 %v2707_v58  ;;  %7936 = vmatprep.subr.bf16.mxu1 %v2708_v23 }
 0x6c9   : > { %v2647_v51 = vpop.permute.xlu1 %2646  ;;  %v2709_v54 = vsel %vm1006_vm8, %v2641_v36, %v2643_v47 }
 0x6cb   : > { %2807 = vmatpush1.bf16.msra.mxu0 %v2706_v59  ;;  %7937 = vmatpush3.bf16.msra.mxu1 %v2684_v31 }
 0x6cc   : > { %v2645_v46 = vpop.permute.xlu0 %2644 }
 0x6cd   : > { %v2651_v1 = vpop.permute.xlu1 %2650  ;;  %v2710_v21 = vsel %vm1006_vm8, %v2643_v47, %v2645_v46  ;;  %v2711_v60 = vsel %vm1006_vm8, %v2645_v46, %v2647_v51 }
 0x6ce   : > { %2808 = vmatprep.subr.bf16.mxu0 %v2710_v21  ;;  %7938 = vmatprep.subr.bf16.mxu1 %v2711_v60 }
 0x6cf   : > { %2809 = vmatpush1.bf16.msra.mxu0 %v2709_v54 }
 0x6d0   : > { %v2583_v10 = vpop.permute.xlu0 %2582 }
 0x6d1   : > { %v2687_v12 = vsel %vm1006_vm8, %v10818_v3, %v2583_v10  ;;  %v2649_v57 = vpop.permute.xlu1 %2648 }
 0x6d2   : > { %2811 = vmatmul.mubr.bf16.vlgmr.msra.gmra.mrb[28].mxu0 %v8825_v14  ;;  %7939 = vmatpush3.bf16.msra.mxu1 %v2687_v12  ;;  %v2712_v49 = vsel %vm1006_vm8, %v2649_v57, %v2651_v1 }
 0x6d3   : > { %2820 = vmatprep.mubr.bf16.mxu0 %v8828_v28 }
 0x6d4   : > { %v2653_v52 = vpop.permute.xlu0 %2652 }
 0x6d5   : > { %2917 = vmatmul.mubr.bf16.vlgmr.msra.gmra.mrb[48].mxu1 %v8825_v14  ;;  %v2659_v38 = vpop.permute.xlu1 %2658  ;;  %v2713_v6 = vsel %vm1006_vm8, %v2651_v1, %v2653_v52 }
 0x6d6   : > { %2831 = vmatprep.subr.bf16.mxu0 %v2713_v6  ;;  %2924 = vmatprep.mubr.bf16.mxu1 %v8828_v28 }
 0x6d7   : > { %2832 = vmatpush1.bf16.msra.mxu0 %v2712_v49 }
 0x6d8   : > { %v2655_v26 = vpop.permute.xlu0 %2654 }
 0x6d9   : > { %v2714_v5 = vsel %vm1006_vm8, %v2653_v52, %v2655_v26  ;;  %v2657_v3 = vpop.permute.xlu1 %2656 }
 0x6da   : > { %2821 = vmatmul.mubr.bf16.gmra.mrb[32].mxu0 %v8830_v4  ;;  %8161 = vmatprep.subr.bf16.mxu1 %v2714_v5  ;;  %v2715_v7 = vsel %vm1006_vm8, %v2657_v3, %v2659_v38 }
 0x6db   : > { %8162 = vmatpush3.bf16.msra.mxu1 %v2714_v5  ;;  %2863 = vmatprep.mubr.bf16.mxu0 %v14454_v8 }
 0x6dc   : > { %v2661_v45 = vpop.permute.xlu0 %2660 }
 0x6dd   : > { %2925 = vmatmul.mubr.bf16.gmra.mrb[52].mxu1 %v8830_v4  ;;  %v2716_v63 = vsel %vm1006_vm8, %v2659_v38, %v2661_v45 }
 0x6de   : > { %2833 = vmatprep.subr.bf16.mxu0 %v2716_v63  ;;  %8165 = vmatprep.mubr.msk.bf16.mxu1 %vm1115_vm9, %v8831_v24 }
 0x6df   : > { %2834 = vmatpush1.bf16.msra.mxu0 %v2715_v7 }
 0x6e0   : > { %v2663_v11 = vpop.permute.xlu0 %2662 }
 0x6e1   : > { %v2717_v55 = vsel %vm1006_vm8, %v2661_v45, %v2663_v11 }
 0x6e2   : > { %7747 = vmatmul.mubr.msk.bf16.vlgmr.msra.gmra.mrb[28].mxu0 %vm1115_vm9, %v8831_v24  ;;  %8163 = vmatprep.subr.bf16.mxu1 %v2717_v55 }
 0x6e3   : > { %8164 = vmatpush3.bf16.msra.mxu1 %v2717_v55  ;;  %2873 = vmatprep.mubr.bf16.mxu0 %v14454_v8 }
 0x6e6   : > { %8166 = vmatmul.mubr.msk.bf16.vlgmr.msra.gmra.mrb[56].mxu1 %vm1115_vm9, %v8832_v41 }
 0x6ea   : > { %7748 = vmatmul.mubr.msk.bf16.gmra.mrb[32].mxu0 %vm1115_vm9, %v8832_v41  ;;  %v2473_v50 = vpop.permute.xlu1 %2472 }
 0x6ee   : > { %v2483_v36 = vpop.permute.xlu1 %2482 }
 0x6f1   : > { %v2478_v18 = vpop.permute.xlu0 %2477 }
 0x6f5   : > { %v2488_v60 = vpop.permute.xlu0 %2487 }
 0x7a8   : > { %v7940_v44 = vpop.f32.mrb[48].mxu1 }
 0x7a9   : > { %v7941_v62 = vpop.f32.mrb[49].mxu1 }
 0x7aa   : > { %v7942_v16 = vadd.f32 %v7941_v62, %v7940_v44  ;;  %v7943_v27 = vpop.f32.mrb[50].mxu1 }
 0x7ab   : > { %v7944_v19 = vpop.f32.mrb[51].mxu1 }
 0x7ac   : > { %v7945_v17 = vadd.f32 %v7944_v19, %v7943_v27  ;;  %v2919_v10 = vadd.f32 %v7942_v16, %v2473_v50 }
 0x7ae   : > { %v2922_v26 = vadd.f32 %v7945_v17, %v2478_v18 }
 0x7b0   : > { %v7946_v25 = vpop.f32.mrb[52].mxu1 }
 0x7b1   : > { %v7947_v34 = vpop.f32.mrb[53].mxu1 }
 0x7b2   : > { %v7948_v42 = vadd.f32 %v7947_v34, %v7946_v25  ;;  %v7949_v47 = vpop.f32.mrb[54].mxu1 }
 0x7b3   : > { %v7950_v53 = vpop.f32.mrb[55].mxu1 }
 0x7b4   : > { %v7951_v48 = vadd.f32 %v7950_v53, %v7949_v47  ;;  %v2927_v21 = vadd.f32 %v7948_v42, %v2483_v36 }
 0x7b5   : > { %v2865_v30 = vpop.f32.mrb[28].mxu0 }
 0x7b6   : > { %v8257_v58 = vadd.f32 %v2865_v30, %v2473_v50  ;;  %v2867_v23 = vpop.f32.mrb[29].mxu0  ;;  %v2930_v38 = vadd.f32 %v7951_v48, %v2488_v60 }
 0x7b7   : > { %v8258_v51 = vadd.f32 %v2867_v23, %v2473_v50  ;;  %v2869_v59 = vpop.f32.mrb[30].mxu0 }
 0x7b8   : > { %v2982_v31 = vmax.f32 %v8257_v58, 0.0  ;;  %v8259_v46 = vadd.f32 %v2869_v59, %v2478_v18  ;;  %v2871_v1 = vpop.f32.mrb[31].mxu0 }
 0x7b9   : > { %v2983_v54 = vmax.f32 %v8258_v51, 0.0  ;;  %v8260_v14 = vadd.f32 %v2871_v1, %v2478_v18  ;;  %v8167_v28 = vpop.f32.mrb[56].mxu1 }
 0x7ba   : > { %v2985_v12 = vmax.f32 %v8259_v46, 0.0  ;;  %v2976_v57 = vadd.f32 %v8167_v28, %v2927_v21  ;;  %v2967_v52 = vpop.f32.mrb[57].mxu1  ;;  %v2994_v5 = vmul.f32 %v2982_v31, %v9883_v22 }
 0x7bb   : > { %v2986_v6 = vmax.f32 %v8260_v14, 0.0  ;;  %v2968_v49 = vadd.f32 %v2967_v52, %v2919_v10  ;;  %v8168_v4 = vpop.f32.mrb[58].mxu1  ;;  %v2995_v7 = vmul.f32 %v2983_v54, %v9886_v43 }
 0x7bc   : > { %v2997_v3 = vmul.f32 %v2985_v12, %v9883_v22  ;;  %v2990_v45 = vmax.f32 %v2976_v57, 0.0  ;;  %v2979_v24 = vadd.f32 %v8168_v4, %v2930_v38  ;;  %v2970_v63 = vpop.f32.mrb[59].mxu1  ;;  %v10958_v57 = vpop.permute.xlu0 %8548 }
 0x7bd   : > { %v2998_v11 = vmul.f32 %v2986_v6, %v9886_v43  ;;  %v2984_v55 = vmax.f32 %v2968_v49, 0.0  ;;  %v2971_v41 = vadd.f32 %v2970_v63, %v2922_v26  ;;  %v2875_v44 = vpop.f32.mrb[32].mxu0 }
 0x7be   : > { %v3006_v62 = vpack.c.bf16 %v2997_v3, %v2994_v5  ;;  %v2993_v16 = vmax.f32 %v2979_v24, 0.0  ;;  %v8261_v27 = vadd.f32 %v2875_v44, %v2483_v36  ;;  %v2877_v19 = vpop.f32.mrb[33].mxu0  ;;  %v3002_v42 = vmul.f32 %v2990_v45, %v9849_v29 }
 0x7bf   : > { %v3007_v25 = vpack.c.bf16 %v2998_v11, %v2995_v7  ;;  %v2987_v17 = vmax.f32 %v2971_v41, 0.0  ;;  %v8262_v50 = vadd.f32 %v2877_v19, %v2483_v36  ;;  %v2879_v34 = vpop.f32.mrb[34].mxu0  ;;  %v2996_v30 = vmul.f32 %v2984_v55, %v9849_v29 }
 0x7c0   : > { %v3005_v47 = vmul.f32 %v2993_v16, %v9849_v29  ;;  %v2988_v18 = vmax.f32 %v8261_v27, 0.0  ;;  %v8263_v53 = vadd.f32 %v2879_v34, %v2488_v60  ;;  %v2881_v48 = vpop.f32.mrb[35].mxu0  ;;  %v10964_v38 = vpop.permute.xlu0 %8558 }
 0x7c1   : > { %v2999_v58 = vmul.f32 %v2987_v17, %v9849_v29  ;;  %v2989_v23 = vmax.f32 %v8262_v50, 0.0  ;;  %v8264_v51 = vadd.f32 %v2881_v48, %v2488_v60  ;;  %v10950_v60 = vpop.permute.xlu1 %8553 }
 0x7c2   : > { %v3011_v59 = vpack.c.bf16 %v3005_v47, %v3002_v42  ;;  %v2991_v31 = vmax.f32 %v8263_v53, 0.0  ;;  %v3000_v36 = vmul.f32 %v2988_v18, %v9883_v22 }
 0x7c3   : > { %v3008_v46 = vpack.c.bf16 %v2999_v58, %v2996_v30  ;;  %v2992_v1 = vmax.f32 %v8264_v51, 0.0  ;;  %v3001_v54 = vmul.f32 %v2989_v23, %v9886_v43 }
 0x7c4   : > { %v3003_v21 = vmul.f32 %v2991_v31, %v9883_v22  ;;  %3087 = vrot.lane.b32.xlu0 %v3011_v59, %s9074_s21  ;;  %3065 = vrot.lane.b32.xlu1 %v3011_v59, %s9072_s18  ;;  %v8569_v49 = vpop.permute.xlu0 %8568 }
 0x7c5   : > { %v3004_v14 = vmul.f32 %v2992_v1, %v9886_v43  ;;  %v8564_v12 = vpop.permute.xlu1 %8563  ;;  %v8571_v47 = vunpack.i.h.bf16 %v8569_v49  ;;  %v8570_v1 = vunpack.i.l.bf16 %v8569_v49 }
 0x7c6   : > { %v3009_v28 = vpack.c.bf16 %v3003_v21, %v3000_v36  ;;  %v8566_v19 = vunpack.i.h.bf16 %v8564_v12  ;;  %v8565_v23 = vunpack.i.l.bf16 %v8564_v12 }
 0x7c7   : > { %v3010_v10 = vpack.c.bf16 %v3004_v14, %v3001_v54 }
 0x7c8   : > { %3153 = vrot.lane.b32.xlu0 %v3011_v59, %s9073_s19  ;;  %3109 = vrot.lane.b32.xlu1 %v3011_v59, %s9076_s15  ;;  %v10976_v26 = vpop.permute.xlu0 %3241 }
 0x7c9   : > { %v10960_v52 = vpop.permute.xlu1 %8573  ;;  %14458 = vst [vmem:[#allocation38_spill] sm:$0xff] %v10976_v26 }
 0x7cc   : > { %3197 = vrot.lane.b32.xlu0 %v3011_v59, %s9077_s27  ;;  %3127 = vrot.lane.b32.xlu1 %v3011_v59, %s9071_s28  ;;  %v10982_v3 = vpop.permute.xlu0 %3251 }
 0x7cd   : > { %v10966_v6 = vpop.permute.xlu1 %8578  ;;  %14460 = vst [vmem:[#allocation40_spill] sm:$0xff] %v10982_v3 }
 0x7d0   : > { %3219 = vrot.lane.b32.xlu0 %v3011_v59, %s9070_s17  ;;  %3175 = vrot.lane.b32.xlu1 %v3011_v59, %s9075_s24 }
 0x7d1   : > { %v10972_v4 = vpop.permute.xlu1 %8583 }
 0x7d2   : > { %v8586_v18 = vunpack.i.h.bf16 %v10972_v4 }
 0x7d4   : > { %3298 = vrot.lane.b32.xlu0 %v3011_v59, %s9078_s22  ;;  %3057 = vrot.lane.b32.xlu1 %v3008_v46, %s9072_s18 }
 0x7d5   : > { %v10978_v5 = vpop.permute.xlu1 %3236 }
 0x7d6   : > { %14459 = vst [vmem:[#allocation39_spill] sm:$0xff] %v10978_v5 }
 0x7d8   : > { %3079 = vrot.lane.b32.xlu0 %v3008_v46, %s9074_s21  ;;  %3101 = vrot.lane.b32.xlu1 %v3008_v46, %s9076_s15 }
 0x7d9   : > { %v10984_v45 = vpop.permute.xlu1 %3246 }
 0x7da   : > { %14461 = vst [vmem:[#allocation41_spill] sm:$0xff] %v10984_v45 }
 0x7dc   : > { %3121 = vrot.lane.b32.xlu0 %v3008_v46, %s9071_s28  ;;  %3167 = vrot.lane.b32.xlu1 %v3008_v46, %s9075_s24 }
 0x7e0   : > { %3145 = vrot.lane.b32.xlu0 %v3008_v46, %s9073_s19  ;;  %3211 = vrot.lane.b32.xlu1 %v3008_v46, %s9070_s17 }
 0x7e4   : > { %3189 = vrot.lane.b32.xlu0 %v3008_v46, %s9077_s27  ;;  %3290 = vrot.lane.b32.xlu1 %v3008_v46, %s9078_s22  ;;  %v8576_v46 = vunpack.i.h.bf16 %v10960_v52 }
 0x7e8   : > { %3075 = vrot.lane.b32.xlu0 %v3006_v62, %s9074_s21  ;;  %3053 = vrot.lane.b32.xlu1 %v3006_v62, %s9072_s18 }
 0x7ec   : > { %3117 = vrot.lane.b32.xlu0 %v3006_v62, %s9071_s28  ;;  %3097 = vrot.lane.b32.xlu1 %v3006_v62, %s9076_s15 }
 0x7f0   : > { %3141 = vrot.lane.b32.xlu0 %v3006_v62, %s9073_s19  ;;  %3163 = vrot.lane.b32.xlu1 %v3006_v62, %s9075_s24 }
 0x7f4   : > { %3185 = vrot.lane.b32.xlu0 %v3006_v62, %s9077_s27  ;;  %3286 = vrot.lane.b32.xlu1 %v3006_v62, %s9078_s22 }
 0x7f8   : > { %3055 = vrot.lane.b32.xlu0 %v3007_v25, %s9072_s18  ;;  %3207 = vrot.lane.b32.xlu1 %v3006_v62, %s9070_s17 }
 0x7fc   : > { %3099 = vrot.lane.b32.xlu0 %v3007_v25, %s9076_s15  ;;  %3077 = vrot.lane.b32.xlu1 %v3007_v25, %s9074_s21 }
 0x800   : > { %3165 = vrot.lane.b32.xlu0 %v3007_v25, %s9075_s24  ;;  %3119 = vrot.lane.b32.xlu1 %v3007_v25, %s9071_s28 }
 0x804   : > { %3288 = vrot.lane.b32.xlu0 %v3007_v25, %s9078_s22  ;;  %3143 = vrot.lane.b32.xlu1 %v3007_v25, %s9073_s19 }
 0x808   : > { %3209 = vrot.lane.b32.xlu0 %v3007_v25, %s9070_s17  ;;  %3187 = vrot.lane.b32.xlu1 %v3007_v25, %s9077_s27 }
 0x80c   : > { %3083 = vrot.lane.b32.xlu0 %v3009_v28, %s9074_s21  ;;  %3061 = vrot.lane.b32.xlu1 %v3009_v28, %s9072_s18 }
 0x810   : > { %3149 = vrot.lane.b32.xlu0 %v3009_v28, %s9073_s19  ;;  %3105 = vrot.lane.b32.xlu1 %v3009_v28, %s9076_s15 }
 0x814   : > { %3193 = vrot.lane.b32.xlu0 %v3009_v28, %s9077_s27  ;;  %3123 = vrot.lane.b32.xlu1 %v3009_v28, %s9071_s28 }
 0x818   : > { %3294 = vrot.lane.b32.xlu0 %v3009_v28, %s9078_s22  ;;  %3171 = vrot.lane.b32.xlu1 %v3009_v28, %s9075_s24 }
 0x81c   : > { %3215 = vrot.lane.b32.xlu0 %v3009_v28, %s9070_s17  ;;  %3085 = vrot.lane.b32.xlu1 %v3010_v10, %s9074_s21  ;;  %v8575_v28 = vunpack.i.l.bf16 %v10960_v52  ;;  %v8550_v52 = vunpack.i.l.bf16 %v10958_v57 }
 0x820   : > { %3063 = vrot.lane.b32.xlu0 %v3010_v10, %s9072_s18  ;;  %3151 = vrot.lane.b32.xlu1 %v3010_v10, %s9073_s19 }
 0x824   : > { %3107 = vrot.lane.b32.xlu0 %v3010_v10, %s9076_s15  ;;  %3195 = vrot.lane.b32.xlu1 %v3010_v10, %s9077_s27 }
 0x828   : > { %3125 = vrot.lane.b32.xlu0 %v3010_v10, %s9071_s28  ;;  %3296 = vrot.lane.b32.xlu1 %v3010_v10, %s9078_s22 }
 0x82c   : > { %3173 = vrot.lane.b32.xlu0 %v3010_v10, %s9075_s24  ;;  %3217 = vrot.lane.b32.xlu1 %v3010_v10, %s9070_s17 }
 0x836   : > { %v10986_v24 = vpop.permute.xlu0 %3087  ;;  %v10988_v63 = vpop.permute.xlu1 %3065 }
 0x837   : > { %3314 = vrot.lane.b32.xlu0 %v10988_v63, %s9078_s22 }
 0x83a   : > { %v10992_v7 = vpop.permute.xlu0 %3153  ;;  %v10994_v11 = vpop.permute.xlu1 %3109 }
 0x83b   : > { %3330 = vrot.lane.b32.xlu0 %v10986_v24, %s9078_s22  ;;  %v3162_v50 = vsel %vm662_vm3, %v10992_v7, %v8566_v19  ;;  %v8585_v19 = vunpack.i.l.bf16 %v10972_v4 }
 0x83e   : > { %v10998_v55 = vpop.permute.xlu0 %3197  ;;  %v11000_v41 = vpop.permute.xlu1 %3127 }
 0x83f   : > { %3346 = vrot.lane.b32.xlu0 %v10994_v11, %s9078_s22  ;;  %3362 = vrot.lane.b32.xlu1 %v11000_v41, %s9078_s22  ;;  %v3206_v54 = vsel %vm708_vm7, %v10998_v55, %v8576_v46 }
 0x842   : > { %v11006_v44 = vpop.permute.xlu0 %3219  ;;  %v11008_v62 = vpop.permute.xlu1 %3175 }
 0x843   : > { %14462 = vst [vmem:[#allocation42_spill] sm:$0xff] %v11006_v44  ;;  %v3228_v30 = vsel %vm731_vm0, %v11006_v44, %v8586_v18  ;;  %v3184_v58 = vsel %vm685_vm5, %v11008_v62, %v8571_v47 }
 0x846   : > { %v11010_v16 = vpop.permute.xlu0 %3298  ;;  %v11012_v27 = vpop.permute.xlu1 %3057 }
 0x847   : > { %3306 = vrot.lane.b32.xlu1 %v11012_v27, %s9078_s22 }
 0x84a   : > { %v3080_v25 = vpop.permute.xlu0 %3079  ;;  %v11016_v17 = vpop.permute.xlu1 %3101 }
 0x84b   : > { %3378 = vrot.lane.b32.xlu1 %v3162_v50, %s9078_s22 }
 0x84e   : > { %v11021_v34 = vpop.permute.xlu0 %3121  ;;  %v11023_v42 = vpop.permute.xlu1 %3167 }
 0x84f   : > { %3354 = vrot.lane.b32.xlu0 %v11021_v34, %s9078_s22  ;;  %3322 = vrot.lane.b32.xlu1 %v3080_v25, %s9078_s22  ;;  %v3181_v14 = vsel %vm685_vm5, %v11023_v42, %v8570_v1 }
 0x852   : > { %v11029_v53 = vpop.permute.xlu0 %3145  ;;  %v11031_v48 = vpop.permute.xlu1 %3211 }
 0x853   : > { %3426 = vrot.lane.b32.xlu0 %v3228_v30, %s9078_s22  ;;  %3394 = vrot.lane.b32.xlu1 %v3184_v58, %s9078_s22  ;;  %v3159_v31 = vsel %vm662_vm3, %v11029_v53, %v8565_v23  ;;  %v3225_v18 = vsel %vm731_vm0, %v11031_v48, %v8585_v19 }
 0x856   : > { %v11039_v51 = vpop.permute.xlu0 %3189  ;;  %v11041_v59 = vpop.permute.xlu1 %3290 }
 0x857   : > { %3338 = vrot.lane.b32.xlu1 %v11016_v17, %s9078_s22  ;;  %3370 = vrot.lane.b32.xlu0 %v3159_v31, %s9078_s22  ;;  %v3203_v49 = vsel %vm708_vm7, %v11039_v51, %v8575_v28  ;;  %v8555_v28 = vunpack.i.l.bf16 %v10950_v60 }
 0x85a   : > { %v3076_v36 = vpop.permute.xlu0 %3075  ;;  %v3054_v21 = vpop.permute.xlu1 %3053 }
 0x85b   : > { %3410 = vrot.lane.b32.xlu1 %v3206_v54, %s9078_s22  ;;  %3386 = vrot.lane.b32.xlu0 %v3181_v14, %s9078_s22  ;;  %v3067_v23 = vsel %vm566_vm2, %v8550_v52, %v3054_v21  ;;  %v8560_v52 = vunpack.i.l.bf16 %v10964_v38 }
 0x85e   : > { %v11056_v10 = vpop.permute.xlu0 %3117  ;;  %v3098_v12 = vpop.permute.xlu1 %3097 }
 0x85f   : > { %3348 = vrot.lane.b32.xlu1 %v11056_v10, %s9078_s22  ;;  %3402 = vrot.lane.b32.xlu0 %v3203_v49, %s9078_s22 }
 0x862   : > { %v3142_v50 = vpop.permute.xlu0 %3141  ;;  %v3164_v47 = vpop.permute.xlu1 %3163 }
 0x863   : > { %3364 = vrot.lane.b32.xlu1 %v3142_v50, %s9078_s22  ;;  %3418 = vrot.lane.b32.xlu0 %v3225_v18, %s9078_s22  ;;  %v3089_v18 = vsel %vm589_vm4, %v8555_v28, %v3076_v36 }
 0x866   : > { %v3186_v30 = vpop.permute.xlu0 %3185  ;;  %v3287_v58 = vpop.permute.xlu1 %3286 }
 0x867   : > { %3380 = vrot.lane.b32.xlu1 %v3164_v47, %s9078_s22  ;;  %3300 = vrot.lane.b32.xlu0 %v3067_v23, %s9078_s22  ;;  %v8580_v23 = vunpack.i.l.bf16 %v10966_v6 }
 0x86a   : > { %v3056_v4 = vpop.permute.xlu0 %3055  ;;  %v11072_v31 = vpop.permute.xlu1 %3207 }
 0x86b   : > { %3396 = vrot.lane.b32.xlu1 %v3186_v30, %s9078_s22  ;;  %v3068_v46 = vsel %vm566_vm2, %v3054_v21, %v3056_v4  ;;  %v3069_v3 = vsel %vm566_vm2, %v3056_v4, %v11012_v27 }
 0x86c   : > { %3302 = vrot.lane.b32.xlu0 %v3068_v46, %s9078_s22 }
 0x86e   : > { %v3100_v1 = vpop.permute.xlu0 %3099  ;;  %v3078_v54 = vpop.permute.xlu1 %3077 }
 0x86f   : > { %3412 = vrot.lane.b32.xlu1 %v11072_v31, %s9078_s22  ;;  %v3091_v14 = vsel %vm589_vm4, %v3078_v54, %v3080_v25  ;;  %v3113_v21 = vsel %vm612_vm6, %v3100_v1, %v11016_v17  ;;  %v3428_v17 = vsel %vm1006_vm8, %v8580_v23, %v3287_v58  ;;  %v3112_v27 = vsel %vm612_vm6, %v3098_v12, %v3100_v1 }
 0x870   : > { %3320 = vrot.lane.b32.xlu0 %v3091_v14, %s9078_s22  ;;  %v3111_v14 = vsel %vm612_vm6, %v8560_v52, %v3098_v12 }
 0x872   : > { %v3166_v49 = vpop.permute.xlu0 %3165  ;;  %v3120_v19 = vpop.permute.xlu1 %3119 }
 0x873   : > { %3316 = vrot.lane.b32.xlu1 %v3089_v18, %s9078_s22  ;;  %v3130_v18 = vsel %vm631_vm1, %v3120_v19, %v11021_v34 }
 0x874   : > { %3336 = vrot.lane.b32.xlu0 %v3113_v21, %s9078_s22 }
 0x876   : > { %v11089_v25 = vpop.permute.xlu0 %3288  ;;  %v3144_v46 = vpop.permute.xlu1 %3143 }
 0x877   : > { %3332 = vrot.lane.b32.xlu1 %v3111_v14, %s9078_s22  ;;  %v3429_v28 = vsel %vm1006_vm8, %v3287_v58, %v11089_v25  ;;  %v3157_v52 = vsel %vm662_vm3, %v3142_v50, %v3144_v46  ;;  %v3179_v58 = vsel %vm685_vm5, %v3164_v47, %v3166_v49 }
 0x878   : > { %3542 = vmatprep.subr.bf16.mxu1 %v3429_v28  ;;  %3352 = vrot.lane.b32.xlu0 %v3130_v18, %s9078_s22  ;;  %v3090_v28 = vsel %vm589_vm4, %v3076_v36, %v3078_v54  ;;  %v3129_v36 = vsel %vm631_vm1, %v11056_v10, %v3120_v19  ;;  %v3180_v54 = vsel %vm685_vm5, %v3166_v49, %v11023_v42  ;;  %v8551_v49 = vunpack.i.h.bf16 %v10958_v57 }
 0x879   : > { %3543 = vmatpush1.bf16.msra.mxu1 %v3428_v17  ;;  %v8556_v57 = vunpack.i.h.bf16 %v10950_v60 }
 0x87a   : > { %v3210_v21 = vpop.permute.xlu0 %3209  ;;  %v3188_v26 = vpop.permute.xlu1 %3187 }
 0x87b   : > { %3304 = vrot.lane.b32.xlu1 %v3069_v3, %s9078_s22  ;;  %v3201_v50 = vsel %vm708_vm7, %v3186_v30, %v3188_v26  ;;  %v3224_v47 = vsel %vm731_vm0, %v3210_v21, %v11031_v48  ;;  %v3158_v30 = vsel %vm662_vm3, %v3144_v46, %v11029_v53  ;;  %v3202_v53 = vsel %vm708_vm7, %v3188_v26, %v11039_v51 }
 0x87c   : > { %3366 = vrot.lane.b32.xlu0 %v3157_v52, %s9078_s22  ;;  %v3223_v42 = vsel %vm731_vm0, %v11072_v31, %v3210_v21  ;;  %v8581_v26 = vunpack.i.h.bf16 %v10966_v6 }
 0x87e   : > { %v11104_v14 = vpop.permute.xlu0 %3083  ;;  %v3062_v34 = vpop.permute.xlu1 %3061 }
 0x87f   : > { %3318 = vrot.lane.b32.xlu1 %v3090_v28, %s9078_s22  ;;  %v3070_v31 = vsel %vm566_vm2, %v8551_v49, %v3062_v34  ;;  %v3092_v28 = vsel %vm589_vm4, %v8556_v57, %v11104_v14 }
 0x880   : > { %3382 = vrot.lane.b32.xlu0 %v3179_v58, %s9078_s22  ;;  %v758_v58 = vld [vmem:[%s14345_s3 + $0x20] sm:$0xff] }
 0x882   : > { %v11110_v23 = vpop.permute.xlu1 %3105  ;;  %v11113_v3 = vpop.permute.xlu0 %3149 }
 0x883   : > { %3334 = vrot.lane.b32.xlu1 %v3112_v27, %s9078_s22  ;;  %v8561_v27 = vunpack.i.h.bf16 %v10964_v38  ;;  %v760_v38 = vld [vmem:[%s14345_s3 + $0x30] sm:$0xff] }
 0x884   : > { %3398 = vrot.lane.b32.xlu0 %v3201_v50, %s9078_s22 }
 0x885   : > { %v3114_v60 = vsel %vm612_vm6, %v8561_v27, %v11110_v23 }
 0x886   : > { %v11118_v4 = vpop.permute.xlu1 %3123  ;;  %v11126_v12 = vpop.permute.xlu0 %3193 }
 0x887   : > { %3350 = vrot.lane.b32.xlu1 %v3129_v36, %s9078_s22 }
 0x888   : > { %3416 = vrot.lane.b32.xlu0 %v3224_v47, %s9078_s22 }
 0x88a   : > { %v11128_v1 = vpop.permute.xlu1 %3171  ;;  %v3295_v19 = vpop.permute.xlu0 %3294 }
 0x88b   : > { %3368 = vrot.lane.b32.xlu1 %v3158_v30, %s9078_s22  ;;  %v3431_v21 = vsel %vm1006_vm8, %v8581_v26, %v3295_v19  ;;  %v759_v30 = vld [vmem:[%s14345_s3 + $0x28] sm:$0xff] }
 0x88c   : > { %3356 = vrot.lane.b32.xlu0 %v11118_v4, %s9078_s22 }
 0x88e   : > { %v3086_v10 = vpop.permute.xlu1 %3085  ;;  %v11147_v46 = vpop.permute.xlu0 %3215 }
 0x88f   : > { %3384 = vrot.lane.b32.xlu1 %v3180_v54, %s9078_s22 }
 0x890   : > { %3372 = vrot.lane.b32.xlu0 %v11113_v3, %s9078_s22 }
 0x892   : > { %v11140_v48 = vpop.permute.xlu1 %3151  ;;  %v3064_v17 = vpop.permute.xlu0 %3063 }
 0x893   : > { %3400 = vrot.lane.b32.xlu1 %v3202_v53, %s9078_s22  ;;  %v3071_v6 = vsel %vm566_vm2, %v3062_v34, %v3064_v17  ;;  %v3094_v34 = vsel %vm589_vm4, %v3086_v10, %v10986_v24  ;;  %v3072_v47 = vsel %vm566_vm2, %v3064_v17, %v10988_v63  ;;  %v3093_v63 = vsel %vm589_vm4, %v11104_v14, %v3086_v10 }
 0x894   : > { %3388 = vrot.lane.b32.xlu0 %v11128_v1, %s9078_s22 }
 0x896   : > { %v11149_v18 = vpop.permute.xlu1 %3195  ;;  %v3108_v50 = vpop.permute.xlu0 %3107 }
 0x897   : > { %3414 = vrot.lane.b32.xlu1 %v3223_v42, %s9078_s22  ;;  %v3116_v24 = vsel %vm612_vm6, %v3108_v50, %v10994_v11  ;;  %v761_v42 = vld [vmem:[%s14345_s3 + $0x38] sm:$0xff]  ;;  %v3115_v10 = vsel %vm612_vm6, %v11110_v23, %v3108_v50  ;;  %v3160_v23 = vsel %vm662_vm3, %v11113_v3, %v11140_v48 }
 0x898   : > { %3404 = vrot.lane.b32.xlu0 %v11126_v12, %s9078_s22 }
 0x89a   : > { %v11158_v51 = vpop.permute.xlu1 %3296  ;;  %v3126_v36 = vpop.permute.xlu0 %3125 }
 0x89b   : > { %3420 = vrot.lane.b32.xlu1 %v11147_v46, %s9078_s22  ;;  %v3432_v52 = vsel %vm1006_vm8, %v3295_v19, %v11158_v51  ;;  %v3131_v49 = vsel %vm631_vm1, %v11118_v4, %v3126_v36  ;;  %v3132_v17 = vsel %vm631_vm1, %v3126_v36, %v11000_v41 }
 0x89c   : > { %3544 = vmatprep.subr.bf16.mxu1 %v3432_v52  ;;  %3308 = vrot.lane.b32.xlu0 %v3070_v31, %s9078_s22  ;;  %v3161_v31 = vsel %vm662_vm3, %v11140_v48, %v10992_v7 }
 0x89d   : > { %3545 = vmatpush1.bf16.msra.mxu1 %v3431_v21 }
 0x89e   : > { %v3174_v54 = vpop.permute.xlu0 %3173  ;;  %v11198_v19 = vpop.permute.xlu1 %3217 }
 0x89f   : > { %3310 = vrot.lane.b32.xlu1 %v3071_v6, %s9078_s22  ;;  %v3183_v57 = vsel %vm685_vm5, %v3174_v54, %v11008_v62  ;;  %v3182_v7 = vsel %vm685_vm5, %v11128_v1, %v3174_v54  ;;  %v3204_v1 = vsel %vm708_vm7, %v11126_v12, %v11149_v18 }
 0x8a0   : > { %3324 = vrot.lane.b32.xlu0 %v3092_v28, %s9078_s22 }
 0x8a3   : > { %784 = vperm.xlu1 %8466, %v758_v58  }
 0x8a4   : > { %3340 = vrot.lane.b32.xlu0 %v3114_v60, %s9078_s22 }
 0x8a7   : > { %3328 = vrot.lane.b32.xlu1 %v3094_v34, %s9078_s22 }
 0x8a8   : > { %3312 = vrot.lane.b32.xlu0 %v3072_v47, %s9078_s22 }
 0x8a9   : > { %v11200_v53 = vpop.permute.xlu0 %3314 }
 0x8ab   : > { %794 = vperm.xlu1 %8466, %v760_v38  }
 0x8ac   : > { %789 = vperm.xlu0 %8465, %v759_v30  }
 0x8ad   : > { %v11211_v14 = vpop.permute.xlu0 %3330 }
 0x8ae   : > { %14463 = vst [vmem:[#allocation43_spill] sm:$0xff] %v11211_v14  ;;  %v14484_v14 = vld [vmem:[#allocation27_spill] sm:$0xff] }
 0x8af   : > { %3344 = vrot.lane.b32.xlu1 %v3116_v24, %s9078_s22 }
 0x8b0   : > { %3326 = vrot.lane.b32.xlu0 %v3093_v63, %s9078_s22 }
 0x8b1   : > { %v11207_v11 = vpop.permute.xlu1 %3362  ;;  %v11224_v4 = vpop.permute.xlu0 %3346 }
 0x8b2   : > { %14464 = vst [vmem:[#allocation44_spill] sm:$0xff] %v11224_v4 }
 0x8b3   : > { %8588 = vrot.lane.b32.xlu1 %v14454_v8, %s9073_s19 }
 0x8b4   : > { %799 = vperm.xlu0 %8465, %v761_v42  }
 0x8b7   : > { %3358 = vrot.lane.b32.xlu1 %v3131_v49, %s9078_s22 }
 0x8b8   : > { %3342 = vrot.lane.b32.xlu0 %v3115_v10, %s9078_s22 }
 0x8b9   : > { %v11217_v26 = vpop.permute.xlu1 %3306 }
 0x8bb   : > { %8593 = vrot.lane.b32.xlu1 %v14454_v8, %s9072_s18 }
 0x8bc   : > { %3360 = vrot.lane.b32.xlu0 %v3132_v17, %s9078_s22  ;;  %v3430_v17 = vsel %vm1006_vm8, %v11089_v25, %v11041_v59 }
 0x8bd   : > { %v11226_v52 = vpop.permute.xlu1 %3378 }
 0x8bf   : > { %3374 = vrot.lane.b32.xlu1 %v3160_v23, %s9078_s22 }
 0x8c0   : > { %3376 = vrot.lane.b32.xlu0 %v3161_v31, %s9078_s22 }
 0x8c1   : > { %v3355_v21 = vpop.permute.xlu0 %3354  ;;  %v11236_v41 = vpop.permute.xlu1 %3322 }
 0x8c3   : > { %8598 = vrot.lane.b32.xlu1 %v14454_v8, %s9075_s24 }
 0x8c4   : > { %3392 = vrot.lane.b32.xlu0 %v3183_v57, %s9078_s22 }
 0x8c5   : > { %v11243_v3 = vpop.permute.xlu0 %3426  ;;  %v11245_v6 = vpop.permute.xlu1 %3394 }
 0x8c6   : > { %14465 = vst [vmem:[#allocation45_spill] sm:$0xff] %v11243_v3  ;;  %14466 = vst [vmem:[#allocation46_spill] sm:$0xff] %v11245_v6 }
 0x8c7   : > { %3390 = vrot.lane.b32.xlu1 %v3182_v7, %s9078_s22 }
 0x8c8   : > { %8618 = vrot.lane.b32.xlu0 %v14454_v8, %s9070_s17 }
 0x8c9   : > { %v11252_v48 = vpop.permute.xlu1 %3338  ;;  %v11254_v28 = vpop.permute.xlu0 %3370 }
 0x8ca   : > { %14467 = vst [vmem:[#allocation47_spill] sm:$0xff] %v11252_v48 }
 0x8cb   : > { %8603 = vrot.lane.b32.xlu1 %v14454_v8, %s9074_s21 }
 0x8cd   : > { %v11258_v62 = vpop.permute.xlu1 %3410  ;;  %v11260_v58 = vpop.permute.xlu0 %3386 }
 0x8ce   : > { %14468 = vst [vmem:[#allocation48_spill] sm:$0xff] %v11258_v62 }
 0x8cf   : > { %3406 = vrot.lane.b32.xlu1 %v3204_v1, %s9078_s22 }
 0x8d1   : > { %v11266_v27 = vpop.permute.xlu1 %3348  ;;  %v11268_v50 = vpop.permute.xlu0 %3402 }
 0x8d2   : > { %14469 = vst [vmem:[#allocation49_spill] sm:$0xff] %v11268_v50 }
 0x8d3   : > { %8608 = vrot.lane.b32.xlu1 %v14454_v8, %s9077_s27 }
 0x8d5   : > { %v11272_v60 = vpop.permute.xlu1 %3364  ;;  %v11274_v34 = vpop.permute.xlu0 %3418 }
 0x8d6   : > { %14470 = vst [vmem:[#allocation50_spill] sm:$0xff] %v11274_v34 }
 0x8d7   : > { %8613 = vrot.lane.b32.xlu1 %v14454_v8, %s9076_s15 }
 0x8d9   : > { %v11278_v36 = vpop.permute.xlu1 %3380  ;;  %v3301_v47 = vpop.permute.xlu0 %3300 }
 0x8da   : > { %14471 = vst [vmem:[#allocation51_spill] sm:$0xff] %v11278_v36 }
 0x8dd   : > { %v11280_v12 = vpop.permute.xlu1 %3396 }
 0x8de   : > { %14472 = vst [vmem:[#allocation52_spill] sm:$0xff] %v11280_v12  ;;  %v3303_v38 = vpop.permute.xlu0 %3302 }
 0x8df   : > { %v3434_v7 = vsel %vm1006_vm8, %v3301_v47, %v3303_v38 }
 0x8e1   : > { %v11282_v30 = vpop.permute.xlu1 %3412 }
 0x8e2   : > { %14473 = vst [vmem:[#allocation53_spill] sm:$0xff] %v11282_v30  ;;  %v11284_v54 = vpop.permute.xlu0 %3320 }
 0x8e5   : > { %v3317_v24 = vpop.permute.xlu1 %3316 }
 0x8e6   : > { %v11286_v63 = vpop.permute.xlu0 %3336 }
 0x8e9   : > { %v11288_v42 = vpop.permute.xlu1 %3332 }
 0x8ea   : > { %v11290_v49 = vpop.permute.xlu0 %3352 }
 0x8eb   : > { %v3454_v10 = vsel %vm1006_vm8, %v11290_v49, %v3355_v21 }
 0x8ec   : > { %7956 = vmatprep.subr.bf16.mxu0 %v3454_v10 }
 0x8ed   : > { %7957 = vmatpush3.bf16.msra.mxu0 %v3430_v17  ;;  %v11297_v23 = vpop.permute.xlu1 %3304 }
 0x8ee   : > { %v11299_v31 = vpop.permute.xlu0 %3366  ;;  %v3435_v57 = vsel %vm1006_vm8, %v3303_v38, %v11297_v23 }
 0x8ef   : > { %3546 = vmatprep.subr.bf16.mxu1 %v3435_v57 }
 0x8f0   : > { %3547 = vmatpush1.bf16.msra.mxu1 %v3434_v7 }
 0x8f1   : > { %v3319_v1 = vpop.permute.xlu1 %3318 }
 0x8f2   : > { %v11304_v5 = vpop.permute.xlu0 %3382 }
 0x8f3   : > { %14474 = vst [vmem:[#allocation54_spill] sm:$0xff] %v11304_v5 }
 0x8f5   : > { %v11306_v21 = vpop.permute.xlu1 %3334 }
 0x8f6   : > { %v11308_v10 = vpop.permute.xlu0 %3398 }
 0x8f7   : > { %14475 = vst [vmem:[#allocation55_spill] sm:$0xff] %v11308_v10 }
 0x8f9   : > { %v11310_v59 = vpop.permute.xlu1 %3350 }
 0x8fa   : > { %v11312_v25 = vpop.permute.xlu0 %3416 }
 0x8fb   : > { %14476 = vst [vmem:[#allocation56_spill] sm:$0xff] %v11312_v25 }
 0x8fd   : > { %v11314_v17 = vpop.permute.xlu1 %3368 }
 0x8fe   : > { %v11316_v45 = vpop.permute.xlu0 %3356 }
 0x901   : > { %v11318_v3 = vpop.permute.xlu1 %3384 }
 0x902   : > { %v11320_v57 = vpop.permute.xlu0 %3372 }
 0x905   : > { %v11324_v38 = vpop.permute.xlu1 %3400 }
 0x906   : > { %v11322_v47 = vpop.permute.xlu0 %3388  ;;  %14478 = vst [vmem:[#allocation58_spill] sm:$0xff] %v11324_v38 }
 0x907   : > { %14477 = vst [vmem:[#allocation57_spill] sm:$0xff] %v11322_v47 }
 0x909   : > { %v11328_v30 = vpop.permute.xlu1 %3414 }
 0x90a   : > { %v11326_v7 = vpop.permute.xlu0 %3404  ;;  %14480 = vst [vmem:[#allocation60_spill] sm:$0xff] %v11328_v30  ;;  %v3440_v30 = vsel %vm1006_vm8, %v3317_v24, %v3319_v1 }
 0x90b   : > { %14479 = vst [vmem:[#allocation59_spill] sm:$0xff] %v11326_v7  ;;  %v3441_v7 = vsel %vm1006_vm8, %v3319_v1, %v11284_v54 }
 0x90d   : > { %v11330_v62 = vpop.permute.xlu1 %3420 }
 0x90e   : > { %v3309_v34 = vpop.permute.xlu0 %3308  ;;  %14481 = vst [vmem:[#allocation61_spill] sm:$0xff] %v11330_v62 }
 0x911   : > { %v3311_v12 = vpop.permute.xlu1 %3310 }
 0x912   : > { %v3325_v4 = vpop.permute.xlu0 %3324  ;;  %v3437_v47 = vsel %vm1006_vm8, %v3309_v34, %v3311_v12 }
 0x916   : > { %v11332_v25 = vpop.permute.xlu0 %3340 }
 0x91a   : > { %v11334_v10 = vpop.permute.xlu0 %3312 }
 0x91b   : > { %v3438_v44 = vsel %vm1006_vm8, %v3311_v12, %v11334_v10 }
 0x91c   : > { %3548 = vmatprep.subr.bf16.mxu1 %v3438_v44 }
 0x91d   : > { %3549 = vmatpush1.bf16.msra.mxu1 %v3437_v47 }
 0x91e   : > { %3550 = vmatprep.subr.bf16.mxu1 %v3441_v7 }
 0x921   : > { %3551 = vmatpush1.bf16.msra.mxu1 %v3440_v30 }
 0x922   : > { %v785_v62 = vpop.permute.xlu1 %784 }
 0x923   : > { %v1183_v48 = vadd.f32 %v10232_v9, %v785_v62  ;;  %v1185_v38 = vadd.f32 %v10234_v56, %v785_v62  ;;  %v1325_v50 = vadd.f32 %v9873_v37, %v785_v62  ;;  %v14482_v62 = vld [vmem:[#allocation35_spill] sm:$0xff] }
 0x925   : > { %v1256_v36 = vadd.f32 %v9855_v32, %v1183_v48  ;;  %v1258_v44 = vadd.f32 %v9857_v33, %v1185_v38  ;;  %v1390_v34 = vadd.f32 %v10399_v35, %v1325_v50  ;;  %v14483_v38 = vld [vmem:[#allocation26_spill] sm:$0xff] }
 0x926   : > { %v11348_v12 = vpop.permute.xlu1 %3328 }
 0x927   : > { %v1416_v1 = vmax.f32 %v1256_v36, 0.0  ;;  %v1417_v33 = vmax.f32 %v1258_v44, 0.0 }
 0x929   : > { %v1457_v44 = vmul.f32 %v9886_v43, %v1417_v33 }
 0x92a   : > { %v795_v47 = vpop.permute.xlu1 %794 }
 0x92b   : > { %v1193_v7 = vadd.f32 %v10242_v13, %v795_v47  ;;  %v1195_v30 = vadd.f32 %v10244_v2, %v795_v47  ;;  %v1333_v24 = vadd.f32 %v9877_v0, %v795_v47  ;;  %v790_v9 = vpop.permute.xlu0 %789  ;;  %v1418_v13 = vmax.f32 %v1390_v34, 0.0  ;;  %v14485_v47 = vld [vmem:[#allocation37_spill] sm:$0xff] }
 0x92c   : > { %v1187_v56 = vadd.f32 %v10236_v20, %v790_v9  ;;  %v1189_v37 = vadd.f32 %v10240_v15, %v790_v9  ;;  %v1328_v32 = vadd.f32 %v9875_v61, %v790_v9 }
 0x92d   : > { %v1266_v35 = vadd.f32 %v9863_v39, %v1193_v7  ;;  %v1268_v48 = vadd.f32 %v9865_v40, %v1195_v30  ;;  %v1398_v50 = vadd.f32 %v14482_v62, %v1333_v24  ;;  %v1456_v40 = vmul.f32 %v9883_v22, %v1416_v1  ;;  %v8835_v7 = vld [vmem:[#allocation8 + $0x64] ss:$12 sps:$4 sm:$0xff]  }
 0x92e   : > { %v1260_v2 = vadd.f32 %v14483_v38, %v1187_v56  ;;  %v1262_v0 = vadd.f32 %v14484_v14, %v1189_v37  ;;  %v1393_v36 = vadd.f32 %v14485_v47, %v1328_v32  ;;  %v11362_v6 = vpop.permute.xlu1 %3344  ;;  %v3447_v14 = vsel %vm1006_vm8, %v11306_v21, %v11286_v63  ;;  %3680 = vmatprep.mubr.bf16.mxu0 %v8835_v7  ;;  %v14486_v62 = vld [vmem:[#allocation33_spill] sm:$0xff]  ;;  %v14487_v38 = vld [vmem:[#allocation34_spill] sm:$0xff] }
 0x92f   : > { %v3327_v20 = vpop.permute.xlu0 %3326  ;;  %v1458_v30 = vmul.f32 %v9849_v29, %v1418_v13  ;;  %3574 = vmatprep.mubr.bf16.mxu1 %v8835_v7  ;;  %v1422_v47 = vmax.f32 %v1266_v35, 0.0 }
 0x930   : > { %v1419_v15 = vmax.f32 %v1260_v2, 0.0  ;;  %v1420_v5 = vmax.f32 %v1262_v0, 0.0  ;;  %v1421_v61 = vmax.f32 %v1393_v36, 0.0  ;;  %v3444_v39 = vsel %vm1006_vm8, %v3327_v20, %v11348_v12  ;;  %v14489_v36 = vld [vmem:[#allocation28_spill] sm:$0xff] }
 0x931   : > { %3552 = vmatprep.subr.bf16.mxu1 %v3444_v39  ;;  %v3443_v34 = vsel %vm1006_vm8, %v3325_v4, %v3327_v20  ;;  %v1423_v39 = vmax.f32 %v1268_v48, 0.0  ;;  %v1462_v48 = vmul.f32 %v9883_v22, %v1422_v47 }
 0x932   : > { %v1459_v24 = vmul.f32 %v9883_v22, %v1419_v15  ;;  %v1460_v9 = vmul.f32 %v9886_v43, %v1420_v5  ;;  %v1461_v56 = vmul.f32 %v9849_v29, %v1421_v61  ;;  %3553 = vmatpush1.bf16.msra.mxu1 %v3443_v34  ;;  %v11376_v1 = vpop.permute.xlu1 %8588  ;;  %v14488_v5 = vld [vmem:[#allocation30_spill] sm:$0xff]  ;;  %v3446_v15 = vsel %vm1006_vm8, %v11288_v42, %v11306_v21 }
 0x933   : > { %v800_v37 = vpop.permute.xlu0 %799  ;;  %3554 = vmatprep.subr.bf16.mxu1 %v3447_v14  ;;  %v14491_v14 = vld [vmem:[#allocation36_spill] sm:$0xff]  ;;  %v3205_v42 = vsel %vm708_vm7, %v11149_v18, %v10998_v55  ;;  %v3226_v21 = vsel %vm731_vm0, %v11147_v46, %v11198_v19  ;;  %v1463_v55 = vmul.f32 %v9886_v43, %v1423_v39 }
 0x934   : > { %v11378_v4 = vpack.c.bf16 %v1459_v24, %v1456_v40  ;;  %v11380_v32 = vpack.c.bf16 %v1460_v9, %v1457_v44  ;;  %v11382_v33 = vpack.c.bf16 %v1461_v56, %v1458_v30  ;;  %v1197_v13 = vadd.f32 %v14486_v62, %v800_v37  ;;  %v14490_v44 = vld [vmem:[#allocation29_spill] sm:$0xff] }
 0x935   : > { %v1199_v2 = vadd.f32 %v14487_v38, %v800_v37  ;;  %v1336_v0 = vadd.f32 %v14488_v5, %v800_v37  ;;  %v1424_v40 = vmax.f32 %v1398_v50, 0.0  ;;  %v3453_v62 = vsel %vm1006_vm8, %v11310_v59, %v11290_v49 }
 0x936   : > { %v1270_v20 = vadd.f32 %v14489_v36, %v1197_v13  ;;  %4592 = vrot.lane.b32.xlu0 %v11380_v32, %s9072_s18  ;;  %4590 = vrot.lane.b32.xlu1 %v11378_v4, %s9072_s18  ;;  %v3359_v61 = vpop.permute.xlu1 %3358  ;;  %v3433_v49 = vsel %vm1006_vm8, %v11158_v51, %v11010_v16  ;;  %v3452_v36 = vsel %vm1006_vm8, %v11266_v27, %v11310_v59 }
 0x937   : > { %v1272_v34 = vadd.f32 %v14490_v44, %v1199_v2  ;;  %v1401_v7 = vadd.f32 %v14491_v14, %v1336_v0  ;;  %3555 = vmatpush1.bf16.msra.mxu1 %v3446_v15  ;;  %v3343_v35 = vpop.permute.xlu0 %3342  ;;  %v1464_v18 = vmul.f32 %v9849_v29, %v1424_v40  ;;  %v3436_v51 = vsel %vm1006_vm8, %v11297_v23, %v11217_v26  ;;  %v14497_v14 = vld [vmem:[#allocation58_spill] sm:$0xff] }
 0x938   : > { %v1425_v30 = vmax.f32 %v1270_v20, 0.0  ;;  %v3450_v24 = vsel %vm1006_vm8, %v3343_v35, %v11362_v6  ;;  %v3449_v9 = vsel %vm1006_vm8, %v11332_v25, %v3343_v35  ;;  %v3460_v20 = vsel %vm1006_vm8, %v11314_v17, %v11254_v28 }
 0x939   : > { %v1426_v56 = vmax.f32 %v1272_v34, 0.0  ;;  %v1427_v37 = vmax.f32 %v1401_v7, 0.0  ;;  %3556 = vmatprep.subr.bf16.mxu1 %v3450_v24  ;;  %v3455_v27 = vsel %vm1006_vm8, %v11316_v45, %v3359_v61  ;;  %v3459_v28 = vsel %vm1006_vm8, %v11299_v31, %v11314_v17  ;;  %v14496_v34 = vld [vmem:[#allocation49_spill] sm:$0xff] }
 0x93a   : > { %v1465_v50 = vmul.f32 %v9883_v22, %v1425_v30  ;;  %3408 = vrot.lane.b32.xlu0 %v3205_v42, %s9078_s22  ;;  %3422 = vrot.lane.b32.xlu1 %v3226_v21, %s9078_s22  ;;  %v11411_v25 = vpop.permute.xlu1 %8593  ;;  %v3439_v26 = vsel %vm1006_vm8, %v11334_v10, %v11200_v53  ;;  %v3458_v45 = vsel %vm1006_vm8, %v11272_v60, %v11299_v31  ;;  %v14499_v30 = vld [vmem:[#allocation42_spill] sm:$0xff] }
 0x93b   : > { %v1466_v46 = vmul.f32 %v9886_v43, %v1426_v56  ;;  %v1467_v13 = vmul.f32 %v9849_v29, %v1427_v37  ;;  %3557 = vmatpush1.bf16.msra.mxu1 %v3449_v9  ;;  %v3361_v38 = vpop.permute.xlu0 %3360  ;;  %v3466_v53 = vsel %vm1006_vm8, %v11318_v3, %v11260_v58  ;;  %v3442_v17 = vsel %vm1006_vm8, %v11284_v54, %v11236_v41  ;;  %v14492_v58 = vld [vmem:[#allocation54_spill] sm:$0xff]  ;;  %v14494_v41 = vld [vmem:[#allocation43_spill] sm:$0xff]  ;;  %v14500_v9 = vld [vmem:[#allocation57_spill] sm:$0xff] }
 0x93c   : > { %v11420_v2 = vpack.c.bf16 %v1465_v50, %v1462_v48  ;;  %3558 = vmatprep.subr.bf16.mxu1 %v3453_v62  ;;  %v3457_v5 = vsel %vm1006_vm8, %v3361_v38, %v11207_v11  ;;  %v3456_v11 = vsel %vm1006_vm8, %v3359_v61, %v3361_v38  ;;  %v3465_v31 = vsel %vm1006_vm8, %v14492_v58, %v11318_v3  ;;  %v14493_v61 = vld [vmem:[#allocation46_spill] sm:$0xff]  ;;  %v14501_v37 = vld [vmem:[#allocation55_spill] sm:$0xff] }
 0x93d   : > { %v11424_v0 = vpack.c.bf16 %v1466_v46, %v1463_v55  ;;  %v11426_v47 = vpack.c.bf16 %v1467_v13, %v1464_v18  ;;  %7958 = vmatprep.subr.bf16.mxu0 %v3457_v5  ;;  %v3445_v54 = vsel %vm1006_vm8, %v11348_v12, %v14494_v41  ;;  %v3472_v7 = vsel %vm1006_vm8, %v14497_v14, %v14496_v34  ;;  %v14498_v12 = vld [vmem:[#allocation47_spill] sm:$0xff] }
 0x93e   : > { %7959 = vmatpush3.bf16.msra.mxu0 %v3433_v49  ;;  %4594 = vrot.lane.b32.xlu1 %v11382_v33, %s9072_s18  ;;  %v3375_v15 = vpop.permute.xlu1 %3374  ;;  %v3448_v35 = vsel %vm1006_vm8, %v11286_v63, %v14498_v12  ;;  %v3227_v24 = vsel %vm731_vm0, %v11198_v19, %v14499_v30  ;;  %v3471_v42 = vsel %vm1006_vm8, %v14501_v37, %v14497_v14  ;;  %v14502_v63 = vld [vmem:[#allocation52_spill] sm:$0xff] }
 0x93f   : > { %4598 = vrot.lane.b32.xlu0 %v11420_v2, %s9072_s18  ;;  %3559 = vmatpush1.bf16.msra.mxu1 %v3452_v36  ;;  %v3377_v16 = vpop.permute.xlu0 %3376  ;;  %v3461_v60 = vsel %vm1006_vm8, %v11320_v57, %v3375_v15  ;;  %v14495_v57 = vld [vmem:[#allocation51_spill] sm:$0xff]  ;;  %v3470_v21 = vsel %vm1006_vm8, %v14502_v63, %v14501_v37  ;;  %v14503_v36 = vld [vmem:[#allocation48_spill] sm:$0xff]  ;;  %v14511_v37 = vld [vmem:[#allocation45_spill] sm:$0xff] }
 0x940   : > { %3560 = vmatprep.subr.bf16.mxu1 %v3456_v11  ;;  %7960 = vmatprep.subr.bf16.mxu0 %v3460_v20  ;;  %v3463_v59 = vsel %vm1006_vm8, %v3377_v16, %v11226_v52  ;;  %v3462_v52 = vsel %vm1006_vm8, %v3375_v15, %v3377_v16  ;;  %v3464_v44 = vsel %vm1006_vm8, %v14495_v57, %v14492_v58  ;;  %v14504_v20 = vld [vmem:[#allocation59_spill] sm:$0xff]  ;;  %v14505_v16 = vld [vmem:[#allocation44_spill] sm:$0xff] }
 0x942   : > { %7961 = vmatpush3.bf16.msra.mxu0 %v3436_v51  ;;  %8623 = vrot.lane.b32.xlu1 %v14454_v8, %s9072_s18  ;;  %v11459_v23 = vpop.permute.xlu1 %8598  ;;  %v3451_v51 = vsel %vm1006_vm8, %v11362_v6, %v14505_v16 }
 0x943   : > { %4602 = vrot.lane.b32.xlu0 %v11426_v47, %s9072_s18  ;;  %3561 = vmatpush1.bf16.msra.mxu1 %v3455_v27  ;;  %v3393_v10 = vpop.permute.xlu0 %3392  ;;  %v8833_v27 = vld [vmem:[#allocation8 + $0x60] ss:$12 sps:$4 sm:$0xff]  }
 0x944   : > { %3562 = vmatprep.subr.bf16.mxu1 %v3459_v28  ;;  %7962 = vmatprep.subr.bf16.mxu0 %v3463_v59  ;;  %v3469_v39 = vsel %vm1006_vm8, %v3393_v10, %v14493_v61  ;;  %v14506_v28 = vld [vmem:[#allocation56_spill] sm:$0xff] }
 0x945   : > { %v14507_v59 = vld [vmem:[#allocation60_spill] sm:$0xff] }
 0x946   : > { %7963 = vmatpush3.bf16.msra.mxu0 %v3439_v26  ;;  %4600 = vrot.lane.b32.xlu1 %v11424_v0, %s9072_s18  ;;  %v3391_v40 = vpop.permute.xlu1 %3390  ;;  %v3477_v26 = vsel %vm1006_vm8, %v14507_v59, %v14506_v28 }
 0x947   : > { %4614 = vrot.lane.b32.xlu0 %v11380_v32, %s9074_s21  ;;  %3563 = vmatpush1.bf16.msra.mxu1 %v3458_v45  ;;  %v3468_v3 = vsel %vm1006_vm8, %v3391_v40, %v3393_v10  ;;  %v3467_v56 = vsel %vm1006_vm8, %v14500_v9, %v3391_v40  ;;  %v11599_v62 = vpop.permute.xlu0 %8618  ;;  %v14508_v45 = vld [vmem:[#allocation50_spill] sm:$0xff] }
 0x948   : > { %3564 = vmatprep.subr.bf16.mxu1 %v3462_v52  ;;  %7964 = vmatprep.subr.bf16.mxu0 %v3466_v53  ;;  %v3478_v52 = vsel %vm1006_vm8, %v14506_v28, %v14508_v45  ;;  %v8836_v10 = vld [vmem:[#allocation8 + $0x7c] ss:$12 sps:$4 sm:$0xff]   ;;  %v8838_v40 = vld [vmem:[#allocation8 + $0x78] ss:$12 sps:$4 sm:$0xff]  }
 0x94a   : > { %7965 = vmatpush3.bf16.msra.mxu0 %v3442_v17  ;;  %4612 = vrot.lane.b32.xlu1 %v11378_v4, %s9074_s21  ;;  %v11577_v19 = vpop.permute.xlu1 %8603 }
 0x94b   : > { %8633 = vrot.lane.b32.xlu0 %v14454_v8, %s9074_s21  ;;  %3565 = vmatpush1.bf16.msra.mxu1 %v3461_v60  ;;  %v14509_v60 = vld [vmem:[#allocation53_spill] sm:$0xff] }
 0x94c   : > { %3566 = vmatprep.subr.bf16.mxu1 %v3465_v31  ;;  %7966 = vmatprep.subr.bf16.mxu0 %v3469_v39  ;;  %v3476_v58 = vsel %vm1006_vm8, %v14509_v60, %v14507_v59 }
 0x94e   : > { %7967 = vmatpush3.bf16.msra.mxu0 %v3445_v54  ;;  %4616 = vrot.lane.b32.xlu1 %v11382_v33, %s9074_s21  ;;  %v3407_v48 = vpop.permute.xlu1 %3406  ;;  %v8839_v54 = vld [vmem:[#allocation8 + $0x68] ss:$12 sps:$4 sm:$0xff]  }
 0x94f   : > { %4620 = vrot.lane.b32.xlu0 %v11420_v2, %s9074_s21  ;;  %3567 = vmatpush1.bf16.msra.mxu1 %v3464_v44  ;;  %v3473_v15 = vsel %vm1006_vm8, %v14504_v20, %v3407_v48 }
 0x950   : > { %3568 = vmatprep.subr.bf16.mxu1 %v3468_v3  ;;  %7968 = vmatprep.subr.bf16.mxu0 %v3472_v7 }
 0x952   : > { %7969 = vmatpush3.bf16.msra.mxu0 %v3448_v35  ;;  %8628 = vrot.lane.b32.xlu1 %v14454_v8, %s9078_s22  ;;  %v11591_v50 = vpop.permute.xlu1 %8608 }
 0x953   : > { %3424 = vrot.lane.b32.xlu0 %v3227_v24, %s9078_s22  ;;  %3569 = vmatpush1.bf16.msra.mxu1 %v3467_v56 }
 0x954   : > { %3570 = vmatprep.subr.bf16.mxu1 %v3471_v42 }
 0x956   : > { %4622 = vrot.lane.b32.xlu1 %v11424_v0, %s9074_s21  ;;  %v11601_v55 = vpop.permute.xlu1 %8613 }
 0x957   : > { %4624 = vrot.lane.b32.xlu0 %v11426_v47, %s9074_s21  ;;  %3571 = vmatpush1.bf16.msra.mxu1 %v3470_v21  ;;  %v8840_v21 = vld [vmem:[#allocation8 + $0x80] ss:$12 sps:$4 sm:$0xff]  }
 0x95a   : > { %4636 = vrot.lane.b32.xlu1 %v11380_v32, %s9076_s15 }
 0x95b   : > { %4634 = vrot.lane.b32.xlu0 %v11378_v4, %s9076_s15 }
 0x95e   : > { %4642 = vrot.lane.b32.xlu1 %v11420_v2, %s9076_s15 }
 0x95f   : > { %4638 = vrot.lane.b32.xlu0 %v11382_v33, %s9076_s15 }
 0x962   : > { %4646 = vrot.lane.b32.xlu1 %v11426_v47, %s9076_s15 }
 0x963   : > { %8638 = vrot.lane.b32.xlu0 %v14454_v8, %s9076_s15 }
 0x966   : > { %4654 = vrot.lane.b32.xlu1 %v11378_v4, %s9071_s28 }
 0x967   : > { %4644 = vrot.lane.b32.xlu0 %v11424_v0, %s9076_s15 }
 0x96a   : > { %4658 = vrot.lane.b32.xlu1 %v11382_v33, %s9071_s28 }
 0x96b   : > { %4656 = vrot.lane.b32.xlu0 %v11380_v32, %s9071_s28 }
 0x96e   : > { %4662 = vrot.lane.b32.xlu1 %v11424_v0, %s9071_s28 }
 0x96f   : > { %4660 = vrot.lane.b32.xlu0 %v11420_v2, %s9071_s28 }
 0x972   : > { %4678 = vrot.lane.b32.xlu1 %v11378_v4, %s9073_s19 }
 0x973   : > { %4664 = vrot.lane.b32.xlu0 %v11426_v47, %s9071_s28 }
 0x976   : > { %4682 = vrot.lane.b32.xlu1 %v11382_v33, %s9073_s19 }
 0x977   : > { %4680 = vrot.lane.b32.xlu0 %v11380_v32, %s9073_s19 }
 0x97a   : > { %4686 = vrot.lane.b32.xlu1 %v11420_v2, %s9073_s19 }
 0x97b   : > { %8643 = vrot.lane.b32.xlu0 %v14454_v8, %s9073_s19 }
 0x97e   : > { %4690 = vrot.lane.b32.xlu1 %v11426_v47, %s9073_s19 }
 0x97f   : > { %4688 = vrot.lane.b32.xlu0 %v11424_v0, %s9073_s19 }
 0x982   : > { %4702 = vrot.lane.b32.xlu1 %v11380_v32, %s9075_s24 }
 0x983   : > { %4700 = vrot.lane.b32.xlu0 %v11378_v4, %s9075_s24 }
 0x986   : > { %8648 = vrot.lane.b32.xlu1 %v14454_v8, %s9075_s24 }
 0x987   : > { %4704 = vrot.lane.b32.xlu0 %v11382_v33, %s9075_s24 }
 0x98a   : > { %4710 = vrot.lane.b32.xlu1 %v11424_v0, %s9075_s24 }
 0x98b   : > { %4708 = vrot.lane.b32.xlu0 %v11420_v2, %s9075_s24 }
 0x98e   : > { %4722 = vrot.lane.b32.xlu1 %v11378_v4, %s9077_s27 }
 0x98f   : > { %4712 = vrot.lane.b32.xlu0 %v11426_v47, %s9075_s24 }
 0x992   : > { %4726 = vrot.lane.b32.xlu1 %v11382_v33, %s9077_s27 }
 0x993   : > { %4724 = vrot.lane.b32.xlu0 %v11380_v32, %s9077_s27 }
 0x996   : > { %4822 = vrot.lane.b32.xlu1 %v11378_v4, %s9078_s22 }
 0x997   : > { %4824 = vrot.lane.b32.xlu0 %v11380_v32, %s9078_s22 }
 0x99a   : > { %4730 = vrot.lane.b32.xlu1 %v11420_v2, %s9077_s27 }
 0x99b   : > { %8653 = vrot.lane.b32.xlu0 %v14454_v8, %s9077_s27 }
 0x99e   : > { %4734 = vrot.lane.b32.xlu1 %v11426_v47, %s9077_s27 }
 0x99f   : > { %4732 = vrot.lane.b32.xlu0 %v11424_v0, %s9077_s27 }
 0x9a2   : > { %4832 = vrot.lane.b32.xlu1 %v11424_v0, %s9078_s22 }
 0x9a3   : > { %8658 = vrot.lane.b32.xlu0 %v14454_v8, %s9078_s22 }
 0x9a7   : > { %4830 = vrot.lane.b32.xlu0 %v11420_v2, %s9078_s22 }
 0x9a8   : > { %v4593_v18 = vpop.permute.xlu0 %4592  ;;  %v4591_v46 = vpop.permute.xlu1 %4590 }
 0x9a9   : > { %v4605_v13 = vsel %vm566_vm2, %v4591_v46, %v4593_v18 }
 0x9ab   : > { %4838 = vrot.lane.b32.xlu0 %v4605_v13, %s9078_s22 }
 0x9ac   : > { %v3409_v38 = vpop.permute.xlu0 %3408  ;;  %v3423_v5 = vpop.permute.xlu1 %3422 }
 0x9ad   : > { %v3474_v49 = vsel %vm1006_vm8, %v3407_v48, %v3409_v38  ;;  %v3475_v11 = vsel %vm1006_vm8, %v3409_v38, %v14503_v36 }
 0x9ae   : > { %3572 = vmatprep.subr.bf16.mxu1 %v3474_v49  ;;  %7970 = vmatprep.subr.bf16.mxu0 %v3475_v11 }
 0x9af   : > { %3573 = vmatpush1.bf16.msra.mxu1 %v3473_v15  ;;  %7971 = vmatpush3.bf16.msra.mxu0 %v3451_v51 }
 0x9b0   : > { %3595 = vmatprep.subr.bf16.mxu1 %v3477_v26  ;;  %8169 = vmatprep.subr.bf16.mxu0 %v3478_v52  ;;  %v11623_v53 = vpop.permute.xlu1 %4594 }
 0x9b1   : > { %v4599_v17 = vpop.permute.xlu0 %4598  ;;  %v4606_v6 = vsel %vm566_vm2, %v4593_v18, %v11623_v53 }
 0x9b2   : > { %3681 = vmatmul.mubr.bf16.vlgmr.msra.gmra.mrb[36].mxu0 %v8833_v27  ;;  %4840 = vrot.lane.b32.xlu1 %v4606_v6, %s9078_s22 }
 0x9b3   : > { %3575 = vmatmul.mubr.bf16.vlgmr.msra.gmra.mrb[60].mxu1 %v8833_v27  ;;  %8170 = vmatpush3.bf16.msra.mxu0 %v3478_v52 }
 0x9b4   : > { %3596 = vmatpush1.bf16.msra.mxu1 %v3476_v58  ;;  %v8624_v31 = vpop.permute.xlu1 %8623  ;;  %3688 = vmatprep.mubr.bf16.mxu0 %v8836_v10 }
 0x9b5   : > { %v11631_v61 = vpop.permute.xlu0 %4602  ;;  %v8625_v39 = vunpack.i.l.bf16 %v8624_v31  ;;  %3584 = vmatprep.mubr.bf16.mxu1 %v8836_v10  ;;  %v8626_v12 = vunpack.i.h.bf16 %v8624_v31 }
 0x9b7   : > { %v4604_v41 = vsel %vm566_vm2, %v8625_v39, %v4591_v46  ;;  %v4607_v24 = vsel %vm566_vm2, %v8626_v12, %v4599_v17 }
 0x9b8   : > { %v4601_v57 = vpop.permute.xlu1 %4600  ;;  %4836 = vrot.lane.b32.xlu1 %v4604_v41, %s9078_s22 }
 0x9b9   : > { %v4615_v44 = vpop.permute.xlu0 %4614  ;;  %v4609_v3 = vsel %vm566_vm2, %v4601_v57, %v11631_v61  ;;  %v4608_v34 = vsel %vm566_vm2, %v4599_v17, %v4601_v57 }
 0x9ba   : > { %3689 = vmatmul.mubr.bf16.gmra.mrb[40].mxu0 %v8838_v40  ;;  %4848 = vrot.lane.b32.xlu0 %v4609_v3, %s9078_s22 }
 0x9bb   : > { %3585 = vmatmul.mubr.bf16.gmra.mrb[64].mxu1 %v8838_v40  ;;  %8173 = vmatprep.mubr.msk.bf16.mxu0 %vm1115_vm9, %v8839_v54 }
 0x9bc   : > { %v4613_v14 = vpop.permute.xlu1 %4612  ;;  %4846 = vrot.lane.b32.xlu1 %v4608_v34, %s9078_s22  ;;  %3627 = vmatprep.mubr.bf16.mxu1 %v14454_v8 }
 0x9bd   : > { %v8634_v7 = vpop.permute.xlu0 %8633  ;;  %v4627_v18 = vsel %vm589_vm4, %v4613_v14, %v4615_v44 }
 0x9be   : > { %4744 = vrot.lane.b32.xlu0 %v11378_v4, %s9070_s17  ;;  %v8635_v13 = vunpack.i.l.bf16 %v8634_v7  ;;  %v8636_v15 = vunpack.i.h.bf16 %v8634_v7 }
 0x9c0   : > { %4746 = vrot.lane.b32.xlu1 %v11380_v32, %s9070_s17  ;;  %v11646_v30 = vpop.permute.xlu1 %4616  ;;  %v14512_v32 = vld [vmem:[#allocation61_spill] sm:$0xff]  ;;  %v4626_v36 = vsel %vm589_vm4, %v8635_v13, %v4613_v14 }
 0x9c1   : > { %v4621_v35 = vpop.permute.xlu0 %4620  ;;  %14510 = vst [vmem:[#allocation35_spill] sm:$0xff] %v11646_v30  ;;  %v4628_v56 = vsel %vm589_vm4, %v4615_v44, %v11646_v30  ;;  %v3479_v63 = vsel %vm1006_vm8, %v14512_v32, %v3423_v5  ;;  %v8595_v30 = vunpack.i.l.bf16 %v11411_v25 }
 0x9c2   : > { %4748 = vrot.lane.b32.xlu0 %v11382_v33, %s9070_s17  ;;  %v4629_v27 = vsel %vm589_vm4, %v8636_v15, %v4621_v35  ;;  %v14518_v15 = vld [vmem:[#allocation39_spill] sm:$0xff] }
 0x9c4   : > { %4844 = vrot.lane.b32.xlu1 %v4607_v24, %s9078_s22  ;;  %v11660_v48 = vpop.permute.xlu1 %8628 }
 0x9c5   : > { %v3425_v9 = vpop.permute.xlu0 %3424 }
 0x9c6   : > { %v3480_v4 = vsel %vm1006_vm8, %v3423_v5, %v3425_v9  ;;  %v3481_v42 = vsel %vm1006_vm8, %v3425_v9, %v14511_v37  ;;  %4856 = vrot.lane.b32.xlu0 %v4628_v56, %s9078_s22 }
 0x9c7   : > { %3597 = vmatprep.subr.bf16.mxu1 %v3480_v4  ;;  %8171 = vmatprep.subr.bf16.mxu0 %v3481_v42 }
 0x9c8   : > { %3598 = vmatpush1.bf16.msra.mxu1 %v3479_v63  ;;  %8172 = vmatpush3.bf16.msra.mxu0 %v3481_v42  ;;  %v4623_v5 = vpop.permute.xlu1 %4622 }
 0x9c9   : > { %v11663_v46 = vpop.permute.xlu0 %4624  ;;  %4854 = vrot.lane.b32.xlu1 %v4627_v18, %s9078_s22 }
 0x9ca   : > { %14513 = vst [vmem:[#allocation26_spill] sm:$0xff] %v11663_v46  ;;  %8663 = vrot.lane.b32.xlu0 %v14454_v8, %s9070_s17  ;;  %v4631_v20 = vsel %vm589_vm4, %v4623_v5, %v11663_v46 }
 0x9cb   : > { %7761 = vmatmul.mubr.msk.bf16.vlgmr.msra.gmra.mrb[60].mxu1 %vm1115_vm9, %v8839_v54  ;;  %8174 = vmatmul.mubr.msk.bf16.vlgmr.msra.gmra.mrb[44].mxu0 %vm1115_vm9, %v8840_v21 }
 0x9cc   : > { %3637 = vmatprep.mubr.bf16.mxu1 %v14454_v8  ;;  %v4637_v11 = vpop.permute.xlu1 %4636 }
 0x9cd   : > { %v4635_v38 = vpop.permute.xlu0 %4634  ;;  %4752 = vrot.lane.b32.xlu1 %v11420_v2, %s9070_s17 }
 0x9ce   : > { %4754 = vrot.lane.b32.xlu0 %v11424_v0, %s9070_s17  ;;  %v4630_v0 = vsel %vm589_vm4, %v4621_v35, %v4623_v5  ;;  %v4649_v51 = vsel %vm612_vm6, %v4635_v38, %v4637_v11 }
 0x9d0   : > { %v4643_v28 = vpop.permute.xlu1 %4642 }
 0x9d1   : > { %v11675_v49 = vpop.permute.xlu0 %4638  ;;  %4756 = vrot.lane.b32.xlu1 %v11426_v47, %s9070_s17 }
 0x9d2   : > { %14514 = vst [vmem:[#allocation27_spill] sm:$0xff] %v11675_v49  ;;  %4852 = vrot.lane.b32.xlu0 %v4626_v36, %s9078_s22  ;;  %v4650_v45 = vsel %vm612_vm6, %v4637_v11, %v11675_v49  ;;  %v14517_v11 = vld [vmem:[#allocation41_spill] sm:$0xff] }
 0x9d3   : > { %7762 = vmatmul.mubr.msk.bf16.gmra.mrb[64].mxu1 %vm1115_vm9, %v8840_v21 }
 0x9d4   : > { %v11696_v52 = vpop.permute.xlu1 %4646 }
 0x9d5   : > { %v8639_v2 = vpop.permute.xlu0 %8638  ;;  %4864 = vrot.lane.b32.xlu1 %v4631_v20, %s9078_s22  ;;  %14515 = vst [vmem:[#allocation37_spill] sm:$0xff] %v11696_v52 }
 0x9d6   : > { %4862 = vrot.lane.b32.xlu0 %v4630_v0, %s9078_s22  ;;  %v8640_v16 = vunpack.i.l.bf16 %v8639_v2  ;;  %v8641_v17 = vunpack.i.h.bf16 %v8639_v2 }
 0x9d8   : > { %v4648_v59 = vsel %vm612_vm6, %v8640_v16, %v4635_v38  ;;  %v4651_v60 = vsel %vm612_vm6, %v8641_v17, %v4643_v28  ;;  %v11709_v39 = vpop.permute.xlu1 %4654 }
 0x9d9   : > { %4870 = vrot.lane.b32.xlu1 %v4649_v51, %s9078_s22  ;;  %v4645_v26 = vpop.permute.xlu0 %4644 }
 0x9da   : > { %4860 = vrot.lane.b32.xlu0 %v4629_v27, %s9078_s22  ;;  %v4652_v10 = vsel %vm612_vm6, %v4643_v28, %v4645_v26  ;;  %v4653_v6 = vsel %vm612_vm6, %v4645_v26, %v11696_v52  ;;  %v14519_v26 = vld [vmem:[#allocation40_spill] sm:$0xff] }
 0x9dc   : > { %v11713_v41 = vpop.permute.xlu1 %4658 }
 0x9dd   : > { %4868 = vrot.lane.b32.xlu1 %v4648_v59, %s9078_s22  ;;  %v11705_v58 = vpop.permute.xlu0 %4656 }
 0x9de   : > { %4872 = vrot.lane.b32.xlu0 %v4650_v45, %s9078_s22 }
 0x9e0   : > { %v11717_v57 = vpop.permute.xlu1 %4662 }
 0x9e1   : > { %4878 = vrot.lane.b32.xlu1 %v4652_v10, %s9078_s22  ;;  %v11707_v31 = vpop.permute.xlu0 %4660 }
 0x9e2   : > { %4880 = vrot.lane.b32.xlu0 %v4653_v6, %s9078_s22 }
 0x9e4   : > { %v11721_v24 = vpop.permute.xlu1 %4678 }
 0x9e5   : > { %v11711_v40 = vpop.permute.xlu0 %4664 }
 0x9e6   : > { %4876 = vrot.lane.b32.xlu0 %v4651_v60, %s9078_s22 }
 0x9e8   : > { %v11725_v63 = vpop.permute.xlu1 %4682 }
 0x9e9   : > { %v11715_v54 = vpop.permute.xlu0 %4680 }
 0x9ec   : > { %v11729_v13 = vpop.permute.xlu1 %4686 }
 0x9ed   : > { %v11719_v44 = vpop.permute.xlu0 %8643 }
 0x9f0   : > { %v11733_v5 = vpop.permute.xlu1 %4690 }
 0x9f1   : > { %v11723_v9 = vpop.permute.xlu0 %4688 }
 0x9f5   : > { %v11727_v21 = vpop.permute.xlu0 %4700 }
 0x9f9   : > { %v11731_v38 = vpop.permute.xlu0 %4704 }
 0x9fd   : > { %v11735_v36 = vpop.permute.xlu0 %4708 }
 0x9fe   : > { %14516 = vst [vmem:[#allocation33_spill] sm:$0xff] %v11735_v36 }
 0xa85   : > { %v7972_v3 = vpop.f32.mrb[36].mxu0 }
 0xa86   : > { %v7973_v34 = vpop.f32.mrb[37].mxu0 }
 0xa87   : > { %v7974_v14 = vadd.f32 %v7973_v34, %v7972_v3  ;;  %v7975_v7 = vpop.f32.mrb[38].mxu0  ;;  %v14520_v3 = vld [vmem:[#allocation38_spill] sm:$0xff] }
 0xa88   : > { %v7976_v12 = vpop.f32.mrb[39].mxu0 }
 0xa89   : > { %v7977_v35 = vadd.f32 %v7976_v12, %v7975_v7  ;;  %v3683_v16 = vadd.f32 %v7974_v14, %v14518_v15 }
 0xa8b   : > { %v3686_v34 = vadd.f32 %v7977_v35, %v14520_v3 }
 0xa8d   : > { %v7978_v56 = vpop.f32.mrb[40].mxu0 }
 0xa8e   : > { %v7979_v4 = vpop.f32.mrb[41].mxu0 }
 0xa8f   : > { %v7980_v37 = vadd.f32 %v7979_v4, %v7978_v56  ;;  %v7981_v42 = vpop.f32.mrb[42].mxu0 }
 0xa90   : > { %v7982_v32 = vpop.f32.mrb[43].mxu0 }
 0xa91   : > { %v7983_v18 = vadd.f32 %v7982_v32, %v7981_v42  ;;  %v3691_v20 = vadd.f32 %v7980_v37, %v14517_v11 }
 0xa93   : > { %v3694_v45 = vadd.f32 %v7983_v18, %v14519_v26  ;;  %v11745_v18 = vpop.permute.xlu1 %4702 }
 0xa9e   : > { %v3629_v2 = vpop.f32.mrb[60].mxu1  ;;  %v8175_v0 = vpop.f32.mrb[44].mxu0 }
 0xa9f   : > { %v8265_v51 = vadd.f32 %v3629_v2, %v14518_v15  ;;  %v3740_v27 = vadd.f32 %v8175_v0, %v3691_v20  ;;  %v3631_v28 = vpop.f32.mrb[61].mxu1  ;;  %v3731_v59 = vpop.f32.mrb[45].mxu0 }
 0xaa0   : > { %v8266_v10 = vadd.f32 %v3631_v28, %v14518_v15  ;;  %v3732_v17 = vadd.f32 %v3731_v59, %v3683_v16  ;;  %v3633_v6 = vpop.f32.mrb[62].mxu1  ;;  %v8176_v60 = vpop.f32.mrb[46].mxu0 }
 0xaa1   : > { %v3746_v7 = vmax.f32 %v8265_v51, 0.0  ;;  %v3754_v12 = vmax.f32 %v3740_v27, 0.0  ;;  %v8267_v56 = vadd.f32 %v3633_v6, %v14520_v3  ;;  %v3743_v4 = vadd.f32 %v8176_v60, %v3694_v45  ;;  %v3635_v14 = vpop.f32.mrb[63].mxu1  ;;  %v3734_v37 = vpop.f32.mrb[47].mxu0 }
 0xaa2   : > { %v3747_v42 = vmax.f32 %v8266_v10, 0.0  ;;  %v3748_v32 = vmax.f32 %v3732_v17, 0.0  ;;  %v8268_v20 = vadd.f32 %v3635_v14, %v14520_v3  ;;  %v3735_v2 = vadd.f32 %v3734_v37, %v3686_v34  ;;  %v11755_v3 = vpop.permute.xlu0 %4712 }
 0xaa3   : > { %v3749_v0 = vmax.f32 %v8267_v56, 0.0  ;;  %v3757_v15 = vmax.f32 %v3743_v4, 0.0  ;;  %v3758_v35 = vmul.f32 %v3746_v7, %v9883_v22  ;;  %v3766_v51 = vmul.f32 %v3754_v12, %v9849_v29 }
 0xaa4   : > { %v3750_v16 = vmax.f32 %v8268_v20, 0.0  ;;  %v3751_v28 = vmax.f32 %v3735_v2, 0.0  ;;  %v3759_v45 = vmul.f32 %v3747_v42, %v9886_v43  ;;  %v3760_v10 = vmul.f32 %v3748_v32, %v9849_v29  ;;  %v11763_v32 = vpop.permute.xlu1 %8648 }
 0xaa5   : > { %v3761_v27 = vmul.f32 %v3749_v0, %v9883_v22  ;;  %v3769_v59 = vmul.f32 %v3757_v15, %v9849_v29 }
 0xaa6   : > { %v3762_v17 = vmul.f32 %v3750_v16, %v9886_v43  ;;  %v3763_v6 = vmul.f32 %v3751_v28, %v9849_v29  ;;  %v3639_v60 = vpop.f32.mrb[64].mxu1 }
 0xaa7   : > { %v11757_v34 = vpack.c.bf16 %v3761_v27, %v3758_v35  ;;  %v3775_v7 = vpack.c.bf16 %v3769_v59, %v3766_v51  ;;  %v8269_v12 = vadd.f32 %v3639_v60, %v14517_v11  ;;  %v3641_v56 = vpop.f32.mrb[65].mxu1  ;;  %v11769_v51 = vpop.permute.xlu0 %4724 }
 0xaa8   : > { %v11760_v4 = vpack.c.bf16 %v3762_v17, %v3759_v45  ;;  %v3772_v14 = vpack.c.bf16 %v3763_v6, %v3760_v10  ;;  %v8270_v37 = vadd.f32 %v3641_v56, %v14517_v11  ;;  %v3643_v42 = vpop.f32.mrb[66].mxu1  ;;  %14521 = vst [vmem:[#allocation34_spill] sm:$0xff] %v11769_v51  ;;  %v11777_v10 = vpop.permute.xlu1 %4710 }
 0xaa9   : > { %v3752_v20 = vmax.f32 %v8269_v12, 0.0  ;;  %v8271_v2 = vadd.f32 %v3643_v42, %v14519_v26  ;;  %v3645_v0 = vpop.f32.mrb[67].mxu1  ;;  %3890 = vrot.lane.b32.xlu0 %v3775_v7, %s9071_s28  ;;  %3828 = vrot.lane.b32.xlu1 %v3775_v7, %s9072_s18  ;;  %14522 = vst [vmem:[#allocation30_spill] sm:$0xff] %v11777_v10 }
 0xaaa   : > { %v3753_v15 = vmax.f32 %v8270_v37, 0.0  ;;  %v8272_v16 = vadd.f32 %v3645_v0, %v14519_v26 }
 0xaab   : > { %v3755_v28 = vmax.f32 %v8271_v2, 0.0  ;;  %v3764_v11 = vmul.f32 %v3752_v20, %v9883_v22  ;;  %v11785_v6 = vpop.permute.xlu0 %4824 }
 0xaac   : > { %v3756_v35 = vmax.f32 %v8272_v16, 0.0  ;;  %v3765_v59 = vmul.f32 %v3753_v15, %v9886_v43  ;;  %14523 = vst [vmem:[#allocation28_spill] sm:$0xff] %v11785_v6  ;;  %v11787_v60 = vpop.permute.xlu1 %4722 }
 0xaad   : > { %v3767_v27 = vmul.f32 %v3755_v28, %v9883_v22  ;;  %3916 = vrot.lane.b32.xlu0 %v3775_v7, %s9073_s19  ;;  %3850 = vrot.lane.b32.xlu1 %v3775_v7, %s9074_s21  ;;  %14524 = vst [vmem:[#allocation29_spill] sm:$0xff] %v11787_v60 }
 0xaae   : > { %v3768_v45 = vmul.f32 %v3756_v35, %v9886_v43 }
 0xaaf   : > { %v11779_v17 = vpack.c.bf16 %v3767_v27, %v3764_v11  ;;  %v11791_v12 = vpop.permute.xlu0 %8653 }
 0xab0   : > { %v11781_v26 = vpack.c.bf16 %v3768_v45, %v3765_v59  ;;  %14525 = vst [vmem:[#allocation36_spill] sm:$0xff] %v11791_v12  ;;  %v11795_v56 = vpop.permute.xlu1 %4726 }
 0xab1   : > { %3938 = vrot.lane.b32.xlu0 %v3775_v7, %s9075_s24  ;;  %3872 = vrot.lane.b32.xlu1 %v3775_v7, %s9076_s15  ;;  %14526 = vst [vmem:[#allocation54_spill] sm:$0xff] %v11795_v56 }
 0xab3   : > { %v11799_v37 = vpop.permute.xlu0 %4732 }
 0xab4   : > { %14527 = vst [vmem:[#allocation46_spill] sm:$0xff] %v11799_v37  ;;  %v11801_v42 = vpop.permute.xlu1 %4822 }
 0xab5   : > { %3960 = vrot.lane.b32.xlu0 %v3775_v7, %s9077_s27  ;;  %3982 = vrot.lane.b32.xlu1 %v3775_v7, %s9070_s17  ;;  %14528 = vst [vmem:[#allocation43_spill] sm:$0xff] %v11801_v42 }
 0xab7   : > { %v11805_v20 = vpop.permute.xlu0 %8658 }
 0xab8   : > { %14529 = vst [vmem:[#allocation51_spill] sm:$0xff] %v11805_v20 }
 0xab9   : > { %3884 = vrot.lane.b32.xlu0 %v3772_v14, %s9071_s28  ;;  %4060 = vrot.lane.b32.xlu1 %v3775_v7, %s9078_s22  ;;  %v11809_v7 = vpop.permute.xlu1 %4730 }
 0xaba   : > { %14530 = vst [vmem:[#allocation49_spill] sm:$0xff] %v11809_v7 }
 0xabb   : > { %v11814_v2 = vpop.permute.xlu0 %4830 }
 0xabc   : > { %14531 = vst [vmem:[#allocation58_spill] sm:$0xff] %v11814_v2 }
 0xabd   : > { %3908 = vrot.lane.b32.xlu0 %v3772_v14, %s9073_s19  ;;  %3820 = vrot.lane.b32.xlu1 %v3772_v14, %s9072_s18  ;;  %v11816_v0 = vpop.permute.xlu1 %4734 }
 0xabe   : > { %14532 = vst [vmem:[#allocation47_spill] sm:$0xff] %v11816_v0 }
 0xabf   : > { %v11821_v15 = vpop.permute.xlu0 %4838 }
 0xac0   : > { %14533 = vst [vmem:[#allocation42_spill] sm:$0xff] %v11821_v15 }
 0xac1   : > { %3930 = vrot.lane.b32.xlu0 %v3772_v14, %s9075_s24  ;;  %3842 = vrot.lane.b32.xlu1 %v3772_v14, %s9074_s21  ;;  %v11827_v16 = vpop.permute.xlu1 %4832 }
 0xac2   : > { %14534 = vst [vmem:[#allocation57_spill] sm:$0xff] %v11827_v16  ;;  %v8591_v16 = vunpack.i.h.bf16 %v11376_v1 }
 0xac3   : > { %v11829_v28 = vpop.permute.xlu0 %4848 }
 0xac4   : > { %14535 = vst [vmem:[#allocation55_spill] sm:$0xff] %v11829_v28 }
 0xac5   : > { %3952 = vrot.lane.b32.xlu0 %v3772_v14, %s9077_s27  ;;  %3864 = vrot.lane.b32.xlu1 %v3772_v14, %s9076_s15  ;;  %v11835_v35 = vpop.permute.xlu1 %4840 }
 0xac6   : > { %14536 = vst [vmem:[#allocation52_spill] sm:$0xff] %v11835_v35 }
 0xac7   : > { %v11843_v11 = vpop.permute.xlu0 %4744 }
 0xac8   : > { %14538 = vst [vmem:[#allocation59_spill] sm:$0xff] %v11843_v11 }
 0xac9   : > { %3816 = vrot.lane.b32.xlu0 %v11757_v34, %s9072_s18  ;;  %3974 = vrot.lane.b32.xlu1 %v3772_v14, %s9070_s17 }
 0xacb   : > { %v11851_v59 = vpop.permute.xlu0 %4748 }
 0xacc   : > { %14540 = vst [vmem:[#allocation56_spill] sm:$0xff] %v11851_v59 }
 0xacd   : > { %3838 = vrot.lane.b32.xlu0 %v11757_v34, %s9074_s21  ;;  %4052 = vrot.lane.b32.xlu1 %v3772_v14, %s9078_s22  ;;  %v11841_v14 = vpop.permute.xlu1 %4836 }
 0xace   : > { %14537 = vst [vmem:[#allocation48_spill] sm:$0xff] %v11841_v14 }
 0xacf   : > { %v11863_v45 = vpop.permute.xlu0 %4856 }
 0xad0   : > { %14542 = vst [vmem:[#allocation50_spill] sm:$0xff] %v11863_v45 }
 0xad1   : > { %3860 = vrot.lane.b32.xlu0 %v11757_v34, %s9076_s15  ;;  %3880 = vrot.lane.b32.xlu1 %v11757_v34, %s9071_s28  ;;  %v11849_v27 = vpop.permute.xlu1 %4846 }
 0xad2   : > { %14539 = vst [vmem:[#allocation44_spill] sm:$0xff] %v11849_v27 }
 0xad3   : > { %v11871_v43 = vpop.permute.xlu0 %8663 }
 0xad4   : > { %14544 = vst [vmem:[#allocation45_spill] sm:$0xff] %v11871_v43 }
 0xad5   : > { %3904 = vrot.lane.b32.xlu0 %v11757_v34, %s9073_s19  ;;  %3948 = vrot.lane.b32.xlu1 %v11757_v34, %s9077_s27 }
 0xad7   : > { %v11883_v8 = vpop.permute.xlu0 %4754 }
 0xad8   : > { %14546 = vst [vmem:[#allocation41_spill] sm:$0xff] %v11883_v8 }
 0xad9   : > { %3926 = vrot.lane.b32.xlu0 %v11757_v34, %s9075_s24  ;;  %3970 = vrot.lane.b32.xlu1 %v11757_v34, %s9070_s17 }
 0xadd   : > { %4048 = vrot.lane.b32.xlu0 %v11757_v34, %s9078_s22  ;;  %3882 = vrot.lane.b32.xlu1 %v11760_v4, %s9071_s28  ;;  %v11861_v34 = vpop.permute.xlu1 %4746 }
 0xade   : > { %14541 = vst [vmem:[#allocation60_spill] sm:$0xff] %v11861_v34  ;;  %v8621_v34 = vunpack.i.h.bf16 %v11599_v62 }
 0xae1   : > { %3818 = vrot.lane.b32.xlu0 %v11760_v4, %s9072_s18  ;;  %3906 = vrot.lane.b32.xlu1 %v11760_v4, %s9073_s19  ;;  %v11869_v29 = vpop.permute.xlu1 %4844 }
 0xae2   : > { %14543 = vst [vmem:[#allocation53_spill] sm:$0xff] %v11869_v29  ;;  %v11891_v29 = vpop.permute.xlu0 %4852 }
 0xae3   : > { %14548 = vst [vmem:[#allocation40_spill] sm:$0xff] %v11891_v29 }
 0xae5   : > { %3840 = vrot.lane.b32.xlu0 %v11760_v4, %s9074_s21  ;;  %3928 = vrot.lane.b32.xlu1 %v11760_v4, %s9075_s24  ;;  %v11881_v22 = vpop.permute.xlu1 %4854 }
 0xae6   : > { %14545 = vst [vmem:[#allocation61_spill] sm:$0xff] %v11881_v22  ;;  %v11903_v22 = vpop.permute.xlu0 %4862 }
 0xae7   : > { %14550 = vst [vmem:[#allocation62_spill] sm:$0xff] %v11903_v22 }
 0xae9   : > { %3862 = vrot.lane.b32.xlu0 %v11760_v4, %s9076_s15  ;;  %3950 = vrot.lane.b32.xlu1 %v11760_v4, %s9077_s27  ;;  %v11889_v45 = vpop.permute.xlu1 %4752 }
 0xaea   : > { %14547 = vst [vmem:[#allocation39_spill] sm:$0xff] %v11889_v45  ;;  %v11911_v27 = vpop.permute.xlu0 %4860 }
 0xaeb   : > { %14552 = vst [vmem:[#allocation64_spill] sm:$0xff] %v11911_v27 }
 0xaed   : > { %3972 = vrot.lane.b32.xlu0 %v11760_v4, %s9070_s17  ;;  %3886 = vrot.lane.b32.xlu1 %v11779_v17, %s9071_s28 }
 0xaee   : > { %v11923_v28 = vpop.permute.xlu0 %4872 }
 0xaef   : > { %14554 = vst [vmem:[#allocation66_spill] sm:$0xff] %v11923_v28 }
 0xaf1   : > { %4050 = vrot.lane.b32.xlu0 %v11760_v4, %s9078_s22  ;;  %3912 = vrot.lane.b32.xlu1 %v11779_v17, %s9073_s19  ;;  %v11901_v4 = vpop.permute.xlu1 %4756 }
 0xaf2   : > { %14549 = vst [vmem:[#allocation38_spill] sm:$0xff] %v11901_v4  ;;  %v8601_v4 = vunpack.i.h.bf16 %v11459_v23 }
 0xaf5   : > { %3824 = vrot.lane.b32.xlu0 %v11779_v17, %s9072_s18  ;;  %4056 = vrot.lane.b32.xlu1 %v11779_v17, %s9078_s22  ;;  %v11909_v29 = vpop.permute.xlu1 %4864 }
 0xaf6   : > { %14551 = vst [vmem:[#allocation63_spill] sm:$0xff] %v11909_v29  ;;  %v11929_v29 = vpop.permute.xlu0 %4880 }
 0xaf7   : > { %14556 = vst [vmem:[#allocation68_spill] sm:$0xff] %v11929_v29 }
 0xaf9   : > { %3846 = vrot.lane.b32.xlu0 %v11779_v17, %s9074_s21  ;;  %3978 = vrot.lane.b32.xlu1 %v11779_v17, %s9070_s17  ;;  %v11921_v22 = vpop.permute.xlu1 %4870 }
 0xafa   : > { %14553 = vst [vmem:[#allocation65_spill] sm:$0xff] %v11921_v22  ;;  %v11937_v14 = vpop.permute.xlu0 %4876 }
 0xafb   : > { %14558 = vst [vmem:[#allocation70_spill] sm:$0xff] %v11937_v14 }
 0xafd   : > { %3868 = vrot.lane.b32.xlu0 %v11779_v17, %s9076_s15  ;;  %3888 = vrot.lane.b32.xlu1 %v11781_v26, %s9071_s28  ;;  %v11927_v27 = vpop.permute.xlu1 %4868 }
 0xafe   : > { %14555 = vst [vmem:[#allocation67_spill] sm:$0xff] %v11927_v27 }
 0xb01   : > { %3934 = vrot.lane.b32.xlu0 %v11779_v17, %s9075_s24  ;;  %3914 = vrot.lane.b32.xlu1 %v11781_v26, %s9073_s19 }
 0xb05   : > { %3956 = vrot.lane.b32.xlu0 %v11779_v17, %s9077_s27  ;;  %3936 = vrot.lane.b32.xlu1 %v11781_v26, %s9075_s24  ;;  %v11935_v17 = vpop.permute.xlu1 %4878 }
 0xb06   : > { %14557 = vst [vmem:[#allocation69_spill] sm:$0xff] %v11935_v17 }
 0xb09   : > { %3826 = vrot.lane.b32.xlu0 %v11781_v26, %s9072_s18  ;;  %3958 = vrot.lane.b32.xlu1 %v11781_v26, %s9077_s27 }
 0xb0d   : > { %3848 = vrot.lane.b32.xlu0 %v11781_v26, %s9074_s21 }
 0xb11   : > { %3870 = vrot.lane.b32.xlu0 %v11781_v26, %s9076_s15 }
 0xb15   : > { %3980 = vrot.lane.b32.xlu0 %v11781_v26, %s9070_s17 }
 0xb19   : > { %4058 = vrot.lane.b32.xlu0 %v11781_v26, %s9078_s22 }
 0xb1b   : > { %v11941_v22 = vpop.permute.xlu0 %3890  ;;  %v11943_v28 = vpop.permute.xlu1 %3828 }
 0xb1c   : > { %4076 = vrot.lane.b32.xlu1 %v11943_v28, %s9078_s22 }
 0xb1d   : > { %4124 = vrot.lane.b32.xlu0 %v11941_v22, %s9078_s22 }
 0xb1f   : > { %v11949_v29 = vpop.permute.xlu0 %3916  ;;  %v11951_v27 = vpop.permute.xlu1 %3850 }
 0xb20   : > { %v3925_v6 = vsel %vm662_vm3, %v11949_v29, %v8591_v16 }
 0xb21   : > { %4092 = vrot.lane.b32.xlu0 %v11951_v27, %s9078_s22 }
 0xb23   : > { %v11955_v14 = vpop.permute.xlu0 %3938  ;;  %v11957_v26 = vpop.permute.xlu1 %3872 }
 0xb24   : > { %v3947_v16 = vsel %vm685_vm5, %v11955_v14, %v8601_v4  ;;  %v8590_v4 = vunpack.i.l.bf16 %v11376_v1 }
 0xb25   : > { %4108 = vrot.lane.b32.xlu0 %v11957_v26, %s9078_s22 }
 0xb27   : > { %v11961_v17 = vpop.permute.xlu0 %3960  ;;  %v11963_v15 = vpop.permute.xlu1 %3982 }
 0xb28   : > { %v3991_v52 = vsel %vm731_vm0, %v11963_v15, %v8621_v34 }
 0xb2b   : > { %v11965_v35 = vpop.permute.xlu0 %3884  ;;  %v11967_v2 = vpop.permute.xlu1 %4060 }
 0xb2c   : > { %14559 = vst [vmem:[#allocation71_spill] sm:$0xff] %v11967_v2  ;;  %4116 = vrot.lane.b32.xlu1 %v11965_v35, %s9078_s22 }
 0xb2f   : > { %v11972_v20 = vpop.permute.xlu0 %3908  ;;  %v11974_v42 = vpop.permute.xlu1 %3820 }
 0xb30   : > { %4068 = vrot.lane.b32.xlu0 %v11974_v42, %s9078_s22  ;;  %4140 = vrot.lane.b32.xlu1 %v3925_v6, %s9078_s22  ;;  %v8611_v6 = vunpack.i.h.bf16 %v11591_v50 }
 0xb32   : > { %v3969_v49 = vsel %vm708_vm7, %v11961_v17, %v8611_v6  ;;  %v3922_v6 = vsel %vm662_vm3, %v11972_v20, %v8590_v4 }
 0xb33   : > { %v11981_v45 = vpop.permute.xlu0 %3930  ;;  %v11983_v8 = vpop.permute.xlu1 %3842 }
 0xb34   : > { %4084 = vrot.lane.b32.xlu0 %v11983_v8, %s9078_s22 }
 0xb37   : > { %v11988_v11 = vpop.permute.xlu0 %3952  ;;  %v11990_v2 = vpop.permute.xlu1 %3864 }
 0xb38   : > { %4156 = vrot.lane.b32.xlu0 %v3947_v16, %s9078_s22  ;;  %4100 = vrot.lane.b32.xlu1 %v11990_v2, %s9078_s22  ;;  %v8600_v16 = vunpack.i.l.bf16 %v11459_v23  ;;  %v8620_v23 = vunpack.i.l.bf16 %v11599_v62  ;;  %v8605_v62 = vunpack.i.l.bf16 %v11577_v19 }
 0xb3a   : > { %v3944_v0 = vsel %vm685_vm5, %v11981_v45, %v8600_v16 }
 0xb3b   : > { %v3817_v59 = vpop.permute.xlu0 %3816  ;;  %v11999_v43 = vpop.permute.xlu1 %3974 }
 0xb3c   : > { %4172 = vrot.lane.b32.xlu0 %v3969_v49, %s9078_s22  ;;  %4188 = vrot.lane.b32.xlu1 %v3991_v52, %s9078_s22  ;;  %v8610_v49 = vunpack.i.l.bf16 %v11591_v50 }
 0xb3e   : > { %v3966_v1 = vsel %vm708_vm7, %v11988_v11, %v8610_v49 }
 0xb3f   : > { %v3839_v7 = vpop.permute.xlu0 %3838  ;;  %v12009_v37 = vpop.permute.xlu1 %4052 }
 0xb40   : > { %4148 = vrot.lane.b32.xlu0 %v3944_v0, %s9078_s22  ;;  %4132 = vrot.lane.b32.xlu1 %v3922_v6, %s9078_s22  ;;  %v3988_v0 = vsel %vm731_vm0, %v11999_v43, %v8620_v23  ;;  %v8615_v23 = vunpack.i.l.bf16 %v11601_v55 }
 0xb43   : > { %v3861_v52 = vpop.permute.xlu0 %3860  ;;  %v3881_v34 = vpop.permute.xlu1 %3880 }
 0xb44   : > { %4164 = vrot.lane.b32.xlu1 %v3966_v1, %s9078_s22  ;;  %v3852_v1 = vsel %vm589_vm4, %v8605_v62, %v3839_v7  ;;  %v3874_v46 = vsel %vm612_vm6, %v8615_v23, %v3861_v52 }
 0xb47   : > { %v12022_v56 = vpop.permute.xlu0 %3904  ;;  %v12024_v16 = vpop.permute.xlu1 %3948 }
 0xb48   : > { %4126 = vrot.lane.b32.xlu0 %v12022_v56, %s9078_s22  ;;  %4180 = vrot.lane.b32.xlu1 %v3988_v0, %s9078_s22 }
 0xb4b   : > { %v12031_v50 = vpop.permute.xlu0 %3926  ;;  %v12033_v4 = vpop.permute.xlu1 %3970 }
 0xb4c   : > { %4158 = vrot.lane.b32.xlu0 %v12024_v16, %s9078_s22  ;;  %4110 = vrot.lane.b32.xlu1 %v3881_v34, %s9078_s22 }
 0xb4f   : > { %v4049_v6 = vpop.permute.xlu0 %4048  ;;  %v3883_v49 = vpop.permute.xlu1 %3882 }
 0xb50   : > { %4078 = vrot.lane.b32.xlu0 %v3852_v1, %s9078_s22  ;;  %4142 = vrot.lane.b32.xlu1 %v12031_v50, %s9078_s22  ;;  %v3893_v62 = vsel %vm631_vm1, %v3883_v49, %v11965_v35  ;;  %v3830_v1 = vsel %vm566_vm2, %v8595_v30, %v3817_v59 }
 0xb53   : > { %v3819_v0 = vpop.permute.xlu0 %3818  ;;  %v3907_v12 = vpop.permute.xlu1 %3906 }
 0xb54   : > { %4094 = vrot.lane.b32.xlu0 %v3874_v46, %s9078_s22  ;;  %4174 = vrot.lane.b32.xlu1 %v12033_v4, %s9078_s22  ;;  %v3921_v46 = vsel %vm662_vm3, %v3907_v12, %v11972_v20  ;;  %v3832_v36 = vsel %vm566_vm2, %v3819_v0, %v11974_v42  ;;  %v3831_v30 = vsel %vm566_vm2, %v3817_v59, %v3819_v0 }
 0xb57   : > { %v3841_v60 = vpop.permute.xlu0 %3840  ;;  %v3929_v51 = vpop.permute.xlu1 %3928 }
 0xb58   : > { %4114 = vrot.lane.b32.xlu0 %v3893_v62, %s9078_s22  ;;  %4062 = vrot.lane.b32.xlu1 %v3830_v1, %s9078_s22  ;;  %v3853_v35 = vsel %vm589_vm4, %v3839_v7, %v3841_v60  ;;  %v8630_v1 = vunpack.i.l.bf16 %v11660_v48 }
 0xb5a   : > { %v4190_v59 = vsel %vm1006_vm8, %v8630_v1, %v4049_v6 }
 0xb5b   : > { %v3863_v23 = vpop.permute.xlu0 %3862  ;;  %v3951_v62 = vpop.permute.xlu1 %3950 }
 0xb5c   : > { %4130 = vrot.lane.b32.xlu0 %v3921_v46, %s9078_s22  ;;  %4066 = vrot.lane.b32.xlu1 %v3832_v36, %s9078_s22  ;;  %v3965_v42 = vsel %vm708_vm7, %v3951_v62, %v11988_v11  ;;  %v3943_v36 = vsel %vm685_vm5, %v3929_v51, %v11981_v45  ;;  %v3876_v46 = vsel %vm612_vm6, %v3863_v23, %v11990_v2 }
 0xb5d   : > { %v3854_v11 = vsel %vm589_vm4, %v3841_v60, %v11983_v8  ;;  %v3964_v60 = vsel %vm708_vm7, %v12024_v16, %v3951_v62 }
 0xb5f   : > { %v3973_v10 = vpop.permute.xlu0 %3972  ;;  %v12082_v45 = vpop.permute.xlu1 %3886 }
 0xb60   : > { %4080 = vrot.lane.b32.xlu0 %v3853_v35, %s9078_s22  ;;  %4064 = vrot.lane.b32.xlu1 %v3831_v30, %s9078_s22  ;;  %v3875_v30 = vsel %vm612_vm6, %v3861_v52, %v3863_v23  ;;  %v3987_v8 = vsel %vm731_vm0, %v3973_v10, %v11999_v43  ;;  %v3942_v43 = vsel %vm685_vm5, %v12031_v50, %v3929_v51 }
 0xb63   : > { %v12065_v20 = vpop.permute.xlu0 %4050  ;;  %v12092_v2 = vpop.permute.xlu1 %3912 }
 0xb64   : > { %4162 = vrot.lane.b32.xlu0 %v3965_v42, %s9078_s22  ;;  %4146 = vrot.lane.b32.xlu1 %v3943_v36, %s9078_s22  ;;  %v4191_v7 = vsel %vm1006_vm8, %v4049_v6, %v12065_v20  ;;  %v3892_v6 = vsel %vm631_vm1, %v3881_v34, %v3883_v49  ;;  %v3920_v34 = vsel %vm662_vm3, %v12022_v56, %v3907_v12  ;;  %v8606_v56 = vunpack.i.h.bf16 %v11577_v19 }
 0xb65   : > { %4304 = vmatprep.subr.bf16.mxu0 %v4191_v7  ;;  %v3986_v12 = vsel %vm731_vm0, %v12033_v4, %v3973_v10  ;;  %v8596_v10 = vunpack.i.h.bf16 %v11411_v25  ;;  %v8616_v7 = vunpack.i.h.bf16 %v11601_v55  ;;  %v4667_v25 = vsel %vm631_vm1, %v11705_v58, %v11713_v41 }
 0xb66   : > { %4305 = vmatpush1.bf16.msra.mxu0 %v4190_v59 }
 0xb67   : > { %v12076_v0 = vpop.permute.xlu0 %3824  ;;  %v4057_v49 = vpop.permute.xlu1 %4056 }
 0xb68   : > { %4098 = vrot.lane.b32.xlu0 %v3876_v46, %s9078_s22  ;;  %4082 = vrot.lane.b32.xlu1 %v3854_v11, %s9078_s22  ;;  %v3833_v36 = vsel %vm566_vm2, %v8596_v10, %v12076_v0 }
 0xb6b   : > { %v12086_v35 = vpop.permute.xlu0 %3846  ;;  %v12116_v16 = vpop.permute.xlu1 %3978 }
 0xb6c   : > { %4096 = vrot.lane.b32.xlu0 %v3875_v30, %s9078_s22  ;;  %4112 = vrot.lane.b32.xlu1 %v3892_v6, %s9078_s22  ;;  %v3855_v51 = vsel %vm589_vm4, %v8606_v56, %v12086_v35 }
 0xb6f   : > { %v12094_v1 = vpop.permute.xlu0 %3868  ;;  %v12126_v50 = vpop.permute.xlu1 %3888 }
 0xb70   : > { %4178 = vrot.lane.b32.xlu0 %v3987_v8, %s9078_s22  ;;  %4160 = vrot.lane.b32.xlu1 %v3964_v60, %s9078_s22  ;;  %v3895_v19 = vsel %vm631_vm1, %v12126_v50, %v11941_v22  ;;  %v3877_v46 = vsel %vm612_vm6, %v8616_v7, %v12094_v1  ;;  %v8631_v22 = vunpack.i.h.bf16 %v11660_v48  ;;  %v4668_v60 = vsel %vm631_vm1, %v11707_v31, %v11717_v57 }
 0xb72   : > { %v4193_v8 = vsel %vm1006_vm8, %v8631_v22, %v4057_v49 }
 0xb73   : > { %v12102_v52 = vpop.permute.xlu0 %3934  ;;  %v12147_v11 = vpop.permute.xlu1 %3914 }
 0xb74   : > { %4128 = vrot.lane.b32.xlu0 %v3920_v34, %s9078_s22  ;;  %4118 = vrot.lane.b32.xlu1 %v12082_v45, %s9078_s22  ;;  %v3924_v55 = vsel %vm662_vm3, %v12147_v11, %v11949_v29  ;;  %v3923_v22 = vsel %vm662_vm3, %v12092_v2, %v12147_v11  ;;  %v8646_v11 = vunpack.i.h.bf16 %v11719_v44 }
 0xb77   : > { %v12109_v23 = vpop.permute.xlu0 %3956  ;;  %v3937_v29 = vpop.permute.xlu1 %3936 }
 0xb78   : > { %4144 = vrot.lane.b32.xlu0 %v3942_v43, %s9078_s22  ;;  %4134 = vrot.lane.b32.xlu1 %v12092_v2, %s9078_s22 }
 0xb7b   : > { %v3827_v62 = vpop.permute.xlu0 %3826 }
 0xb7c   : > { %4176 = vrot.lane.b32.xlu0 %v3986_v12, %s9078_s22  ;;  %4166 = vrot.lane.b32.xlu1 %v12109_v23, %s9078_s22  ;;  %v3835_v48 = vsel %vm566_vm2, %v3827_v62, %v11943_v28  ;;  %v3834_v43 = vsel %vm566_vm2, %v12076_v0, %v3827_v62  ;;  %v4666_v28 = vsel %vm631_vm1, %v11709_v39, %v11705_v58  ;;  %v12182_v12 = vpop.permute.xlu1 %3958 }
 0xb7d   : > { %v3968_v10 = vsel %vm708_vm7, %v12182_v12, %v11961_v17  ;;  %v3894_v17 = vsel %vm631_vm1, %v12082_v45, %v12126_v50  ;;  %v4695_v50 = vsel %vm662_vm3, %v11715_v54, %v11725_v63 }
 0xb7f   : > { %v3849_v42 = vpop.permute.xlu0 %3848 }
 0xb80   : > { %4150 = vrot.lane.b32.xlu0 %v12102_v52, %s9078_s22  ;;  %4086 = vrot.lane.b32.xlu1 %v3855_v51, %s9078_s22  ;;  %v3857_v0 = vsel %vm589_vm4, %v3849_v42, %v11951_v27  ;;  %v4669_v51 = vsel %vm631_vm1, %v11717_v57, %v11711_v40 }
 0xb83   : > { %v3871_v4 = vpop.permute.xlu0 %3870 }
 0xb84   : > { %4070 = vrot.lane.b32.xlu0 %v3833_v36, %s9078_s22  ;;  %4122 = vrot.lane.b32.xlu1 %v3895_v19, %s9078_s22  ;;  %v3878_v19 = vsel %vm612_vm6, %v12094_v1, %v3871_v4  ;;  %v4694_v1 = vsel %vm662_vm3, %v11721_v24, %v11715_v54  ;;  %v8645_v54 = vunpack.i.l.bf16 %v11719_v44 }
 0xb87   : > { %v12140_v59 = vpop.permute.xlu0 %3980 }
 0xb88   : > { %4102 = vrot.lane.b32.xlu0 %v3877_v46, %s9078_s22  ;;  %4888 = vrot.lane.b32.xlu1 %v4667_v25, %s9078_s22  ;;  %v3945_v25 = vsel %vm685_vm5, %v12102_v52, %v3937_v29 }
 0xb8b   : > { %v12152_v30 = vpop.permute.xlu0 %4058 }
 0xb8c   : > { %4138 = vrot.lane.b32.xlu0 %v3924_v55, %s9078_s22  ;;  %4884 = vrot.lane.b32.xlu1 %v11709_v39, %s9078_s22  ;;  %v4194_v6 = vsel %vm1006_vm8, %v4057_v49, %v12152_v30  ;;  %v3946_v49 = vsel %vm685_vm5, %v3937_v29, %v11955_v14  ;;  %v3856_v39 = vsel %vm589_vm4, %v12086_v35, %v3849_v42 }
 0xb8d   : > { %4306 = vmatprep.subr.bf16.mxu0 %v4194_v6  ;;  %v4696_v55 = vsel %vm662_vm3, %v11725_v63, %v8645_v54  ;;  %v4697_v6 = vsel %vm662_vm3, %v11729_v13, %v11723_v9 }
 0xb8e   : > { %4307 = vmatpush1.bf16.msra.mxu0 %v4193_v8  ;;  %v12190_v62 = vpop.permute.xlu1 %4076  ;;  %v4698_v8 = vsel %vm662_vm3, %v11723_v9, %v11733_v5 }
 0xb8f   : > { %v12170_v34 = vpop.permute.xlu0 %4124 }
 0xb90   : > { %4074 = vrot.lane.b32.xlu0 %v3835_v48, %s9078_s22  ;;  %4894 = vrot.lane.b32.xlu1 %v4668_v60, %s9078_s22  ;;  %v4699_v60 = vsel %vm662_vm3, %v11733_v5, %v8646_v11  ;;  %v3967_v5 = vsel %vm708_vm7, %v12109_v23, %v12182_v12  ;;  %v4717_v23 = vsel %vm685_vm5, %v11745_v18, %v11731_v38 }
 0xb93   : > { %v12184_v56 = vpop.permute.xlu0 %4092 }
 0xb94   : > { %4072 = vrot.lane.b32.xlu0 %v3834_v43, %s9078_s22  ;;  %4826 = vrot.lane.b32.xlu1 %v11382_v33, %s9078_s22  ;;  %v8843_v33 = vld [vmem:[%s14348_s6 + $0x4] ss:$12 sps:$4 sm:$0xff]  }
 0xb95   : > { %4442 = vmatprep.mubr.bf16.mxu1 %v8843_v33  ;;  %4336 = vmatprep.mubr.bf16.mxu0 %v8843_v33 }
 0xb97   : > { %v12198_v58 = vpop.permute.xlu0 %4108 }
 0xb98   : > { %4886 = vrot.lane.b32.xlu0 %v4666_v28, %s9078_s22  ;;  %4154 = vrot.lane.b32.xlu1 %v3946_v49, %s9078_s22  ;;  %v8650_v49 = vunpack.i.l.bf16 %v11763_v32 }
 0xb9c   : > { %4182 = vrot.lane.b32.xlu0 %v12116_v16, %s9078_s22  ;;  %4090 = vrot.lane.b32.xlu1 %v3857_v0, %s9078_s22 }
 0xb9e   : > { %v4117_v14 = vpop.permute.xlu1 %4116 }
 0xba0   : > { %4890 = vrot.lane.b32.xlu0 %v11713_v41, %s9078_s22  ;;  %4088 = vrot.lane.b32.xlu1 %v3856_v39, %s9078_s22  ;;  %v3879_v41 = vsel %vm612_vm6, %v3871_v4, %v11957_v26  ;;  %v14560_v39 = vld [vmem:[#allocation30_spill] sm:$0xff] }
 0xba2   : > { %v12205_v27 = vpop.permute.xlu0 %4068  ;;  %v12215_v35 = vpop.permute.xlu1 %4140 }
 0xba4   : > { %4896 = vrot.lane.b32.xlu0 %v4669_v51, %s9078_s22  ;;  %4170 = vrot.lane.b32.xlu1 %v3968_v10, %s9078_s22  ;;  %v14561_v10 = vld [vmem:[#allocation33_spill] sm:$0xff] }
 0xba6   : > { %v12217_v42 = vpop.permute.xlu0 %4084 }
 0xba8   : > { %4892 = vrot.lane.b32.xlu0 %v11707_v31, %s9078_s22  ;;  %4106 = vrot.lane.b32.xlu1 %v3879_v41, %s9078_s22  ;;  %v3990_v31 = vsel %vm731_vm0, %v12140_v59, %v11963_v15  ;;  %v4719_v41 = vsel %vm685_vm5, %v14561_v10, %v14560_v39 }
 0xbaa   : > { %v12224_v57 = vpop.permute.xlu0 %4156  ;;  %v12226_v36 = vpop.permute.xlu1 %4100 }
 0xbac   : > { %4120 = vrot.lane.b32.xlu0 %v3894_v17, %s9078_s22  ;;  %4104 = vrot.lane.b32.xlu1 %v3878_v19, %s9078_s22 }
 0xbae   : > { %v12235_v26 = vpop.permute.xlu1 %4188  ;;  %v12240_v7 = vpop.permute.xlu0 %4172 }
 0xbb0   : > { %4186 = vrot.lane.b32.xlu0 %v3990_v31, %s9078_s22  ;;  %4898 = vrot.lane.b32.xlu1 %v11711_v40, %s9078_s22 }
 0xbb2   : > { %v12245_v45 = vpop.permute.xlu1 %4132  ;;  %v12255_v15 = vpop.permute.xlu0 %4148 }
 0xbb4   : > { %4902 = vrot.lane.b32.xlu0 %v4694_v1, %s9078_s22  ;;  %4904 = vrot.lane.b32.xlu1 %v4695_v50, %s9078_s22  ;;  %v8651_v1 = vunpack.i.h.bf16 %v11763_v32  ;;  %v14564_v50 = vld [vmem:[#allocation35_spill] sm:$0xff] }
 0xbb6   : > { %v12257_v4 = vpop.permute.xlu1 %4164  ;;  %v4721_v11 = vsel %vm685_vm5, %v11755_v3, %v8651_v1  ;;  %v14574_v1 = vld [vmem:[#allocation56_spill] sm:$0xff] }
 0xbb8   : > { %4834 = vrot.lane.b32.xlu0 %v11426_v47, %s9078_s22  ;;  %4900 = vrot.lane.b32.xlu1 %v11721_v24, %s9078_s22 }
 0xbba   : > { %v12263_v40 = vpop.permute.xlu0 %4126  ;;  %v12265_v46 = vpop.permute.xlu1 %4180 }
 0xbbc   : > { %4152 = vrot.lane.b32.xlu0 %v3945_v25, %s9078_s22  ;;  %4136 = vrot.lane.b32.xlu1 %v3923_v22, %s9078_s22  ;;  %v14565_v22 = vld [vmem:[#allocation36_spill] sm:$0xff] }
 0xbbe   : > { %v12275_v47 = vpop.permute.xlu0 %4158  ;;  %v12277_v24 = vpop.permute.xlu1 %4110 }
 0xbc0   : > { %4906 = vrot.lane.b32.xlu0 %v4696_v55, %s9078_s22  ;;  %4910 = vrot.lane.b32.xlu1 %v4697_v6, %s9078_s22  ;;  %v8655_v55 = vunpack.i.l.bf16 %v14565_v22  ;;  %v14566_v6 = vld [vmem:[#allocation26_spill] sm:$0xff] }
 0xbc2   : > { %v12286_v2 = vpop.permute.xlu0 %4078  ;;  %v12288_v52 = vpop.permute.xlu1 %4142 }
 0xbc4   : > { %4912 = vrot.lane.b32.xlu0 %v4698_v8, %s9078_s22  ;;  %4842 = vrot.lane.b32.xlu1 %v11623_v53, %s9078_s22  ;;  %v4716_v53 = vsel %vm685_vm5, %v11727_v21, %v11745_v18 }
 0xbc6   : > { %v12297_v63 = vpop.permute.xlu0 %4094  ;;  %v12299_v48 = vpop.permute.xlu1 %4174 }
 0xbc8   : > { %4908 = vrot.lane.b32.xlu0 %v11729_v13, %s9078_s22  ;;  %4914 = vrot.lane.b32.xlu1 %v4699_v60, %s9078_s22  ;;  %v4192_v13 = vsel %vm1006_vm8, %v12065_v20, %v12009_v37  ;;  %v4718_v20 = vsel %vm685_vm5, %v11731_v38, %v8650_v49  ;;  %v4720_v38 = vsel %vm685_vm5, %v14560_v39, %v11755_v3  ;;  %v14567_v60 = vld [vmem:[#allocation54_spill] sm:$0xff] }
 0xbca   : > { %v12306_v44 = vpop.permute.xlu0 %4114  ;;  %v4063_v9 = vpop.permute.xlu1 %4062 }
 0xbcb   : > { %v4216_v29 = vsel %vm1006_vm8, %v12306_v44, %v4117_v14  ;;  %v3989_v14 = vsel %vm731_vm0, %v12116_v16, %v12140_v59  ;;  %v14562_v16 = vld [vmem:[#allocation34_spill] sm:$0xff]  ;;  %v14563_v59 = vld [vmem:[#allocation29_spill] sm:$0xff] }
 0xbcc   : > { %7988 = vmatprep.subr.bf16.mxu1 %v4216_v29  ;;  %4918 = vrot.lane.b32.xlu0 %v4716_v53, %s9078_s22  ;;  %v4738_v31 = vsel %vm708_vm7, %v14563_v59, %v14562_v16  ;;  %v4739_v29 = vsel %vm708_vm7, %v14562_v16, %v14567_v60 }
 0xbcd   : > { %4168 = vrot.lane.b32.xlu1 %v3967_v5, %s9078_s22  ;;  %7989 = vmatpush3.bf16.msra.mxu1 %v4192_v13  ;;  %v14568_v5 = vld [vmem:[#allocation47_spill] sm:$0xff]  ;;  %v14569_v13 = vld [vmem:[#allocation46_spill] sm:$0xff] }
 0xbce   : > { %v12321_v43 = vpop.permute.xlu0 %4130  ;;  %v12323_v28 = vpop.permute.xlu1 %4066  ;;  %v4742_v49 = vsel %vm708_vm7, %v14569_v13, %v14568_v5 }
 0xbd0   : > { %4850 = vrot.lane.b32.xlu0 %v11631_v61, %s9078_s22 }
 0xbd1   : > { %4920 = vrot.lane.b32.xlu1 %v4717_v23, %s9078_s22 }
 0xbd2   : > { %v12332_v12 = vpop.permute.xlu0 %4080  ;;  %v4065_v37 = vpop.permute.xlu1 %4064 }
 0xbd3   : > { %v4197_v0 = vsel %vm1006_vm8, %v4065_v37, %v12323_v28  ;;  %v4196_v33 = vsel %vm1006_vm8, %v4063_v9, %v4065_v37  ;;  %v4740_v9 = vsel %vm708_vm7, %v14567_v60, %v8655_v55 }
 0xbd4   : > { %4922 = vrot.lane.b32.xlu0 %v4718_v20, %s9078_s22  ;;  %4308 = vmatprep.subr.bf16.mxu0 %v4197_v0  ;;  %v14570_v20 = vld [vmem:[#allocation49_spill] sm:$0xff] }
 0xbd5   : > { %4916 = vrot.lane.b32.xlu1 %v11727_v21, %s9078_s22  ;;  %4309 = vmatpush1.bf16.msra.mxu0 %v4196_v33  ;;  %v4741_v0 = vsel %vm708_vm7, %v14570_v20, %v14569_v13  ;;  %v14577_v13 = vld [vmem:[#allocation59_spill] sm:$0xff] }
 0xbd6   : > { %v12342_v61 = vpop.permute.xlu0 %4162  ;;  %v12344_v18 = vpop.permute.xlu1 %4146 }
 0xbd8   : > { %4928 = vrot.lane.b32.xlu0 %v4720_v38, %s9078_s22  ;;  %v8656_v38 = vunpack.i.h.bf16 %v14565_v22 }
 0xbd9   : > { %4184 = vrot.lane.b32.xlu1 %v3989_v14, %s9078_s22  ;;  %v14571_v14 = vld [vmem:[#allocation37_spill] sm:$0xff] }
 0xbda   : > { %v12354_v51 = vpop.permute.xlu0 %4098  ;;  %v12356_v21 = vpop.permute.xlu1 %4082  ;;  %v4743_v22 = vsel %vm708_vm7, %v14568_v5, %v8656_v38  ;;  %v14578_v38 = vld [vmem:[#allocation38_spill] sm:$0xff] }
 0xbdc   : > { %4924 = vrot.lane.b32.xlu0 %v14561_v10, %s9078_s22  ;;  %v14572_v10 = vld [vmem:[#allocation27_spill] sm:$0xff] }
 0xbdd   : > { %4926 = vrot.lane.b32.xlu1 %v4719_v41, %s9078_s22 }
 0xbde   : > { %v12364_v17 = vpop.permute.xlu0 %4096  ;;  %v12366_v19 = vpop.permute.xlu1 %4112 }
 0xbe0   : > { %4934 = vrot.lane.b32.xlu0 %v4738_v31, %s9078_s22 }
 0xbe1   : > { %4858 = vrot.lane.b32.xlu1 %v14564_v50, %s9078_s22  ;;  %v14575_v50 = vld [vmem:[#allocation60_spill] sm:$0xff] }
 0xbe2   : > { %v12375_v54 = vpop.permute.xlu0 %4178  ;;  %v12377_v25 = vpop.permute.xlu1 %4160  ;;  %v4761_v55 = vsel %vm731_vm0, %v14575_v50, %v14574_v1 }
 0xbe4   : > { %4866 = vrot.lane.b32.xlu0 %v14566_v6, %s9078_s22 }
 0xbe5   : > { %4930 = vrot.lane.b32.xlu1 %v4721_v11, %s9078_s22  ;;  %v14576_v11 = vld [vmem:[#allocation71_spill] sm:$0xff] }
 0xbe6   : > { %v12385_v32 = vpop.permute.xlu0 %4128  ;;  %v12387_v8 = vpop.permute.xlu1 %4118  ;;  %v4195_v60 = vsel %vm1006_vm8, %v12152_v30, %v14576_v11  ;;  %v4760_v30 = vsel %vm731_vm0, %v14577_v13, %v14575_v50  ;;  %v14580_v50 = vld [vmem:[#allocation39_spill] sm:$0xff] }
 0xbe8   : > { %4938 = vrot.lane.b32.xlu0 %v4740_v9, %s9078_s22  ;;  %v4222_v9 = vsel %vm1006_vm8, %v12321_v43, %v12245_v45 }
 0xbe9   : > { %4936 = vrot.lane.b32.xlu1 %v4739_v29, %s9078_s22 }
 0xbea   : > { %v12396_v53 = vpop.permute.xlu0 %4144  ;;  %v12398_v3 = vpop.permute.xlu1 %4134 }
 0xbec   : > { %4944 = vrot.lane.b32.xlu0 %v4742_v49, %s9078_s22  ;;  %v4198_v49 = vsel %vm1006_vm8, %v12323_v28, %v12205_v27 }
 0xbed   : > { %4932 = vrot.lane.b32.xlu1 %v14563_v59, %s9078_s22  ;;  %v14573_v59 = vld [vmem:[#allocation45_spill] sm:$0xff] }
 0xbee   : > { %v12406_v23 = vpop.permute.xlu0 %4176  ;;  %v12408_v37 = vpop.permute.xlu1 %4166  ;;  %v8665_v31 = vunpack.i.l.bf16 %v14573_v59 }
 0xbf0   : > { %4940 = vrot.lane.b32.xlu0 %v14570_v20, %s9078_s22  ;;  %v4762_v5 = vsel %vm731_vm0, %v14574_v1, %v8665_v31 }
 0xbf1   : > { %4942 = vrot.lane.b32.xlu1 %v4741_v0, %s9078_s22  ;;  %v8666_v0 = vunpack.i.h.bf16 %v14573_v59 }
 0xbf2   : > { %v12416_v33 = vpop.permute.xlu0 %4150  ;;  %v12418_v39 = vpop.permute.xlu1 %4086 }
 0xbf3   : > { %v4765_v59 = vsel %vm731_vm0, %v14578_v38, %v8666_v0 }
 0xbf4   : > { %4882 = vrot.lane.b32.xlu0 %v14571_v14, %s9078_s22  ;;  %v14579_v14 = vld [vmem:[#allocation41_spill] sm:$0xff] }
 0xbf5   : > { %4874 = vrot.lane.b32.xlu1 %v14572_v10, %s9078_s22  ;;  %v4764_v10 = vsel %vm731_vm0, %v14579_v14, %v14578_v38  ;;  %v4768_v38 = vld [vmem:[%s14351_s9 + $0x10] sm:$0xff] }
 0xbf6   : > { %v4071_v41 = vpop.permute.xlu0 %4070  ;;  %v12425_v16 = vpop.permute.xlu1 %4122 }
 0xbf7   : > { %v4219_v6 = vsel %vm1006_vm8, %v12425_v16, %v12170_v34 }
 0xbf8   : > { %4952 = vrot.lane.b32.xlu0 %v4761_v55, %s9078_s22  ;;  %7990 = vmatprep.subr.bf16.mxu1 %v4219_v6  ;;  %v4228_v55 = vsel %vm1006_vm8, %v12344_v18, %v12255_v15  ;;  %v4767_v6 = vld [vmem:[%s14351_s9 + $0x8] sm:$0xff]  ;;  %v4204_v15 = vsel %vm1006_vm8, %v12356_v21, %v12217_v42  ;;  %v4766_v42 = vld [vmem:[%s14351_s9] sm:$0xff] }
 0xbf9   : > { %4946 = vrot.lane.b32.xlu1 %v4743_v22, %s9078_s22  ;;  %7991 = vmatpush3.bf16.msra.mxu1 %v4195_v60 }
 0xbfa   : > { %v12444_v29 = vpop.permute.xlu0 %4102  ;;  %7992 = vmatprep.subr.bf16.mxu1 %v4222_v9  ;;  %v12446_v34 = vpop.permute.xlu1 %4888  ;;  %v4769_v9 = vld [vmem:[%s14351_s9 + $0x18] sm:$0xff] }
 0xbfc   : > { %4954 = vrot.lane.b32.xlu0 %v4762_v5, %s9078_s22 }
 0xbfd   : > { %4950 = vrot.lane.b32.xlu1 %v4760_v30, %s9078_s22  ;;  %7993 = vmatpush3.bf16.msra.mxu1 %v4198_v49  ;;  %v4202_v49 = vsel %vm1006_vm8, %v12286_v2, %v12332_v12 }
 0xbfe   : > { %v12458_v45 = vpop.permute.xlu0 %4138  ;;  %v12460_v20 = vpop.permute.xlu1 %4884 }
 0xbff   : > { %v4225_v31 = vsel %vm1006_vm8, %v12458_v45, %v12215_v35  ;;  %v4763_v35 = vsel %vm731_vm0, %v14580_v50, %v14579_v14 }
 0xc00   : > { %4960 = vrot.lane.b32.xlu0 %v4764_v10, %s9078_s22  ;;  %7994 = vmatprep.subr.bf16.mxu1 %v4225_v31  ;;  %v4210_v31 = vsel %vm1006_vm8, %v12354_v51, %v12226_v36  ;;  %v4208_v36 = vsel %vm1006_vm8, %v12297_v63, %v12364_v17  ;;  %v12563_v63 = vld [vmem:[%s14348_s6 + $0x1c] ss:$12 sps:$4 sm:$0xff]  }
 0xc01   : > { %4948 = vrot.lane.b32.xlu1 %v14577_v13, %s9078_s22 }
 0xc02   : > { %v4075_v27 = vpop.permute.xlu0 %4074  ;;  %v12472_v28 = vpop.permute.xlu1 %4894 }
 0xc03   : > { %v4201_v1 = vsel %vm1006_vm8, %v4075_v27, %v12190_v62 }
 0xc04   : > { %4962 = vrot.lane.b32.xlu0 %v4765_v59, %s9078_s22  ;;  %7995 = vmatpush3.bf16.msra.mxu1 %v4201_v1 }
 0xc05   : > { %4958 = vrot.lane.b32.xlu1 %v4763_v35, %s9078_s22  ;;  %7996 = vmatprep.subr.bf16.mxu1 %v4228_v55  ;;  %v12555_v35 = vld [vmem:[%s14348_s6] ss:$12 sps:$4 sm:$0xff]  }
 0xc06   : > { %v4073_v22 = vpop.permute.xlu0 %4072  ;;  %v12489_v62 = vpop.permute.xlu1 %4826 }
 0xc07   : > { %v4200_v11 = vsel %vm1006_vm8, %v4073_v22, %v4075_v27  ;;  %v4199_v60 = vsel %vm1006_vm8, %v4071_v41, %v4073_v22  ;;  %v4203_v41 = vsel %vm1006_vm8, %v12332_v12, %v12356_v21 }
 0xc08   : > { %4777 = vperm.xlu0 %8465, %v4767_v6   ;;  %4310 = vmatprep.subr.bf16.mxu0 %v4200_v11 }
 0xc09   : > { %4956 = vrot.lane.b32.xlu1 %v14580_v50, %s9078_s22  ;;  %7997 = vmatpush3.bf16.msra.mxu1 %v4204_v15  ;;  %v12591_v15 = vld [vmem:[%s14348_s6 + $0x8] ss:$12 sps:$4 sm:$0xff]  }
 0xc0a   : > { %4311 = vmatpush1.bf16.msra.mxu0 %v4199_v60  ;;  %v12501_v5 = vpop.permute.xlu0 %4886  ;;  %v12506_v13 = vpop.permute.xlu1 %4154 }
 0xc0b   : > { %4312 = vmatprep.subr.bf16.mxu0 %v4203_v41  ;;  %v4231_v30 = vsel %vm1006_vm8, %v12506_v13, %v12224_v57  ;;  %v4234_v57 = vsel %vm1006_vm8, %v12342_v61, %v12257_v4  ;;  %v14582_v41 = vld [vmem:[#allocation43_spill] sm:$0xff] }
 0xc0c   : > { %4787 = vperm.xlu0 %8465, %v4769_v9   ;;  %7998 = vmatprep.subr.bf16.mxu1 %v4231_v30  ;;  %v14581_v9 = vld [vmem:[#allocation28_spill] sm:$0xff] }
 0xc0d   : > { %4772 = vperm.xlu1 %8466, %v4766_v42   ;;  %v4965_v42 = vsel %vm1006_vm8, %v14582_v41, %v14581_v9 }
 0xc0e   : > { %4313 = vmatpush1.bf16.msra.mxu0 %v4202_v49  ;;  %v12517_v21 = vpop.permute.xlu0 %4182  ;;  %v4091_v0 = vpop.permute.xlu1 %4090 }
 0xc0f   : > { %v4207_v14 = vsel %vm1006_vm8, %v4091_v0, %v12184_v56  ;;  %v4209_v56 = vsel %vm1006_vm8, %v12364_v17, %v12354_v51 }
 0xc10   : > { %7999 = vmatpush3.bf16.msra.mxu1 %v4207_v14 }
 0xc11   : > { %4782 = vperm.xlu1 %8466, %v4768_v38   ;;  %8000 = vmatprep.subr.bf16.mxu1 %v4234_v57  ;;  %v14583_v38 = vld [vmem:[#allocation51_spill] sm:$0xff]  ;;  %v12618_v57 = vld [vmem:[%s14348_s6 + $0x20] ss:$12 sps:$4 sm:$0xff]  }
 0xc12   : > { %v12527_v10 = vpop.permute.xlu0 %4890  ;;  %v4089_v2 = vpop.permute.xlu1 %4088  ;;  %v8660_v14 = vunpack.i.l.bf16 %v14583_v38 }
 0xc13   : > { %v4206_v12 = vsel %vm1006_vm8, %v4089_v2, %v4091_v0  ;;  %v4205_v27 = vsel %vm1006_vm8, %v12418_v39, %v4089_v2 }
 0xc14   : > { %4314 = vmatprep.subr.bf16.mxu0 %v4206_v12  ;;  %8001 = vmatpush3.bf16.msra.mxu1 %v4210_v31  ;;  %v8661_v31 = vunpack.i.h.bf16 %v14583_v38 }
 0xc15   : > { %4315 = vmatpush1.bf16.msra.mxu0 %v4205_v27  ;;  %v4964_v27 = vsel %vm1006_vm8, %v8660_v14, %v14582_v41  ;;  %v14590_v41 = vld [vmem:[#allocation44_spill] sm:$0xff]  ;;  %v14592_v14 = vld [vmem:[#allocation50_spill] sm:$0xff] }
 0xc16   : > { %v12538_v4 = vpop.permute.xlu0 %4896  ;;  %4316 = vmatprep.subr.bf16.mxu0 %v4209_v56  ;;  %v12540_v59 = vpop.permute.xlu1 %4170 }
 0xc17   : > { %v4237_v1 = vsel %vm1006_vm8, %v12540_v59, %v12240_v7  ;;  %v4240_v7 = vsel %vm1006_vm8, %v12375_v54, %v12265_v46  ;;  %v4215_v46 = vsel %vm1006_vm8, %v12366_v19, %v12306_v44  ;;  %v4214_v44 = vsel %vm1006_vm8, %v12277_v24, %v12366_v19 }
 0xc18   : > { %8002 = vmatprep.subr.bf16.mxu1 %v4237_v1  ;;  %v4221_v19 = vsel %vm1006_vm8, %v12385_v32, %v12321_v43  ;;  %v12623_v43 = vld [vmem:[#allocation10 + $0x4] ss:$12 sps:$4 sm:$0xff]  }
 0xc19   : > { %4317 = vmatpush1.bf16.msra.mxu0 %v4208_v36 }
 0xc1a   : > { %v12548_v39 = vpop.permute.xlu0 %4892  ;;  %v4107_v50 = vpop.permute.xlu1 %4106 }
 0xc1b   : > { %v4213_v51 = vsel %vm1006_vm8, %v4107_v50, %v12198_v58 }
 0xc1c   : > { %8003 = vmatpush3.bf16.msra.mxu1 %v4213_v51 }
 0xc1d   : > { %8177 = vmatprep.subr.bf16.mxu1 %v4240_v7 }
 0xc1e   : > { %v4121_v17 = vpop.permute.xlu0 %4120  ;;  %v4105_v55 = vpop.permute.xlu1 %4104 }
 0xc1f   : > { %4443 = vmatmul.mubr.bf16.vlgmr.msra.gmra.mrb[68].mxu1 %v12555_v35  ;;  %v4212_v58 = vsel %vm1006_vm8, %v4105_v55, %v4107_v50  ;;  %v4211_v6 = vsel %vm1006_vm8, %v12444_v29, %v4105_v55  ;;  %v12583_v29 = vld [vmem:[%s14348_s6 + $0x18] ss:$12 sps:$4 sm:$0xff]   ;;  %v4217_v24 = vsel %vm1006_vm8, %v12387_v8, %v4121_v17  ;;  %v4220_v8 = vsel %vm1006_vm8, %v12263_v40, %v12385_v32  ;;  %v14585_v32 = vld [vmem:[#allocation58_spill] sm:$0xff] }
 0xc20   : > { %4318 = vmatprep.subr.bf16.mxu0 %v4212_v58  ;;  %8178 = vmatpush3.bf16.msra.mxu1 %v4240_v7  ;;  %v14584_v40 = vld [vmem:[#allocation57_spill] sm:$0xff]  ;;  %v4227_v50 = vsel %vm1006_vm8, %v12396_v53, %v12344_v18  ;;  %v4226_v58 = vsel %vm1006_vm8, %v12288_v52, %v12396_v53  ;;  %v4233_v53 = vsel %vm1006_vm8, %v12377_v25, %v12342_v61 }
 0xc21   : > { %4319 = vmatpush1.bf16.msra.mxu0 %v4211_v6  ;;  %4450 = vmatprep.mubr.bf16.mxu1 %v12563_v63  ;;  %v4968_v36 = vsel %vm1006_vm8, %v14585_v32, %v14584_v40 }
 0xc22   : > { %v12573_v22 = vpop.permute.xlu0 %4186  ;;  %4320 = vmatprep.subr.bf16.mxu0 %v4215_v46  ;;  %v12575_v11 = vpop.permute.xlu1 %4898 }
 0xc23   : > { %v4243_v60 = vsel %vm1006_vm8, %v12573_v22, %v12235_v26  ;;  %v4218_v26 = vsel %vm1006_vm8, %v4121_v17, %v12425_v16  ;;  %v14587_v17 = vld [vmem:[#allocation42_spill] sm:$0xff] }
 0xc24   : > { %8179 = vmatprep.subr.bf16.mxu1 %v4243_v60 }
 0xc25   : > { %4321 = vmatpush1.bf16.msra.mxu0 %v4214_v44  ;;  %8180 = vmatpush3.bf16.msra.mxu1 %v4243_v60  ;;  %v14588_v60 = vld [vmem:[#allocation48_spill] sm:$0xff] }
 0xc26   : > { %v12598_v30 = vpop.permute.xlu0 %4902  ;;  %4322 = vmatprep.subr.bf16.mxu0 %v4218_v26  ;;  %5078 = vmatprep.subr.bf16.mxu1 %v4965_v42  ;;  %v12600_v49 = vpop.permute.xlu1 %4904  ;;  %v4970_v44 = vsel %vm1006_vm8, %v14588_v60, %v14587_v17  ;;  %v14589_v26 = vld [vmem:[#allocation55_spill] sm:$0xff] }
 0xc27   : > { %4451 = vmatmul.mubr.bf16.gmra.mrb[72].mxu1 %v12583_v29  ;;  %v4974_v42 = vsel %vm1006_vm8, %v14590_v41, %v14589_v26  ;;  %v14600_v60 = vld [vmem:[#allocation67_spill] sm:$0xff] }
 0xc28   : > { %8181 = vmatprep.mubr.msk.bf16.mxu1 %vm1115_vm9, %v12591_v15 }
 0xc29   : > { %4323 = vmatpush1.bf16.msra.mxu0 %v4217_v24 }
 0xc2a   : > { %v12610_v16 = vpop.permute.xlu0 %4834  ;;  %4324 = vmatprep.subr.bf16.mxu0 %v4221_v19  ;;  %v12612_v0 = vpop.permute.xlu1 %4900  ;;  %v14591_v19 = vld [vmem:[#allocation53_spill] sm:$0xff] }
 0xc2b   : > { %v4973_v38 = vsel %vm1006_vm8, %v14591_v19, %v14590_v41 }
 0xc2d   : > { %4325 = vmatpush1.bf16.msra.mxu0 %v4220_v8  ;;  %v14593_v8 = vld [vmem:[#allocation61_spill] sm:$0xff] }
 0xc2e   : > { %v4153_v2 = vpop.permute.xlu0 %4152  ;;  %v4137_v12 = vpop.permute.xlu1 %4136 }
 0xc2f   : > { %8182 = vmatmul.mubr.msk.bf16.vlgmr.msra.gmra.mrb[76].mxu1 %vm1115_vm9, %v12618_v57  ;;  %v4224_v56 = vsel %vm1006_vm8, %v4137_v12, %v12458_v45  ;;  %v4223_v1 = vsel %vm1006_vm8, %v12398_v3, %v4137_v12  ;;  %v4967_v3 = vsel %vm1006_vm8, %v8661_v31, %v14585_v32  ;;  %v14586_v45 = vld [vmem:[#allocation52_spill] sm:$0xff]  ;;  %v4230_v18 = vsel %vm1006_vm8, %v4153_v2, %v12506_v13  ;;  %v14596_v32 = vld [vmem:[#allocation62_spill] sm:$0xff] }
 0xc30   : > { %5079 = vmatpush1.bf16.msra.mxu1 %v4964_v27  ;;  %4326 = vmatprep.subr.bf16.mxu0 %v4224_v56  ;;  %v4971_v55 = vsel %vm1006_vm8, %v14587_v17, %v14586_v45  ;;  %v4229_v52 = vsel %vm1006_vm8, %v12416_v33, %v4153_v2  ;;  %v4977_v33 = vsel %vm1006_vm8, %v14593_v8, %v14592_v14  ;;  %v14594_v12 = vld [vmem:[#allocation40_spill] sm:$0xff] }
 0xc31   : > { %5080 = vmatprep.subr.bf16.mxu1 %v4968_v36  ;;  %4327 = vmatpush1.bf16.msra.mxu0 %v4223_v1  ;;  %v4232_v2 = vsel %vm1006_vm8, %v12275_v47, %v12377_v25  ;;  %v4976_v31 = vsel %vm1006_vm8, %v14594_v12, %v14593_v8  ;;  %v14595_v1 = vld [vmem:[#allocation63_spill] sm:$0xff]  ;;  %v4989_v8 = vsel %vm1006_vm8, %v12501_v5, %v12446_v34 }
 0xc32   : > { %v12640_v51 = vpop.permute.xlu0 %4906  ;;  %4328 = vmatprep.subr.bf16.mxu0 %v4227_v50  ;;  %v12642_v7 = vpop.permute.xlu1 %4910  ;;  %5110 = vmatprep.mubr.bf16.mxu1 %v12623_v43  ;;  %v4980_v36 = vsel %vm1006_vm8, %v14596_v32, %v14595_v1  ;;  %v4239_v50 = vsel %vm1006_vm8, %v12406_v23, %v12375_v54 }
 0xc34   : > { %5081 = vmatpush1.bf16.msra.mxu1 %v4967_v3  ;;  %v14597_v3 = vld [vmem:[#allocation64_spill] sm:$0xff] }
 0xc35   : > { %5082 = vmatprep.subr.bf16.mxu1 %v4971_v55  ;;  %4329 = vmatpush1.bf16.msra.mxu0 %v4226_v58  ;;  %v14598_v55 = vld [vmem:[#allocation66_spill] sm:$0xff]  ;;  %v14599_v58 = vld [vmem:[#allocation65_spill] sm:$0xff] }
 0xc36   : > { %v12655_v6 = vpop.permute.xlu0 %4912  ;;  %4330 = vmatprep.subr.bf16.mxu0 %v4230_v18  ;;  %v12657_v46 = vpop.permute.xlu1 %4842  ;;  %v4238_v18 = vsel %vm1006_vm8, %v12299_v48, %v12406_v23  ;;  %v14603_v48 = vld [vmem:[#allocation70_spill] sm:$0xff] }
 0xc38   : > { %5083 = vmatpush1.bf16.msra.mxu1 %v4970_v44  ;;  %v4982_v44 = vsel %vm1006_vm8, %v14600_v60, %v14599_v58 }
 0xc39   : > { %5084 = vmatprep.subr.bf16.mxu1 %v4974_v42  ;;  %4331 = vmatpush1.bf16.msra.mxu0 %v4229_v52  ;;  %v14601_v42 = vld [vmem:[#allocation68_spill] sm:$0xff]  ;;  %v14602_v52 = vld [vmem:[#allocation69_spill] sm:$0xff] }
 0xc3a   : > { %v12670_v13 = vpop.permute.xlu0 %4908  ;;  %4332 = vmatprep.subr.bf16.mxu0 %v4233_v53  ;;  %v12672_v24 = vpop.permute.xlu1 %4914  ;;  %v4985_v23 = vsel %vm1006_vm8, %v14603_v48, %v14602_v52  ;;  %v8854_v48 = vld [vmem:[#allocation10 + $0x18] ss:$12 sps:$4 sm:$0xff]  }
 0xc3c   : > { %5085 = vmatpush1.bf16.msra.mxu1 %v4973_v38 }
 0xc3d   : > { %5086 = vmatprep.subr.bf16.mxu1 %v4977_v33  ;;  %4333 = vmatpush1.bf16.msra.mxu0 %v4232_v2  ;;  %v4990_v2 = vsel %vm1006_vm8, %v12446_v34, %v12527_v10  ;;  %v4995_v10 = vsel %vm1006_vm8, %v12598_v30, %v12600_v49 }
 0xc3e   : > { %v12683_v61 = vpop.permute.xlu0 %4918 }
 0xc3f   : > { %v4169_v27 = vpop.permute.xlu1 %4168 }
 0xc40   : > { %5087 = vmatpush1.bf16.msra.mxu1 %v4976_v31  ;;  %v4236_v56 = vsel %vm1006_vm8, %v4169_v27, %v12540_v59  ;;  %v4235_v47 = vsel %vm1006_vm8, %v12408_v37, %v4169_v27  ;;  %v4979_v59 = vsel %vm1006_vm8, %v14597_v3, %v14596_v32  ;;  %v4983_v37 = vsel %vm1006_vm8, %v14599_v58, %v14598_v55  ;;  %v8849_v58 = vld [vmem:[#allocation10] ss:$12 sps:$4 sm:$0xff]  }
 0xc41   : > { %4334 = vmatprep.subr.bf16.mxu0 %v4236_v56  ;;  %5088 = vmatprep.subr.bf16.mxu1 %v4980_v36  ;;  %v4991_v27 = vsel %vm1006_vm8, %v12548_v39, %v12472_v28  ;;  %v4994_v39 = vsel %vm1006_vm8, %v12612_v0, %v12598_v30 }
 0xc42   : > { %4335 = vmatpush1.bf16.msra.mxu0 %v4235_v47  ;;  %v12695_v25 = vpop.permute.xlu0 %4850 }
 0xc43   : > { %4357 = vmatprep.subr.bf16.mxu0 %v4239_v50  ;;  %v12703_v17 = vpop.permute.xlu1 %4920 }
 0xc44   : > { %5089 = vmatpush1.bf16.msra.mxu1 %v4979_v59  ;;  %v5001_v0 = vsel %vm1006_vm8, %v12683_v61, %v12703_v17 }
 0xc45   : > { %4337 = vmatmul.mubr.bf16.vlgmr.msra.gmra.mrb[48].mxu0 %v12555_v35  ;;  %5090 = vmatprep.subr.bf16.mxu1 %v4983_v37  ;;  %v4986_v35 = vsel %vm1006_vm8, %v14602_v52, %v14601_v42 }
 0xc46   : > { %4358 = vmatpush1.bf16.msra.mxu0 %v4238_v18  ;;  %v12712_v54 = vpop.permute.xlu0 %4922  ;;  %4346 = vmatprep.mubr.bf16.mxu0 %v12563_v63  ;;  %v8852_v18 = vld [vmem:[#allocation10 + $0x1c] ss:$12 sps:$4 sm:$0xff]  }
 0xc47   : > { %v4917_v41 = vpop.permute.xlu1 %4916 }
 0xc48   : > { %5091 = vmatpush1.bf16.msra.mxu1 %v4982_v44 }
 0xc49   : > { %5092 = vmatprep.subr.bf16.mxu1 %v4986_v35 }
 0xc4a   : > { %v12721_v53 = vpop.permute.xlu0 %4928 }
 0xc4b   : > { %v4185_v19 = vpop.permute.xlu1 %4184 }
 0xc4c   : > { %5093 = vmatpush1.bf16.msra.mxu1 %v4985_v23  ;;  %v4242_v63 = vsel %vm1006_vm8, %v4185_v19, %v12573_v22  ;;  %v4241_v38 = vsel %vm1006_vm8, %v12517_v21, %v4185_v19  ;;  %v4988_v21 = vsel %vm1006_vm8, %v12460_v20, %v12501_v5  ;;  %v14604_v22 = vmov 0  }
 0xc4d   : > { %4347 = vmatmul.mubr.bf16.gmra.mrb[52].mxu0 %v12583_v29  ;;  %4359 = vmatprep.subr.bf16.mxu0 %v4242_v63  ;;  %v4992_v29 = vsel %vm1006_vm8, %v12472_v28, %v12538_v4  ;;  %v4966_v20 = vsel %vm1006_vm8, %v14581_v9, %v12489_v62  ;;  %v4993_v5 = vsel %vm1006_vm8, %v12538_v4, %v12575_v11 }
 0xc4e   : > { %5094 = vmatprep.subr.bf16.mxu1 %v4989_v8  ;;  %4360 = vmatpush1.bf16.msra.mxu0 %v4241_v38  ;;  %v4925_v33 = vpop.permute.xlu0 %4924  ;;  %v4998_v62 = vsel %vm1006_vm8, %v12642_v7, %v12655_v6  ;;  %v4996_v4 = vsel %vm1006_vm8, %v12600_v49, %v12640_v51  ;;  %v4997_v9 = vsel %vm1006_vm8, %v12670_v13, %v12642_v7 }
 0xc4f   : > { %8020 = vmatprep.subr.bf16.mxu0 %v4990_v2  ;;  %v4927_v12 = vpop.permute.xlu1 %4926  ;;  %4389 = vmatprep.mubr.bf16.mxu0 %v14604_v22  ;;  %v4999_v49 = vsel %vm1006_vm8, %v12655_v6, %v12672_v24  ;;  %v5000_v51 = vsel %vm1006_vm8, %v4917_v41, %v12683_v61  ;;  %v5002_v6 = vsel %vm1006_vm8, %v12703_v17, %v12712_v54  ;;  %v8856_v2 = vld [vmem:[#allocation10 + $0x20] ss:$12 sps:$4 sm:$0xff]  }
 0xc50   : > { %5095 = vmatpush1.bf16.msra.mxu1 %v4988_v21  ;;  %v5003_v13 = vsel %vm1006_vm8, %v4925_v33, %v4927_v12  ;;  %v8855_v33 = vld [vmem:[#allocation10 + $0x8] ss:$12 sps:$4 sm:$0xff]   ;;  %8673 = vrot.lane.b32.xlu1 %v14604_v22, %s9074_s21 }
 0xc51   : > { %5096 = vmatprep.subr.bf16.mxu1 %v4992_v29  ;;  %8668 = vrot.lane.b32.xlu0 %v14604_v22, %s9072_s18 }
 0xc52   : > { %v4935_v31 = vpop.permute.xlu0 %4934 }
 0xc53   : > { %v4859_v34 = vpop.permute.xlu1 %4858 }
 0xc54   : > { %5097 = vmatpush1.bf16.msra.mxu1 %v4991_v27  ;;  %v4978_v61 = vsel %vm1006_vm8, %v14592_v14, %v4859_v34  ;;  %8683 = vrot.lane.b32.xlu1 %v14604_v22, %s9073_s19 }
 0xc55   : > { %7771 = vmatmul.mubr.msk.bf16.vlgmr.msra.gmra.mrb[48].mxu0 %vm1115_vm9, %v12591_v15  ;;  %5098 = vmatprep.subr.bf16.mxu1 %v4995_v10  ;;  %v4969_v15 = vsel %vm1006_vm8, %v14584_v40, %v12610_v16  ;;  %v4972_v16 = vsel %vm1006_vm8, %v14586_v45, %v12657_v46  ;;  %v5004_v45 = vsel %vm1006_vm8, %v4927_v12, %v12721_v53 }
 0xc56   : > { %8021 = vmatpush3.bf16.msra.mxu0 %v4966_v20  ;;  %v4867_v28 = vpop.permute.xlu0 %4866  ;;  %4399 = vmatprep.mubr.bf16.mxu0 %v14604_v22 }
 0xc57   : > { %8022 = vmatprep.subr.bf16.mxu0 %v4993_v5  ;;  %v4931_v56 = vpop.permute.xlu1 %4930  ;;  %v4981_v50 = vsel %vm1006_vm8, %v14595_v1, %v4867_v28  ;;  %8678 = vrot.lane.b32.xlu0 %v14604_v22, %s9076_s15 }
 0xc58   : > { %5099 = vmatpush1.bf16.msra.mxu1 %v4994_v39  ;;  %8693 = vrot.lane.b32.xlu1 %v14604_v22, %s9077_s27 }
 0xc59   : > { %5100 = vmatprep.subr.bf16.mxu1 %v4998_v62 }
 0xc5a   : > { %8023 = vmatpush3.bf16.msra.mxu0 %v4969_v15  ;;  %v4939_v11 = vpop.permute.xlu0 %4938 }
 0xc5b   : > { %8024 = vmatprep.subr.bf16.mxu0 %v4996_v4  ;;  %v4937_v30 = vpop.permute.xlu1 %4936  ;;  %8688 = vrot.lane.b32.xlu0 %v14604_v22, %s9075_s24 }
 0xc5c   : > { %5101 = vmatpush1.bf16.msra.mxu1 %v4997_v9  ;;  %v5007_v24 = vsel %vm1006_vm8, %v4935_v31, %v4937_v30  ;;  %v5008_v14 = vsel %vm1006_vm8, %v4937_v30, %v4939_v11  ;;  %8698 = vrot.lane.b32.xlu1 %v14604_v22, %s9078_s22 }
 0xc5d   : > { %7772 = vmatmul.mubr.msk.bf16.gmra.mrb[52].mxu0 %vm1115_vm9, %v12618_v57  ;;  %5102 = vmatprep.subr.bf16.mxu1 %v5001_v0  ;;  %v4975_v57 = vsel %vm1006_vm8, %v14589_v26, %v12695_v25  ;;  %v5005_v26 = vsel %vm1006_vm8, %v12721_v53, %v4931_v56 }
 0xc5e   : > { %8025 = vmatpush3.bf16.msra.mxu0 %v4972_v16  ;;  %v4945_v40 = vpop.permute.xlu0 %4944  ;;  %5216 = vmatprep.mubr.bf16.mxu0 %v12623_v43 }
 0xc5f   : > { %8026 = vmatprep.subr.bf16.mxu0 %v4999_v49  ;;  %v4933_v7 = vpop.permute.xlu1 %4932 }
 0xc60   : > { %5103 = vmatpush1.bf16.msra.mxu1 %v5000_v51  ;;  %v5006_v36 = vsel %vm1006_vm8, %v4933_v7, %v4935_v31  ;;  %8703 = vrot.lane.b32.xlu1 %v14604_v22, %s9070_s17 }
 0xc61   : > { %5104 = vmatprep.subr.bf16.mxu1 %v5004_v45 }
 0xc62   : > { %8027 = vmatpush3.bf16.msra.mxu0 %v4975_v57  ;;  %v4941_v43 = vpop.permute.xlu0 %4940 }
 0xc63   : > { %8028 = vmatprep.subr.bf16.mxu0 %v5002_v6  ;;  %v4943_v46 = vpop.permute.xlu1 %4942 }
 0xc64   : > { %5105 = vmatpush1.bf16.msra.mxu1 %v5003_v13  ;;  %v5010_v25 = vsel %vm1006_vm8, %v4943_v46, %v4945_v40  ;;  %v5009_v17 = vsel %vm1006_vm8, %v4941_v43, %v4943_v46 }
 0xc65   : > { %5106 = vmatprep.subr.bf16.mxu1 %v5007_v24 }
 0xc66   : > { %8029 = vmatpush3.bf16.msra.mxu0 %v4978_v61  ;;  %v4883_v32 = vpop.permute.xlu0 %4882 }
 0xc67   : > { %8030 = vmatprep.subr.bf16.mxu0 %v5005_v26  ;;  %v4875_v47 = vpop.permute.xlu1 %4874  ;;  %v4987_v52 = vsel %vm1006_vm8, %v14601_v42, %v4883_v32 }
 0xc68   : > { %5107 = vmatpush1.bf16.msra.mxu1 %v5006_v36  ;;  %v4984_v54 = vsel %vm1006_vm8, %v14598_v55, %v4875_v47 }
 0xc69   : > { %5108 = vmatprep.subr.bf16.mxu1 %v5010_v25 }
 0xc6a   : > { %8031 = vmatpush3.bf16.msra.mxu0 %v4981_v50  ;;  %v4953_v3 = vpop.permute.xlu0 %4952 }
 0xc6b   : > { %8032 = vmatprep.subr.bf16.mxu0 %v5008_v14  ;;  %v4947_v59 = vpop.permute.xlu1 %4946 }
 0xc6c   : > { %5109 = vmatpush1.bf16.msra.mxu1 %v5009_v17  ;;  %v5011_v37 = vsel %vm1006_vm8, %v4945_v40, %v4947_v59 }
 0xc6e   : > { %8033 = vmatpush3.bf16.msra.mxu0 %v4984_v54  ;;  %v4955_v60 = vpop.permute.xlu0 %4954 }
 0xc6f   : > { %8034 = vmatprep.subr.bf16.mxu0 %v5011_v37  ;;  %v4951_v1 = vpop.permute.xlu1 %4950  ;;  %5111 = vmatmul.mubr.bf16.vlgmr.msra.gmra.mrb[80].mxu1 %v8849_v58  ;;  %v5014_v41 = vsel %vm1006_vm8, %v4953_v3, %v4955_v60 }
 0xc70   : > { %v5013_v44 = vsel %vm1006_vm8, %v4951_v1, %v4953_v3  ;;  %5120 = vmatprep.mubr.bf16.mxu1 %v8852_v18 }
 0xc71   : > { %5131 = vmatprep.subr.bf16.mxu1 %v5013_v44 }
 0xc72   : > { %8035 = vmatpush3.bf16.msra.mxu0 %v4987_v52  ;;  %v4961_v35 = vpop.permute.xlu0 %4960 }
 0xc73   : > { %8185 = vmatprep.subr.bf16.mxu0 %v5014_v41  ;;  %v4949_v53 = vpop.permute.xlu1 %4948 }
 0xc74   : > { %v5012_v55 = vsel %vm1006_vm8, %v4949_v53, %v4951_v1 }
 0xc75   : > { %5217 = vmatmul.mubr.bf16.vlgmr.msra.gmra.mrb[56].mxu0 %v8849_v58  ;;  %5132 = vmatpush1.bf16.msra.mxu1 %v5012_v55 }
 0xc76   : > { %8186 = vmatpush3.bf16.msra.mxu0 %v5014_v41  ;;  %v4963_v23 = vpop.permute.xlu0 %4962  ;;  %5224 = vmatprep.mubr.bf16.mxu0 %v8852_v18 }
 0xc77   : > { %v4959_v19 = vpop.permute.xlu1 %4958  ;;  %5121 = vmatmul.mubr.bf16.gmra.mrb[84].mxu1 %v8854_v48  ;;  %v5017_v63 = vsel %vm1006_vm8, %v4961_v35, %v4963_v23 }
 0xc78   : > { %v5016_v38 = vsel %vm1006_vm8, %v4959_v19, %v4961_v35  ;;  %8187 = vmatprep.subr.bf16.mxu0 %v5017_v63  ;;  %5163 = vmatprep.mubr.bf16.mxu1 %v14604_v22 }
 0xc79   : > { %5133 = vmatprep.subr.bf16.mxu1 %v5016_v38  ;;  %v14607_v38 = vld [vmem:[#allocation31_spill] sm:$0xff] }
 0xc7a   : > { %8188 = vmatpush3.bf16.msra.mxu0 %v5017_v63 }
 0xc7b   : > { %v4957_v42 = vpop.permute.xlu1 %4956 }
 0xc7c   : > { %v5015_v8 = vsel %vm1006_vm8, %v4957_v42, %v4959_v19 }
 0xc7d   : > { %5225 = vmatmul.mubr.bf16.gmra.mrb[60].mxu0 %v8854_v48  ;;  %5134 = vmatpush1.bf16.msra.mxu1 %v5015_v8 }
 0xc7e   : > { %8189 = vmatprep.mubr.msk.bf16.mxu0 %vm1115_vm9, %v8855_v33 }
 0xc80   : > { %7789 = vmatmul.mubr.msk.bf16.vlgmr.msra.gmra.mrb[80].mxu1 %vm1115_vm9, %v8855_v33 }
 0xc81   : > { %5173 = vmatprep.mubr.bf16.mxu1 %v14604_v22 }
 0xc85   : > { %8190 = vmatmul.mubr.msk.bf16.vlgmr.msra.gmra.mrb[64].mxu0 %vm1115_vm9, %v8856_v2 }
 0xc87   : > { %v4778_v32 = vpop.permute.xlu0 %4777 }
 0xc88   : > { %7790 = vmatmul.mubr.msk.bf16.gmra.mrb[84].mxu1 %vm1115_vm9, %v8856_v2 }
 0xc8b   : > { %v4788_v52 = vpop.permute.xlu0 %4787 }
 0xc8c   : > { %v4773_v24 = vpop.permute.xlu1 %4772 }
 0xc90   : > { %v4783_v37 = vpop.permute.xlu1 %4782 }
 0xcf2   : > { %v8004_v12 = vpop.f32.mrb[68].mxu1 }
 0xcf3   : > { %v8005_v21 = vpop.f32.mrb[69].mxu1 }
 0xcf4   : > { %v12841_v29 = vadd.f32 %v8005_v21, %v8004_v12  ;;  %v8007_v31 = vpop.f32.mrb[70].mxu1  ;;  %v14608_v21 = vld [vmem:[#allocation32_spill] sm:$0xff] }
 0xcf5   : > { %v8008_v27 = vpop.f32.mrb[71].mxu1 }
 0xcf6   : > { %v12843_v34 = vadd.f32 %v8008_v27, %v8007_v31 }
 0xcfa   : > { %v8010_v10 = vpop.f32.mrb[72].mxu1 }
 0xcfb   : > { %v8011_v20 = vpop.f32.mrb[73].mxu1 }
 0xcfc   : > { %v12845_v5 = vadd.f32 %v8011_v20, %v8010_v10  ;;  %v8013_v28 = vpop.f32.mrb[74].mxu1 }
 0xcfd   : > { %v8014_v39 = vpop.f32.mrb[75].mxu1 }
 0xcfe   : > { %v12847_v56 = vadd.f32 %v8014_v39, %v8013_v28 }
 0xd02   : > { %v12849_v62 = vpop.f32.mrb[76].mxu1 }
 0xd03   : > { %14605 = vst [vmem:[#allocation30_spill] sm:$0xff] %v12849_v62  ;;  %v12851_v15 = vpop.f32.mrb[77].mxu1 }
 0xd04   : > { %v12853_v4 = vpop.f32.mrb[78].mxu1 }
 0xd05   : > { %14606 = vst [vmem:[#allocation33_spill] sm:$0xff] %v12853_v4  ;;  %v12855_v11 = vpop.f32.mrb[79].mxu1 }
 0xd28   : > { %v12857_v9 = vpop.f32.mrb[48].mxu0 }
 0xd29   : > { %v12859_v30 = vpop.f32.mrb[49].mxu0 }
 0xd2a   : > { %v12861_v0 = vpop.f32.mrb[50].mxu0 }
 0xd2b   : > { %v12863_v16 = vpop.f32.mrb[51].mxu0 }
 0xd30   : > { %v12865_v49 = vpop.f32.mrb[52].mxu0 }
 0xd31   : > { %v12867_v40 = vpop.f32.mrb[53].mxu0 }
 0xd32   : > { %v12869_v51 = vpop.f32.mrb[54].mxu0 }
 0xd33   : > { %v12871_v7 = vpop.f32.mrb[55].mxu0 }
 0xd48   : > { %v8036_v45 = vpop.f32.mrb[56].mxu0 }
 0xd49   : > { %v8037_v57 = vpop.f32.mrb[57].mxu0 }
 0xd4a   : > { %v8038_v6 = vadd.f32 %v8037_v57, %v8036_v45  ;;  %v8039_v43 = vpop.f32.mrb[58].mxu0 }
 0xd4b   : > { %v8040_v46 = vpop.f32.mrb[59].mxu0 }
 0xd4c   : > { %v8041_v13 = vadd.f32 %v8040_v46, %v8039_v43  ;;  %v5219_v48 = vadd.f32 %v8038_v6, %v4773_v24 }
 0xd4e   : > { %v5222_v12 = vadd.f32 %v8041_v13, %v4778_v32 }
 0xd50   : > { %v8042_v61 = vpop.f32.mrb[60].mxu0 }
 0xd51   : > { %v8043_v26 = vpop.f32.mrb[61].mxu0 }
 0xd52   : > { %v8044_v36 = vadd.f32 %v8043_v26, %v8042_v61  ;;  %v8045_v47 = vpop.f32.mrb[62].mxu0 }
 0xd53   : > { %v8046_v25 = vpop.f32.mrb[63].mxu0  ;;  %v5165_v50 = vpop.f32.mrb[80].mxu1 }
 0xd54   : > { %v8047_v14 = vadd.f32 %v8046_v25, %v8045_v47  ;;  %v8281_v3 = vadd.f32 %v5165_v50, %v4773_v24  ;;  %v5167_v59 = vpop.f32.mrb[81].mxu1  ;;  %v5227_v41 = vadd.f32 %v8044_v36, %v4783_v37  ;;  %v14609_v50 = vld [vmem:[#allocation25_spill] sm:$0xff] }
 0xd55   : > { %v8282_v17 = vadd.f32 %v5167_v59, %v4773_v24  ;;  %v5169_v58 = vpop.f32.mrb[82].mxu1 }
 0xd56   : > { %v5282_v18 = vmax.f32 %v8281_v3, 0.0  ;;  %v8283_v54 = vadd.f32 %v5169_v58, %v4778_v32  ;;  %v5171_v60 = vpop.f32.mrb[83].mxu1  ;;  %v5230_v63 = vadd.f32 %v8047_v14, %v4788_v52 }
 0xd57   : > { %v5283_v1 = vmax.f32 %v8282_v17, 0.0  ;;  %v8284_v44 = vadd.f32 %v5171_v60, %v4778_v32 }
 0xd58   : > { %v5285_v35 = vmax.f32 %v8283_v54, 0.0  ;;  %v8191_v53 = vpop.f32.mrb[64].mxu0  ;;  %v5294_v42 = vmul.f32 %v5282_v18, %v14607_v38 }
 0xd59   : > { %v5286_v55 = vmax.f32 %v8284_v44, 0.0  ;;  %v5276_v23 = vadd.f32 %v8191_v53, %v5227_v41  ;;  %v5267_v19 = vpop.f32.mrb[65].mxu0  ;;  %v5295_v31 = vmul.f32 %v5283_v1, %v14608_v21 }
 0xd5a   : > { %v5297_v8 = vmul.f32 %v5285_v35, %v14607_v38  ;;  %v5268_v33 = vadd.f32 %v5267_v19, %v5219_v48  ;;  %v8192_v2 = vpop.f32.mrb[66].mxu0  ;;  %v12937_v19 = vpop.permute.xlu0 %8668 }
 0xd5b   : > { %v5298_v27 = vmul.f32 %v5286_v55, %v14608_v21  ;;  %v5290_v10 = vmax.f32 %v5276_v23, 0.0  ;;  %v5279_v20 = vadd.f32 %v8192_v2, %v5230_v63  ;;  %v5270_v28 = vpop.f32.mrb[67].mxu0  ;;  %v5175_v39 = vpop.f32.mrb[84].mxu1 }
 0xd5c   : > { %v5306_v45 = vpack.c.bf16 %v5297_v8, %v5294_v42  ;;  %v5284_v57 = vmax.f32 %v5268_v33, 0.0  ;;  %v5271_v6 = vadd.f32 %v5270_v28, %v5222_v12  ;;  %v8285_v43 = vadd.f32 %v5175_v39, %v4783_v37  ;;  %v5177_v46 = vpop.f32.mrb[85].mxu1  ;;  %v12929_v55 = vpop.permute.xlu1 %8673 }
 0xd5d   : > { %v5307_v24 = vpack.c.bf16 %v5298_v27, %v5295_v31  ;;  %v5293_v61 = vmax.f32 %v5279_v20, 0.0  ;;  %v8286_v26 = vadd.f32 %v5177_v46, %v4783_v37  ;;  %v5179_v36 = vpop.f32.mrb[86].mxu1  ;;  %v5302_v14 = vmul.f32 %v5290_v10, %v14609_v50 }
 0xd5e   : > { %v5287_v47 = vmax.f32 %v5271_v6, 0.0  ;;  %v5288_v25 = vmax.f32 %v8285_v43, 0.0  ;;  %v8287_v13 = vadd.f32 %v5179_v36, %v4788_v52  ;;  %v5181_v32 = vpop.f32.mrb[87].mxu1  ;;  %v5296_v58 = vmul.f32 %v5284_v57, %v14609_v50  ;;  %v12943_v42 = vpop.permute.xlu0 %8678 }
 0xd5f   : > { %v5305_v3 = vmul.f32 %v5293_v61, %v14609_v50  ;;  %v5289_v59 = vmax.f32 %v8286_v26, 0.0  ;;  %v8288_v17 = vadd.f32 %v5181_v32, %v4788_v52  ;;  %v8681_v4 = vunpack.i.h.bf16 %v12943_v42 }
 0xd60   : > { %v5299_v18 = vmul.f32 %v5287_v47, %v14609_v50  ;;  %v5291_v54 = vmax.f32 %v8287_v13, 0.0  ;;  %v5300_v37 = vmul.f32 %v5288_v25, %v14607_v38  ;;  %v8684_v23 = vpop.permute.xlu1 %8683 }
 0xd61   : > { %v5311_v60 = vpack.c.bf16 %v5305_v3, %v5302_v14  ;;  %v5292_v1 = vmax.f32 %v8288_v17, 0.0  ;;  %v5301_v35 = vmul.f32 %v5289_v59, %v14608_v21  ;;  %v8686_v43 = vunpack.i.h.bf16 %v8684_v23 }
 0xd62   : > { %v5308_v44 = vpack.c.bf16 %v5299_v18, %v5296_v58  ;;  %v5303_v41 = vmul.f32 %v5291_v54, %v14607_v38  ;;  %v12949_v33 = vpop.permute.xlu0 %8688  ;;  %v8685_v47 = vunpack.i.l.bf16 %v8684_v23  ;;  %v8670_v59 = vunpack.i.l.bf16 %v12937_v19 }
 0xd63   : > { %v5304_v53 = vmul.f32 %v5292_v1, %v14608_v21  ;;  %5387 = vrot.lane.b32.xlu0 %v5311_v60, %s9074_s21  ;;  %5365 = vrot.lane.b32.xlu1 %v5311_v60, %s9072_s18 }
 0xd64   : > { %v5309_v52 = vpack.c.bf16 %v5303_v41, %v5300_v37  ;;  %v12939_v63 = vpop.permute.xlu1 %8693  ;;  %v8675_v37 = vunpack.i.l.bf16 %v12929_v55 }
 0xd65   : > { %v5310_v48 = vpack.c.bf16 %v5304_v53, %v5301_v35 }
 0xd67   : > { %5453 = vrot.lane.b32.xlu0 %v5311_v60, %s9073_s19  ;;  %5409 = vrot.lane.b32.xlu1 %v5311_v60, %s9076_s15 }
 0xd68   : > { %v12945_v8 = vpop.permute.xlu1 %8698 }
 0xd6b   : > { %5497 = vrot.lane.b32.xlu0 %v5311_v60, %s9077_s27  ;;  %5427 = vrot.lane.b32.xlu1 %v5311_v60, %s9071_s28 }
 0xd6c   : > { %v12951_v2 = vpop.permute.xlu1 %8703 }
 0xd6f   : > { %5519 = vrot.lane.b32.xlu0 %v5311_v60, %s9070_s17  ;;  %5475 = vrot.lane.b32.xlu1 %v5311_v60, %s9075_s24 }
 0xd73   : > { %5598 = vrot.lane.b32.xlu0 %v5311_v60, %s9078_s22  ;;  %5357 = vrot.lane.b32.xlu1 %v5308_v44, %s9072_s18 }
 0xd77   : > { %5379 = vrot.lane.b32.xlu0 %v5308_v44, %s9074_s21  ;;  %5401 = vrot.lane.b32.xlu1 %v5308_v44, %s9076_s15 }
 0xd7b   : > { %5421 = vrot.lane.b32.xlu0 %v5308_v44, %s9071_s28  ;;  %5467 = vrot.lane.b32.xlu1 %v5308_v44, %s9075_s24 }
 0xd7f   : > { %5445 = vrot.lane.b32.xlu0 %v5308_v44, %s9073_s19  ;;  %5511 = vrot.lane.b32.xlu1 %v5308_v44, %s9070_s17 }
 0xd83   : > { %5489 = vrot.lane.b32.xlu0 %v5308_v44, %s9077_s27  ;;  %5590 = vrot.lane.b32.xlu1 %v5308_v44, %s9078_s22 }
 0xd87   : > { %5375 = vrot.lane.b32.xlu0 %v5306_v45, %s9074_s21  ;;  %5353 = vrot.lane.b32.xlu1 %v5306_v45, %s9072_s18 }
 0xd8b   : > { %5417 = vrot.lane.b32.xlu0 %v5306_v45, %s9071_s28  ;;  %5397 = vrot.lane.b32.xlu1 %v5306_v45, %s9076_s15 }
 0xd8f   : > { %5441 = vrot.lane.b32.xlu0 %v5306_v45, %s9073_s19  ;;  %5463 = vrot.lane.b32.xlu1 %v5306_v45, %s9075_s24 }
 0xd93   : > { %5485 = vrot.lane.b32.xlu0 %v5306_v45, %s9077_s27  ;;  %5586 = vrot.lane.b32.xlu1 %v5306_v45, %s9078_s22 }
 0xd97   : > { %5355 = vrot.lane.b32.xlu0 %v5307_v24, %s9072_s18  ;;  %5507 = vrot.lane.b32.xlu1 %v5306_v45, %s9070_s17 }
 0xd9b   : > { %5399 = vrot.lane.b32.xlu0 %v5307_v24, %s9076_s15  ;;  %5377 = vrot.lane.b32.xlu1 %v5307_v24, %s9074_s21 }
 0xd9f   : > { %5465 = vrot.lane.b32.xlu0 %v5307_v24, %s9075_s24  ;;  %5419 = vrot.lane.b32.xlu1 %v5307_v24, %s9071_s28 }
 0xda3   : > { %5588 = vrot.lane.b32.xlu0 %v5307_v24, %s9078_s22  ;;  %5443 = vrot.lane.b32.xlu1 %v5307_v24, %s9073_s19 }
 0xda7   : > { %5509 = vrot.lane.b32.xlu0 %v5307_v24, %s9070_s17  ;;  %5487 = vrot.lane.b32.xlu1 %v5307_v24, %s9077_s27 }
 0xdab   : > { %5383 = vrot.lane.b32.xlu0 %v5309_v52, %s9074_s21  ;;  %5361 = vrot.lane.b32.xlu1 %v5309_v52, %s9072_s18 }
 0xdaf   : > { %5449 = vrot.lane.b32.xlu0 %v5309_v52, %s9073_s19  ;;  %5405 = vrot.lane.b32.xlu1 %v5309_v52, %s9076_s15 }
 0xdb3   : > { %5493 = vrot.lane.b32.xlu0 %v5309_v52, %s9077_s27  ;;  %5423 = vrot.lane.b32.xlu1 %v5309_v52, %s9071_s28 }
 0xdb7   : > { %5594 = vrot.lane.b32.xlu0 %v5309_v52, %s9078_s22  ;;  %5471 = vrot.lane.b32.xlu1 %v5309_v52, %s9075_s24 }
 0xdbb   : > { %5515 = vrot.lane.b32.xlu0 %v5309_v52, %s9070_s17  ;;  %5385 = vrot.lane.b32.xlu1 %v5310_v48, %s9074_s21  ;;  %v8680_v52 = vunpack.i.l.bf16 %v12943_v42  ;;  %v8690_v42 = vunpack.i.l.bf16 %v12949_v33 }
 0xdbf   : > { %5363 = vrot.lane.b32.xlu0 %v5310_v48, %s9072_s18  ;;  %5451 = vrot.lane.b32.xlu1 %v5310_v48, %s9073_s19 }
 0xdc3   : > { %5407 = vrot.lane.b32.xlu0 %v5310_v48, %s9076_s15  ;;  %5495 = vrot.lane.b32.xlu1 %v5310_v48, %s9077_s27 }
 0xdc7   : > { %5425 = vrot.lane.b32.xlu0 %v5310_v48, %s9071_s28  ;;  %5596 = vrot.lane.b32.xlu1 %v5310_v48, %s9078_s22 }
 0xdcb   : > { %5473 = vrot.lane.b32.xlu0 %v5310_v48, %s9075_s24  ;;  %5517 = vrot.lane.b32.xlu1 %v5310_v48, %s9070_s17 }
 0xdd5   : > { %v12953_v12 = vpop.permute.xlu0 %5387  ;;  %v12955_v31 = vpop.permute.xlu1 %5365 }
 0xdd6   : > { %5614 = vrot.lane.b32.xlu0 %v12955_v31, %s9078_s22 }
 0xdd9   : > { %v12959_v27 = vpop.permute.xlu0 %5453  ;;  %v12961_v10 = vpop.permute.xlu1 %5409 }
 0xdda   : > { %v5462_v61 = vsel %vm662_vm3, %v12959_v27, %v8686_v43 }
 0xddd   : > { %v12963_v20 = vpop.permute.xlu0 %5497  ;;  %v12965_v28 = vpop.permute.xlu1 %5427 }
 0xdde   : > { %5662 = vrot.lane.b32.xlu1 %v12965_v28, %s9078_s22 }
 0xde1   : > { %v12969_v39 = vpop.permute.xlu0 %5519  ;;  %v12971_v45 = vpop.permute.xlu1 %5475 }
 0xde5   : > { %v12973_v57 = vpop.permute.xlu0 %5598  ;;  %v5358_v6 = vpop.permute.xlu1 %5357 }
 0xde6   : > { %5606 = vrot.lane.b32.xlu1 %v5358_v6, %s9078_s22 }
 0xde9   : > { %v12976_v46 = vpop.permute.xlu0 %5379  ;;  %v12978_v24 = vpop.permute.xlu1 %5401 }
 0xdea   : > { %5678 = vrot.lane.b32.xlu1 %v5462_v61, %s9078_s22 }
 0xded   : > { %v5422_v26 = vpop.permute.xlu0 %5421  ;;  %v12983_v36 = vpop.permute.xlu1 %5467 }
 0xdee   : > { %5654 = vrot.lane.b32.xlu0 %v5422_v26, %s9078_s22 }
 0xdf1   : > { %v5446_v25 = vpop.permute.xlu0 %5445  ;;  %v12986_v13 = vpop.permute.xlu1 %5511 }
 0xdf2   : > { %v5459_v32 = vsel %vm662_vm3, %v5446_v25, %v8685_v47 }
 0xdf3   : > { %5670 = vrot.lane.b32.xlu0 %v5459_v32, %s9078_s22 }
 0xdf5   : > { %v12990_v14 = vpop.permute.xlu0 %5489  ;;  %v12992_v3 = vpop.permute.xlu1 %5590 }
 0xdf9   : > { %v5376_v17 = vpop.permute.xlu0 %5375  ;;  %v5354_v58 = vpop.permute.xlu1 %5353 }
 0xdfa   : > { %v5367_v18 = vsel %vm566_vm2, %v8670_v59, %v5354_v58  ;;  %v5389_v53 = vsel %vm589_vm4, %v8675_v37, %v5376_v17 }
 0xdfb   : > { %5600 = vrot.lane.b32.xlu0 %v5367_v18, %s9078_s22 }
 0xdfd   : > { %v5418_v54 = vpop.permute.xlu0 %5417  ;;  %v5398_v60 = vpop.permute.xlu1 %5397 }
 0xdfe   : > { %5648 = vrot.lane.b32.xlu1 %v5418_v54, %s9078_s22  ;;  %v5411_v43 = vsel %vm612_vm6, %v8680_v52, %v5398_v60 }
 0xe01   : > { %v5442_v1 = vpop.permute.xlu0 %5441  ;;  %v12998_v44 = vpop.permute.xlu1 %5463 }
 0xe02   : > { %5664 = vrot.lane.b32.xlu1 %v5442_v1, %s9078_s22 }
 0xe05   : > { %v13002_v41 = vpop.permute.xlu0 %5485  ;;  %v5587_v35 = vpop.permute.xlu1 %5586 }
 0xe06   : > { %5616 = vrot.lane.b32.xlu1 %v5389_v53, %s9078_s22 }
 0xe09   : > { %v5356_v48 = vpop.permute.xlu0 %5355  ;;  %v13007_v23 = vpop.permute.xlu1 %5507 }
 0xe0a   : > { %5632 = vrot.lane.b32.xlu1 %v5411_v43, %s9078_s22  ;;  %v5368_v61 = vsel %vm566_vm2, %v5354_v58, %v5356_v48  ;;  %v5369_v59 = vsel %vm566_vm2, %v5356_v48, %v5358_v6  ;;  %v8700_v6 = vunpack.i.l.bf16 %v12945_v8 }
 0xe0b   : > { %5602 = vrot.lane.b32.xlu0 %v5368_v61, %s9078_s22 }
 0xe0d   : > { %v5400_v47 = vpop.permute.xlu0 %5399  ;;  %v5378_v32 = vpop.permute.xlu1 %5377 }
 0xe0e   : > { %5604 = vrot.lane.b32.xlu1 %v5369_v59, %s9078_s22  ;;  %v5391_v18 = vsel %vm589_vm4, %v5378_v32, %v12976_v46  ;;  %v5390_v52 = vsel %vm589_vm4, %v5376_v17, %v5378_v32  ;;  %v5413_v58 = vsel %vm612_vm6, %v5400_v47, %v12978_v24  ;;  %v5412_v61 = vsel %vm612_vm6, %v5398_v60, %v5400_v47 }
 0xe0f   : > { %5620 = vrot.lane.b32.xlu0 %v5391_v18, %s9078_s22  ;;  %v5728_v32 = vsel %vm1006_vm8, %v8700_v6, %v5587_v35 }
 0xe11   : > { %v5466_v37 = vpop.permute.xlu0 %5465  ;;  %v5420_v53 = vpop.permute.xlu1 %5419 }
 0xe12   : > { %5618 = vrot.lane.b32.xlu1 %v5390_v52, %s9078_s22  ;;  %v5430_v17 = vsel %vm631_vm1, %v5420_v53, %v5422_v26 }
 0xe13   : > { %5636 = vrot.lane.b32.xlu0 %v5413_v58, %s9078_s22  ;;  %v5429_v58 = vsel %vm631_vm1, %v5418_v54, %v5420_v53  ;;  %v5480_v54 = vsel %vm685_vm5, %v5466_v37, %v12983_v36 }
 0xe15   : > { %v13024_v48 = vpop.permute.xlu0 %5588  ;;  %v5444_v43 = vpop.permute.xlu1 %5443 }
 0xe16   : > { %5634 = vrot.lane.b32.xlu1 %v5412_v61, %s9078_s22  ;;  %v5729_v59 = vsel %vm1006_vm8, %v5587_v35, %v13024_v48  ;;  %v5457_v60 = vsel %vm662_vm3, %v5442_v1, %v5444_v43  ;;  %v5458_v61 = vsel %vm662_vm3, %v5444_v43, %v5446_v25  ;;  %v5479_v35 = vsel %vm685_vm5, %v12998_v44, %v5466_v37 }
 0xe17   : > { %5842 = vmatprep.subr.bf16.mxu0 %v5729_v59  ;;  %5652 = vrot.lane.b32.xlu0 %v5430_v17, %s9078_s22  ;;  %v8671_v17 = vunpack.i.h.bf16 %v12937_v19  ;;  %v8676_v37 = vunpack.i.h.bf16 %v12929_v55  ;;  %v8701_v55 = vunpack.i.h.bf16 %v12945_v8 }
 0xe18   : > { %5843 = vmatpush1.bf16.msra.mxu0 %v5728_v32 }
 0xe19   : > { %v13033_v18 = vpop.permute.xlu0 %5509  ;;  %v13035_v52 = vpop.permute.xlu1 %5487 }
 0xe1a   : > { %5650 = vrot.lane.b32.xlu1 %v5429_v58, %s9078_s22 }
 0xe1b   : > { %5666 = vrot.lane.b32.xlu0 %v5457_v60, %s9078_s22 }
 0xe1d   : > { %v5384_v47 = vpop.permute.xlu0 %5383  ;;  %v5362_v26 = vpop.permute.xlu1 %5361 }
 0xe1e   : > { %5668 = vrot.lane.b32.xlu1 %v5458_v61, %s9078_s22  ;;  %v5370_v60 = vsel %vm566_vm2, %v8671_v17, %v5362_v26 }
 0xe1f   : > { %5682 = vrot.lane.b32.xlu0 %v5479_v35, %s9078_s22 }
 0xe21   : > { %v5450_v6 = vpop.permute.xlu0 %5449  ;;  %v5406_v59 = vpop.permute.xlu1 %5405 }
 0xe22   : > { %5684 = vrot.lane.b32.xlu1 %v5480_v54, %s9078_s22  ;;  %v5392_v54 = vsel %vm589_vm4, %v8676_v37, %v5384_v47  ;;  %v5414_v17 = vsel %vm612_vm6, %v8681_v4, %v5406_v59 }
 0xe25   : > { %v13049_v1 = vpop.permute.xlu0 %5493  ;;  %v5424_v53 = vpop.permute.xlu1 %5423 }
 0xe26   : > { %5656 = vrot.lane.b32.xlu0 %v5424_v53, %s9078_s22 }
 0xe29   : > { %v5595_v25 = vpop.permute.xlu0 %5594  ;;  %v5472_v43 = vpop.permute.xlu1 %5471 }
 0xe2a   : > { %5672 = vrot.lane.b32.xlu0 %v5450_v6, %s9078_s22  ;;  %v5731_v8 = vsel %vm1006_vm8, %v8701_v55, %v5595_v25  ;;  %v8695_v55 = vunpack.i.l.bf16 %v12939_v63 }
 0xe2d   : > { %v13054_v32 = vpop.permute.xlu0 %5515  ;;  %v5386_v58 = vpop.permute.xlu1 %5385 }
 0xe2e   : > { %5608 = vrot.lane.b32.xlu0 %v5370_v60, %s9078_s22  ;;  %v5394_v4 = vsel %vm589_vm4, %v5386_v58, %v12953_v12  ;;  %v5393_v37 = vsel %vm589_vm4, %v5384_v47, %v5386_v58  ;;  %v5502_v58 = vsel %vm708_vm7, %v13035_v52, %v12990_v14 }
 0xe31   : > { %v5364_v61 = vpop.permute.xlu0 %5363  ;;  %v5452_v35 = vpop.permute.xlu1 %5451 }
 0xe32   : > { %5624 = vrot.lane.b32.xlu0 %v5392_v54, %s9078_s22  ;;  %v5371_v62 = vsel %vm566_vm2, %v5362_v26, %v5364_v61  ;;  %v5372_v26 = vsel %vm566_vm2, %v5364_v61, %v12955_v31 }
 0xe33   : > { %5610 = vrot.lane.b32.xlu1 %v5371_v62, %s9078_s22 }
 0xe35   : > { %v13064_v19 = vpop.permute.xlu1 %5495  ;;  %v5408_v31 = vpop.permute.xlu0 %5407 }
 0xe36   : > { %5640 = vrot.lane.b32.xlu0 %v5414_v17, %s9078_s22  ;;  %v5416_v61 = vsel %vm612_vm6, %v5408_v31, %v12961_v10 }
 0xe37   : > { %5680 = vrot.lane.b32.xlu1 %v12998_v44, %s9078_s22  ;;  %v5481_v44 = vsel %vm685_vm5, %v12983_v36, %v8690_v42 }
 0xe39   : > { %v13071_v60 = vpop.permute.xlu1 %5596  ;;  %v5426_v54 = vpop.permute.xlu0 %5425 }
 0xe3a   : > { %5612 = vrot.lane.b32.xlu0 %v5372_v26, %s9078_s22  ;;  %v5732_v62 = vsel %vm1006_vm8, %v5595_v25, %v13071_v60  ;;  %v8691_v25 = vunpack.i.h.bf16 %v12949_v33  ;;  %v5431_v47 = vsel %vm631_vm1, %v5424_v53, %v5426_v54  ;;  %v5501_v33 = vsel %vm708_vm7, %v13002_v41, %v13035_v52 }
 0xe3b   : > { %5844 = vmatprep.subr.bf16.mxu0 %v5732_v62  ;;  %5628 = vrot.lane.b32.xlu1 %v5394_v4, %s9078_s22  ;;  %v5460_v53 = vsel %vm662_vm3, %v5450_v6, %v5452_v35  ;;  %v5461_v52 = vsel %vm662_vm3, %v5452_v35, %v12959_v27  ;;  %v5503_v6 = vsel %vm708_vm7, %v12990_v14, %v8695_v55 }
 0xe3c   : > { %5845 = vmatpush1.bf16.msra.mxu0 %v5731_v8  ;;  %v5484_v36 = vsel %vm685_vm5, %v12971_v45, %v8691_v25  ;;  %v5504_v14 = vsel %vm708_vm7, %v13049_v1, %v13064_v19  ;;  %v8705_v8 = vunpack.i.l.bf16 %v12951_v2  ;;  %v8706_v25 = vunpack.i.h.bf16 %v12951_v2 }
 0xe3d   : > { %v5474_v17 = vpop.permute.xlu0 %5473  ;;  %v5518_v26 = vpop.permute.xlu1 %5517 }
 0xe3e   : > { %5686 = vrot.lane.b32.xlu0 %v5481_v44, %s9078_s22  ;;  %v5483_v27 = vsel %vm685_vm5, %v5474_v17, %v12971_v45  ;;  %v5526_v42 = vsel %vm731_vm0, %v13054_v32, %v5518_v26 }
 0xe3f   : > { %5622 = vrot.lane.b32.xlu1 %v12976_v46, %s9078_s22  ;;  %v5415_v46 = vsel %vm612_vm6, %v5406_v59, %v5408_v31  ;;  %v5432_v59 = vsel %vm631_vm1, %v5426_v54, %v12965_v28  ;;  %v5482_v28 = vsel %vm685_vm5, %v5472_v43, %v5474_v17  ;;  %v7793_v31 = vld [vmem:[%s14351_s9 + $0x20] sm:$0xff]  ;;  %v5528_v54 = vsel %vm731_vm0, %v12969_v39, %v8706_v25 }
 0xe42   : > { %5626 = vrot.lane.b32.xlu0 %v5393_v37, %s9078_s22 }
 0xe43   : > { %5644 = vrot.lane.b32.xlu1 %v5416_v61, %s9078_s22  ;;  %v5527_v61 = vsel %vm731_vm0, %v5518_v26, %v12969_v39  ;;  %v7796_v39 = vld [vmem:[%s14351_s9 + $0x38] sm:$0xff] }
 0xe46   : > { %5688 = vrot.lane.b32.xlu0 %v5472_v43, %s9078_s22  ;;  %v8696_v43 = vunpack.i.h.bf16 %v12939_v63  ;;  %v5523_v63 = vsel %vm731_vm0, %v13007_v23, %v13033_v18 }
 0xe47   : > { %5694 = vrot.lane.b32.xlu1 %v5484_v36, %s9078_s22  ;;  %v7795_v36 = vld [vmem:[%s14351_s9 + $0x30] sm:$0xff] }
 0xe48   : > { %v5506_v45 = vsel %vm708_vm7, %v12963_v20, %v8696_v43  ;;  %v13154_v62 = vpop.permute.xlu0 %5614 }
 0xe4a   : > { %5642 = vrot.lane.b32.xlu0 %v5415_v46, %s9078_s22  ;;  %v7794_v46 = vld [vmem:[%s14351_s9 + $0x28] sm:$0xff] }
 0xe4b   : > { %5658 = vrot.lane.b32.xlu1 %v5431_v47, %s9078_s22 }
 0xe4e   : > { %5698 = vrot.lane.b32.xlu0 %v5501_v33, %s9078_s22 }
 0xe4f   : > { %5700 = vrot.lane.b32.xlu1 %v5502_v58, %s9078_s22 }
 0xe52   : > { %5660 = vrot.lane.b32.xlu0 %v5432_v59, %s9078_s22 }
 0xe53   : > { %5674 = vrot.lane.b32.xlu1 %v5460_v53, %s9078_s22 }
 0xe56   : > { %5630 = vrot.lane.b32.xlu0 %v12953_v12, %s9078_s22  ;;  %v8859_v12 = vld [vmem:[#allocation10 + $0x34] ss:$12 sps:$4 sm:$0xff]  }
 0xe57   : > { %5696 = vrot.lane.b32.xlu1 %v13002_v41, %s9078_s22  ;;  %5874 = vmatprep.mubr.bf16.mxu0 %v8859_v12  ;;  %v13132_v41 = vpop.permute.xlu1 %5662 }
 0xe58   : > { %5980 = vmatprep.mubr.bf16.mxu1 %v8859_v12 }
 0xe5a   : > { %5676 = vrot.lane.b32.xlu0 %v5461_v52, %s9078_s22 }
 0xe5b   : > { %5690 = vrot.lane.b32.xlu1 %v5482_v28, %s9078_s22  ;;  %v13140_v35 = vpop.permute.xlu1 %5606  ;;  %v5730_v28 = vsel %vm1006_vm8, %v13024_v48, %v12992_v3 }
 0xe5e   : > { %5702 = vrot.lane.b32.xlu0 %v5503_v6, %s9078_s22 }
 0xe5f   : > { %5638 = vrot.lane.b32.xlu1 %v12978_v24, %s9078_s22  ;;  %v5505_v24 = vsel %vm708_vm7, %v13064_v19, %v12963_v20  ;;  %v5524_v19 = vsel %vm731_vm0, %v13033_v18, %v12986_v13 }
 0xe60   : > { %v5655_v4 = vpop.permute.xlu0 %5654 }
 0xe62   : > { %5692 = vrot.lane.b32.xlu0 %v5483_v27, %s9078_s22 }
 0xe63   : > { %5706 = vrot.lane.b32.xlu1 %v5504_v14, %s9078_s22 }
 0xe65   : > { %v13175_v44 = vpop.permute.xlu0 %5670 }
 0xe66   : > { %5704 = vrot.lane.b32.xlu0 %v13049_v1, %s9078_s22  ;;  %v13157_v1 = vpop.permute.xlu1 %5678 }
 0xe67   : > { %5710 = vrot.lane.b32.xlu1 %v5506_v45, %s9078_s22 }
 0xe6a   : > { %5708 = vrot.lane.b32.xlu0 %v5505_v24, %s9078_s22 }
 0xe6b   : > { %5714 = vrot.lane.b32.xlu1 %v5523_v63, %s9078_s22 }
 0xe6d   : > { %v5601_v37 = vpop.permute.xlu0 %5600 }
 0xe6e   : > { %5646 = vrot.lane.b32.xlu0 %v12961_v10, %s9078_s22 }
 0xe6f   : > { %5712 = vrot.lane.b32.xlu1 %v13007_v23, %s9078_s22  ;;  %v5525_v23 = vsel %vm731_vm0, %v12986_v13, %v8705_v8 }
 0xe70   : > { %v13163_v20 = vpop.permute.xlu1 %5648 }
 0xe72   : > { %5716 = vrot.lane.b32.xlu0 %v5524_v19, %s9078_s22 }
 0xe73   : > { %5722 = vrot.lane.b32.xlu1 %v5526_v42, %s9078_s22 }
 0xe74   : > { %v13173_v10 = vpop.permute.xlu1 %5664 }
 0xe76   : > { %5718 = vrot.lane.b32.xlu0 %v5525_v23, %s9078_s22 }
 0xe77   : > { %5720 = vrot.lane.b32.xlu1 %v13054_v32, %s9078_s22 }
 0xe78   : > { %v5617_v18 = vpop.permute.xlu1 %5616 }
 0xe7a   : > { %5724 = vrot.lane.b32.xlu0 %v5527_v61, %s9078_s22 }
 0xe7b   : > { %5536 = vperm.xlu1 %8466, %v7793_v31  }
 0xe7c   : > { %v5633_v13 = vpop.permute.xlu1 %5632 }
 0xe7d   : > { %v5603_v32 = vpop.permute.xlu0 %5602 }
 0xe7e   : > { %5726 = vrot.lane.b32.xlu0 %v5528_v54, %s9078_s22  ;;  %v5734_v58 = vsel %vm1006_vm8, %v5601_v37, %v5603_v32 }
 0xe7f   : > { %5546 = vperm.xlu1 %8466, %v7795_v36  }
 0xe80   : > { %v13198_v47 = vpop.permute.xlu1 %5604 }
 0xe81   : > { %v13200_v2 = vpop.permute.xlu0 %5620  ;;  %v5735_v33 = vsel %vm1006_vm8, %v5603_v32, %v13198_v47 }
 0xe82   : > { %5541 = vperm.xlu0 %8465, %v7794_v46   ;;  %5846 = vmatprep.subr.bf16.mxu0 %v5735_v33 }
 0xe83   : > { %5847 = vmatpush1.bf16.msra.mxu0 %v5734_v58  ;;  %8713 = vrot.lane.b32.xlu1 %v14604_v22, %s9074_s21 }
 0xe84   : > { %v5619_v53 = vpop.permute.xlu1 %5618 }
 0xe85   : > { %v13208_v59 = vpop.permute.xlu0 %5636  ;;  %v5741_v31 = vsel %vm1006_vm8, %v5619_v53, %v13200_v2  ;;  %v5740_v25 = vsel %vm1006_vm8, %v5617_v18, %v5619_v53 }
 0xe86   : > { %5551 = vperm.xlu0 %8465, %v7796_v39  }
 0xe87   : > { %8723 = vrot.lane.b32.xlu1 %v14604_v22, %s9073_s19 }
 0xe88   : > { %v5635_v6 = vpop.permute.xlu1 %5634 }
 0xe89   : > { %v5653_v17 = vpop.permute.xlu0 %5652  ;;  %v5747_v33 = vsel %vm1006_vm8, %v5635_v6, %v13208_v59  ;;  %v5746_v18 = vsel %vm1006_vm8, %v5633_v13, %v5635_v6 }
 0xe8a   : > { %v5754_v52 = vsel %vm1006_vm8, %v5653_v17, %v5655_v4  ;;  %8708 = vrot.lane.b32.xlu0 %v14604_v22, %s9072_s18 }
 0xe8b   : > { %8052 = vmatprep.subr.bf16.mxu1 %v5754_v52  ;;  %8733 = vrot.lane.b32.xlu1 %v14604_v22, %s9077_s27 }
 0xe8c   : > { %8053 = vmatpush3.bf16.msra.mxu1 %v5730_v28  ;;  %v5651_v12 = vpop.permute.xlu1 %5650 }
 0xe8d   : > { %v13214_v55 = vpop.permute.xlu0 %5666 }
 0xe8e   : > { %8718 = vrot.lane.b32.xlu0 %v14604_v22, %s9076_s15 }
 0xe8f   : > { %8738 = vrot.lane.b32.xlu1 %v14604_v22, %s9078_s22 }
 0xe90   : > { %v5669_v14 = vpop.permute.xlu1 %5668 }
 0xe91   : > { %v13216_v26 = vpop.permute.xlu0 %5682 }
 0xe92   : > { %8728 = vrot.lane.b32.xlu0 %v14604_v22, %s9075_s24 }
 0xe93   : > { %8743 = vrot.lane.b32.xlu1 %v14604_v22, %s9070_s17 }
 0xe94   : > { %v13220_v24 = vpop.permute.xlu1 %5684 }
 0xe98   : > { %v5657_v27 = vpop.permute.xlu0 %5656 }
 0xe9c   : > { %v13218_v43 = vpop.permute.xlu0 %5672 }
 0xea0   : > { %v5609_v45 = vpop.permute.xlu0 %5608 }
 0xea4   : > { %v5625_v63 = vpop.permute.xlu0 %5624 }
 0xea5   : > { %v5611_v4 = vpop.permute.xlu1 %5610 }
 0xea6   : > { %v5737_v23 = vsel %vm1006_vm8, %v5609_v45, %v5611_v4 }
 0xea8   : > { %v5641_v19 = vpop.permute.xlu0 %5640 }
 0xea9   : > { %v13222_v42 = vpop.permute.xlu1 %5680 }
 0xeac   : > { %v13224_v3 = vpop.permute.xlu0 %5612 }
 0xead   : > { %v13226_v48 = vpop.permute.xlu1 %5628  ;;  %v5738_v8 = vsel %vm1006_vm8, %v5611_v4, %v13224_v3 }
 0xeae   : > { %5848 = vmatprep.subr.bf16.mxu0 %v5738_v8 }
 0xeaf   : > { %5849 = vmatpush1.bf16.msra.mxu0 %v5737_v23  ;;  %v5752_v23 = vsel %vm1006_vm8, %v13163_v20, %v5651_v12  ;;  %v5759_v20 = vsel %vm1006_vm8, %v13214_v55, %v5669_v14 }
 0xeb0   : > { %v5687_v37 = vpop.permute.xlu0 %5686  ;;  %5850 = vmatprep.subr.bf16.mxu0 %v5741_v31 }
 0xeb1   : > { %v13233_v61 = vpop.permute.xlu1 %5622 }
 0xeb3   : > { %5851 = vmatpush1.bf16.msra.mxu0 %v5740_v25 }
 0xeb4   : > { %v5627_v36 = vpop.permute.xlu0 %5626 }
 0xeb5   : > { %v13236_v32 = vpop.permute.xlu1 %5644  ;;  %v5744_v54 = vsel %vm1006_vm8, %v5627_v36, %v13226_v48  ;;  %v5743_v46 = vsel %vm1006_vm8, %v5625_v63, %v5627_v36  ;;  %v5753_v63 = vsel %vm1006_vm8, %v5651_v12, %v5653_v17  ;;  %v5733_v17 = vsel %vm1006_vm8, %v13071_v60, %v12973_v57 }
 0xeb6   : > { %5852 = vmatprep.subr.bf16.mxu0 %v5744_v54  ;;  %v5760_v12 = vsel %vm1006_vm8, %v5669_v14, %v13175_v44  ;;  %v5736_v57 = vsel %vm1006_vm8, %v13198_v47, %v13140_v35  ;;  %v5765_v35 = vsel %vm1006_vm8, %v13216_v26, %v13220_v24  ;;  %v5766_v47 = vsel %vm1006_vm8, %v13220_v24, %v5687_v37 }
 0xeb7   : > { %5853 = vmatpush1.bf16.msra.mxu0 %v5743_v46 }
 0xeb8   : > { %v13243_v58 = vpop.permute.xlu0 %5688  ;;  %5854 = vmatprep.subr.bf16.mxu0 %v5747_v33 }
 0xeb9   : > { %v5695_v39 = vpop.permute.xlu1 %5694 }
 0xebb   : > { %5855 = vmatpush1.bf16.msra.mxu0 %v5746_v18 }
 0xebc   : > { %v5643_v53 = vpop.permute.xlu0 %5642 }
 0xebd   : > { %v5659_v52 = vpop.permute.xlu1 %5658  ;;  %v5750_v28 = vsel %vm1006_vm8, %v5643_v53, %v13236_v32  ;;  %v5749_v45 = vsel %vm1006_vm8, %v5641_v19, %v5643_v53 }
 0xebe   : > { %5856 = vmatprep.subr.bf16.mxu0 %v5750_v28  ;;  %v5755_v19 = vsel %vm1006_vm8, %v5657_v27, %v5659_v52  ;;  %v5758_v27 = vsel %vm1006_vm8, %v13173_v10, %v13214_v55  ;;  %v5739_v10 = vsel %vm1006_vm8, %v13224_v3, %v13154_v62  ;;  %v5742_v62 = vsel %vm1006_vm8, %v13200_v2, %v13233_v61 }
 0xebf   : > { %5857 = vmatpush1.bf16.msra.mxu0 %v5749_v45 }
 0xec0   : > { %v5699_v4 = vpop.permute.xlu0 %5698  ;;  %5858 = vmatprep.subr.bf16.mxu0 %v5753_v63 }
 0xec1   : > { %v5701_v8 = vpop.permute.xlu1 %5700 }
 0xec2   : > { %v5771_v2 = vsel %vm1006_vm8, %v5699_v4, %v5701_v8 }
 0xec3   : > { %5859 = vmatpush1.bf16.msra.mxu0 %v5752_v23  ;;  %v8860_v23 = vld [vmem:[#allocation10 + $0x4c] ss:$12 sps:$4 sm:$0xff]  }
 0xec4   : > { %v5661_v13 = vpop.permute.xlu0 %5660 }
 0xec5   : > { %v5675_v6 = vpop.permute.xlu1 %5674  ;;  %v5756_v31 = vsel %vm1006_vm8, %v5659_v52, %v5661_v13  ;;  %v5757_v25 = vsel %vm1006_vm8, %v5661_v13, %v13132_v41 }
 0xec6   : > { %5860 = vmatprep.subr.bf16.mxu0 %v5756_v31  ;;  %8054 = vmatprep.subr.bf16.mxu1 %v5757_v25  ;;  %v5761_v14 = vsel %vm1006_vm8, %v13218_v43, %v5675_v6  ;;  %v5764_v43 = vsel %vm1006_vm8, %v13222_v42, %v13216_v26 }
 0xec7   : > { %5861 = vmatpush1.bf16.msra.mxu0 %v5755_v19  ;;  %8055 = vmatpush3.bf16.msra.mxu1 %v5733_v17  ;;  %v8862_v17 = vld [vmem:[#allocation10 + $0x48] ss:$12 sps:$4 sm:$0xff]  }
 0xec8   : > { %v5631_v36 = vpop.permute.xlu0 %5630  ;;  %5862 = vmatprep.subr.bf16.mxu0 %v5759_v20  ;;  %8056 = vmatprep.subr.bf16.mxu1 %v5760_v12 }
 0xec9   : > { %v5697_v41 = vpop.permute.xlu1 %5696  ;;  %v5745_v37 = vsel %vm1006_vm8, %v13226_v48, %v5631_v36 }
 0xecb   : > { %5863 = vmatpush1.bf16.msra.mxu0 %v5758_v27  ;;  %8057 = vmatpush3.bf16.msra.mxu1 %v5736_v57 }
 0xecc   : > { %v5677_v60 = vpop.permute.xlu0 %5676 }
 0xecd   : > { %v5691_v54 = vpop.permute.xlu1 %5690  ;;  %v5762_v46 = vsel %vm1006_vm8, %v5675_v6, %v5677_v60  ;;  %v5763_v44 = vsel %vm1006_vm8, %v5677_v60, %v13157_v1 }
 0xece   : > { %5864 = vmatprep.subr.bf16.mxu0 %v5762_v46  ;;  %8058 = vmatprep.subr.bf16.mxu1 %v5763_v44  ;;  %v5767_v26 = vsel %vm1006_vm8, %v13243_v58, %v5691_v54  ;;  %v8864_v46 = vld [vmem:[#allocation10 + $0x50] ss:$12 sps:$4 sm:$0xff]  }
 0xecf   : > { %5865 = vmatpush1.bf16.msra.mxu0 %v5761_v14  ;;  %8059 = vmatpush3.bf16.msra.mxu1 %v5739_v10 }
 0xed0   : > { %v5703_v55 = vpop.permute.xlu0 %5702  ;;  %5866 = vmatprep.subr.bf16.mxu0 %v5765_v35  ;;  %8060 = vmatprep.subr.bf16.mxu1 %v5766_v47 }
 0xed1   : > { %v5639_v1 = vpop.permute.xlu1 %5638  ;;  %v5772_v42 = vsel %vm1006_vm8, %v5701_v8, %v5703_v55  ;;  %v8857_v8 = vld [vmem:[#allocation10 + $0x30] ss:$12 sps:$4 sm:$0xff]  }
 0xed2   : > { %v5748_v48 = vsel %vm1006_vm8, %v13208_v59, %v5639_v1 }
 0xed3   : > { %5867 = vmatpush1.bf16.msra.mxu0 %v5764_v43  ;;  %8061 = vmatpush3.bf16.msra.mxu1 %v5742_v62 }
 0xed4   : > { %v5693_v3 = vpop.permute.xlu0 %5692 }
 0xed5   : > { %v5707_v33 = vpop.permute.xlu1 %5706  ;;  %v5768_v18 = vsel %vm1006_vm8, %v5691_v54, %v5693_v3  ;;  %v5769_v24 = vsel %vm1006_vm8, %v5693_v3, %v5695_v39  ;;  %v5770_v39 = vsel %vm1006_vm8, %v5697_v41, %v5699_v4  ;;  %v8863_v41 = vld [vmem:[#allocation10 + $0x38] ss:$12 sps:$4 sm:$0xff]  }
 0xed6   : > { %5868 = vmatprep.subr.bf16.mxu0 %v5768_v18  ;;  %8062 = vmatprep.subr.bf16.mxu1 %v5769_v24 }
 0xed7   : > { %5869 = vmatpush1.bf16.msra.mxu0 %v5767_v26  ;;  %8063 = vmatpush3.bf16.msra.mxu1 %v5745_v37 }
 0xed8   : > { %v5705_v61 = vpop.permute.xlu0 %5704  ;;  %5870 = vmatprep.subr.bf16.mxu0 %v5771_v2  ;;  %8064 = vmatprep.subr.bf16.mxu1 %v5772_v42 }
 0xed9   : > { %v5711_v53 = vpop.permute.xlu1 %5710  ;;  %v5773_v63 = vsel %vm1006_vm8, %v5705_v61, %v5707_v33 }
 0xedb   : > { %5871 = vmatpush1.bf16.msra.mxu0 %v5770_v39  ;;  %8065 = vmatpush3.bf16.msra.mxu1 %v5748_v48 }
 0xedc   : > { %v5709_v52 = vpop.permute.xlu0 %5708 }
 0xedd   : > { %v5715_v28 = vpop.permute.xlu1 %5714  ;;  %v5774_v58 = vsel %vm1006_vm8, %v5707_v33, %v5709_v52  ;;  %v5775_v45 = vsel %vm1006_vm8, %v5709_v52, %v5711_v53 }
 0xede   : > { %5872 = vmatprep.subr.bf16.mxu0 %v5774_v58  ;;  %8066 = vmatprep.subr.bf16.mxu1 %v5775_v45 }
 0xedf   : > { %5873 = vmatpush1.bf16.msra.mxu0 %v5773_v63 }
 0xee0   : > { %v5647_v13 = vpop.permute.xlu0 %5646 }
 0xee1   : > { %v5751_v4 = vsel %vm1006_vm8, %v13236_v32, %v5647_v13  ;;  %v5713_v59 = vpop.permute.xlu1 %5712 }
 0xee2   : > { %5875 = vmatmul.mubr.bf16.vlgmr.msra.gmra.mrb[68].mxu0 %v8857_v8  ;;  %8067 = vmatpush3.bf16.msra.mxu1 %v5751_v4  ;;  %v5776_v19 = vsel %vm1006_vm8, %v5713_v59, %v5715_v28 }
 0xee3   : > { %5884 = vmatprep.mubr.bf16.mxu0 %v8860_v23 }
 0xee4   : > { %v5717_v6 = vpop.permute.xlu0 %5716 }
 0xee5   : > { %5981 = vmatmul.mubr.bf16.vlgmr.msra.gmra.mrb[88].mxu1 %v8857_v8  ;;  %v5723_v31 = vpop.permute.xlu1 %5722  ;;  %v5777_v25 = vsel %vm1006_vm8, %v5715_v28, %v5717_v6 }
 0xee6   : > { %5895 = vmatprep.subr.bf16.mxu0 %v5777_v25  ;;  %5988 = vmatprep.mubr.bf16.mxu1 %v8860_v23 }
 0xee7   : > { %5896 = vmatpush1.bf16.msra.mxu0 %v5776_v19 }
 0xee8   : > { %v5719_v20 = vpop.permute.xlu0 %5718 }
 0xee9   : > { %v5778_v12 = vsel %vm1006_vm8, %v5717_v6, %v5719_v20  ;;  %v5721_v32 = vpop.permute.xlu1 %5720 }
 0xeea   : > { %5885 = vmatmul.mubr.bf16.gmra.mrb[72].mxu0 %v8862_v17  ;;  %8193 = vmatprep.subr.bf16.mxu1 %v5778_v12  ;;  %v5779_v57 = vsel %vm1006_vm8, %v5721_v32, %v5723_v31 }
 0xeeb   : > { %8194 = vmatpush3.bf16.msra.mxu1 %v5778_v12  ;;  %5927 = vmatprep.mubr.bf16.mxu0 %v14604_v22 }
 0xeec   : > { %v5725_v36 = vpop.permute.xlu0 %5724 }
 0xeed   : > { %5989 = vmatmul.mubr.bf16.gmra.mrb[92].mxu1 %v8862_v17  ;;  %v5780_v27 = vsel %vm1006_vm8, %v5723_v31, %v5725_v36 }
 0xeee   : > { %5897 = vmatprep.subr.bf16.mxu0 %v5780_v27  ;;  %8197 = vmatprep.mubr.msk.bf16.mxu1 %vm1115_vm9, %v8863_v41 }
 0xeef   : > { %5898 = vmatpush1.bf16.msra.mxu0 %v5779_v57 }
 0xef0   : > { %v5727_v60 = vpop.permute.xlu0 %5726 }
 0xef1   : > { %v5781_v54 = vsel %vm1006_vm8, %v5725_v36, %v5727_v60 }
 0xef2   : > { %7803 = vmatmul.mubr.msk.bf16.vlgmr.msra.gmra.mrb[68].mxu0 %vm1115_vm9, %v8863_v41  ;;  %8195 = vmatprep.subr.bf16.mxu1 %v5781_v54 }
 0xef3   : > { %8196 = vmatpush3.bf16.msra.mxu1 %v5781_v54  ;;  %5937 = vmatprep.mubr.bf16.mxu0 %v14604_v22 }
 0xef6   : > { %8198 = vmatmul.mubr.msk.bf16.vlgmr.msra.gmra.mrb[96].mxu1 %vm1115_vm9, %v8864_v46 }
 0xefa   : > { %7804 = vmatmul.mubr.msk.bf16.gmra.mrb[72].mxu0 %vm1115_vm9, %v8864_v46  ;;  %v5537_v43 = vpop.permute.xlu1 %5536 }
 0xefe   : > { %v5547_v61 = vpop.permute.xlu1 %5546 }
 0xf01   : > { %v5542_v18 = vpop.permute.xlu0 %5541 }
 0xf05   : > { %v5552_v45 = vpop.permute.xlu0 %5551 }
 0xfb8   : > { %v8068_v44 = vpop.f32.mrb[88].mxu1 }
 0xfb9   : > { %v8069_v14 = vpop.f32.mrb[89].mxu1 }
 0xfba   : > { %v8070_v10 = vadd.f32 %v8069_v14, %v8068_v44  ;;  %v8071_v35 = vpop.f32.mrb[90].mxu1 }
 0xfbb   : > { %v8072_v47 = vpop.f32.mrb[91].mxu1 }
 0xfbc   : > { %v8073_v55 = vadd.f32 %v8072_v47, %v8071_v35  ;;  %v5983_v13 = vadd.f32 %v8070_v10, %v5537_v43 }
 0xfbe   : > { %v5986_v20 = vadd.f32 %v8073_v55, %v5542_v18 }
 0xfc0   : > { %v8074_v1 = vpop.f32.mrb[92].mxu1 }
 0xfc1   : > { %v8075_v62 = vpop.f32.mrb[93].mxu1 }
 0xfc2   : > { %v8076_v3 = vadd.f32 %v8075_v62, %v8074_v1  ;;  %v8077_v33 = vpop.f32.mrb[94].mxu1 }
 0xfc3   : > { %v8078_v24 = vpop.f32.mrb[95].mxu1 }
 0xfc4   : > { %v8079_v37 = vadd.f32 %v8078_v24, %v8077_v33  ;;  %v5991_v58 = vadd.f32 %v8076_v3, %v5547_v61 }
 0xfc5   : > { %v5929_v26 = vpop.f32.mrb[68].mxu0 }
 0xfc6   : > { %v8289_v2 = vadd.f32 %v5929_v26, %v5537_v43  ;;  %v5931_v42 = vpop.f32.mrb[69].mxu0  ;;  %v5994_v31 = vadd.f32 %v8079_v37, %v5552_v45 }
 0xfc7   : > { %v8290_v53 = vadd.f32 %v5931_v42, %v5537_v43  ;;  %v5933_v39 = vpop.f32.mrb[70].mxu0 }
 0xfc8   : > { %v6046_v48 = vmax.f32 %v8289_v2, 0.0  ;;  %v8291_v52 = vadd.f32 %v5933_v39, %v5542_v18  ;;  %v5935_v28 = vpop.f32.mrb[71].mxu0 }
 0xfc9   : > { %v6047_v63 = vmax.f32 %v8290_v53, 0.0  ;;  %v8292_v8 = vadd.f32 %v5935_v28, %v5542_v18  ;;  %v8199_v23 = vpop.f32.mrb[96].mxu1 }
 0xfca   : > { %v6049_v4 = vmax.f32 %v8291_v52, 0.0  ;;  %v6040_v59 = vadd.f32 %v8199_v23, %v5991_v58  ;;  %v6031_v6 = vpop.f32.mrb[97].mxu1  ;;  %v6058_v12 = vmul.f32 %v6046_v48, %v14607_v38 }
 0xfcb   : > { %v6050_v25 = vmax.f32 %v8292_v8, 0.0  ;;  %v6032_v19 = vadd.f32 %v6031_v6, %v5983_v13  ;;  %v8200_v17 = vpop.f32.mrb[98].mxu1  ;;  %v6059_v57 = vmul.f32 %v6047_v63, %v14608_v21 }
 0xfcc   : > { %v6061_v32 = vmul.f32 %v6049_v4, %v14607_v38  ;;  %v6054_v36 = vmax.f32 %v6040_v59, 0.0  ;;  %v6043_v41 = vadd.f32 %v8200_v17, %v5994_v31  ;;  %v6034_v27 = vpop.f32.mrb[99].mxu1  ;;  %v13396_v59 = vpop.permute.xlu0 %8708 }
 0xfcd   : > { %v6062_v60 = vmul.f32 %v6050_v25, %v14608_v21  ;;  %v6048_v54 = vmax.f32 %v6032_v19, 0.0  ;;  %v6035_v46 = vadd.f32 %v6034_v27, %v5986_v20  ;;  %v5939_v44 = vpop.f32.mrb[72].mxu0 }
 0xfce   : > { %v6070_v14 = vpack.c.bf16 %v6061_v32, %v6058_v12  ;;  %v6057_v10 = vmax.f32 %v6043_v41, 0.0  ;;  %v8293_v35 = vadd.f32 %v5939_v44, %v5547_v61  ;;  %v5941_v47 = vpop.f32.mrb[73].mxu0  ;;  %v6066_v3 = vmul.f32 %v6054_v36, %v14609_v50 }
 0xfcf   : > { %v6071_v1 = vpack.c.bf16 %v6062_v60, %v6059_v57  ;;  %v6051_v55 = vmax.f32 %v6035_v46, 0.0  ;;  %v8294_v43 = vadd.f32 %v5941_v47, %v5547_v61  ;;  %v5943_v62 = vpop.f32.mrb[74].mxu0  ;;  %v6060_v26 = vmul.f32 %v6048_v54, %v14609_v50 }
 0xfd0   : > { %v6069_v33 = vmul.f32 %v6057_v10, %v14609_v50  ;;  %v6052_v18 = vmax.f32 %v8293_v35, 0.0  ;;  %v8295_v24 = vadd.f32 %v5943_v62, %v5552_v45  ;;  %v5945_v37 = vpop.f32.mrb[75].mxu0  ;;  %v13402_v31 = vpop.permute.xlu0 %8718 }
 0xfd1   : > { %v6063_v2 = vmul.f32 %v6051_v55, %v14609_v50  ;;  %v6053_v42 = vmax.f32 %v8294_v43, 0.0  ;;  %v8296_v53 = vadd.f32 %v5945_v37, %v5552_v45  ;;  %v13388_v45 = vpop.permute.xlu1 %8713 }
 0xfd2   : > { %v6075_v39 = vpack.c.bf16 %v6069_v33, %v6066_v3  ;;  %v6055_v48 = vmax.f32 %v8295_v24, 0.0  ;;  %v6064_v61 = vmul.f32 %v6052_v18, %v14607_v38  ;;  %v8710_v24 = vunpack.i.l.bf16 %v13396_v59 }
 0xfd3   : > { %v6072_v52 = vpack.c.bf16 %v6063_v2, %v6060_v26  ;;  %v6056_v28 = vmax.f32 %v8296_v53, 0.0  ;;  %v6065_v63 = vmul.f32 %v6053_v42, %v14608_v21 }
 0xfd4   : > { %v6067_v58 = vmul.f32 %v6055_v48, %v14607_v38  ;;  %6151 = vrot.lane.b32.xlu0 %v6075_v39, %s9074_s21  ;;  %6129 = vrot.lane.b32.xlu1 %v6075_v39, %s9072_s18  ;;  %v13408_v19 = vpop.permute.xlu0 %8728 }
 0xfd5   : > { %v6068_v8 = vmul.f32 %v6056_v28, %v14608_v21  ;;  %v8724_v4 = vpop.permute.xlu1 %8723 }
 0xfd6   : > { %v6073_v23 = vpack.c.bf16 %v6067_v58, %v6064_v61  ;;  %v8726_v44 = vunpack.i.h.bf16 %v8724_v4  ;;  %v8725_v55 = vunpack.i.l.bf16 %v8724_v4 }
 0xfd7   : > { %v6074_v13 = vpack.c.bf16 %v6068_v8, %v6065_v63  ;;  %v8720_v63 = vunpack.i.l.bf16 %v13402_v31 }
 0xfd8   : > { %6217 = vrot.lane.b32.xlu0 %v6075_v39, %s9073_s19  ;;  %6173 = vrot.lane.b32.xlu1 %v6075_v39, %s9076_s15 }
 0xfd9   : > { %v13398_v6 = vpop.permute.xlu1 %8733 }
 0xfdc   : > { %6261 = vrot.lane.b32.xlu0 %v6075_v39, %s9077_s27  ;;  %6191 = vrot.lane.b32.xlu1 %v6075_v39, %s9071_s28 }
 0xfdd   : > { %v13404_v25 = vpop.permute.xlu1 %8738 }
 0xfe0   : > { %6283 = vrot.lane.b32.xlu0 %v6075_v39, %s9070_s17  ;;  %6239 = vrot.lane.b32.xlu1 %v6075_v39, %s9075_s24 }
 0xfe1   : > { %v13410_v17 = vpop.permute.xlu1 %8743 }
 0xfe4   : > { %6362 = vrot.lane.b32.xlu0 %v6075_v39, %s9078_s22  ;;  %6121 = vrot.lane.b32.xlu1 %v6072_v52, %s9072_s18 }
 0xfe8   : > { %6143 = vrot.lane.b32.xlu0 %v6072_v52, %s9074_s21  ;;  %6165 = vrot.lane.b32.xlu1 %v6072_v52, %s9076_s15 }
 0xfec   : > { %6185 = vrot.lane.b32.xlu0 %v6072_v52, %s9071_s28  ;;  %6231 = vrot.lane.b32.xlu1 %v6072_v52, %s9075_s24 }
 0xff0   : > { %6209 = vrot.lane.b32.xlu0 %v6072_v52, %s9073_s19  ;;  %6275 = vrot.lane.b32.xlu1 %v6072_v52, %s9070_s17 }
 0xff4   : > { %6253 = vrot.lane.b32.xlu0 %v6072_v52, %s9077_s27  ;;  %6354 = vrot.lane.b32.xlu1 %v6072_v52, %s9078_s22  ;;  %v8715_v52 = vunpack.i.l.bf16 %v13388_v45 }
 0xff8   : > { %6139 = vrot.lane.b32.xlu0 %v6070_v14, %s9074_s21  ;;  %6117 = vrot.lane.b32.xlu1 %v6070_v14, %s9072_s18 }
 0xffc   : > { %6181 = vrot.lane.b32.xlu0 %v6070_v14, %s9071_s28  ;;  %6161 = vrot.lane.b32.xlu1 %v6070_v14, %s9076_s15 }
0x1000   : > { %6205 = vrot.lane.b32.xlu0 %v6070_v14, %s9073_s19  ;;  %6227 = vrot.lane.b32.xlu1 %v6070_v14, %s9075_s24 }
0x1004   : > { %6249 = vrot.lane.b32.xlu0 %v6070_v14, %s9077_s27  ;;  %6350 = vrot.lane.b32.xlu1 %v6070_v14, %s9078_s22 }
0x1008   : > { %6119 = vrot.lane.b32.xlu0 %v6071_v1, %s9072_s18  ;;  %6271 = vrot.lane.b32.xlu1 %v6070_v14, %s9070_s17 }
0x100c   : > { %6163 = vrot.lane.b32.xlu0 %v6071_v1, %s9076_s15  ;;  %6141 = vrot.lane.b32.xlu1 %v6071_v1, %s9074_s21 }
0x1010   : > { %6229 = vrot.lane.b32.xlu0 %v6071_v1, %s9075_s24  ;;  %6183 = vrot.lane.b32.xlu1 %v6071_v1, %s9071_s28 }
0x1014   : > { %6352 = vrot.lane.b32.xlu0 %v6071_v1, %s9078_s22  ;;  %6207 = vrot.lane.b32.xlu1 %v6071_v1, %s9073_s19 }
0x1018   : > { %6273 = vrot.lane.b32.xlu0 %v6071_v1, %s9070_s17  ;;  %6251 = vrot.lane.b32.xlu1 %v6071_v1, %s9077_s27 }
0x101c   : > { %6147 = vrot.lane.b32.xlu0 %v6073_v23, %s9074_s21  ;;  %6125 = vrot.lane.b32.xlu1 %v6073_v23, %s9072_s18 }
0x1020   : > { %6213 = vrot.lane.b32.xlu0 %v6073_v23, %s9073_s19  ;;  %6169 = vrot.lane.b32.xlu1 %v6073_v23, %s9076_s15 }
0x1024   : > { %6257 = vrot.lane.b32.xlu0 %v6073_v23, %s9077_s27  ;;  %6187 = vrot.lane.b32.xlu1 %v6073_v23, %s9071_s28 }
0x1028   : > { %6358 = vrot.lane.b32.xlu0 %v6073_v23, %s9078_s22  ;;  %6235 = vrot.lane.b32.xlu1 %v6073_v23, %s9075_s24 }
0x102c   : > { %6279 = vrot.lane.b32.xlu0 %v6073_v23, %s9070_s17  ;;  %6149 = vrot.lane.b32.xlu1 %v6074_v13, %s9074_s21 }
0x1030   : > { %6127 = vrot.lane.b32.xlu0 %v6074_v13, %s9072_s18  ;;  %6215 = vrot.lane.b32.xlu1 %v6074_v13, %s9073_s19 }
0x1034   : > { %6171 = vrot.lane.b32.xlu0 %v6074_v13, %s9076_s15  ;;  %6259 = vrot.lane.b32.xlu1 %v6074_v13, %s9077_s27 }
0x1038   : > { %6189 = vrot.lane.b32.xlu0 %v6074_v13, %s9071_s28  ;;  %6360 = vrot.lane.b32.xlu1 %v6074_v13, %s9078_s22 }
0x103c   : > { %6237 = vrot.lane.b32.xlu0 %v6074_v13, %s9075_s24  ;;  %6281 = vrot.lane.b32.xlu1 %v6074_v13, %s9070_s17 }
0x1046   : > { %v13412_v20 = vpop.permute.xlu0 %6151  ;;  %v13414_v12 = vpop.permute.xlu1 %6129 }
0x1047   : > { %6378 = vrot.lane.b32.xlu0 %v13414_v12, %s9078_s22 }
0x104a   : > { %v13418_v32 = vpop.permute.xlu0 %6217  ;;  %v13420_v36 = vpop.permute.xlu1 %6173 }
0x104b   : > { %v6226_v35 = vsel %vm662_vm3, %v13418_v32, %v8726_v44 }
0x104e   : > { %v13422_v41 = vpop.permute.xlu0 %6261  ;;  %v13424_v27 = vpop.permute.xlu1 %6191 }
0x104f   : > { %6426 = vrot.lane.b32.xlu1 %v13424_v27, %s9078_s22 }
0x1052   : > { %v13428_v57 = vpop.permute.xlu0 %6283  ;;  %v13430_v60 = vpop.permute.xlu1 %6239 }
0x1056   : > { %v13432_v54 = vpop.permute.xlu0 %6362  ;;  %v6122_v46 = vpop.permute.xlu1 %6121 }
0x1057   : > { %6370 = vrot.lane.b32.xlu1 %v6122_v46, %s9078_s22 }
0x105a   : > { %v13435_v14 = vpop.permute.xlu0 %6143  ;;  %v13437_v10 = vpop.permute.xlu1 %6165 }
0x105b   : > { %6442 = vrot.lane.b32.xlu1 %v6226_v35, %s9078_s22 }
0x105e   : > { %v6186_v47 = vpop.permute.xlu0 %6185  ;;  %v13442_v1 = vpop.permute.xlu1 %6231 }
0x105f   : > { %6418 = vrot.lane.b32.xlu0 %v6186_v47, %s9078_s22 }
0x1062   : > { %v6210_v43 = vpop.permute.xlu0 %6209  ;;  %v13445_v62 = vpop.permute.xlu1 %6275 }
0x1063   : > { %v6223_v3 = vsel %vm662_vm3, %v6210_v43, %v8725_v55 }
0x1064   : > { %6434 = vrot.lane.b32.xlu0 %v6223_v3, %s9078_s22 }
0x1066   : > { %v13449_v33 = vpop.permute.xlu0 %6253  ;;  %v13451_v18 = vpop.permute.xlu1 %6354 }
0x106a   : > { %v6140_v37 = vpop.permute.xlu0 %6139  ;;  %v6118_v26 = vpop.permute.xlu1 %6117 }
0x106b   : > { %v6131_v2 = vsel %vm566_vm2, %v8710_v24, %v6118_v26  ;;  %v6153_v58 = vsel %vm589_vm4, %v8715_v52, %v6140_v37 }
0x106c   : > { %6364 = vrot.lane.b32.xlu0 %v6131_v2, %s9078_s22 }
0x106e   : > { %v6182_v42 = vpop.permute.xlu0 %6181  ;;  %v6162_v53 = vpop.permute.xlu1 %6161 }
0x106f   : > { %6412 = vrot.lane.b32.xlu1 %v6182_v42, %s9078_s22  ;;  %v6175_v13 = vsel %vm612_vm6, %v8720_v63, %v6162_v53 }
0x1072   : > { %v6206_v39 = vpop.permute.xlu0 %6205  ;;  %v13457_v48 = vpop.permute.xlu1 %6227 }
0x1073   : > { %6428 = vrot.lane.b32.xlu1 %v6206_v39, %s9078_s22 }
0x1076   : > { %v13461_v28 = vpop.permute.xlu0 %6249  ;;  %v6351_v61 = vpop.permute.xlu1 %6350 }
0x1077   : > { %6380 = vrot.lane.b32.xlu1 %v6153_v58, %s9078_s22 }
0x107a   : > { %v6120_v8 = vpop.permute.xlu0 %6119  ;;  %v13466_v23 = vpop.permute.xlu1 %6271 }
0x107b   : > { %6396 = vrot.lane.b32.xlu1 %v6175_v13, %s9078_s22  ;;  %v6132_v4 = vsel %vm566_vm2, %v6118_v26, %v6120_v8  ;;  %v6133_v55 = vsel %vm566_vm2, %v6120_v8, %v6122_v46  ;;  %v8740_v46 = vunpack.i.l.bf16 %v13404_v25 }
0x107c   : > { %6366 = vrot.lane.b32.xlu0 %v6132_v4, %s9078_s22 }
0x107d   : > { %v6492_v4 = vsel %vm1006_vm8, %v8740_v46, %v6351_v61 }
0x107e   : > { %v6164_v44 = vpop.permute.xlu0 %6163  ;;  %v6142_v35 = vpop.permute.xlu1 %6141 }
0x107f   : > { %6368 = vrot.lane.b32.xlu1 %v6133_v55, %s9078_s22  ;;  %v6155_v3 = vsel %vm589_vm4, %v6142_v35, %v13435_v14  ;;  %v6154_v52 = vsel %vm589_vm4, %v6140_v37, %v6142_v35  ;;  %v6177_v26 = vsel %vm612_vm6, %v6164_v44, %v13437_v10  ;;  %v6176_v8 = vsel %vm612_vm6, %v6162_v53, %v6164_v44 }
0x1080   : > { %6384 = vrot.lane.b32.xlu0 %v6155_v3, %s9078_s22 }
0x1082   : > { %v6230_v24 = vpop.permute.xlu0 %6229  ;;  %v6184_v2 = vpop.permute.xlu1 %6183 }
0x1083   : > { %6382 = vrot.lane.b32.xlu1 %v6154_v52, %s9078_s22  ;;  %v6194_v37 = vsel %vm631_vm1, %v6184_v2, %v6186_v47  ;;  %v6193_v3 = vsel %vm631_vm1, %v6182_v42, %v6184_v2  ;;  %v6244_v42 = vsel %vm685_vm5, %v6230_v24, %v13442_v1 }
0x1084   : > { %6400 = vrot.lane.b32.xlu0 %v6177_v26, %s9078_s22 }
0x1086   : > { %v13483_v58 = vpop.permute.xlu0 %6352  ;;  %v6208_v63 = vpop.permute.xlu1 %6207 }
0x1087   : > { %6398 = vrot.lane.b32.xlu1 %v6176_v8, %s9078_s22  ;;  %v6493_v13 = vsel %vm1006_vm8, %v6351_v61, %v13483_v58  ;;  %v6221_v53 = vsel %vm662_vm3, %v6206_v39, %v6208_v63  ;;  %v6222_v52 = vsel %vm662_vm3, %v6208_v63, %v6210_v43  ;;  %v6243_v61 = vsel %vm685_vm5, %v13457_v48, %v6230_v24 }
0x1088   : > { %6606 = vmatprep.subr.bf16.mxu1 %v6493_v13  ;;  %6416 = vrot.lane.b32.xlu0 %v6194_v37, %s9078_s22  ;;  %v8711_v8 = vunpack.i.h.bf16 %v13396_v59  ;;  %v8716_v24 = vunpack.i.h.bf16 %v13388_v45  ;;  %v8741_v45 = vunpack.i.h.bf16 %v13404_v25 }
0x1089   : > { %6607 = vmatpush1.bf16.msra.mxu1 %v6492_v4 }
0x108a   : > { %v13492_v35 = vpop.permute.xlu0 %6273  ;;  %v13494_v55 = vpop.permute.xlu1 %6251 }
0x108b   : > { %6414 = vrot.lane.b32.xlu1 %v6193_v3, %s9078_s22 }
0x108c   : > { %6430 = vrot.lane.b32.xlu0 %v6221_v53, %s9078_s22 }
0x108e   : > { %v6148_v44 = vpop.permute.xlu0 %6147  ;;  %v6126_v47 = vpop.permute.xlu1 %6125 }
0x108f   : > { %6432 = vrot.lane.b32.xlu1 %v6222_v52, %s9078_s22  ;;  %v6134_v4 = vsel %vm566_vm2, %v8711_v8, %v6126_v47  ;;  %v6156_v52 = vsel %vm589_vm4, %v8716_v24, %v6148_v44 }
0x1090   : > { %6446 = vrot.lane.b32.xlu0 %v6243_v61, %s9078_s22 }
0x1092   : > { %v6214_v26 = vpop.permute.xlu0 %6213  ;;  %v6170_v46 = vpop.permute.xlu1 %6169 }
0x1093   : > { %6448 = vrot.lane.b32.xlu1 %v6244_v42, %s9078_s22  ;;  %v8721_v42 = vunpack.i.h.bf16 %v13402_v31 }
0x1095   : > { %v6178_v8 = vsel %vm612_vm6, %v8721_v42, %v6170_v46 }
0x1096   : > { %v13508_v39 = vpop.permute.xlu0 %6257  ;;  %v6188_v2 = vpop.permute.xlu1 %6187 }
0x1097   : > { %6420 = vrot.lane.b32.xlu0 %v6188_v2, %s9078_s22 }
0x109a   : > { %v6359_v43 = vpop.permute.xlu0 %6358  ;;  %v6236_v63 = vpop.permute.xlu1 %6235 }
0x109b   : > { %6436 = vrot.lane.b32.xlu0 %v6214_v26, %s9078_s22  ;;  %v6495_v25 = vsel %vm1006_vm8, %v8741_v45, %v6359_v43  ;;  %v8735_v45 = vunpack.i.l.bf16 %v13398_v6 }
0x109e   : > { %v13513_v13 = vpop.permute.xlu0 %6279  ;;  %v6150_v37 = vpop.permute.xlu1 %6149 }
0x109f   : > { %6372 = vrot.lane.b32.xlu0 %v6134_v4, %s9078_s22  ;;  %v6158_v24 = vsel %vm589_vm4, %v6150_v37, %v13412_v20 }
0x10a2   : > { %v6128_v3 = vpop.permute.xlu0 %6127  ;;  %v6216_v53 = vpop.permute.xlu1 %6215 }
0x10a3   : > { %6388 = vrot.lane.b32.xlu0 %v6156_v52, %s9078_s22  ;;  %v6135_v61 = vsel %vm566_vm2, %v6126_v47, %v6128_v3  ;;  %v6136_v47 = vsel %vm566_vm2, %v6128_v3, %v13414_v12  ;;  %v8730_v52 = vunpack.i.l.bf16 %v13408_v19  ;;  %v6157_v3 = vsel %vm589_vm4, %v6148_v44, %v6150_v37 }
0x10a4   : > { %6374 = vrot.lane.b32.xlu1 %v6135_v61, %s9078_s22  ;;  %v6266_v37 = vsel %vm708_vm7, %v13494_v55, %v13449_v33 }
0x10a6   : > { %v13523_v59 = vpop.permute.xlu1 %6259  ;;  %v6172_v12 = vpop.permute.xlu0 %6171 }
0x10a7   : > { %6404 = vrot.lane.b32.xlu0 %v6178_v8, %s9078_s22  ;;  %v6180_v61 = vsel %vm612_vm6, %v6172_v12, %v13420_v36 }
0x10a8   : > { %6444 = vrot.lane.b32.xlu1 %v13457_v48, %s9078_s22  ;;  %v6245_v48 = vsel %vm685_vm5, %v13442_v1, %v8730_v52 }
0x10aa   : > { %v13530_v4 = vpop.permute.xlu1 %6360  ;;  %v6190_v42 = vpop.permute.xlu0 %6189 }
0x10ab   : > { %6376 = vrot.lane.b32.xlu0 %v6136_v47, %s9078_s22  ;;  %v6496_v31 = vsel %vm1006_vm8, %v6359_v43, %v13530_v4  ;;  %v8731_v43 = vunpack.i.h.bf16 %v13408_v19  ;;  %v6195_v44 = vsel %vm631_vm1, %v6188_v2, %v6190_v42  ;;  %v6265_v19 = vsel %vm708_vm7, %v13461_v28, %v13494_v55 }
0x10ac   : > { %6608 = vmatprep.subr.bf16.mxu1 %v6496_v31  ;;  %6392 = vrot.lane.b32.xlu1 %v6158_v24, %s9078_s22  ;;  %v6224_v2 = vsel %vm662_vm3, %v6214_v26, %v6216_v53  ;;  %v6225_v55 = vsel %vm662_vm3, %v6216_v53, %v13418_v32  ;;  %v6267_v26 = vsel %vm708_vm7, %v13449_v33, %v8735_v45 }
0x10ad   : > { %6609 = vmatpush1.bf16.msra.mxu1 %v6495_v25  ;;  %v6248_v1 = vsel %vm685_vm5, %v13430_v60, %v8731_v43  ;;  %v6268_v33 = vsel %vm708_vm7, %v13508_v39, %v13523_v59  ;;  %v8745_v25 = vunpack.i.l.bf16 %v13410_v17  ;;  %v8746_v43 = vunpack.i.h.bf16 %v13410_v17 }
0x10ae   : > { %v6238_v8 = vpop.permute.xlu0 %6237  ;;  %v6282_v47 = vpop.permute.xlu1 %6281 }
0x10af   : > { %6450 = vrot.lane.b32.xlu0 %v6245_v48, %s9078_s22  ;;  %v6247_v32 = vsel %vm685_vm5, %v6238_v8, %v13430_v60  ;;  %v6290_v52 = vsel %vm731_vm0, %v13513_v13, %v6282_v47 }
0x10b0   : > { %6386 = vrot.lane.b32.xlu1 %v13435_v14, %s9078_s22  ;;  %v6179_v14 = vsel %vm612_vm6, %v6170_v46, %v6172_v12  ;;  %v6196_v46 = vsel %vm631_vm1, %v6190_v42, %v13424_v27  ;;  %v6246_v27 = vsel %vm685_vm5, %v6236_v63, %v6238_v8  ;;  %v7807_v12 = vld [vmem:[%s14351_s9 + $0x40] sm:$0xff]  ;;  %v6292_v42 = vsel %vm731_vm0, %v13428_v57, %v8746_v43 }
0x10b3   : > { %6390 = vrot.lane.b32.xlu0 %v6157_v3, %s9078_s22 }
0x10b4   : > { %6408 = vrot.lane.b32.xlu1 %v6180_v61, %s9078_s22  ;;  %v6291_v61 = vsel %vm731_vm0, %v6282_v47, %v13428_v57  ;;  %v7810_v57 = vld [vmem:[%s14351_s9 + $0x58] sm:$0xff] }
0x10b7   : > { %6452 = vrot.lane.b32.xlu0 %v6236_v63, %s9078_s22  ;;  %v8736_v63 = vunpack.i.h.bf16 %v13398_v6  ;;  %v6287_v6 = vsel %vm731_vm0, %v13466_v23, %v13492_v35 }
0x10b8   : > { %6458 = vrot.lane.b32.xlu1 %v6248_v1, %s9078_s22  ;;  %v7809_v1 = vld [vmem:[%s14351_s9 + $0x50] sm:$0xff] }
0x10b9   : > { %v6270_v60 = vsel %vm708_vm7, %v13422_v41, %v8736_v63  ;;  %v13613_v31 = vpop.permute.xlu0 %6378 }
0x10bb   : > { %6406 = vrot.lane.b32.xlu0 %v6179_v14, %s9078_s22  ;;  %v7808_v14 = vld [vmem:[%s14351_s9 + $0x48] sm:$0xff] }
0x10bc   : > { %6422 = vrot.lane.b32.xlu1 %v6195_v44, %s9078_s22 }
0x10bf   : > { %6462 = vrot.lane.b32.xlu0 %v6265_v19, %s9078_s22 }
0x10c0   : > { %6464 = vrot.lane.b32.xlu1 %v6266_v37, %s9078_s22 }
0x10c3   : > { %6424 = vrot.lane.b32.xlu0 %v6196_v46, %s9078_s22 }
0x10c4   : > { %6438 = vrot.lane.b32.xlu1 %v6224_v2, %s9078_s22 }
0x10c7   : > { %6394 = vrot.lane.b32.xlu0 %v13412_v20, %s9078_s22  ;;  %v8867_v20 = vld [vmem:[#allocation10 + $0x64] ss:$12 sps:$4 sm:$0xff]  }
0x10c8   : > { %6460 = vrot.lane.b32.xlu1 %v13461_v28, %s9078_s22  ;;  %6638 = vmatprep.mubr.bf16.mxu1 %v8867_v20  ;;  %v13591_v28 = vpop.permute.xlu1 %6426 }
0x10c9   : > { %6744 = vmatprep.mubr.bf16.mxu0 %v8867_v20 }
0x10cb   : > { %6440 = vrot.lane.b32.xlu0 %v6225_v55, %s9078_s22 }
0x10cc   : > { %6454 = vrot.lane.b32.xlu1 %v6246_v27, %s9078_s22  ;;  %v13599_v53 = vpop.permute.xlu1 %6370  ;;  %v6494_v27 = vsel %vm1006_vm8, %v13483_v58, %v13451_v18 }
0x10cf   : > { %6466 = vrot.lane.b32.xlu0 %v6267_v26, %s9078_s22 }
0x10d0   : > { %6402 = vrot.lane.b32.xlu1 %v13437_v10, %s9078_s22  ;;  %v6269_v10 = vsel %vm708_vm7, %v13523_v59, %v13422_v41  ;;  %v6288_v59 = vsel %vm731_vm0, %v13492_v35, %v13445_v62 }
0x10d1   : > { %v6419_v24 = vpop.permute.xlu0 %6418 }
0x10d3   : > { %6456 = vrot.lane.b32.xlu0 %v6247_v32, %s9078_s22 }
0x10d4   : > { %6470 = vrot.lane.b32.xlu1 %v6268_v33, %s9078_s22 }
0x10d6   : > { %v13634_v48 = vpop.permute.xlu0 %6434 }
0x10d7   : > { %6468 = vrot.lane.b32.xlu0 %v13508_v39, %s9078_s22  ;;  %v13616_v39 = vpop.permute.xlu1 %6442 }
0x10d8   : > { %6474 = vrot.lane.b32.xlu1 %v6270_v60, %s9078_s22 }
0x10db   : > { %6472 = vrot.lane.b32.xlu0 %v6269_v10, %s9078_s22 }
0x10dc   : > { %6478 = vrot.lane.b32.xlu1 %v6287_v6, %s9078_s22 }
0x10de   : > { %v6365_v3 = vpop.permute.xlu0 %6364 }
0x10df   : > { %6410 = vrot.lane.b32.xlu0 %v13420_v36, %s9078_s22 }
0x10e0   : > { %6476 = vrot.lane.b32.xlu1 %v13466_v23, %s9078_s22  ;;  %v6289_v23 = vsel %vm731_vm0, %v13445_v62, %v8745_v25 }
0x10e1   : > { %v13622_v41 = vpop.permute.xlu1 %6412 }
0x10e3   : > { %6480 = vrot.lane.b32.xlu0 %v6288_v59, %s9078_s22 }
0x10e4   : > { %6486 = vrot.lane.b32.xlu1 %v6290_v52, %s9078_s22 }
0x10e5   : > { %v13632_v36 = vpop.permute.xlu1 %6428 }
0x10e7   : > { %6482 = vrot.lane.b32.xlu0 %v6289_v23, %s9078_s22 }
0x10e8   : > { %6484 = vrot.lane.b32.xlu1 %v13513_v13, %s9078_s22 }
0x10e9   : > { %v6381_v35 = vpop.permute.xlu1 %6380 }
0x10eb   : > { %6488 = vrot.lane.b32.xlu0 %v6291_v61, %s9078_s22 }
0x10ec   : > { %6300 = vperm.xlu1 %8466, %v7807_v12  }
0x10ed   : > { %v6397_v62 = vpop.permute.xlu1 %6396 }
0x10ee   : > { %v6367_v13 = vpop.permute.xlu0 %6366 }
0x10ef   : > { %6490 = vrot.lane.b32.xlu0 %v6292_v42, %s9078_s22  ;;  %v6498_v37 = vsel %vm1006_vm8, %v6365_v3, %v6367_v13 }
0x10f0   : > { %6310 = vperm.xlu1 %8466, %v7809_v1  }
0x10f1   : > { %v13657_v44 = vpop.permute.xlu1 %6368 }
0x10f2   : > { %v13659_v17 = vpop.permute.xlu0 %6384  ;;  %v6499_v19 = vsel %vm1006_vm8, %v6367_v13, %v13657_v44 }
0x10f3   : > { %6305 = vperm.xlu0 %8465, %v7808_v14   ;;  %6610 = vmatprep.subr.bf16.mxu1 %v6499_v19 }
0x10f4   : > { %6611 = vmatpush1.bf16.msra.mxu1 %v6498_v37  ;;  %8753 = vrot.lane.b32.xlu1 %v14604_v22, %s9074_s21 }
0x10f5   : > { %v6383_v2 = vpop.permute.xlu1 %6382 }
0x10f6   : > { %v13667_v46 = vpop.permute.xlu0 %6400  ;;  %v6505_v12 = vsel %vm1006_vm8, %v6383_v2, %v13659_v17  ;;  %v6504_v43 = vsel %vm1006_vm8, %v6381_v35, %v6383_v2 }
0x10f7   : > { %6315 = vperm.xlu0 %8465, %v7810_v57  }
0x10f8   : > { %8768 = vrot.lane.b32.xlu1 %v14604_v22, %s9075_s24 }
0x10f9   : > { %v6399_v26 = vpop.permute.xlu1 %6398 }
0x10fa   : > { %v6417_v8 = vpop.permute.xlu0 %6416  ;;  %v6511_v19 = vsel %vm1006_vm8, %v6399_v26, %v13667_v46  ;;  %v6510_v35 = vsel %vm1006_vm8, %v6397_v62, %v6399_v26 }
0x10fb   : > { %v6518_v55 = vsel %vm1006_vm8, %v6417_v8, %v6419_v24  ;;  %8748 = vrot.lane.b32.xlu0 %v14604_v22, %s9072_s18 }
0x10fc   : > { %8084 = vmatprep.subr.bf16.mxu0 %v6518_v55  ;;  %8778 = vrot.lane.b32.xlu1 %v14604_v22, %s9077_s27 }
0x10fd   : > { %8085 = vmatpush3.bf16.msra.mxu0 %v6494_v27  ;;  %v6415_v20 = vpop.permute.xlu1 %6414 }
0x10fe   : > { %v13673_v45 = vpop.permute.xlu0 %6430 }
0x10ff   : > { %8758 = vrot.lane.b32.xlu0 %v14604_v22, %s9076_s15 }
0x1101   : > { %v6433_v33 = vpop.permute.xlu1 %6432 }
0x1102   : > { %v13675_v47 = vpop.permute.xlu0 %6446 }
0x1103   : > { %8763 = vrot.lane.b32.xlu0 %v14604_v22, %s9073_s19 }
0x1105   : > { %v13679_v10 = vpop.permute.xlu1 %6448 }
0x1107   : > { %8773 = vrot.lane.b32.xlu0 %v14604_v22, %s9078_s22 }
0x1109   : > { %v6421_v32 = vpop.permute.xlu0 %6420 }
0x110b   : > { %8783 = vrot.lane.b32.xlu0 %v14604_v22, %s9070_s17 }
0x110d   : > { %v13677_v63 = vpop.permute.xlu0 %6436 }
0x1111   : > { %v6373_v60 = vpop.permute.xlu0 %6372 }
0x1115   : > { %v6389_v6 = vpop.permute.xlu0 %6388 }
0x1116   : > { %v6375_v24 = vpop.permute.xlu1 %6374 }
0x1117   : > { %v6501_v23 = vsel %vm1006_vm8, %v6373_v60, %v6375_v24 }
0x1119   : > { %v6405_v59 = vpop.permute.xlu0 %6404 }
0x111a   : > { %v13681_v52 = vpop.permute.xlu1 %6444 }
0x111d   : > { %v13683_v18 = vpop.permute.xlu0 %6376 }
0x111e   : > { %v13685_v58 = vpop.permute.xlu1 %6392  ;;  %v6502_v25 = vsel %vm1006_vm8, %v6375_v24, %v13683_v18 }
0x111f   : > { %6612 = vmatprep.subr.bf16.mxu1 %v6502_v25 }
0x1120   : > { %6613 = vmatpush1.bf16.msra.mxu1 %v6501_v23  ;;  %v6516_v23 = vsel %vm1006_vm8, %v13622_v41, %v6415_v20  ;;  %v6523_v41 = vsel %vm1006_vm8, %v13673_v45, %v6433_v33 }
0x1121   : > { %v6451_v3 = vpop.permute.xlu0 %6450  ;;  %6614 = vmatprep.subr.bf16.mxu1 %v6505_v12 }
0x1122   : > { %v13692_v61 = vpop.permute.xlu1 %6386 }
0x1124   : > { %6615 = vmatpush1.bf16.msra.mxu1 %v6504_v43 }
0x1125   : > { %v6391_v1 = vpop.permute.xlu0 %6390 }
0x1126   : > { %v13695_v13 = vpop.permute.xlu1 %6408  ;;  %v6508_v42 = vsel %vm1006_vm8, %v6391_v1, %v13685_v58  ;;  %v6507_v14 = vsel %vm1006_vm8, %v6389_v6, %v6391_v1  ;;  %v6517_v6 = vsel %vm1006_vm8, %v6415_v20, %v6417_v8  ;;  %v6497_v8 = vsel %vm1006_vm8, %v13530_v4, %v13432_v54 }
0x1127   : > { %6616 = vmatprep.subr.bf16.mxu1 %v6508_v42  ;;  %v6524_v20 = vsel %vm1006_vm8, %v6433_v33, %v13634_v48  ;;  %v6500_v54 = vsel %vm1006_vm8, %v13657_v44, %v13599_v53  ;;  %v6529_v53 = vsel %vm1006_vm8, %v13675_v47, %v13679_v10  ;;  %v6530_v44 = vsel %vm1006_vm8, %v13679_v10, %v6451_v3 }
0x1128   : > { %6617 = vmatpush1.bf16.msra.mxu1 %v6507_v14 }
0x1129   : > { %v13702_v37 = vpop.permute.xlu0 %6452  ;;  %6618 = vmatprep.subr.bf16.mxu1 %v6511_v19 }
0x112a   : > { %v6459_v57 = vpop.permute.xlu1 %6458 }
0x112c   : > { %6619 = vmatpush1.bf16.msra.mxu1 %v6510_v35 }
0x112d   : > { %v6407_v2 = vpop.permute.xlu0 %6406 }
0x112e   : > { %v6423_v55 = vpop.permute.xlu1 %6422  ;;  %v6514_v27 = vsel %vm1006_vm8, %v6407_v2, %v13695_v13  ;;  %v6513_v60 = vsel %vm1006_vm8, %v6405_v59, %v6407_v2 }
0x112f   : > { %6620 = vmatprep.subr.bf16.mxu1 %v6514_v27  ;;  %v6519_v59 = vsel %vm1006_vm8, %v6421_v32, %v6423_v55  ;;  %v6522_v32 = vsel %vm1006_vm8, %v13632_v36, %v13673_v45  ;;  %v6503_v36 = vsel %vm1006_vm8, %v13683_v18, %v13613_v31  ;;  %v6506_v31 = vsel %vm1006_vm8, %v13659_v17, %v13692_v61 }
0x1130   : > { %6621 = vmatpush1.bf16.msra.mxu1 %v6513_v60 }
0x1131   : > { %v6463_v24 = vpop.permute.xlu0 %6462  ;;  %6622 = vmatprep.subr.bf16.mxu1 %v6517_v6 }
0x1132   : > { %v6465_v25 = vpop.permute.xlu1 %6464 }
0x1133   : > { %v6535_v17 = vsel %vm1006_vm8, %v6463_v24, %v6465_v25 }
0x1134   : > { %6623 = vmatpush1.bf16.msra.mxu1 %v6516_v23  ;;  %v8868_v23 = vld [vmem:[#allocation10 + $0x7c] ss:$12 sps:$4 sm:$0xff]  }
0x1135   : > { %v6425_v62 = vpop.permute.xlu0 %6424 }
0x1136   : > { %v6439_v26 = vpop.permute.xlu1 %6438  ;;  %v6520_v12 = vsel %vm1006_vm8, %v6423_v55, %v6425_v62  ;;  %v6521_v43 = vsel %vm1006_vm8, %v6425_v62, %v13591_v28 }
0x1137   : > { %6624 = vmatprep.subr.bf16.mxu1 %v6520_v12  ;;  %8086 = vmatprep.subr.bf16.mxu0 %v6521_v43  ;;  %v6525_v33 = vsel %vm1006_vm8, %v13677_v63, %v6439_v26  ;;  %v6528_v63 = vsel %vm1006_vm8, %v13681_v52, %v13675_v47 }
0x1138   : > { %6625 = vmatpush1.bf16.msra.mxu1 %v6519_v59  ;;  %8087 = vmatpush3.bf16.msra.mxu0 %v6497_v8  ;;  %v8870_v8 = vld [vmem:[#allocation10 + $0x78] ss:$12 sps:$4 sm:$0xff]  }
0x1139   : > { %v6395_v1 = vpop.permute.xlu0 %6394  ;;  %6626 = vmatprep.subr.bf16.mxu1 %v6523_v41  ;;  %8088 = vmatprep.subr.bf16.mxu0 %v6524_v20 }
0x113a   : > { %v6461_v28 = vpop.permute.xlu1 %6460  ;;  %v6509_v3 = vsel %vm1006_vm8, %v13685_v58, %v6395_v1 }
0x113c   : > { %6627 = vmatpush1.bf16.msra.mxu1 %v6522_v32  ;;  %8089 = vmatpush3.bf16.msra.mxu0 %v6500_v54 }
0x113d   : > { %v6441_v4 = vpop.permute.xlu0 %6440 }
0x113e   : > { %v6455_v42 = vpop.permute.xlu1 %6454  ;;  %v6526_v14 = vsel %vm1006_vm8, %v6439_v26, %v6441_v4  ;;  %v6527_v48 = vsel %vm1006_vm8, %v6441_v4, %v13616_v39 }
0x113f   : > { %6628 = vmatprep.subr.bf16.mxu1 %v6526_v14  ;;  %8090 = vmatprep.subr.bf16.mxu0 %v6527_v48  ;;  %v6531_v47 = vsel %vm1006_vm8, %v13702_v37, %v6455_v42  ;;  %v8872_v14 = vld [vmem:[#allocation10 + $0x80] ss:$12 sps:$4 sm:$0xff]  }
0x1140   : > { %6629 = vmatpush1.bf16.msra.mxu1 %v6525_v33  ;;  %8091 = vmatpush3.bf16.msra.mxu0 %v6503_v36 }
0x1141   : > { %v6467_v45 = vpop.permute.xlu0 %6466  ;;  %6630 = vmatprep.subr.bf16.mxu1 %v6529_v53  ;;  %8092 = vmatprep.subr.bf16.mxu0 %v6530_v44 }
0x1142   : > { %v6403_v39 = vpop.permute.xlu1 %6402  ;;  %v6536_v52 = vsel %vm1006_vm8, %v6465_v25, %v6467_v45  ;;  %v8865_v25 = vld [vmem:[#allocation10 + $0x60] ss:$12 sps:$4 sm:$0xff]  }
0x1143   : > { %v6512_v58 = vsel %vm1006_vm8, %v13667_v46, %v6403_v39 }
0x1144   : > { %6631 = vmatpush1.bf16.msra.mxu1 %v6528_v63  ;;  %8093 = vmatpush3.bf16.msra.mxu0 %v6506_v31 }
0x1145   : > { %v6457_v18 = vpop.permute.xlu0 %6456 }
0x1146   : > { %v6471_v19 = vpop.permute.xlu1 %6470  ;;  %v6532_v35 = vsel %vm1006_vm8, %v6455_v42, %v6457_v18  ;;  %v6533_v10 = vsel %vm1006_vm8, %v6457_v18, %v6459_v57  ;;  %v6534_v57 = vsel %vm1006_vm8, %v6461_v28, %v6463_v24  ;;  %v8871_v28 = vld [vmem:[#allocation10 + $0x68] ss:$12 sps:$4 sm:$0xff]  }
0x1147   : > { %6632 = vmatprep.subr.bf16.mxu1 %v6532_v35  ;;  %8094 = vmatprep.subr.bf16.mxu0 %v6533_v10 }
0x1148   : > { %6633 = vmatpush1.bf16.msra.mxu1 %v6531_v47  ;;  %8095 = vmatpush3.bf16.msra.mxu0 %v6509_v3 }
0x1149   : > { %v6469_v61 = vpop.permute.xlu0 %6468  ;;  %6634 = vmatprep.subr.bf16.mxu1 %v6535_v17  ;;  %8096 = vmatprep.subr.bf16.mxu0 %v6536_v52 }
0x114a   : > { %v6475_v2 = vpop.permute.xlu1 %6474  ;;  %v6537_v6 = vsel %vm1006_vm8, %v6469_v61, %v6471_v19 }
0x114c   : > { %6635 = vmatpush1.bf16.msra.mxu1 %v6534_v57  ;;  %8097 = vmatpush3.bf16.msra.mxu0 %v6512_v58 }
0x114d   : > { %v6473_v55 = vpop.permute.xlu0 %6472 }
0x114e   : > { %v6479_v27 = vpop.permute.xlu1 %6478  ;;  %v6538_v37 = vsel %vm1006_vm8, %v6471_v19, %v6473_v55  ;;  %v6539_v60 = vsel %vm1006_vm8, %v6473_v55, %v6475_v2 }
0x114f   : > { %6636 = vmatprep.subr.bf16.mxu1 %v6538_v37  ;;  %8098 = vmatprep.subr.bf16.mxu0 %v6539_v60 }
0x1150   : > { %6637 = vmatpush1.bf16.msra.mxu1 %v6537_v6 }
0x1151   : > { %v6411_v62 = vpop.permute.xlu0 %6410 }
0x1152   : > { %v6515_v24 = vsel %vm1006_vm8, %v13695_v13, %v6411_v62  ;;  %v6477_v46 = vpop.permute.xlu1 %6476 }
0x1153   : > { %6639 = vmatmul.mubr.bf16.vlgmr.msra.gmra.mrb[100].mxu1 %v8865_v25  ;;  %8099 = vmatpush3.bf16.msra.mxu0 %v6515_v24  ;;  %v6540_v59 = vsel %vm1006_vm8, %v6477_v46, %v6479_v27 }
0x1154   : > { %6648 = vmatprep.mubr.bf16.mxu1 %v8868_v23 }
0x1155   : > { %v6481_v26 = vpop.permute.xlu0 %6480 }
0x1156   : > { %6745 = vmatmul.mubr.bf16.vlgmr.msra.gmra.mrb[76].mxu0 %v8865_v25  ;;  %v6487_v12 = vpop.permute.xlu1 %6486  ;;  %v6541_v43 = vsel %vm1006_vm8, %v6479_v27, %v6481_v26 }
0x1157   : > { %6659 = vmatprep.subr.bf16.mxu1 %v6541_v43  ;;  %6752 = vmatprep.mubr.bf16.mxu0 %v8868_v23 }
0x1158   : > { %6660 = vmatpush1.bf16.msra.mxu1 %v6540_v59 }
0x1159   : > { %v6483_v41 = vpop.permute.xlu0 %6482 }
0x115a   : > { %v6542_v20 = vsel %vm1006_vm8, %v6481_v26, %v6483_v41  ;;  %v6485_v13 = vpop.permute.xlu1 %6484 }
0x115b   : > { %6649 = vmatmul.mubr.bf16.gmra.mrb[104].mxu1 %v8870_v8  ;;  %8201 = vmatprep.subr.bf16.mxu0 %v6542_v20  ;;  %v6543_v54 = vsel %vm1006_vm8, %v6485_v13, %v6487_v12 }
0x115c   : > { %8202 = vmatpush3.bf16.msra.mxu0 %v6542_v20  ;;  %6691 = vmatprep.mubr.bf16.mxu1 %v14604_v22 }
0x115d   : > { %v6489_v1 = vpop.permute.xlu0 %6488 }
0x115e   : > { %6753 = vmatmul.mubr.bf16.gmra.mrb[80].mxu0 %v8870_v8  ;;  %v6544_v32 = vsel %vm1006_vm8, %v6487_v12, %v6489_v1 }
0x115f   : > { %6661 = vmatprep.subr.bf16.mxu1 %v6544_v32  ;;  %8205 = vmatprep.mubr.msk.bf16.mxu0 %vm1115_vm9, %v8871_v28 }
0x1160   : > { %6662 = vmatpush1.bf16.msra.mxu1 %v6543_v54 }
0x1161   : > { %v6491_v4 = vpop.permute.xlu0 %6490 }
0x1162   : > { %v6545_v42 = vsel %vm1006_vm8, %v6489_v1, %v6491_v4 }
0x1163   : > { %7817 = vmatmul.mubr.msk.bf16.vlgmr.msra.gmra.mrb[100].mxu1 %vm1115_vm9, %v8871_v28  ;;  %8203 = vmatprep.subr.bf16.mxu0 %v6545_v42 }
0x1164   : > { %8204 = vmatpush3.bf16.msra.mxu0 %v6545_v42  ;;  %6701 = vmatprep.mubr.bf16.mxu1 %v14604_v22 }
0x1167   : > { %8206 = vmatmul.mubr.msk.bf16.vlgmr.msra.gmra.mrb[84].mxu0 %vm1115_vm9, %v8872_v14 }
0x116b   : > { %7818 = vmatmul.mubr.msk.bf16.gmra.mrb[104].mxu1 %vm1115_vm9, %v8872_v14  ;;  %v6301_v63 = vpop.permute.xlu1 %6300 }
0x116f   : > { %v6311_v61 = vpop.permute.xlu1 %6310 }
0x1172   : > { %v6306_v35 = vpop.permute.xlu0 %6305 }
0x1176   : > { %v6316_v60 = vpop.permute.xlu0 %6315 }
0x1229   : > { %v8100_v48 = vpop.f32.mrb[76].mxu0 }
0x122a   : > { %v8101_v33 = vpop.f32.mrb[77].mxu0 }
0x122b   : > { %v8102_v36 = vadd.f32 %v8101_v33, %v8100_v48  ;;  %v8103_v53 = vpop.f32.mrb[78].mxu0 }
0x122c   : > { %v8104_v44 = vpop.f32.mrb[79].mxu0 }
0x122d   : > { %v8105_v45 = vadd.f32 %v8104_v44, %v8103_v53  ;;  %v6747_v62 = vadd.f32 %v8102_v36, %v6301_v63 }
0x122f   : > { %v6750_v41 = vadd.f32 %v8105_v45, %v6306_v35 }
0x1231   : > { %v8106_v39 = vpop.f32.mrb[80].mxu0 }
0x1232   : > { %v8107_v31 = vpop.f32.mrb[81].mxu0 }
0x1233   : > { %v8108_v18 = vadd.f32 %v8107_v31, %v8106_v39  ;;  %v8109_v19 = vpop.f32.mrb[82].mxu0 }
0x1234   : > { %v8110_v10 = vpop.f32.mrb[83].mxu0 }
0x1235   : > { %v8111_v3 = vadd.f32 %v8110_v10, %v8109_v19  ;;  %v6755_v37 = vadd.f32 %v8108_v18, %v6311_v61 }
0x1236   : > { %v6693_v47 = vpop.f32.mrb[100].mxu1 }
0x1237   : > { %v8297_v17 = vadd.f32 %v6693_v47, %v6301_v63  ;;  %v6695_v52 = vpop.f32.mrb[101].mxu1  ;;  %v6758_v12 = vadd.f32 %v8111_v3, %v6316_v60 }
0x1238   : > { %v8298_v2 = vadd.f32 %v6695_v52, %v6301_v63  ;;  %v6697_v57 = vpop.f32.mrb[102].mxu1 }
0x1239   : > { %v6810_v58 = vmax.f32 %v8297_v17, 0.0  ;;  %v8299_v55 = vadd.f32 %v6697_v57, %v6306_v35  ;;  %v6699_v27 = vpop.f32.mrb[103].mxu1 }
0x123a   : > { %v6811_v6 = vmax.f32 %v8298_v2, 0.0  ;;  %v8300_v25 = vadd.f32 %v6699_v27, %v6306_v35  ;;  %v8207_v23 = vpop.f32.mrb[84].mxu0 }
0x123b   : > { %v6813_v24 = vmax.f32 %v8299_v55, 0.0  ;;  %v6804_v46 = vadd.f32 %v8207_v23, %v6755_v37  ;;  %v6795_v26 = vpop.f32.mrb[85].mxu0  ;;  %v6822_v20 = vmul.f32 %v6810_v58, %v14607_v38 }
0x123c   : > { %v6814_v43 = vmax.f32 %v8300_v25, 0.0  ;;  %v6796_v59 = vadd.f32 %v6795_v26, %v6747_v62  ;;  %v8208_v8 = vpop.f32.mrb[86].mxu0  ;;  %v6823_v54 = vmul.f32 %v6811_v6, %v14608_v21  ;;  %v13857_v62 = vpop.permute.xlu1 %8753 }
0x123d   : > { %v6825_v13 = vmul.f32 %v6813_v24, %v14607_v38  ;;  %v6818_v1 = vmax.f32 %v6804_v46, 0.0  ;;  %v6807_v28 = vadd.f32 %v8208_v8, %v6758_v12  ;;  %v6798_v32 = vpop.f32.mrb[87].mxu0 }
0x123e   : > { %v6826_v4 = vmul.f32 %v6814_v43, %v14608_v21  ;;  %v6812_v42 = vmax.f32 %v6796_v59, 0.0  ;;  %v6799_v14 = vadd.f32 %v6798_v32, %v6750_v41  ;;  %v6703_v48 = vpop.f32.mrb[104].mxu1 }
0x123f   : > { %v6834_v33 = vpack.c.bf16 %v6825_v13, %v6822_v20  ;;  %v6821_v36 = vmax.f32 %v6807_v28, 0.0  ;;  %v8301_v53 = vadd.f32 %v6703_v48, %v6311_v61  ;;  %v6705_v44 = vpop.f32.mrb[105].mxu1  ;;  %v6830_v18 = vmul.f32 %v6818_v1, %v14609_v50 }
0x1240   : > { %v6835_v39 = vpack.c.bf16 %v6826_v4, %v6823_v54  ;;  %v6815_v45 = vmax.f32 %v6799_v14, 0.0  ;;  %v8302_v63 = vadd.f32 %v6705_v44, %v6311_v61  ;;  %v6707_v31 = vpop.f32.mrb[106].mxu1  ;;  %v6824_v47 = vmul.f32 %v6812_v42, %v14609_v50  ;;  %v13863_v46 = vpop.permute.xlu1 %8768 }
0x1241   : > { %v6833_v19 = vmul.f32 %v6821_v36, %v14609_v50  ;;  %v6816_v35 = vmax.f32 %v8301_v53, 0.0  ;;  %v8303_v10 = vadd.f32 %v6707_v31, %v6316_v60  ;;  %v6709_v3 = vpop.f32.mrb[107].mxu1 }
0x1242   : > { %v6827_v17 = vmul.f32 %v6815_v45, %v14609_v50  ;;  %v6817_v52 = vmax.f32 %v8302_v63, 0.0  ;;  %v8304_v2 = vadd.f32 %v6709_v3, %v6316_v60 }
0x1243   : > { %v6839_v57 = vpack.c.bf16 %v6833_v19, %v6830_v18  ;;  %v6819_v58 = vmax.f32 %v8303_v10, 0.0  ;;  %v6828_v61 = vmul.f32 %v6816_v35, %v14607_v38  ;;  %v8770_v18 = vunpack.i.l.bf16 %v13863_v46 }
0x1244   : > { %v6836_v55 = vpack.c.bf16 %v6827_v17, %v6824_v47  ;;  %v6820_v27 = vmax.f32 %v8304_v2, 0.0  ;;  %v6829_v6 = vmul.f32 %v6817_v52, %v14608_v21  ;;  %v13869_v12 = vpop.permute.xlu1 %8778  ;;  %v8755_v2 = vunpack.i.l.bf16 %v13857_v62 }
0x1245   : > { %v6831_v37 = vmul.f32 %v6819_v58, %v14607_v38  ;;  %6910 = vrot.lane.b32.xlu0 %v6839_v57, %s9074_s21  ;;  %6888 = vrot.lane.b32.xlu1 %v6839_v57, %s9072_s18  ;;  %v13847_v38 = vpop.permute.xlu0 %8748 }
0x1246   : > { %v6832_v25 = vmul.f32 %v6820_v27, %v14608_v21  ;;  %v8750_v3 = vunpack.i.l.bf16 %v13847_v38 }
0x1247   : > { %v6837_v23 = vpack.c.bf16 %v6831_v37, %v6828_v61 }
0x1248   : > { %v6838_v50 = vpack.c.bf16 %v6832_v25, %v6829_v6 }
0x1249   : > { %6998 = vrot.lane.b32.xlu0 %v6839_v57, %s9075_s24  ;;  %6932 = vrot.lane.b32.xlu1 %v6839_v57, %s9076_s15  ;;  %v13851_v21 = vpop.permute.xlu0 %8758 }
0x124a   : > { %v8760_v27 = vunpack.i.l.bf16 %v13851_v21 }
0x124d   : > { %6902 = vrot.lane.b32.xlu0 %v6836_v55, %s9074_s21  ;;  %6950 = vrot.lane.b32.xlu1 %v6839_v57, %s9071_s28  ;;  %v8764_v60 = vpop.permute.xlu0 %8763 }
0x124e   : > { %v8766_v32 = vunpack.i.h.bf16 %v8764_v60 }
0x1251   : > { %6944 = vrot.lane.b32.xlu0 %v6836_v55, %s9071_s28  ;;  %6976 = vrot.lane.b32.xlu1 %v6839_v57, %s9073_s19  ;;  %v13861_v24 = vpop.permute.xlu0 %8773 }
0x1255   : > { %6968 = vrot.lane.b32.xlu0 %v6836_v55, %s9073_s19  ;;  %7020 = vrot.lane.b32.xlu1 %v6839_v57, %s9077_s27  ;;  %v13867_v26 = vpop.permute.xlu0 %8783 }
0x1259   : > { %7012 = vrot.lane.b32.xlu0 %v6836_v55, %s9077_s27  ;;  %7042 = vrot.lane.b32.xlu1 %v6839_v57, %s9070_s17 }
0x125d   : > { %7034 = vrot.lane.b32.xlu0 %v6836_v55, %s9070_s17  ;;  %7093 = vrot.lane.b32.xlu1 %v6839_v57, %s9078_s22 }
0x1261   : > { %7085 = vrot.lane.b32.xlu0 %v6836_v55, %s9078_s22  ;;  %6880 = vrot.lane.b32.xlu1 %v6836_v55, %s9072_s18 }
0x1265   : > { %6898 = vrot.lane.b32.xlu0 %v6834_v33, %s9074_s21  ;;  %6924 = vrot.lane.b32.xlu1 %v6836_v55, %s9076_s15 }
0x1269   : > { %6940 = vrot.lane.b32.xlu0 %v6834_v33, %s9071_s28  ;;  %6990 = vrot.lane.b32.xlu1 %v6836_v55, %s9075_s24 }
0x126d   : > { %6964 = vrot.lane.b32.xlu0 %v6834_v33, %s9073_s19  ;;  %6876 = vrot.lane.b32.xlu1 %v6834_v33, %s9072_s18 }
0x1271   : > { %7008 = vrot.lane.b32.xlu0 %v6834_v33, %s9077_s27  ;;  %6920 = vrot.lane.b32.xlu1 %v6834_v33, %s9076_s15 }
0x1275   : > { %7030 = vrot.lane.b32.xlu0 %v6834_v33, %s9070_s17  ;;  %6986 = vrot.lane.b32.xlu1 %v6834_v33, %s9075_s24 }
0x1279   : > { %6878 = vrot.lane.b32.xlu0 %v6835_v39, %s9072_s18  ;;  %7081 = vrot.lane.b32.xlu1 %v6834_v33, %s9078_s22 }
0x127d   : > { %6922 = vrot.lane.b32.xlu0 %v6835_v39, %s9076_s15  ;;  %6900 = vrot.lane.b32.xlu1 %v6835_v39, %s9074_s21 }
0x1281   : > { %6988 = vrot.lane.b32.xlu0 %v6835_v39, %s9075_s24  ;;  %6942 = vrot.lane.b32.xlu1 %v6835_v39, %s9071_s28 }
0x1285   : > { %7083 = vrot.lane.b32.xlu0 %v6835_v39, %s9078_s22  ;;  %6966 = vrot.lane.b32.xlu1 %v6835_v39, %s9073_s19 }
0x1289   : > { %6906 = vrot.lane.b32.xlu0 %v6837_v23, %s9074_s21  ;;  %7010 = vrot.lane.b32.xlu1 %v6835_v39, %s9077_s27 }
0x128d   : > { %6994 = vrot.lane.b32.xlu0 %v6837_v23, %s9075_s24  ;;  %7032 = vrot.lane.b32.xlu1 %v6835_v39, %s9070_s17  ;;  %v8765_v39 = vunpack.i.l.bf16 %v8764_v60 }
0x1291   : > { %7089 = vrot.lane.b32.xlu0 %v6837_v23, %s9078_s22  ;;  %6884 = vrot.lane.b32.xlu1 %v6837_v23, %s9072_s18 }
0x1295   : > { %6886 = vrot.lane.b32.xlu0 %v6838_v50, %s9072_s18  ;;  %6928 = vrot.lane.b32.xlu1 %v6837_v23, %s9076_s15 }
0x1299   : > { %6930 = vrot.lane.b32.xlu0 %v6838_v50, %s9076_s15  ;;  %6946 = vrot.lane.b32.xlu1 %v6837_v23, %s9071_s28 }
0x129d   : > { %6948 = vrot.lane.b32.xlu0 %v6838_v50, %s9071_s28  ;;  %6972 = vrot.lane.b32.xlu1 %v6837_v23, %s9073_s19  ;;  %s14235_s28 = sand.u32 1, %s9055_s26  }
0x129e   : > { %s8369_s18 = smul.u32 48, %s14235_s28  ;;  %s7527_s20 = scalar_lea.sflag [#allocation7], %s14235_s28 }
0x12a1   : > { %6974 = vrot.lane.b32.xlu0 %v6838_v50, %s9073_s19  ;;  %7016 = vrot.lane.b32.xlu1 %v6837_v23, %s9077_s27  ;;  %s479_s19 = scalar_lea.vmem [#allocation11], %s8369_s18 }
0x12a2   : > { %s7545_s15 = sshll.u32 %s479_s19, 4  ;;  %s14260_s15 = int_to_ptr.vmem [resolvable:$true] %s7545_s15 }
0x12a3   : > { %s8961_s14 = scalar_lea.vmem %s14260_s15, 768  ;;  %p8968_p13 = scmp.lt.s32.totalorder %s14260_s15, %s8966_s30 }
0x12a4   : > { %p8962_p12 = scmp.ne.s32.totalorder %s14260_s15, %s8961_s14  ;;  %p8969_p1 = scmp.lt.s32.totalorder %s8967_s12, %s8961_s14 }
0x12a5   : > { %7018 = vrot.lane.b32.xlu0 %v6838_v50, %s9077_s27  ;;  %7038 = vrot.lane.b32.xlu1 %v6837_v23, %s9070_s17 }
0x12a6   : > { %p8970_p6 = por %p8969_p1, %p8968_p13 }
0x12a9   : > { %7040 = vrot.lane.b32.xlu0 %v6838_v50, %s9070_s17  ;;  %6908 = vrot.lane.b32.xlu1 %v6838_v50, %s9074_s21  ;;  %s14612_s21 = sld [smem:[#allocation23_spill]] }
0x12ad   : > { %6996 = vrot.lane.b32.xlu1 %v6838_v50, %s9075_s24  ;;  %s8372_s24 = smul.u32 768, %s9177_s29 }
0x12af   : > { %p14614_p7 = scmp.ne.s32.totalorder %s14612_s21, 0 }
0x12b1   : > { %7091 = vrot.lane.b32.xlu1 %v6838_v50, %s9078_s22  ;;  %p8963_p8 = pnand %p8962_p12, %p14614_p7 }
0x12b3   : > { %p8964_p11 = pneg %p8963_p8 }
0x12b5   : > { %p8971_p9 = pnand %p8970_p6, %p8964_p11 }
0x12b7   : > { %v13871_v43 = vpop.permute.xlu0 %6910  ;;  %v13873_v59 = vpop.permute.xlu1 %6888 }
0x12bb   : > { %v13875_v8 = vpop.permute.xlu0 %6998  ;;  %v13877_v41 = vpop.permute.xlu1 %6932 }
0x12bf   : > { %v13879_v20 = vpop.permute.xlu0 %6902  ;;  %v13881_v13 = vpop.permute.xlu1 %6950 }
0x12c0   : > { %7157 = vrot.lane.b32.xlu1 %v13881_v13, %s9078_s22 }
0x12c3   : > { %v13885_v1 = vpop.permute.xlu0 %6944  ;;  %v13887_v28 = vpop.permute.xlu1 %6976 }
0x12c4   : > { %7149 = vrot.lane.b32.xlu0 %v13885_v1, %s9078_s22  ;;  %7109 = vrot.lane.b32.xlu1 %v13873_v59, %s9078_s22  ;;  %v6985_v42 = vsel %vm662_vm3, %v13887_v28, %v8766_v32 }
0x12c7   : > { %v13893_v54 = vpop.permute.xlu0 %6968  ;;  %v13895_v4 = vpop.permute.xlu1 %7020 }
0x12c8   : > { %7173 = vrot.lane.b32.xlu1 %v6985_v42, %s9078_s22  ;;  %v6982_v31 = vsel %vm662_vm3, %v13893_v54, %v8765_v39 }
0x12cb   : > { %v13900_v14 = vpop.permute.xlu0 %7012  ;;  %v13902_v48 = vpop.permute.xlu1 %7042 }
0x12cf   : > { %v13904_v33 = vpop.permute.xlu0 %7034  ;;  %v13906_v36 = vpop.permute.xlu1 %7093 }
0x12d3   : > { %v13908_v53 = vpop.permute.xlu0 %7085  ;;  %v6881_v44 = vpop.permute.xlu1 %6880 }
0x12d4   : > { %7101 = vrot.lane.b32.xlu0 %v6881_v44, %s9078_s22 }
0x12d7   : > { %v6899_v45 = vpop.permute.xlu0 %6898  ;;  %v13911_v63 = vpop.permute.xlu1 %6924 }
0x12d8   : > { %7165 = vrot.lane.b32.xlu0 %v6982_v31, %s9078_s22  ;;  %v6912_v55 = vsel %vm589_vm4, %v8755_v2, %v6899_v45 }
0x12db   : > { %v6941_v19 = vpop.permute.xlu0 %6940  ;;  %v6991_v35 = vpop.permute.xlu1 %6990 }
0x12dc   : > { %7143 = vrot.lane.b32.xlu1 %v6941_v19, %s9078_s22  ;;  %v7004_v10 = vsel %vm685_vm5, %v6991_v35, %v8770_v18 }
0x12dd   : > { %7181 = vrot.lane.b32.xlu0 %v7004_v10, %s9078_s22 }
0x12df   : > { %v6965_v47 = vpop.permute.xlu0 %6964  ;;  %v6877_v17 = vpop.permute.xlu1 %6876 }
0x12e0   : > { %v6890_v52 = vsel %vm566_vm2, %v8750_v3, %v6877_v17 }
0x12e1   : > { %7095 = vrot.lane.b32.xlu1 %v6890_v52, %s9078_s22  ;;  %7159 = vrot.lane.b32.xlu0 %v6965_v47, %s9078_s22 }
0x12e3   : > { %v13925_v57 = vpop.permute.xlu0 %7008  ;;  %v6921_v58 = vpop.permute.xlu1 %6920 }
0x12e4   : > { %v6934_v6 = vsel %vm612_vm6, %v8760_v27, %v6921_v58 }
0x12e5   : > { %7111 = vrot.lane.b32.xlu1 %v6912_v55, %s9078_s22 }
0x12e7   : > { %v13930_v61 = vpop.permute.xlu0 %7030  ;;  %v6987_v37 = vpop.permute.xlu1 %6986 }
0x12e8   : > { %7175 = vrot.lane.b32.xlu0 %v6987_v37, %s9078_s22 }
0x12e9   : > { %7127 = vrot.lane.b32.xlu1 %v6934_v6, %s9078_s22 }
0x12eb   : > { %v6879_v25 = vpop.permute.xlu0 %6878  ;;  %v7082_v23 = vpop.permute.xlu1 %7081 }
0x12ec   : > { %v6891_v50 = vsel %vm566_vm2, %v6877_v17, %v6879_v25  ;;  %v6892_v60 = vsel %vm566_vm2, %v6879_v25, %v6881_v44 }
0x12ed   : > { %7097 = vrot.lane.b32.xlu0 %v6891_v50, %s9078_s22  ;;  %7099 = vrot.lane.b32.xlu1 %v6892_v60, %s9078_s22 }
0x12ef   : > { %v6923_v32 = vpop.permute.xlu0 %6922  ;;  %v6901_v42 = vpop.permute.xlu1 %6900 }
0x12f0   : > { %v6913_v39 = vsel %vm589_vm4, %v6899_v45, %v6901_v42  ;;  %v6914_v31 = vsel %vm589_vm4, %v6901_v42, %v13879_v20  ;;  %v6935_v3 = vsel %vm612_vm6, %v6921_v58, %v6923_v32  ;;  %v6936_v44 = vsel %vm612_vm6, %v6923_v32, %v13911_v63 }
0x12f1   : > { %7115 = vrot.lane.b32.xlu0 %v6914_v31, %s9078_s22  ;;  %7113 = vrot.lane.b32.xlu1 %v6913_v39, %s9078_s22  ;;  %v8775_v45 = vunpack.i.l.bf16 %v13861_v24  ;;  %v8751_v42 = vunpack.i.h.bf16 %v13847_v38  ;;  %v8756_v39 = vunpack.i.h.bf16 %v13857_v62 }
0x12f3   : > { %v6989_v18 = vpop.permute.xlu0 %6988  ;;  %v6943_v10 = vpop.permute.xlu1 %6942  ;;  %v7223_v27 = vsel %vm1006_vm8, %v8775_v45, %v7082_v23 }
0x12f4   : > { %v6953_v2 = vsel %vm631_vm1, %v6943_v10, %v13885_v1  ;;  %v6952_v58 = vsel %vm631_vm1, %v6941_v19, %v6943_v10  ;;  %v7003_v60 = vsel %vm685_vm5, %v6989_v18, %v6991_v35 }
0x12f5   : > { %7131 = vrot.lane.b32.xlu0 %v6936_v44, %s9078_s22  ;;  %7129 = vrot.lane.b32.xlu1 %v6935_v3, %s9078_s22 }
0x12f7   : > { %v13950_v17 = vpop.permute.xlu0 %7083  ;;  %v6967_v52 = vpop.permute.xlu1 %6966 }
0x12f8   : > { %v7224_v55 = vsel %vm1006_vm8, %v7082_v23, %v13950_v17  ;;  %v6981_v50 = vsel %vm662_vm3, %v6967_v52, %v13893_v54  ;;  %v6980_v1 = vsel %vm662_vm3, %v6965_v47, %v6967_v52  ;;  %v7002_v23 = vsel %vm685_vm5, %v6987_v37, %v6989_v18 }
0x12f9   : > { %7334 = vmatprep.subr.bf16.mxu0 %v7224_v55  ;;  %7147 = vrot.lane.b32.xlu0 %v6953_v2, %s9078_s22  ;;  %v8761_v37 = vunpack.i.h.bf16 %v13851_v21 }
0x12fa   : > { %7145 = vrot.lane.b32.xlu1 %v6952_v58, %s9078_s22  ;;  %7335 = vmatpush1.bf16.msra.mxu0 %v7223_v27 }
0x12fb   : > { %v6907_v6 = vpop.permute.xlu0 %6906  ;;  %v7011_v25 = vpop.permute.xlu1 %7010 }
0x12fc   : > { %v6915_v35 = vsel %vm589_vm4, %v8756_v39, %v6907_v6  ;;  %v7024_v27 = vsel %vm708_vm7, %v13925_v57, %v7011_v25 }
0x12fd   : > { %7163 = vrot.lane.b32.xlu0 %v6981_v50, %s9078_s22 }
0x12fe   : > { %7161 = vrot.lane.b32.xlu1 %v6980_v1, %s9078_s22 }
0x12ff   : > { %v13965_v19 = vpop.permute.xlu1 %7032  ;;  %v13969_v32 = vpop.permute.xlu0 %6994 }
0x1301   : > { %7179 = vrot.lane.b32.xlu0 %v7003_v60, %s9078_s22 }
0x1302   : > { %7177 = vrot.lane.b32.xlu1 %v7002_v23, %s9078_s22 }
0x1303   : > { %v6885_v54 = vpop.permute.xlu1 %6884  ;;  %v7090_v31 = vpop.permute.xlu0 %7089 }
0x1304   : > { %v6893_v47 = vsel %vm566_vm2, %v8751_v42, %v6885_v54 }
0x1305   : > { %7103 = vrot.lane.b32.xlu0 %v6893_v47, %s9078_s22 }
0x1307   : > { %v6929_v10 = vpop.permute.xlu1 %6928  ;;  %v6887_v3 = vpop.permute.xlu0 %6886 }
0x1308   : > { %v6937_v38 = vsel %vm612_vm6, %v8761_v37, %v6929_v10  ;;  %v6895_v62 = vsel %vm566_vm2, %v6887_v3, %v13873_v59  ;;  %v6894_v45 = vsel %vm566_vm2, %v6885_v54, %v6887_v3 }
0x1309   : > { %7119 = vrot.lane.b32.xlu0 %v6915_v35, %s9078_s22 }
0x130b   : > { %v6947_v18 = vpop.permute.xlu1 %6946  ;;  %v6931_v50 = vpop.permute.xlu0 %6930 }
0x130c   : > { %7151 = vrot.lane.b32.xlu1 %v6947_v18, %s9078_s22  ;;  %v6938_v60 = vsel %vm612_vm6, %v6929_v10, %v6931_v50  ;;  %v6939_v54 = vsel %vm612_vm6, %v6931_v50, %v13877_v41  ;;  %v8780_v10 = vunpack.i.l.bf16 %v13869_v12 }
0x130d   : > { %7135 = vrot.lane.b32.xlu0 %v6937_v38, %s9078_s22 }
0x130f   : > { %v6973_v44 = vpop.permute.xlu1 %6972 }
0x1310   : > { %7167 = vrot.lane.b32.xlu1 %v6973_v44, %s9078_s22 }
0x1311   : > { %7107 = vrot.lane.b32.xlu0 %v6895_v62, %s9078_s22 }
0x1313   : > { %v7017_v52 = vpop.permute.xlu1 %7016 }
0x1314   : > { %7105 = vrot.lane.b32.xlu1 %v6894_v45, %s9078_s22  ;;  %v7046_v45 = vsel %vm731_vm0, %v13930_v61, %v13965_v19 }
0x1315   : > { %7117 = vrot.lane.b32.xlu0 %v13879_v20, %s9078_s22  ;;  %v7025_v20 = vsel %vm708_vm7, %v7011_v25, %v13900_v14  ;;  %v6949_v25 = vpop.permute.xlu0 %6948 }
0x1316   : > { %v6954_v39 = vsel %vm631_vm1, %v6947_v18, %v6949_v25 }
0x1317   : > { %v13991_v21 = vpop.permute.xlu1 %7038 }
0x1318   : > { %7183 = vrot.lane.b32.xlu1 %v13969_v32, %s9078_s22 }
0x131b   : > { %v6909_v2 = vpop.permute.xlu1 %6908 }
0x131c   : > { %v6916_v59 = vsel %vm589_vm4, %v6907_v6, %v6909_v2  ;;  %v6917_v55 = vsel %vm589_vm4, %v6909_v2, %v13871_v43  ;;  %v8776_v6 = vunpack.i.h.bf16 %v13861_v24  ;;  %v8771_v24 = vunpack.i.h.bf16 %v13863_v46 }
0x131d   : > { %7121 = vrot.lane.b32.xlu0 %v6916_v59, %s9078_s22  ;;  %7123 = vrot.lane.b32.xlu1 %v6917_v55, %s9078_s22  ;;  %v7026_v46 = vsel %vm708_vm7, %v13900_v14, %v8780_v10  ;;  %v8875_v14 = vld [vmem:[%s14352_s10 + $0x4] ss:$12 sps:$4 sm:$0xff]  }
0x131e   : > { %v7226_v42 = vsel %vm1006_vm8, %v8776_v6, %v7090_v31  ;;  %v7007_v47 = vsel %vm685_vm5, %v13875_v8, %v8771_v24  ;;  %7452 = vmatprep.mubr.bf16.mxu1 %v8875_v14  ;;  %7366 = vmatprep.mubr.bf16.mxu0 %v8875_v14  ;;  %v3993_v6 = vld [vmem:[%s14349_s7 + $0x8] sm:$0xff] }
0x131f   : > { %v6997_v58 = vpop.permute.xlu1 %6996 }
0x1321   : > { %7195 = vrot.lane.b32.xlu0 %v7025_v20, %s9078_s22  ;;  %7193 = vrot.lane.b32.xlu1 %v7024_v27, %s9078_s22  ;;  %v8786_v20 = vunpack.i.h.bf16 %v13867_v26 }
0x1323   : > { %v14007_v1 = vpop.permute.xlu1 %7091 }
0x1324   : > { %v7227_v23 = vsel %vm1006_vm8, %v7090_v31, %v14007_v1  ;;  %v6955_v31 = vsel %vm631_vm1, %v6949_v25, %v13881_v13 }
0x1325   : > { %7336 = vmatprep.subr.bf16.mxu0 %v7227_v23  ;;  %7137 = vrot.lane.b32.xlu0 %v6938_v60, %s9078_s22 }
0x1326   : > { %7139 = vrot.lane.b32.xlu1 %v6939_v54, %s9078_s22  ;;  %7337 = vmatpush1.bf16.msra.mxu0 %v7226_v42  ;;  %v7053_v54 = vld [vmem:[%s14353_s11 + $0x8] sm:$0xff] }
0x1329   : > { %7191 = vrot.lane.b32.xlu0 %v13925_v57, %s9078_s22  ;;  %v6975_v57 = vpop.permute.xlu0 %6974 }
0x132a   : > { %7189 = vrot.lane.b32.xlu1 %v7007_v47, %s9078_s22  ;;  %v6983_v35 = vsel %vm662_vm3, %v6973_v44, %v6975_v57  ;;  %v6984_v13 = vsel %vm662_vm3, %v6975_v57, %v13887_v28  ;;  %v7006_v28 = vsel %vm685_vm5, %v6997_v58, %v13875_v8  ;;  %v7052_v47 = vld [vmem:[%s14353_s11] sm:$0xff] }
0x132d   : > { %7153 = vrot.lane.b32.xlu0 %v6954_v39, %s9078_s22  ;;  %v7019_v37 = vpop.permute.xlu0 %7018 }
0x132e   : > { %7155 = vrot.lane.b32.xlu1 %v6955_v31, %s9078_s22  ;;  %v7027_v8 = vsel %vm708_vm7, %v7017_v52, %v7019_v37  ;;  %v7028_v62 = vsel %vm708_vm7, %v7019_v37, %v13895_v4 }
0x1331   : > { %7197 = vrot.lane.b32.xlu0 %v7026_v46, %s9078_s22  ;;  %v7041_v18 = vpop.permute.xlu0 %7040 }
0x1332   : > { %7125 = vrot.lane.b32.xlu1 %v13871_v43, %s9078_s22  ;;  %v7005_v43 = vsel %vm685_vm5, %v13969_v32, %v6997_v58  ;;  %v14050_v38 = vpop.permute.xlu1 %7157  ;;  %v7049_v27 = vsel %vm731_vm0, %v13991_v21, %v7041_v18 }
0x1335   : > { %7169 = vrot.lane.b32.xlu0 %v6983_v35, %s9078_s22 }
0x1336   : > { %7171 = vrot.lane.b32.xlu1 %v6984_v13, %s9078_s22  ;;  %v7150_v3 = vpop.permute.xlu0 %7149  ;;  %v14060_v44 = vpop.permute.xlu1 %7109 }
0x1339   : > { %7133 = vrot.lane.b32.xlu0 %v13911_v63, %s9078_s22  ;;  %v8781_v63 = vunpack.i.h.bf16 %v13869_v12 }
0x133a   : > { %7199 = vrot.lane.b32.xlu1 %v7017_v52, %s9078_s22  ;;  %v8785_v52 = vunpack.i.l.bf16 %v13867_v26  ;;  %v14074_v2 = vpop.permute.xlu1 %7173  ;;  %v3992_v26 = vld [vmem:[%s14349_s7] sm:$0xff] }
0x133b   : > { %v7029_v32 = vsel %vm708_vm7, %v13895_v4, %v8781_v63 }
0x133c   : > { %v7048_v59 = vsel %vm731_vm0, %v13904_v33, %v8785_v52 }
0x133d   : > { %7185 = vrot.lane.b32.xlu0 %v7005_v43, %s9078_s22  ;;  %v7225_v43 = vsel %vm1006_vm8, %v13950_v17, %v13908_v53 }
0x133e   : > { %7187 = vrot.lane.b32.xlu1 %v7006_v28, %s9078_s22 }
0x1341   : > { %7141 = vrot.lane.b32.xlu0 %v13877_v41, %s9078_s22  ;;  %v7047_v41 = vsel %vm731_vm0, %v13965_v19, %v13904_v33  ;;  %v7050_v19 = vsel %vm731_vm0, %v7041_v18, %v13902_v48 }
0x1342   : > { %7205 = vrot.lane.b32.xlu1 %v7029_v32, %s9078_s22 }
0x1345   : > { %7201 = vrot.lane.b32.xlu0 %v7027_v8, %s9078_s22 }
0x1346   : > { %7203 = vrot.lane.b32.xlu1 %v7028_v62, %s9078_s22  ;;  %v7102_v12 = vpop.permute.xlu0 %7101 }
0x1349   : > { %7211 = vrot.lane.b32.xlu0 %v7047_v41, %s9078_s22 }
0x134a   : > { %7209 = vrot.lane.b32.xlu1 %v7046_v45, %s9078_s22  ;;  %v14077_v4 = vpop.permute.xlu0 %7165 }
0x134d   : > { %7213 = vrot.lane.b32.xlu0 %v7048_v59, %s9078_s22 }
0x134e   : > { %7207 = vrot.lane.b32.xlu1 %v13930_v61, %s9078_s22  ;;  %v14084_v55 = vpop.permute.xlu1 %7143  ;;  %v7051_v61 = vsel %vm731_vm0, %v13902_v48, %v8786_v20  ;;  %v3995_v48 = vld [vmem:[%s14349_s7 + $0x18] sm:$0xff] }
0x134f   : > { %v14088_v58 = vpop.permute.xlu0 %7181 }
0x1351   : > { %7219 = vrot.lane.b32.xlu0 %v7050_v19, %s9078_s22 }
0x1352   : > { %7217 = vrot.lane.b32.xlu1 %v7049_v27, %s9078_s22 }
0x1353   : > { %v7096_v33 = vpop.permute.xlu1 %7095  ;;  %v14098_v50 = vpop.permute.xlu0 %7159 }
0x1355   : > { %7221 = vrot.lane.b32.xlu0 %v7051_v61, %s9078_s22 }
0x1356   : > { %7215 = vrot.lane.b32.xlu1 %v13991_v21, %s9078_s22  ;;  %v3994_v21 = vld [vmem:[%s14349_s7 + $0x10] sm:$0xff]  ;;  %s14613_s22 = sld [smem:[#allocation72_spill]] }
0x1357   : > { %v7112_v60 = vpop.permute.xlu1 %7111 }
0x1359   : > { %4003 = vperm.xlu0 %8465, %v3993_v6  }
0x135a   : > { %3998 = vperm.xlu1 %8466, %v3992_v26   ;;  %v14108_v23 = vpop.permute.xlu0 %7175 }
0x135b   : > { %v7128_v42 = vpop.permute.xlu1 %7127 }
0x135c   : > { %s14258_s16 = scalar_lea.hbm %s14613_s22, %s8372_s24 }
0x135d   : > { %4013 = vperm.xlu0 %8465, %v3995_v48  }
0x135e   : > { %4008 = vperm.xlu1 %8466, %v3994_v21  }
0x135f   : > { %v7098_v24 = vpop.permute.xlu0 %7097  ;;  %v7100_v25 = vpop.permute.xlu1 %7099 }
0x1360   : > { %v7229_v39 = vsel %vm1006_vm8, %v7096_v33, %v7098_v24  ;;  %v14124_v31 = vsel %vm1006_vm8, %v7100_v25, %v7102_v12  ;;  %v7230_v10 = vsel %vm1006_vm8, %v7098_v24, %v7100_v25 }
0x1361   : > { %7061 = vperm.xlu0 %8465, %v7053_v54   ;;  %7338 = vmatprep.subr.bf16.mxu0 %v7230_v10 }
0x1362   : > { %7056 = vperm.xlu1 %8466, %v7052_v47   ;;  %7339 = vmatpush1.bf16.msra.mxu0 %v7229_v39 }
0x1363   : > { %v14127_v46 = vpop.permute.xlu0 %7115  ;;  %v7114_v57 = vpop.permute.xlu1 %7113 }
0x1364   : > { %v7236_v17 = vsel %vm1006_vm8, %v7114_v57, %v14127_v46  ;;  %v7235_v33 = vsel %vm1006_vm8, %v7112_v60, %v7114_v57 }
0x1367   : > { %v14129_v35 = vpop.permute.xlu0 %7131  ;;  %v7130_v13 = vpop.permute.xlu1 %7129 }
0x1368   : > { %v7242_v21 = vsel %vm1006_vm8, %v7130_v13, %v14129_v35  ;;  %v7241_v60 = vsel %vm1006_vm8, %v7128_v42, %v7130_v13 }
0x136b   : > { %v7148_v37 = vpop.permute.xlu0 %7147 }
0x136c   : > { %v7249_v14 = vsel %vm1006_vm8, %v7148_v37, %v7150_v3  ;;  %v7146_v28 = vpop.permute.xlu1 %7145 }
0x136d   : > { %8116 = vmatprep.subr.bf16.mxu1 %v7249_v14  ;;  %v7248_v14 = vsel %vm1006_vm8, %v7146_v28, %v7148_v37 }
0x136e   : > { %8117 = vmatpush3.bf16.msra.mxu1 %v7225_v43 }
0x136f   : > { %v7164_v18 = vpop.permute.xlu0 %7163 }
0x1370   : > { %v7162_v32 = vpop.permute.xlu1 %7161 }
0x1373   : > { %v14135_v63 = vpop.permute.xlu0 %7179 }
0x1374   : > { %v14137_v62 = vpop.permute.xlu1 %7177 }
0x1377   : > { %v7104_v8 = vpop.permute.xlu0 %7103 }
0x137b   : > { %v7120_v12 = vpop.permute.xlu0 %7119 }
0x137e   : > { %v7152_v41 = vpop.permute.xlu1 %7151 }
0x137f   : > { %v7136_v45 = vpop.permute.xlu0 %7135 }
0x1382   : > { %v7168_v52 = vpop.permute.xlu1 %7167 }
0x1383   : > { %v7108_v59 = vpop.permute.xlu0 %7107 }
0x1386   : > { %v7106_v3 = vpop.permute.xlu1 %7105 }
0x1387   : > { %v7232_v19 = vsel %vm1006_vm8, %v7104_v8, %v7106_v3  ;;  %v7233_v53 = vsel %vm1006_vm8, %v7106_v3, %v7108_v59  ;;  %v14145_v20 = vpop.permute.xlu0 %7117  ;;  %v7247_v8 = vsel %vm1006_vm8, %v14084_v55, %v7146_v28  ;;  %v7254_v55 = vsel %vm1006_vm8, %v7162_v32, %v7164_v18 }
0x1388   : > { %7340 = vmatprep.subr.bf16.mxu0 %v7233_v53  ;;  %v7255_v28 = vsel %vm1006_vm8, %v7164_v18, %v14077_v4  ;;  %v7234_v4 = vsel %vm1006_vm8, %v7108_v59, %v14060_v44  ;;  %v7261_v18 = vsel %vm1006_vm8, %v14135_v63, %v14088_v58  ;;  %v7259_v44 = vsel %vm1006_vm8, %v14108_v23, %v14137_v62 }
0x1389   : > { %7341 = vmatpush1.bf16.msra.mxu0 %v7232_v19  ;;  %v7228_v19 = vsel %vm1006_vm8, %v14007_v1, %v13906_v36 }
0x138a   : > { %7342 = vmatprep.subr.bf16.mxu0 %v7236_v17  ;;  %v14143_v27 = vpop.permute.xlu1 %7183 }
0x138d   : > { %7343 = vmatpush1.bf16.msra.mxu0 %v7235_v33 }
0x138f   : > { %v7122_v61 = vpop.permute.xlu0 %7121  ;;  %v14148_v6 = vpop.permute.xlu1 %7123 }
0x1390   : > { %v7238_v26 = vsel %vm1006_vm8, %v7120_v12, %v7122_v61  ;;  %v7239_v48 = vsel %vm1006_vm8, %v7122_v61, %v14148_v6 }
0x1391   : > { %7344 = vmatprep.subr.bf16.mxu0 %v7239_v48 }
0x1392   : > { %7345 = vmatpush1.bf16.msra.mxu0 %v7238_v26 }
0x1393   : > { %v14155_v54 = vpop.permute.xlu0 %7195  ;;  %7346 = vmatprep.subr.bf16.mxu0 %v7242_v21  ;;  %v14157_v24 = vpop.permute.xlu1 %7193 }
0x1396   : > { %7347 = vmatpush1.bf16.msra.mxu0 %v7241_v60 }
0x1397   : > { %v7138_v25 = vpop.permute.xlu0 %7137 }
0x1398   : > { %v7244_v47 = vsel %vm1006_vm8, %v7136_v45, %v7138_v25  ;;  %v14161_v39 = vpop.permute.xlu1 %7139 }
0x1399   : > { %v7245_v10 = vsel %vm1006_vm8, %v7138_v25, %v14161_v39 }
0x139a   : > { %7348 = vmatprep.subr.bf16.mxu0 %v7245_v10 }
0x139b   : > { %7349 = vmatpush1.bf16.msra.mxu0 %v7244_v47  ;;  %v7192_v57 = vpop.permute.xlu0 %7191 }
0x139c   : > { %7350 = vmatprep.subr.bf16.mxu0 %v7248_v14  ;;  %v7190_v43 = vpop.permute.xlu1 %7189 }
0x139f   : > { %7351 = vmatpush1.bf16.msra.mxu0 %v7247_v8  ;;  %v7154_v42 = vpop.permute.xlu0 %7153 }
0x13a0   : > { %v7250_v13 = vsel %vm1006_vm8, %v7152_v41, %v7154_v42  ;;  %v7156_v12 = vpop.permute.xlu1 %7155 }
0x13a1   : > { %v7251_v45 = vsel %vm1006_vm8, %v7154_v42, %v7156_v12  ;;  %v7252_v3 = vsel %vm1006_vm8, %v7156_v12, %v14050_v38  ;;  %v7253_v38 = vsel %vm1006_vm8, %v14098_v50, %v7162_v32 }
0x13a2   : > { %7352 = vmatprep.subr.bf16.mxu0 %v7251_v45  ;;  %8118 = vmatprep.subr.bf16.mxu1 %v7252_v3 }
0x13a3   : > { %7353 = vmatpush1.bf16.msra.mxu0 %v7250_v13  ;;  %8119 = vmatpush3.bf16.msra.mxu1 %v7228_v19  ;;  %v7198_v37 = vpop.permute.xlu0 %7197 }
0x13a4   : > { %7354 = vmatprep.subr.bf16.mxu0 %v7254_v55  ;;  %8120 = vmatprep.subr.bf16.mxu1 %v7255_v28  ;;  %v7126_v41 = vpop.permute.xlu1 %7125  ;;  %v8876_v55 = vld [vmem:[%s14352_s10 + $0x8] ss:$12 sps:$4 sm:$0xff]  }
0x13a5   : > { %v7240_v26 = vsel %vm1006_vm8, %v14148_v6, %v7126_v41 }
0x13a7   : > { %7355 = vmatpush1.bf16.msra.mxu0 %v7253_v38  ;;  %8121 = vmatpush3.bf16.msra.mxu1 %v14124_v31  ;;  %v7170_v36 = vpop.permute.xlu0 %7169  ;;  %v7260_v31 = vsel %vm1006_vm8, %v14137_v62, %v14135_v63  ;;  %v7267_v62 = vsel %vm1006_vm8, %v14155_v54, %v7198_v37 }
0x13a8   : > { %v7256_v1 = vsel %vm1006_vm8, %v7168_v52, %v7170_v36  ;;  %v7172_v53 = vpop.permute.xlu1 %7171 }
0x13a9   : > { %v7257_v17 = vsel %vm1006_vm8, %v7170_v36, %v7172_v53  ;;  %v7258_v33 = vsel %vm1006_vm8, %v7172_v53, %v14074_v2  ;;  %v7237_v2 = vsel %vm1006_vm8, %v14127_v46, %v14145_v20  ;;  %v7266_v46 = vsel %vm1006_vm8, %v14157_v24, %v14155_v54 }
0x13aa   : > { %7356 = vmatprep.subr.bf16.mxu0 %v7257_v17  ;;  %8122 = vmatprep.subr.bf16.mxu1 %v7258_v33  ;;  %v7265_v20 = vsel %vm1006_vm8, %v7192_v57, %v14157_v24  ;;  %v8873_v24 = vld [vmem:[%s14352_s10] ss:$12 sps:$4 sm:$0xff]   ;;  %v9080_v57 = vmov 0.0  }
0x13ab   : > { %7357 = vmatpush1.bf16.msra.mxu0 %v7256_v1  ;;  %8123 = vmatpush3.bf16.msra.mxu1 %v7234_v4  ;;  %v7134_v50 = vpop.permute.xlu0 %7133 }
0x13ac   : > { %7358 = vmatprep.subr.bf16.mxu0 %v7260_v31  ;;  %8124 = vmatprep.subr.bf16.mxu1 %v7261_v18  ;;  %v7200_v32 = vpop.permute.xlu1 %7199  ;;  %v7243_v6 = vsel %vm1006_vm8, %v14129_v35, %v7134_v50 }
0x13af   : > { %7359 = vmatpush1.bf16.msra.mxu0 %v7259_v44  ;;  %8125 = vmatpush3.bf16.msra.mxu1 %v7237_v2  ;;  %v7186_v52 = vpop.permute.xlu0 %7185  ;;  %v14610_v2 = vld [vmem:[#allocation33_spill] sm:$0xff] }
0x13b0   : > { %v7262_v59 = vsel %vm1006_vm8, %v14143_v27, %v7186_v52  ;;  %v7188_v61 = vpop.permute.xlu1 %7187 }
0x13b1   : > { %v7263_v58 = vsel %vm1006_vm8, %v7186_v52, %v7188_v61  ;;  %v7264_v63 = vsel %vm1006_vm8, %v7188_v61, %v7190_v43 }
0x13b2   : > { %7360 = vmatprep.subr.bf16.mxu0 %v7263_v58  ;;  %8126 = vmatprep.subr.bf16.mxu1 %v7264_v63 }
0x13b3   : > { %7361 = vmatpush1.bf16.msra.mxu0 %v7262_v59  ;;  %8127 = vmatpush3.bf16.msra.mxu1 %v7240_v26  ;;  %v7142_v23 = vpop.permute.xlu0 %7141 }
0x13b4   : > { %7362 = vmatprep.subr.bf16.mxu0 %v7266_v46  ;;  %8128 = vmatprep.subr.bf16.mxu1 %v7267_v62  ;;  %v7206_v27 = vpop.permute.xlu1 %7205  ;;  %v7246_v54 = vsel %vm1006_vm8, %v14161_v39, %v7142_v23 }
0x13b7   : > { %7363 = vmatpush1.bf16.msra.mxu0 %v7265_v20  ;;  %8129 = vmatpush3.bf16.msra.mxu1 %v7243_v6  ;;  %v7202_v48 = vpop.permute.xlu0 %7201 }
0x13b8   : > { %v7268_v21 = vsel %vm1006_vm8, %v7200_v32, %v7202_v48  ;;  %v7204_v60 = vpop.permute.xlu1 %7203 }
0x13b9   : > { %v7269_v25 = vsel %vm1006_vm8, %v7202_v48, %v7204_v60  ;;  %v7270_v47 = vsel %vm1006_vm8, %v7204_v60, %v7206_v27 }
0x13ba   : > { %7364 = vmatprep.subr.bf16.mxu0 %v7269_v25  ;;  %8130 = vmatprep.subr.bf16.mxu1 %v7270_v47 }
0x13bb   : > { %7365 = vmatpush1.bf16.msra.mxu0 %v7268_v21  ;;  %8131 = vmatpush3.bf16.msra.mxu1 %v7246_v54  ;;  %v7212_v35 = vpop.permute.xlu0 %7211 }
0x13bc   : > { %v7210_v10 = vpop.permute.xlu1 %7209  ;;  %8209 = vmatprep.subr.bf16.mxu1 %v9080_v57 }
0x13bd   : > { %v7272_v14 = vsel %vm1006_vm8, %v7210_v10, %v7212_v35 }
0x13be   : > { %7377 = vmatprep.subr.bf16.mxu0 %v7272_v14  ;;  %7453 = vmatmul.mubr.bf16.vlgmr.msra.gmra.mrb[108].mxu1 %v8873_v24 }
0x13bf   : > { %v7214_v43 = vpop.permute.xlu0 %7213  ;;  %7367 = vmatmul.mubr.bf16.vlgmr.msra.gmra.mrb[88].mxu0 %v8873_v24  ;;  %8213 = vmatprep.mubr.msk.bf16.mxu1 %vm9081_vm10, %v9080_v57 }
0x13c0   : > { %v7273_v39 = vsel %vm1006_vm8, %v7212_v35, %v7214_v43  ;;  %v7208_v8 = vpop.permute.xlu1 %7207  ;;  %7409 = vmatprep.mubr.bf16.mxu0 %v14604_v22 }
0x13c1   : > { %v7271_v42 = vsel %vm1006_vm8, %v7208_v8, %v7210_v10  ;;  %8210 = vmatpush3.bf16.msra.mxu1 %v7273_v39 }
0x13c2   : > { %7378 = vmatpush1.bf16.msra.mxu0 %v7271_v42  ;;  %8211 = vmatprep.subr.bf16.mxu1 %v9080_v57 }
0x13c3   : > { %v7220_v13 = vpop.permute.xlu0 %7219 }
0x13c4   : > { %v7218_v12 = vpop.permute.xlu1 %7217 }
0x13c5   : > { %v7275_v45 = vsel %vm1006_vm8, %v7218_v12, %v7220_v13 }
0x13c6   : > { %7379 = vmatprep.subr.bf16.mxu0 %v7275_v45 }
0x13c7   : > { %v7222_v3 = vpop.permute.xlu0 %7221 }
0x13c8   : > { %v7276_v19 = vsel %vm1006_vm8, %v7220_v13, %v7222_v3  ;;  %v7216_v37 = vpop.permute.xlu1 %7215 }
0x13c9   : > { %v7274_v22 = vsel %vm1006_vm8, %v7216_v37, %v7218_v12  ;;  %8212 = vmatpush3.bf16.msra.mxu1 %v7276_v19 }
0x13ca   : > { %7380 = vmatpush1.bf16.msra.mxu0 %v7274_v22 }
0x13cc   : > { %8214 = vmatmul.mubr.msk.bf16.vlgmr.msra.gmra.mrb[112].mxu1 %vm1115_vm9, %v8876_v55 }
0x13cd   : > { %7824 = vmatmul.mubr.msk.bf16.vlgmr.msra.gmra.mrb[88].mxu0 %vm1115_vm9, %v8876_v55 }
0x13d8   : > { %v4004_v28 = vpop.permute.xlu0 %4003 }
0x13d9   : > { %v8275_v41 = vadd.f32 %v12861_v0, %v4004_v28  ;;  %v8276_v38 = vadd.f32 %v12863_v16, %v4004_v28  ;;  %v4448_v36 = vadd.f32 %v12843_v34, %v4004_v28  ;;  %v3999_v1 = vpop.permute.xlu1 %3998 }
0x13da   : > { %v8273_v53 = vadd.f32 %v12857_v9, %v3999_v1  ;;  %v8274_v17 = vadd.f32 %v12859_v30, %v3999_v1  ;;  %v4445_v33 = vadd.f32 %v12841_v29, %v3999_v1 }
0x13db   : > { %v4497_v4 = vadd.f32 %v12855_v11, %v4448_v36  ;;  %v7836_v50 = vpack.c.bf16 %v8276_v38, %v8275_v41 }
0x13dc   : > { %v4494_v31 = vadd.f32 %v12851_v15, %v4445_v33  ;;  %v7834_v18 = vpack.c.bf16 %v8274_v17, %v8273_v53  ;;  %v4014_v32 = vpop.permute.xlu0 %4013 }
0x13dd   : > { %v7837_v44 = vpack.c.bf16 %v4497_v4, %v4497_v4  ;;  %4550 = vst [vmem:[%s479_s19 + $0xc] sm:$0xff] %v7836_v50  ;;  %v8279_v0 = vadd.f32 %v12869_v51, %v4014_v32  ;;  %v8280_v34 = vadd.f32 %v12871_v7, %v4014_v32  ;;  %v4456_v9 = vadd.f32 %v12847_v56, %v4014_v32  ;;  %v4009_v16 = vpop.permute.xlu1 %4008  ;;  %v14611_v51 = vld [vmem:[#allocation30_spill] sm:$0xff] }
0x13de   : > { %v7835_v30 = vpack.c.bf16 %v4494_v31, %v4494_v31  ;;  %4548 = vst [vmem:[%s479_s19] sm:$0xff] %v7834_v18  ;;  %v8277_v29 = vadd.f32 %v12865_v49, %v4009_v16  ;;  %v8278_v11 = vadd.f32 %v12867_v40, %v4009_v16  ;;  %v4453_v15 = vadd.f32 %v12845_v5, %v4009_v16 }
0x13df   : > { %4551 = vst [vmem:[%s479_s19 + $0x14] sm:$0xf] %v7837_v44  ;;  %v4505_v52 = vadd.f32 %v14610_v2, %v4456_v9  ;;  %v7840_v59 = vpack.c.bf16 %v8280_v34, %v8279_v0 }
0x13e0   : > { %4549 = vst [vmem:[%s479_s19 + $0x8] sm:$0xf] %v7835_v30  ;;  %v4502_v7 = vadd.f32 %v14611_v51, %v4453_v15  ;;  %v7838_v56 = vpack.c.bf16 %v8278_v11, %v8277_v29 }
0x13e1   : > { %v7841_v61 = vpack.c.bf16 %v4505_v52, %v4505_v52  ;;  %4554 = vst [vmem:[%s479_s19 + $0x24] sm:$0xff] %v7840_v59 }
0x13e2   : > { %v7839_v58 = vpack.c.bf16 %v4502_v7, %v4502_v7  ;;  %4552 = vst [vmem:[%s479_s19 + $0x18] sm:$0xff] %v7838_v56 }
0x13e3   : > { %4555 = vst [vmem:[%s479_s19 + $0x2c] sm:$0xf] %v7841_v61 }
0x13e4   : > { %4553 = vst [vmem:[%s479_s19 + $0x20] sm:$0xf] %v7839_v58 }
0x13e5   : > { %8974 = shalt.err (!%p8971_p9)
}
0x13e6   : > { %s8975_s25 = scalar_lea.hbm %s14258_s16, 768  ;;  %s8979_s19 = scalar_lea.hbm %s14613_s22, 1536 }
0x13e7   : > { %p8976_p2 = scmp.ne.s32.totalorder %s14258_s16, %s8975_s25  ;;  %p8980_p5 = scmp.lt.u32.totalorder %s14258_s16, %s14613_s22 }
0x13e8   : > { %p8981_p10 = scmp.lt.u32.totalorder %s8979_s19, %s8975_s25  ;;  %p8983_p12 = scmp.lt.u32.totalorder %s8975_s25, %s14258_s16 }
0x13e9   : > { %p8977_p0 = pnand %p8976_p2, %p14614_p7 }
0x13ea   : > { %p8982_p4 = por %p8981_p10, %p8980_p5 }
0x13eb   : > { %p8978_p3 = pneg %p8977_p0 }
0x13ec   : > { %p8984_p8 = por %p8983_p12, %p8982_p4 }
0x13ee   : > { %p8985_p11 = pnand %p8984_p8, %p8978_p3 }
0x13f0   : > { %8988 = shalt.err (!%p8985_p11)
}
0x13f1   : > { %s9083_s23 = smov 192   ;;  %s9084_s14 = smov 12   ;;  %v7057_v46 = vpop.permute.xlu1 %7056  ;;  %v7062_v27 = vpop.permute.xlu0 %7061 }
0x13f2   : > { %8386 = dma.vmem_to_hbm [thread:$0]  (%p14614_p7), %s14260_s15, 768, %s14258_s16, %s7527_s20, %s9083_s23, %s9083_s23, %s9084_s14  }
0x13f3   : > { %s8370_s13 = smul.u32 24, %s14235_s28  ;;  %s14615_s25 = sld [smem:[#allocation73_spill]] }
0x13f4   : > { %s8373_s20 = smul.u32 384, %s9177_s29  ;;  %s7532_s29 = scalar_lea.sflag [#allocation13], %s14235_s28 }
0x13f5   : > { %s486_s15 = scalar_lea.vmem [#allocation12], %s8370_s13  ;;  %s9085_s24 = smov [#allocation12]  }
0x13f6   : > { %s7561_s16 = sshll.u32 %s486_s15, 4  ;;  %s8993_s27 = sshll.u32 %s9085_s24, 4  ;;  %s14291_s16 = int_to_ptr.vmem [resolvable:$true] %s7561_s16  ;;  %s8994_s27 = int_to_ptr.vmem [resolvable:$false] %s8993_s27 }
0x13f7   : > { %s8989_s19 = scalar_lea.vmem %s14291_s16, 384  ;;  %s8995_s13 = scalar_lea.vmem %s8994_s27, 768 }
0x13f8   : > { %p8990_p13 = scmp.ne.s32.totalorder %s14291_s16, %s8989_s19  ;;  %p8996_p9 = scmp.lt.s32.totalorder %s14291_s16, %s8994_s27 }
0x13f9   : > { %s14616_s17 = smov %s14615_s25  ;;  %s14296_s18 = scalar_lea.hbm %s14615_s25, %s8373_s20 }
0x13fa   : > { %p8991_p1 = pnand %p8990_p13, %p14614_p7  ;;  %p8997_p2 = scmp.lt.s32.totalorder %s8995_s13, %s8989_s19 }
0x13fc   : > { %p8992_p6 = pneg %p8991_p1  ;;  %p8998_p0 = por %p8997_p2, %p8996_p9 }
0x13fe   : > { %p8999_p3 = pnand %p8998_p0, %p8992_p6 }
0x1491   : > { %v8132_v5 = vpop.f32.mrb[108].mxu1 }
0x1492   : > { %v8133_v49 = vpop.f32.mrb[109].mxu1 }
0x1493   : > { %v8134_v40 = vadd.f32 %v8133_v49, %v8132_v5  ;;  %v8135_v63 = vpop.f32.mrb[110].mxu1 }
0x1494   : > { %v8136_v26 = vpop.f32.mrb[111].mxu1 }
0x1495   : > { %v8137_v23 = vadd.f32 %v8136_v26, %v8135_v63  ;;  %v7455_v62 = vadd.f32 %v8134_v40, %v7057_v46 }
0x1497   : > { %v7458_v60 = vadd.f32 %v8137_v23, %v7062_v27 }
0x149f   : > { %v7495_v20 = vpop.f32.mrb[112].mxu1 }
0x14a0   : > { %v7411_v6 = vpop.f32.mrb[88].mxu0  ;;  %v7496_v48 = vadd.f32 %v7495_v20, %v7455_v62  ;;  %v8215_v21 = vpop.f32.mrb[113].mxu1 }
0x14a1   : > { %v8305_v25 = vadd.f32 %v7411_v6, %v7057_v46  ;;  %v7413_v47 = vpop.f32.mrb[89].mxu0  ;;  %v7498_v54 = vpop.f32.mrb[114].mxu1 }
0x14a2   : > { %v7843_v24 = vpack.c.bf16 %v7496_v48, %v7496_v48  ;;  %v8306_v35 = vadd.f32 %v7413_v47, %v7057_v46  ;;  %v7415_v10 = vpop.f32.mrb[90].mxu0  ;;  %v7499_v57 = vadd.f32 %v7498_v54, %v7458_v60  ;;  %v8216_v14 = vpop.f32.mrb[115].mxu1 }
0x14a3   : > { %v8307_v43 = vadd.f32 %v7415_v10, %v7062_v27  ;;  %v7417_v39 = vpop.f32.mrb[91].mxu0 }
0x14a4   : > { %7523 = vst [vmem:[%s486_s15 + $0x8] sm:$0xf] %v7843_v24  ;;  %v7842_v8 = vpack.c.bf16 %v8306_v35, %v8305_v25  ;;  %v7845_v42 = vpack.c.bf16 %v7499_v57, %v7499_v57  ;;  %v8308_v13 = vadd.f32 %v7417_v39, %v7062_v27 }
0x14a6   : > { %7522 = vst [vmem:[%s486_s15] sm:$0xff] %v7842_v8  ;;  %7525 = vst [vmem:[%s486_s15 + $0x14] sm:$0xf] %v7845_v42  ;;  %v7844_v12 = vpack.c.bf16 %v8308_v13, %v8307_v43 }
0x14a8   : > { %7524 = vst [vmem:[%s486_s15 + $0xc] sm:$0xff] %v7844_v12 }
0x14a9   : > { %9002 = shalt.err (!%p8999_p3)
}
0x14aa   : > { %s9003_s15 = scalar_lea.hbm %s14296_s18, 384  ;;  %s9007_s12 = scalar_lea.hbm %s14616_s17, 768 }
0x14ab   : > { %p9004_p5 = scmp.ne.s32.totalorder %s14296_s18, %s9003_s15  ;;  %p9008_p12 = scmp.lt.u32.totalorder %s14296_s18, %s14616_s17 }
0x14ac   : > { %p9009_p8 = scmp.lt.u32.totalorder %s9007_s12, %s9003_s15  ;;  %p9011_p13 = scmp.lt.u32.totalorder %s9003_s15, %s14296_s18 }
0x14ad   : > { %p9005_p10 = pnand %p9004_p5, %p14614_p7 }
0x14ae   : > { %p9010_p11 = por %p9009_p8, %p9008_p12 }
0x14af   : > { %p9006_p4 = pneg %p9005_p10 }
0x14b0   : > { %p9012_p1 = por %p9011_p13, %p9010_p11 }
0x14b2   : > { %p9013_p6 = pnand %p9012_p1, %p9006_p4 }
0x14b4   : > { %9016 = shalt.err (!%p9013_p6)
}
0x14b5   : > { %8387 = dma.vmem_to_hbm [thread:$0]  (%p14614_p7), %s14291_s16, 384, %s14296_s18, %s7532_s29, %s9083_s23, %s9083_s23, %s9084_s14  }
0x14b6 PF: > { %s14617_s19 = sld [smem:[#allocation20_spill]]  ;;  %s14618_s27 = sld [smem:[#allocation18_spill]] }
0x14b7   : > { %s14619_s13 = sld [smem:[#allocation24_spill]] }
0x14bc   : > { %p8413_p9 = scmp.ge.s32.totalorder %s14617_s19, 2  ;;  %s7576_s20 = sand.u32 1, %s14618_s27  }
0x14bd   : > { %p14620_p2 = scmp.ne.s32.totalorder %s14619_s13, 0  ;;  %s7577_s15 = scalar_lea.sflag [#allocation7], %s7576_s20 }
0x14bf   : > { %p8401_p0 = pnand %p8413_p9, %p14620_p2 }
0x14c1   : > { %9042 = dma.done.wait (!%p8401_p0), %s7577_s15, 768  }
0x14c2   : > { %9044 = vsyncadd (!%p8401_p0), %s7577_s15, 4294966528  ;;  %s7586_s21 = scalar_lea.sflag [#allocation13], %s7576_s20 }
0x14c3   : > { %9046 = dma.done.wait (!%p8401_p0), %s7586_s21, 384  }
0x14c4   : > { %9048 = vsyncadd (!%p8401_p0), %s7586_s21, 4294966912  ;;  %s14621_s28 = sld [smem:[#allocation21_spill]]  ;;  %s14622_s30 = sld [smem:[#allocation19_spill]] }
0x14c5   : > { %s14623_s27 = sld [smem:[#allocation22_spill]]  ;;  %s14624_s25 = smov %s9055_s26 }
0x14ca   : > { %p29_p7 = scmp.ge.s32.totalorder %s14621_s28, 4   ;;  %s14625_s26 = smov %s14622_s30 }
0x14cc   :  { %31 = sbr.rel (!%p29_p7) target bundleno = 10 (0xa), region = 141 }
0x14d3   :  { %7591 = vsyncpa [#allocation6], 1 }
0x14d4   :  { %7593 = vsyncpa [#allocation6 + $0x1], 1 }
0x14d5   :  { %7594 = vsyncpa [#allocation9], 1 }
0x14d6   :  { %7595 = vsyncpa [#allocation7], 1 }
0x14d7   :  { %7597 = vsyncpa [#allocation7 + $0x1], 1 }
0x14d8   :  { %7598 = vsyncpa [#allocation13], 1 }
0x14d9   :  { %7600 = vsyncpa [#allocation13 + $0x1], 1 }

</bundles_post_ra>
